<compile_context>
chip_gen: v5e
topology: v5e:2x2
jax: 0.10.0
libtpu: 0.0.40
codegen_flags: <defaults>
</compile_context>

<pallas_src>
import math

import jax
import jax.numpy as jnp
from jax import lax
from jax.experimental import pallas as pl
from jax.experimental.pallas import tpu as pltpu


NUM_GATES = 4   # gate order i, f, c, o (matches the torch module)
GATE_PACK = 2   # gates packed per 128-lane accumulator: [i|f] and [c|o]


# ------------------------------------------------------------------ kernel

def _convlstm_kernel(x_ref, h_ref, c_ref, wrow_ref, brow_ref,
                     h_out_ref, c_out_ref):
    """Fused ConvLSTM cell for one batch sample.

    x_ref:     (Cin, H, W)              input frame
    h_ref:     (Ch,  H, W)              previous hidden state
    c_ref:     (Ch,  H, W)              previous cell state
    wrow_ref:  (Ch*2*(Cin+Ch)*9, 2W)    gate-pair-packed, lane-replicated taps
    brow_ref:  (Ch*2, 2W)               gate-pair-packed biases
    h_out_ref: (Ch, H, W)               new hidden state
    c_out_ref: (Ch, H, W)               new cell state
    """
    cin, hh, ww = x_ref.shape
    ch = h_ref.shape[0]
    nsrc = cin + ch
    npairs = NUM_GATES // GATE_PACK       # 2 accumulators per output channel
    lanes = GATE_PACK * ww
    ntap = 9

    # Gate-pair accumulators, one (H, 2W) tile per (output channel, pair),
    # initialised with the packed bias row sublane-broadcast over H.
    accs = [jnp.broadcast_to(brow_ref[pl.ds(row, 1), :], (hh, lanes))
            for row in range(ch * npairs)]

    # Build each circularly shifted source tap once (XLU rotates) and FMA it
    # straight into every accumulator -- no VMEM scratch round trip.
    #   tap_{ky,kx}[y, x] = src[(y+ky-1) % H, (x+kx-1) % W]
    # (circular padding of a 3x3 cross-correlation, matching torch Conv2d).
    # The replicated [base|base] row is W-periodic, so one global 2W-lane
    # rotate is identical to a per-copy circular roll.
    for s in range(nsrc):
        base = x_ref[s] if s < cin else h_ref[s - cin]               # (H, W)
        rep = jnp.concatenate([base, base], axis=-1)                 # (H, 2W)
        for ky in range(3):
            sy = (1 - ky) % hh
            rows = pltpu.roll(rep, sy, axis=0) if sy else rep        # sublane rotate
            for kx in range(3):
                sx = (1 - kx) % ww
                tap = pltpu.roll(rows, sx, axis=1) if sx else rows   # lane rotate
                t = ky * 3 + kx
                for row in range(ch * npairs):
                    r = (row * nsrc + s) * ntap + t
                    w = wrow_ref[pl.ds(r, 1), :]                     # (1, 2W)
                    accs[row] = accs[row] + w * tap

    # Epilogue: nonlinearities + state update, one output channel at a time.
    # sigmoid(x) = 0.5*(tanh(0.5*x)+1) keeps the transcendental on the EUP
    # slot; the packed [i|f] tile gets a single 128-lane tanh.
    for oc in range(ch):
        acc_if = accs[oc * npairs + 0]                   # lanes [ i | f ]
        acc_cg = accs[oc * npairs + 1]                   # lanes [ c | o ]
        sig_if = 0.5 * (jnp.tanh(0.5 * acc_if) + 1.0)
        s_i = sig_if[:, :ww]
        s_f = sig_if[:, ww:]
        t_c = jnp.tanh(acc_cg[:, :ww])
        s_o = 0.5 * (jnp.tanh(0.5 * acc_cg[:, ww:]) + 1.0)
        c_new = s_f * c_ref[oc] + s_i * t_c
        h_new = s_o * jnp.tanh(c_new)
        h_out_ref[oc] = h_new
        c_out_ref[oc] = c_new


# ------------------------------------------------------------------ wrapper

def _pack_weight_rows(wx, wh, bias, w):
    """Host-side layout plumbing: gate-pair-packed, lane-replicated conv taps.

    wx:   (4, Ch, Cin, 3, 3)  input->gate taps  (gate order i, f, c, o)
    wh:   (4, Ch, Ch, 3, 3)   hidden->gate taps
    bias: (4, Ch)             gate biases (only the Wx convs carry bias)
    Returns wrow (Ch*2*(Cin+Ch)*9, 2w) and brow (Ch*2, 2w); row order is
    ((oc*2 + pair)*(Cin+Ch) + src)*9 + tap, with pair 0 = (i,f), pair 1 = (c,o).
    """
    g, ch, cin = wx.shape[0], wx.shape[1], wx.shape[2]
    nsrc = cin + ch
    npairs = NUM_GATES // GATE_PACK
    wall = jnp.concatenate([wx.reshape(g, ch, cin, 9),
                            wh.reshape(g, ch, ch, 9)], axis=2)        # (4, Ch, nsrc, 9)
    wall = wall.reshape(npairs, GATE_PACK, ch, nsrc, 9)               # (pair, gate, Ch, nsrc, 9)
    wall = jnp.transpose(wall, (2, 0, 3, 4, 1))                       # (Ch, pair, nsrc, 9, gate)
    wrow = jnp.repeat(wall, w, axis=-1)                               # (Ch, pair, nsrc, 9, 2w)
    wrow = wrow.reshape(ch * npairs * nsrc * 9, GATE_PACK * w)
    brow = jnp.transpose(bias.reshape(npairs, GATE_PACK, ch), (2, 0, 1))
    brow = jnp.repeat(brow, w, axis=-1).reshape(ch * npairs, GATE_PACK * w)
    return wrow, brow


@jax.jit
def convlstm_cell(x, h, c, wx, wh, bias):
    """ConvLSTMCell.forward(x, h, c) -> (h_new, c_new).

    x: (N, Cin, H, W);  h, c: (N, Ch, H, W)
    wx: (4, Ch, Cin, 3, 3);  wh: (4, Ch, Ch, 3, 3);  bias: (4, Ch)
    """
    n, cin, hh, ww = x.shape
    ch = h.shape[1]
    # NOTE: wrow/brow are re-packed on device each call; a few KB of reshapes,
    # harmless, keeps the torch-style weight interface unchanged.
    wrow, brow = _pack_weight_rows(wx, wh, bias, ww)
    r = wrow.shape[0]
    lanes = GATE_PACK * ww

    h_new, c_new = pl.pallas_call(
        _convlstm_kernel,
        out_shape=(jax.ShapeDtypeStruct((n, ch, hh, ww), jnp.float32),
                   jax.ShapeDtypeStruct((n, ch, hh, ww), jnp.float32)),
        # TODO(synk): block 2-4 samples per grid step if N grows (amortise the
        # ~0.35us/step overhead) and keep the grid length even for v7x's 2 TCs.
        grid=(n,),
        in_specs=[
            pl.BlockSpec((None, cin, hh, ww), lambda b: (b, 0, 0, 0)),
            pl.BlockSpec((None, ch, hh, ww), lambda b: (b, 0, 0, 0)),
            pl.BlockSpec((None, ch, hh, ww), lambda b: (b, 0, 0, 0)),
            pl.BlockSpec((r, lanes), lambda b: (0, 0)),
            pl.BlockSpec((NUM_GATES // GATE_PACK * ch, lanes), lambda b: (0, 0)),
        ],
        out_specs=[
            pl.BlockSpec((None, ch, hh, ww), lambda b: (b, 0, 0, 0)),
            pl.BlockSpec((None, ch, hh, ww), lambda b: (b, 0, 0, 0)),
        ],
        compiler_params=pltpu.CompilerParams(
            dimension_semantics=("parallel",),
            vmem_limit_bytes=32 * 1024 * 1024,
        ),
    )(x, h, c, wrow, brow)

    return h_new, c_new


# ------------------------------------------------------------------ pure-JAX reference

def _conv3x3_circular(x, w):
    xp = jnp.pad(x, ((0, 0), (0, 0), (1, 1), (1, 1)), mode='wrap')
    return lax.conv_general_dilated(xp, w, window_strides=(1, 1), padding='VALID',
                                    dimension_numbers=('NCHW', 'OIHW', 'NCHW'),
                                    precision=lax.Precision.HIGHEST)


def convlstm_cell_reference(x, h, c, wx, wh, bias):
    def gate(g):
        return (_conv3x3_circular(x, wx[g]) + _conv3x3_circular(h, wh[g])
                + bias[g][None, :, None, None])
    ci = jax.nn.sigmoid(gate(0))
    cf = jax.nn.sigmoid(gate(1))
    cc = cf * c + ci * jnp.tanh(gate(2))
    co = jax.nn.sigmoid(gate(3))
    return co * jnp.tanh(cc), cc


# ------------------------------------------------------------------ main

if __name__ == "__main__":
    N, CIN, CH, H, W = 2, 2, 2, 64, 64

    key = jax.random.PRNGKey(0)
    k_x, k_h, k_c, k_wx, k_wh = jax.random.split(key, 5)
    x = jax.random.normal(k_x, (N, CIN, H, W), jnp.float32)
    h = 0.1 * jax.random.normal(k_h, (N, CH, H, W), jnp.float32)
    c = 0.1 * jax.random.normal(k_c, (N, CH, H, W), jnp.float32)

    s_x = 1.0 / math.sqrt(CIN * 9)
    s_h = 1.0 / math.sqrt(CH * 9)
    wx = jax.random.uniform(k_wx, (NUM_GATES, CH, CIN, 3, 3), jnp.float32, -s_x, s_x)
    wh = jax.random.uniform(k_wh, (NUM_GATES, CH, CH, 3, 3), jnp.float32, -s_h, s_h)
    # torch init: Wxi/Wxf/Wxc biases zero, Wxo bias = 1 (the Wh convs have no bias).
    bias = jnp.zeros((NUM_GATES, CH), jnp.float32).at[3].set(1.0)

    h_new, c_new = convlstm_cell(x, h, c, wx, wh, bias)
    jax.block_until_ready((h_new, c_new))

    assert h_new.shape == (N, CH, H, W) and c_new.shape == (N, CH, H, W)

    h_exp, c_exp = convlstm_cell_reference(x, h, c, wx, wh, bias)
    err = max(float(jnp.max(jnp.abs(h_new - h_exp))),
              float(jnp.max(jnp.abs(c_new - c_exp))))
    assert err < 1e-4, f"max abs error vs reference too large: {err}"

    print("KERNEL_OK")
</pallas_src>

<mosaic_0001>
module attributes {stable_mosaic.version = 11 : i64} {
  func.func @_convlstm_kernel(%arg0: i32, %arg1: memref<1x2x64x64xf32, #tpu.memory_space<vmem>>, %arg2: memref<1x2x64x64xf32, #tpu.memory_space<vmem>>, %arg3: memref<1x2x64x64xf32, #tpu.memory_space<vmem>>, %arg4: memref<144x128xf32, #tpu.memory_space<vmem>>, %arg5: memref<4x128xf32, #tpu.memory_space<vmem>>, %arg6: memref<1x2x64x64xf32, #tpu.memory_space<vmem>>, %arg7: memref<1x2x64x64xf32, #tpu.memory_space<vmem>>) attributes {dimension_semantics = [#tpu.dimension_semantics<parallel>], iteration_bounds = array<i64: 2>, scalar_prefetch = 0 : i64, scratch_operands = 0 : i64, tpu.core_type = #tpu.core_type<tc>, window_params = [{transform_indices = @transform_0, window_bounds = array<i64: 1, 2, 64, 64>}, {transform_indices = @transform_1, window_bounds = array<i64: 1, 2, 64, 64>}, {transform_indices = @transform_2, window_bounds = array<i64: 1, 2, 64, 64>}, {pipeline_mode = #tpu.pipeline_mode<synchronous>, transform_indices = @transform_3, window_bounds = array<i64: 144, 128>}, {pipeline_mode = #tpu.pipeline_mode<synchronous>, transform_indices = @transform_4, window_bounds = array<i64: 4, 128>}, {transform_indices = @transform_5, window_bounds = array<i64: 1, 2, 64, 64>}, {transform_indices = @transform_6, window_bounds = array<i64: 1, 2, 64, 64>}]} {
    %c0 = arith.constant 0 : index
    %c0_0 = arith.constant 0 : index
    %0 = vector.load %arg5[%c0, %c0_0] : memref<4x128xf32, #tpu.memory_space<vmem>>, vector<1x128xf32>
    %1 = vector.shape_cast %0 : vector<1x128xf32> to vector<1x128xf32>
    %2 = vector.broadcast %1 : vector<1x128xf32> to vector<64x128xf32>
    %c1 = arith.constant 1 : index
    %c0_1 = arith.constant 0 : index
    %3 = vector.load %arg5[%c1, %c0_1] : memref<4x128xf32, #tpu.memory_space<vmem>>, vector<1x128xf32>
    %4 = vector.shape_cast %3 : vector<1x128xf32> to vector<1x128xf32>
    %5 = vector.broadcast %4 : vector<1x128xf32> to vector<64x128xf32>
    %c2 = arith.constant 2 : index
    %c0_2 = arith.constant 0 : index
    %6 = vector.load %arg5[%c2, %c0_2] : memref<4x128xf32, #tpu.memory_space<vmem>>, vector<1x128xf32>
    %7 = vector.shape_cast %6 : vector<1x128xf32> to vector<1x128xf32>
    %8 = vector.broadcast %7 : vector<1x128xf32> to vector<64x128xf32>
    %c3 = arith.constant 3 : index
    %c0_3 = arith.constant 0 : index
    %9 = vector.load %arg5[%c3, %c0_3] : memref<4x128xf32, #tpu.memory_space<vmem>>, vector<1x128xf32>
    %10 = vector.shape_cast %9 : vector<1x128xf32> to vector<1x128xf32>
    %11 = vector.broadcast %10 : vector<1x128xf32> to vector<64x128xf32>
    %c0_4 = arith.constant 0 : index
    %c0_5 = arith.constant 0 : index
    %c0_6 = arith.constant 0 : index
    %c0_7 = arith.constant 0 : index
    %12 = vector.load %arg1[%c0_4, %c0_5, %c0_6, %c0_7] : memref<1x2x64x64xf32, #tpu.memory_space<vmem>>, vector<1x1x64x64xf32>
    %13 = vector.shape_cast %12 : vector<1x1x64x64xf32> to vector<64x64xf32>
    %14 = tpu.concatenate %13, %13 in 1 : vector<64x64xf32>, vector<64x64xf32> -> vector<64x128xf32>
    %c1_i32 = arith.constant 1 : i32
    %15 = tpu.dynamic_rotate %14 by %c1_i32 dim 0 : vector<64x128xf32>, i32 -> vector<64x128xf32>
    %c1_i32_8 = arith.constant 1 : i32
    %16 = tpu.dynamic_rotate %15 by %c1_i32_8 dim 1 : vector<64x128xf32>, i32 -> vector<64x128xf32>
    %c0_9 = arith.constant 0 : index
    %c0_10 = arith.constant 0 : index
    %17 = vector.load %arg4[%c0_9, %c0_10] : memref<144x128xf32, #tpu.memory_space<vmem>>, vector<1x128xf32>
    %18 = vector.broadcast %17 : vector<1x128xf32> to vector<64x128xf32>
    %19 = arith.mulf %18, %16 : vector<64x128xf32>
    %20 = arith.addf %2, %19 : vector<64x128xf32>
    %c36 = arith.constant 36 : index
    %c0_11 = arith.constant 0 : index
    %21 = vector.load %arg4[%c36, %c0_11] : memref<144x128xf32, #tpu.memory_space<vmem>>, vector<1x128xf32>
    %22 = vector.broadcast %21 : vector<1x128xf32> to vector<64x128xf32>
    %23 = arith.mulf %22, %16 : vector<64x128xf32>
    %24 = arith.addf %5, %23 : vector<64x128xf32>
    %c72 = arith.constant 72 : index
    %c0_12 = arith.constant 0 : index
    %25 = vector.load %arg4[%c72, %c0_12] : memref<144x128xf32, #tpu.memory_space<vmem>>, vector<1x128xf32>
    %26 = vector.broadcast %25 : vector<1x128xf32> to vector<64x128xf32>
    %27 = arith.mulf %26, %16 : vector<64x128xf32>
    %28 = arith.addf %8, %27 : vector<64x128xf32>
    %c108 = arith.constant 108 : index
    %c0_13 = arith.constant 0 : index
    %29 = vector.load %arg4[%c108, %c0_13] : memref<144x128xf32, #tpu.memory_space<vmem>>, vector<1x128xf32>
    %30 = vector.broadcast %29 : vector<1x128xf32> to vector<64x128xf32>
    %31 = arith.mulf %30, %16 : vector<64x128xf32>
    %32 = arith.addf %11, %31 : vector<64x128xf32>
    %c1_14 = arith.constant 1 : index
    %c0_15 = arith.constant 0 : index
    %33 = vector.load %arg4[%c1_14, %c0_15] : memref<144x128xf32, #tpu.memory_space<vmem>>, vector<1x128xf32>
    %34 = vector.broadcast %33 : vector<1x128xf32> to vector<64x128xf32>
    %35 = arith.mulf %34, %15 : vector<64x128xf32>
    %36 = arith.addf %20, %35 : vector<64x128xf32>
    %c37 = arith.constant 37 : index
    %c0_16 = arith.constant 0 : index
    %37 = vector.load %arg4[%c37, %c0_16] : memref<144x128xf32, #tpu.memory_space<vmem>>, vector<1x128xf32>
    %38 = vector.broadcast %37 : vector<1x128xf32> to vector<64x128xf32>
    %39 = arith.mulf %38, %15 : vector<64x128xf32>
    %40 = arith.addf %24, %39 : vector<64x128xf32>
    %c73 = arith.constant 73 : index
    %c0_17 = arith.constant 0 : index
    %41 = vector.load %arg4[%c73, %c0_17] : memref<144x128xf32, #tpu.memory_space<vmem>>, vector<1x128xf32>
    %42 = vector.broadcast %41 : vector<1x128xf32> to vector<64x128xf32>
    %43 = arith.mulf %42, %15 : vector<64x128xf32>
    %44 = arith.addf %28, %43 : vector<64x128xf32>
    %c109 = arith.constant 109 : index
    %c0_18 = arith.constant 0 : index
    %45 = vector.load %arg4[%c109, %c0_18] : memref<144x128xf32, #tpu.memory_space<vmem>>, vector<1x128xf32>
    %46 = vector.broadcast %45 : vector<1x128xf32> to vector<64x128xf32>
    %47 = arith.mulf %46, %15 : vector<64x128xf32>
    %48 = arith.addf %32, %47 : vector<64x128xf32>
    %c63_i32 = arith.constant 63 : i32
    %49 = tpu.dynamic_rotate %15 by %c63_i32 dim 1 : vector<64x128xf32>, i32 -> vector<64x128xf32>
    %c2_19 = arith.constant 2 : index
    %c0_20 = arith.constant 0 : index
    %50 = vector.load %arg4[%c2_19, %c0_20] : memref<144x128xf32, #tpu.memory_space<vmem>>, vector<1x128xf32>
    %51 = vector.broadcast %50 : vector<1x128xf32> to vector<64x128xf32>
    %52 = arith.mulf %51, %49 : vector<64x128xf32>
    %53 = arith.addf %36, %52 : vector<64x128xf32>
    %c38 = arith.constant 38 : index
    %c0_21 = arith.constant 0 : index
    %54 = vector.load %arg4[%c38, %c0_21] : memref<144x128xf32, #tpu.memory_space<vmem>>, vector<1x128xf32>
    %55 = vector.broadcast %54 : vector<1x128xf32> to vector<64x128xf32>
    %56 = arith.mulf %55, %49 : vector<64x128xf32>
    %57 = arith.addf %40, %56 : vector<64x128xf32>
    %c74 = arith.constant 74 : index
    %c0_22 = arith.constant 0 : index
    %58 = vector.load %arg4[%c74, %c0_22] : memref<144x128xf32, #tpu.memory_space<vmem>>, vector<1x128xf32>
    %59 = vector.broadcast %58 : vector<1x128xf32> to vector<64x128xf32>
    %60 = arith.mulf %59, %49 : vector<64x128xf32>
    %61 = arith.addf %44, %60 : vector<64x128xf32>
    %c110 = arith.constant 110 : index
    %c0_23 = arith.constant 0 : index
    %62 = vector.load %arg4[%c110, %c0_23] : memref<144x128xf32, #tpu.memory_space<vmem>>, vector<1x128xf32>
    %63 = vector.broadcast %62 : vector<1x128xf32> to vector<64x128xf32>
    %64 = arith.mulf %63, %49 : vector<64x128xf32>
    %65 = arith.addf %48, %64 : vector<64x128xf32>
    %c1_i32_24 = arith.constant 1 : i32
    %66 = tpu.dynamic_rotate %14 by %c1_i32_24 dim 1 : vector<64x128xf32>, i32 -> vector<64x128xf32>
    %c3_25 = arith.constant 3 : index
    %c0_26 = arith.constant 0 : index
    %67 = vector.load %arg4[%c3_25, %c0_26] : memref<144x128xf32, #tpu.memory_space<vmem>>, vector<1x128xf32>
    %68 = vector.broadcast %67 : vector<1x128xf32> to vector<64x128xf32>
    %69 = arith.mulf %68, %66 : vector<64x128xf32>
    %70 = arith.addf %53, %69 : vector<64x128xf32>
    %c39 = arith.constant 39 : index
    %c0_27 = arith.constant 0 : index
    %71 = vector.load %arg4[%c39, %c0_27] : memref<144x128xf32, #tpu.memory_space<vmem>>, vector<1x128xf32>
    %72 = vector.broadcast %71 : vector<1x128xf32> to vector<64x128xf32>
    %73 = arith.mulf %72, %66 : vector<64x128xf32>
    %74 = arith.addf %57, %73 : vector<64x128xf32>
    %c75 = arith.constant 75 : index
    %c0_28 = arith.constant 0 : index
    %75 = vector.load %arg4[%c75, %c0_28] : memref<144x128xf32, #tpu.memory_space<vmem>>, vector<1x128xf32>
    %76 = vector.broadcast %75 : vector<1x128xf32> to vector<64x128xf32>
    %77 = arith.mulf %76, %66 : vector<64x128xf32>
    %78 = arith.addf %61, %77 : vector<64x128xf32>
    %c111 = arith.constant 111 : index
    %c0_29 = arith.constant 0 : index
    %79 = vector.load %arg4[%c111, %c0_29] : memref<144x128xf32, #tpu.memory_space<vmem>>, vector<1x128xf32>
    %80 = vector.broadcast %79 : vector<1x128xf32> to vector<64x128xf32>
    %81 = arith.mulf %80, %66 : vector<64x128xf32>
    %82 = arith.addf %65, %81 : vector<64x128xf32>
    %c4 = arith.constant 4 : index
    %c0_30 = arith.constant 0 : index
    %83 = vector.load %arg4[%c4, %c0_30] : memref<144x128xf32, #tpu.memory_space<vmem>>, vector<1x128xf32>
    %84 = vector.broadcast %83 : vector<1x128xf32> to vector<64x128xf32>
    %85 = arith.mulf %84, %14 : vector<64x128xf32>
    %86 = arith.addf %70, %85 : vector<64x128xf32>
    %c40 = arith.constant 40 : index
    %c0_31 = arith.constant 0 : index
    %87 = vector.load %arg4[%c40, %c0_31] : memref<144x128xf32, #tpu.memory_space<vmem>>, vector<1x128xf32>
    %88 = vector.broadcast %87 : vector<1x128xf32> to vector<64x128xf32>
    %89 = arith.mulf %88, %14 : vector<64x128xf32>
    %90 = arith.addf %74, %89 : vector<64x128xf32>
    %c76 = arith.constant 76 : index
    %c0_32 = arith.constant 0 : index
    %91 = vector.load %arg4[%c76, %c0_32] : memref<144x128xf32, #tpu.memory_space<vmem>>, vector<1x128xf32>
    %92 = vector.broadcast %91 : vector<1x128xf32> to vector<64x128xf32>
    %93 = arith.mulf %92, %14 : vector<64x128xf32>
    %94 = arith.addf %78, %93 : vector<64x128xf32>
    %c112 = arith.constant 112 : index
    %c0_33 = arith.constant 0 : index
    %95 = vector.load %arg4[%c112, %c0_33] : memref<144x128xf32, #tpu.memory_space<vmem>>, vector<1x128xf32>
    %96 = vector.broadcast %95 : vector<1x128xf32> to vector<64x128xf32>
    %97 = arith.mulf %96, %14 : vector<64x128xf32>
    %98 = arith.addf %82, %97 : vector<64x128xf32>
    %c63_i32_34 = arith.constant 63 : i32
    %99 = tpu.dynamic_rotate %14 by %c63_i32_34 dim 1 : vector<64x128xf32>, i32 -> vector<64x128xf32>
    %c5 = arith.constant 5 : index
    %c0_35 = arith.constant 0 : index
    %100 = vector.load %arg4[%c5, %c0_35] : memref<144x128xf32, #tpu.memory_space<vmem>>, vector<1x128xf32>
    %101 = vector.broadcast %100 : vector<1x128xf32> to vector<64x128xf32>
    %102 = arith.mulf %101, %99 : vector<64x128xf32>
    %103 = arith.addf %86, %102 : vector<64x128xf32>
    %c41 = arith.constant 41 : index
    %c0_36 = arith.constant 0 : index
    %104 = vector.load %arg4[%c41, %c0_36] : memref<144x128xf32, #tpu.memory_space<vmem>>, vector<1x128xf32>
    %105 = vector.broadcast %104 : vector<1x128xf32> to vector<64x128xf32>
    %106 = arith.mulf %105, %99 : vector<64x128xf32>
    %107 = arith.addf %90, %106 : vector<64x128xf32>
    %c77 = arith.constant 77 : index
    %c0_37 = arith.constant 0 : index
    %108 = vector.load %arg4[%c77, %c0_37] : memref<144x128xf32, #tpu.memory_space<vmem>>, vector<1x128xf32>
    %109 = vector.broadcast %108 : vector<1x128xf32> to vector<64x128xf32>
    %110 = arith.mulf %109, %99 : vector<64x128xf32>
    %111 = arith.addf %94, %110 : vector<64x128xf32>
    %c113 = arith.constant 113 : index
    %c0_38 = arith.constant 0 : index
    %112 = vector.load %arg4[%c113, %c0_38] : memref<144x128xf32, #tpu.memory_space<vmem>>, vector<1x128xf32>
    %113 = vector.broadcast %112 : vector<1x128xf32> to vector<64x128xf32>
    %114 = arith.mulf %113, %99 : vector<64x128xf32>
    %115 = arith.addf %98, %114 : vector<64x128xf32>
    %c63_i32_39 = arith.constant 63 : i32
    %116 = tpu.dynamic_rotate %14 by %c63_i32_39 dim 0 : vector<64x128xf32>, i32 -> vector<64x128xf32>
    %c1_i32_40 = arith.constant 1 : i32
    %117 = tpu.dynamic_rotate %116 by %c1_i32_40 dim 1 : vector<64x128xf32>, i32 -> vector<64x128xf32>
    %c6 = arith.constant 6 : index
    %c0_41 = arith.constant 0 : index
    %118 = vector.load %arg4[%c6, %c0_41] : memref<144x128xf32, #tpu.memory_space<vmem>>, vector<1x128xf32>
    %119 = vector.broadcast %118 : vector<1x128xf32> to vector<64x128xf32>
    %120 = arith.mulf %119, %117 : vector<64x128xf32>
    %121 = arith.addf %103, %120 : vector<64x128xf32>
    %c42 = arith.constant 42 : index
    %c0_42 = arith.constant 0 : index
    %122 = vector.load %arg4[%c42, %c0_42] : memref<144x128xf32, #tpu.memory_space<vmem>>, vector<1x128xf32>
    %123 = vector.broadcast %122 : vector<1x128xf32> to vector<64x128xf32>
    %124 = arith.mulf %123, %117 : vector<64x128xf32>
    %125 = arith.addf %107, %124 : vector<64x128xf32>
    %c78 = arith.constant 78 : index
    %c0_43 = arith.constant 0 : index
    %126 = vector.load %arg4[%c78, %c0_43] : memref<144x128xf32, #tpu.memory_space<vmem>>, vector<1x128xf32>
    %127 = vector.broadcast %126 : vector<1x128xf32> to vector<64x128xf32>
    %128 = arith.mulf %127, %117 : vector<64x128xf32>
    %129 = arith.addf %111, %128 : vector<64x128xf32>
    %c114 = arith.constant 114 : index
    %c0_44 = arith.constant 0 : index
    %130 = vector.load %arg4[%c114, %c0_44] : memref<144x128xf32, #tpu.memory_space<vmem>>, vector<1x128xf32>
    %131 = vector.broadcast %130 : vector<1x128xf32> to vector<64x128xf32>
    %132 = arith.mulf %131, %117 : vector<64x128xf32>
    %133 = arith.addf %115, %132 : vector<64x128xf32>
    %c7 = arith.constant 7 : index
    %c0_45 = arith.constant 0 : index
    %134 = vector.load %arg4[%c7, %c0_45] : memref<144x128xf32, #tpu.memory_space<vmem>>, vector<1x128xf32>
    %135 = vector.broadcast %134 : vector<1x128xf32> to vector<64x128xf32>
    %136 = arith.mulf %135, %116 : vector<64x128xf32>
    %137 = arith.addf %121, %136 : vector<64x128xf32>
    %c43 = arith.constant 43 : index
    %c0_46 = arith.constant 0 : index
    %138 = vector.load %arg4[%c43, %c0_46] : memref<144x128xf32, #tpu.memory_space<vmem>>, vector<1x128xf32>
    %139 = vector.broadcast %138 : vector<1x128xf32> to vector<64x128xf32>
    %140 = arith.mulf %139, %116 : vector<64x128xf32>
    %141 = arith.addf %125, %140 : vector<64x128xf32>
    %c79 = arith.constant 79 : index
    %c0_47 = arith.constant 0 : index
    %142 = vector.load %arg4[%c79, %c0_47] : memref<144x128xf32, #tpu.memory_space<vmem>>, vector<1x128xf32>
    %143 = vector.broadcast %142 : vector<1x128xf32> to vector<64x128xf32>
    %144 = arith.mulf %143, %116 : vector<64x128xf32>
    %145 = arith.addf %129, %144 : vector<64x128xf32>
    %c115 = arith.constant 115 : index
    %c0_48 = arith.constant 0 : index
    %146 = vector.load %arg4[%c115, %c0_48] : memref<144x128xf32, #tpu.memory_space<vmem>>, vector<1x128xf32>
    %147 = vector.broadcast %146 : vector<1x128xf32> to vector<64x128xf32>
    %148 = arith.mulf %147, %116 : vector<64x128xf32>
    %149 = arith.addf %133, %148 : vector<64x128xf32>
    %c63_i32_49 = arith.constant 63 : i32
    %150 = tpu.dynamic_rotate %116 by %c63_i32_49 dim 1 : vector<64x128xf32>, i32 -> vector<64x128xf32>
    %c8 = arith.constant 8 : index
    %c0_50 = arith.constant 0 : index
    %151 = vector.load %arg4[%c8, %c0_50] : memref<144x128xf32, #tpu.memory_space<vmem>>, vector<1x128xf32>
    %152 = vector.broadcast %151 : vector<1x128xf32> to vector<64x128xf32>
    %153 = arith.mulf %152, %150 : vector<64x128xf32>
    %154 = arith.addf %137, %153 : vector<64x128xf32>
    %c44 = arith.constant 44 : index
    %c0_51 = arith.constant 0 : index
    %155 = vector.load %arg4[%c44, %c0_51] : memref<144x128xf32, #tpu.memory_space<vmem>>, vector<1x128xf32>
    %156 = vector.broadcast %155 : vector<1x128xf32> to vector<64x128xf32>
    %157 = arith.mulf %156, %150 : vector<64x128xf32>
    %158 = arith.addf %141, %157 : vector<64x128xf32>
    %c80 = arith.constant 80 : index
    %c0_52 = arith.constant 0 : index
    %159 = vector.load %arg4[%c80, %c0_52] : memref<144x128xf32, #tpu.memory_space<vmem>>, vector<1x128xf32>
    %160 = vector.broadcast %159 : vector<1x128xf32> to vector<64x128xf32>
    %161 = arith.mulf %160, %150 : vector<64x128xf32>
    %162 = arith.addf %145, %161 : vector<64x128xf32>
    %c116 = arith.constant 116 : index
    %c0_53 = arith.constant 0 : index
    %163 = vector.load %arg4[%c116, %c0_53] : memref<144x128xf32, #tpu.memory_space<vmem>>, vector<1x128xf32>
    %164 = vector.broadcast %163 : vector<1x128xf32> to vector<64x128xf32>
    %165 = arith.mulf %164, %150 : vector<64x128xf32>
    %166 = arith.addf %149, %165 : vector<64x128xf32>
    %c0_54 = arith.constant 0 : index
    %c1_55 = arith.constant 1 : index
    %c0_56 = arith.constant 0 : index
    %c0_57 = arith.constant 0 : index
    %167 = vector.load %arg1[%c0_54, %c1_55, %c0_56, %c0_57] : memref<1x2x64x64xf32, #tpu.memory_space<vmem>>, vector<1x1x64x64xf32>
    %168 = vector.shape_cast %167 : vector<1x1x64x64xf32> to vector<64x64xf32>
    %169 = tpu.concatenate %168, %168 in 1 : vector<64x64xf32>, vector<64x64xf32> -> vector<64x128xf32>
    %c1_i32_58 = arith.constant 1 : i32
    %170 = tpu.dynamic_rotate %169 by %c1_i32_58 dim 0 : vector<64x128xf32>, i32 -> vector<64x128xf32>
    %c1_i32_59 = arith.constant 1 : i32
    %171 = tpu.dynamic_rotate %170 by %c1_i32_59 dim 1 : vector<64x128xf32>, i32 -> vector<64x128xf32>
    %c9 = arith.constant 9 : index
    %c0_60 = arith.constant 0 : index
    %172 = vector.load %arg4[%c9, %c0_60] : memref<144x128xf32, #tpu.memory_space<vmem>>, vector<1x128xf32>
    %173 = vector.broadcast %172 : vector<1x128xf32> to vector<64x128xf32>
    %174 = arith.mulf %173, %171 : vector<64x128xf32>
    %175 = arith.addf %154, %174 : vector<64x128xf32>
    %c45 = arith.constant 45 : index
    %c0_61 = arith.constant 0 : index
    %176 = vector.load %arg4[%c45, %c0_61] : memref<144x128xf32, #tpu.memory_space<vmem>>, vector<1x128xf32>
    %177 = vector.broadcast %176 : vector<1x128xf32> to vector<64x128xf32>
    %178 = arith.mulf %177, %171 : vector<64x128xf32>
    %179 = arith.addf %158, %178 : vector<64x128xf32>
    %c81 = arith.constant 81 : index
    %c0_62 = arith.constant 0 : index
    %180 = vector.load %arg4[%c81, %c0_62] : memref<144x128xf32, #tpu.memory_space<vmem>>, vector<1x128xf32>
    %181 = vector.broadcast %180 : vector<1x128xf32> to vector<64x128xf32>
    %182 = arith.mulf %181, %171 : vector<64x128xf32>
    %183 = arith.addf %162, %182 : vector<64x128xf32>
    %c117 = arith.constant 117 : index
    %c0_63 = arith.constant 0 : index
    %184 = vector.load %arg4[%c117, %c0_63] : memref<144x128xf32, #tpu.memory_space<vmem>>, vector<1x128xf32>
    %185 = vector.broadcast %184 : vector<1x128xf32> to vector<64x128xf32>
    %186 = arith.mulf %185, %171 : vector<64x128xf32>
    %187 = arith.addf %166, %186 : vector<64x128xf32>
    %c10 = arith.constant 10 : index
    %c0_64 = arith.constant 0 : index
    %188 = vector.load %arg4[%c10, %c0_64] : memref<144x128xf32, #tpu.memory_space<vmem>>, vector<1x128xf32>
    %189 = vector.broadcast %188 : vector<1x128xf32> to vector<64x128xf32>
    %190 = arith.mulf %189, %170 : vector<64x128xf32>
    %191 = arith.addf %175, %190 : vector<64x128xf32>
    %c46 = arith.constant 46 : index
    %c0_65 = arith.constant 0 : index
    %192 = vector.load %arg4[%c46, %c0_65] : memref<144x128xf32, #tpu.memory_space<vmem>>, vector<1x128xf32>
    %193 = vector.broadcast %192 : vector<1x128xf32> to vector<64x128xf32>
    %194 = arith.mulf %193, %170 : vector<64x128xf32>
    %195 = arith.addf %179, %194 : vector<64x128xf32>
    %c82 = arith.constant 82 : index
    %c0_66 = arith.constant 0 : index
    %196 = vector.load %arg4[%c82, %c0_66] : memref<144x128xf32, #tpu.memory_space<vmem>>, vector<1x128xf32>
    %197 = vector.broadcast %196 : vector<1x128xf32> to vector<64x128xf32>
    %198 = arith.mulf %197, %170 : vector<64x128xf32>
    %199 = arith.addf %183, %198 : vector<64x128xf32>
    %c118 = arith.constant 118 : index
    %c0_67 = arith.constant 0 : index
    %200 = vector.load %arg4[%c118, %c0_67] : memref<144x128xf32, #tpu.memory_space<vmem>>, vector<1x128xf32>
    %201 = vector.broadcast %200 : vector<1x128xf32> to vector<64x128xf32>
    %202 = arith.mulf %201, %170 : vector<64x128xf32>
    %203 = arith.addf %187, %202 : vector<64x128xf32>
    %c63_i32_68 = arith.constant 63 : i32
    %204 = tpu.dynamic_rotate %170 by %c63_i32_68 dim 1 : vector<64x128xf32>, i32 -> vector<64x128xf32>
    %c11 = arith.constant 11 : index
    %c0_69 = arith.constant 0 : index
    %205 = vector.load %arg4[%c11, %c0_69] : memref<144x128xf32, #tpu.memory_space<vmem>>, vector<1x128xf32>
    %206 = vector.broadcast %205 : vector<1x128xf32> to vector<64x128xf32>
    %207 = arith.mulf %206, %204 : vector<64x128xf32>
    %208 = arith.addf %191, %207 : vector<64x128xf32>
    %c47 = arith.constant 47 : index
    %c0_70 = arith.constant 0 : index
    %209 = vector.load %arg4[%c47, %c0_70] : memref<144x128xf32, #tpu.memory_space<vmem>>, vector<1x128xf32>
    %210 = vector.broadcast %209 : vector<1x128xf32> to vector<64x128xf32>
    %211 = arith.mulf %210, %204 : vector<64x128xf32>
    %212 = arith.addf %195, %211 : vector<64x128xf32>
    %c83 = arith.constant 83 : index
    %c0_71 = arith.constant 0 : index
    %213 = vector.load %arg4[%c83, %c0_71] : memref<144x128xf32, #tpu.memory_space<vmem>>, vector<1x128xf32>
    %214 = vector.broadcast %213 : vector<1x128xf32> to vector<64x128xf32>
    %215 = arith.mulf %214, %204 : vector<64x128xf32>
    %216 = arith.addf %199, %215 : vector<64x128xf32>
    %c119 = arith.constant 119 : index
    %c0_72 = arith.constant 0 : index
    %217 = vector.load %arg4[%c119, %c0_72] : memref<144x128xf32, #tpu.memory_space<vmem>>, vector<1x128xf32>
    %218 = vector.broadcast %217 : vector<1x128xf32> to vector<64x128xf32>
    %219 = arith.mulf %218, %204 : vector<64x128xf32>
    %220 = arith.addf %203, %219 : vector<64x128xf32>
    %c1_i32_73 = arith.constant 1 : i32
    %221 = tpu.dynamic_rotate %169 by %c1_i32_73 dim 1 : vector<64x128xf32>, i32 -> vector<64x128xf32>
    %c12 = arith.constant 12 : index
    %c0_74 = arith.constant 0 : index
    %222 = vector.load %arg4[%c12, %c0_74] : memref<144x128xf32, #tpu.memory_space<vmem>>, vector<1x128xf32>
    %223 = vector.broadcast %222 : vector<1x128xf32> to vector<64x128xf32>
    %224 = arith.mulf %223, %221 : vector<64x128xf32>
    %225 = arith.addf %208, %224 : vector<64x128xf32>
    %c48 = arith.constant 48 : index
    %c0_75 = arith.constant 0 : index
    %226 = vector.load %arg4[%c48, %c0_75] : memref<144x128xf32, #tpu.memory_space<vmem>>, vector<1x128xf32>
    %227 = vector.broadcast %226 : vector<1x128xf32> to vector<64x128xf32>
    %228 = arith.mulf %227, %221 : vector<64x128xf32>
    %229 = arith.addf %212, %228 : vector<64x128xf32>
    %c84 = arith.constant 84 : index
    %c0_76 = arith.constant 0 : index
    %230 = vector.load %arg4[%c84, %c0_76] : memref<144x128xf32, #tpu.memory_space<vmem>>, vector<1x128xf32>
    %231 = vector.broadcast %230 : vector<1x128xf32> to vector<64x128xf32>
    %232 = arith.mulf %231, %221 : vector<64x128xf32>
    %233 = arith.addf %216, %232 : vector<64x128xf32>
    %c120 = arith.constant 120 : index
    %c0_77 = arith.constant 0 : index
    %234 = vector.load %arg4[%c120, %c0_77] : memref<144x128xf32, #tpu.memory_space<vmem>>, vector<1x128xf32>
    %235 = vector.broadcast %234 : vector<1x128xf32> to vector<64x128xf32>
    %236 = arith.mulf %235, %221 : vector<64x128xf32>
    %237 = arith.addf %220, %236 : vector<64x128xf32>
    %c13 = arith.constant 13 : index
    %c0_78 = arith.constant 0 : index
    %238 = vector.load %arg4[%c13, %c0_78] : memref<144x128xf32, #tpu.memory_space<vmem>>, vector<1x128xf32>
    %239 = vector.broadcast %238 : vector<1x128xf32> to vector<64x128xf32>
    %240 = arith.mulf %239, %169 : vector<64x128xf32>
    %241 = arith.addf %225, %240 : vector<64x128xf32>
    %c49 = arith.constant 49 : index
    %c0_79 = arith.constant 0 : index
    %242 = vector.load %arg4[%c49, %c0_79] : memref<144x128xf32, #tpu.memory_space<vmem>>, vector<1x128xf32>
    %243 = vector.broadcast %242 : vector<1x128xf32> to vector<64x128xf32>
    %244 = arith.mulf %243, %169 : vector<64x128xf32>
    %245 = arith.addf %229, %244 : vector<64x128xf32>
    %c85 = arith.constant 85 : index
    %c0_80 = arith.constant 0 : index
    %246 = vector.load %arg4[%c85, %c0_80] : memref<144x128xf32, #tpu.memory_space<vmem>>, vector<1x128xf32>
    %247 = vector.broadcast %246 : vector<1x128xf32> to vector<64x128xf32>
    %248 = arith.mulf %247, %169 : vector<64x128xf32>
    %249 = arith.addf %233, %248 : vector<64x128xf32>
    %c121 = arith.constant 121 : index
    %c0_81 = arith.constant 0 : index
    %250 = vector.load %arg4[%c121, %c0_81] : memref<144x128xf32, #tpu.memory_space<vmem>>, vector<1x128xf32>
    %251 = vector.broadcast %250 : vector<1x128xf32> to vector<64x128xf32>
    %252 = arith.mulf %251, %169 : vector<64x128xf32>
    %253 = arith.addf %237, %252 : vector<64x128xf32>
    %c63_i32_82 = arith.constant 63 : i32
    %254 = tpu.dynamic_rotate %169 by %c63_i32_82 dim 1 : vector<64x128xf32>, i32 -> vector<64x128xf32>
    %c14 = arith.constant 14 : index
    %c0_83 = arith.constant 0 : index
    %255 = vector.load %arg4[%c14, %c0_83] : memref<144x128xf32, #tpu.memory_space<vmem>>, vector<1x128xf32>
    %256 = vector.broadcast %255 : vector<1x128xf32> to vector<64x128xf32>
    %257 = arith.mulf %256, %254 : vector<64x128xf32>
    %258 = arith.addf %241, %257 : vector<64x128xf32>
    %c50 = arith.constant 50 : index
    %c0_84 = arith.constant 0 : index
    %259 = vector.load %arg4[%c50, %c0_84] : memref<144x128xf32, #tpu.memory_space<vmem>>, vector<1x128xf32>
    %260 = vector.broadcast %259 : vector<1x128xf32> to vector<64x128xf32>
    %261 = arith.mulf %260, %254 : vector<64x128xf32>
    %262 = arith.addf %245, %261 : vector<64x128xf32>
    %c86 = arith.constant 86 : index
    %c0_85 = arith.constant 0 : index
    %263 = vector.load %arg4[%c86, %c0_85] : memref<144x128xf32, #tpu.memory_space<vmem>>, vector<1x128xf32>
    %264 = vector.broadcast %263 : vector<1x128xf32> to vector<64x128xf32>
    %265 = arith.mulf %264, %254 : vector<64x128xf32>
    %266 = arith.addf %249, %265 : vector<64x128xf32>
    %c122 = arith.constant 122 : index
    %c0_86 = arith.constant 0 : index
    %267 = vector.load %arg4[%c122, %c0_86] : memref<144x128xf32, #tpu.memory_space<vmem>>, vector<1x128xf32>
    %268 = vector.broadcast %267 : vector<1x128xf32> to vector<64x128xf32>
    %269 = arith.mulf %268, %254 : vector<64x128xf32>
    %270 = arith.addf %253, %269 : vector<64x128xf32>
    %c63_i32_87 = arith.constant 63 : i32
    %271 = tpu.dynamic_rotate %169 by %c63_i32_87 dim 0 : vector<64x128xf32>, i32 -> vector<64x128xf32>
    %c1_i32_88 = arith.constant 1 : i32
    %272 = tpu.dynamic_rotate %271 by %c1_i32_88 dim 1 : vector<64x128xf32>, i32 -> vector<64x128xf32>
    %c15 = arith.constant 15 : index
    %c0_89 = arith.constant 0 : index
    %273 = vector.load %arg4[%c15, %c0_89] : memref<144x128xf32, #tpu.memory_space<vmem>>, vector<1x128xf32>
    %274 = vector.broadcast %273 : vector<1x128xf32> to vector<64x128xf32>
    %275 = arith.mulf %274, %272 : vector<64x128xf32>
    %276 = arith.addf %258, %275 : vector<64x128xf32>
    %c51 = arith.constant 51 : index
    %c0_90 = arith.constant 0 : index
    %277 = vector.load %arg4[%c51, %c0_90] : memref<144x128xf32, #tpu.memory_space<vmem>>, vector<1x128xf32>
    %278 = vector.broadcast %277 : vector<1x128xf32> to vector<64x128xf32>
    %279 = arith.mulf %278, %272 : vector<64x128xf32>
    %280 = arith.addf %262, %279 : vector<64x128xf32>
    %c87 = arith.constant 87 : index
    %c0_91 = arith.constant 0 : index
    %281 = vector.load %arg4[%c87, %c0_91] : memref<144x128xf32, #tpu.memory_space<vmem>>, vector<1x128xf32>
    %282 = vector.broadcast %281 : vector<1x128xf32> to vector<64x128xf32>
    %283 = arith.mulf %282, %272 : vector<64x128xf32>
    %284 = arith.addf %266, %283 : vector<64x128xf32>
    %c123 = arith.constant 123 : index
    %c0_92 = arith.constant 0 : index
    %285 = vector.load %arg4[%c123, %c0_92] : memref<144x128xf32, #tpu.memory_space<vmem>>, vector<1x128xf32>
    %286 = vector.broadcast %285 : vector<1x128xf32> to vector<64x128xf32>
    %287 = arith.mulf %286, %272 : vector<64x128xf32>
    %288 = arith.addf %270, %287 : vector<64x128xf32>
    %c16 = arith.constant 16 : index
    %c0_93 = arith.constant 0 : index
    %289 = vector.load %arg4[%c16, %c0_93] : memref<144x128xf32, #tpu.memory_space<vmem>>, vector<1x128xf32>
    %290 = vector.broadcast %289 : vector<1x128xf32> to vector<64x128xf32>
    %291 = arith.mulf %290, %271 : vector<64x128xf32>
    %292 = arith.addf %276, %291 : vector<64x128xf32>
    %c52 = arith.constant 52 : index
    %c0_94 = arith.constant 0 : index
    %293 = vector.load %arg4[%c52, %c0_94] : memref<144x128xf32, #tpu.memory_space<vmem>>, vector<1x128xf32>
    %294 = vector.broadcast %293 : vector<1x128xf32> to vector<64x128xf32>
    %295 = arith.mulf %294, %271 : vector<64x128xf32>
    %296 = arith.addf %280, %295 : vector<64x128xf32>
    %c88 = arith.constant 88 : index
    %c0_95 = arith.constant 0 : index
    %297 = vector.load %arg4[%c88, %c0_95] : memref<144x128xf32, #tpu.memory_space<vmem>>, vector<1x128xf32>
    %298 = vector.broadcast %297 : vector<1x128xf32> to vector<64x128xf32>
    %299 = arith.mulf %298, %271 : vector<64x128xf32>
    %300 = arith.addf %284, %299 : vector<64x128xf32>
    %c124 = arith.constant 124 : index
    %c0_96 = arith.constant 0 : index
    %301 = vector.load %arg4[%c124, %c0_96] : memref<144x128xf32, #tpu.memory_space<vmem>>, vector<1x128xf32>
    %302 = vector.broadcast %301 : vector<1x128xf32> to vector<64x128xf32>
    %303 = arith.mulf %302, %271 : vector<64x128xf32>
    %304 = arith.addf %288, %303 : vector<64x128xf32>
    %c63_i32_97 = arith.constant 63 : i32
    %305 = tpu.dynamic_rotate %271 by %c63_i32_97 dim 1 : vector<64x128xf32>, i32 -> vector<64x128xf32>
    %c17 = arith.constant 17 : index
    %c0_98 = arith.constant 0 : index
    %306 = vector.load %arg4[%c17, %c0_98] : memref<144x128xf32, #tpu.memory_space<vmem>>, vector<1x128xf32>
    %307 = vector.broadcast %306 : vector<1x128xf32> to vector<64x128xf32>
    %308 = arith.mulf %307, %305 : vector<64x128xf32>
    %309 = arith.addf %292, %308 : vector<64x128xf32>
    %c53 = arith.constant 53 : index
    %c0_99 = arith.constant 0 : index
    %310 = vector.load %arg4[%c53, %c0_99] : memref<144x128xf32, #tpu.memory_space<vmem>>, vector<1x128xf32>
    %311 = vector.broadcast %310 : vector<1x128xf32> to vector<64x128xf32>
    %312 = arith.mulf %311, %305 : vector<64x128xf32>
    %313 = arith.addf %296, %312 : vector<64x128xf32>
    %c89 = arith.constant 89 : index
    %c0_100 = arith.constant 0 : index
    %314 = vector.load %arg4[%c89, %c0_100] : memref<144x128xf32, #tpu.memory_space<vmem>>, vector<1x128xf32>
    %315 = vector.broadcast %314 : vector<1x128xf32> to vector<64x128xf32>
    %316 = arith.mulf %315, %305 : vector<64x128xf32>
    %317 = arith.addf %300, %316 : vector<64x128xf32>
    %c125 = arith.constant 125 : index
    %c0_101 = arith.constant 0 : index
    %318 = vector.load %arg4[%c125, %c0_101] : memref<144x128xf32, #tpu.memory_space<vmem>>, vector<1x128xf32>
    %319 = vector.broadcast %318 : vector<1x128xf32> to vector<64x128xf32>
    %320 = arith.mulf %319, %305 : vector<64x128xf32>
    %321 = arith.addf %304, %320 : vector<64x128xf32>
    %c0_102 = arith.constant 0 : index
    %c0_103 = arith.constant 0 : index
    %c0_104 = arith.constant 0 : index
    %c0_105 = arith.constant 0 : index
    %322 = vector.load %arg2[%c0_102, %c0_103, %c0_104, %c0_105] : memref<1x2x64x64xf32, #tpu.memory_space<vmem>>, vector<1x1x64x64xf32>
    %323 = vector.shape_cast %322 : vector<1x1x64x64xf32> to vector<64x64xf32>
    %324 = tpu.concatenate %323, %323 in 1 : vector<64x64xf32>, vector<64x64xf32> -> vector<64x128xf32>
    %c1_i32_106 = arith.constant 1 : i32
    %325 = tpu.dynamic_rotate %324 by %c1_i32_106 dim 0 : vector<64x128xf32>, i32 -> vector<64x128xf32>
    %c1_i32_107 = arith.constant 1 : i32
    %326 = tpu.dynamic_rotate %325 by %c1_i32_107 dim 1 : vector<64x128xf32>, i32 -> vector<64x128xf32>
    %c18 = arith.constant 18 : index
    %c0_108 = arith.constant 0 : index
    %327 = vector.load %arg4[%c18, %c0_108] : memref<144x128xf32, #tpu.memory_space<vmem>>, vector<1x128xf32>
    %328 = vector.broadcast %327 : vector<1x128xf32> to vector<64x128xf32>
    %329 = arith.mulf %328, %326 : vector<64x128xf32>
    %330 = arith.addf %309, %329 : vector<64x128xf32>
    %c54 = arith.constant 54 : index
    %c0_109 = arith.constant 0 : index
    %331 = vector.load %arg4[%c54, %c0_109] : memref<144x128xf32, #tpu.memory_space<vmem>>, vector<1x128xf32>
    %332 = vector.broadcast %331 : vector<1x128xf32> to vector<64x128xf32>
    %333 = arith.mulf %332, %326 : vector<64x128xf32>
    %334 = arith.addf %313, %333 : vector<64x128xf32>
    %c90 = arith.constant 90 : index
    %c0_110 = arith.constant 0 : index
    %335 = vector.load %arg4[%c90, %c0_110] : memref<144x128xf32, #tpu.memory_space<vmem>>, vector<1x128xf32>
    %336 = vector.broadcast %335 : vector<1x128xf32> to vector<64x128xf32>
    %337 = arith.mulf %336, %326 : vector<64x128xf32>
    %338 = arith.addf %317, %337 : vector<64x128xf32>
    %c126 = arith.constant 126 : index
    %c0_111 = arith.constant 0 : index
    %339 = vector.load %arg4[%c126, %c0_111] : memref<144x128xf32, #tpu.memory_space<vmem>>, vector<1x128xf32>
    %340 = vector.broadcast %339 : vector<1x128xf32> to vector<64x128xf32>
    %341 = arith.mulf %340, %326 : vector<64x128xf32>
    %342 = arith.addf %321, %341 : vector<64x128xf32>
    %c19 = arith.constant 19 : index
    %c0_112 = arith.constant 0 : index
    %343 = vector.load %arg4[%c19, %c0_112] : memref<144x128xf32, #tpu.memory_space<vmem>>, vector<1x128xf32>
    %344 = vector.broadcast %343 : vector<1x128xf32> to vector<64x128xf32>
    %345 = arith.mulf %344, %325 : vector<64x128xf32>
    %346 = arith.addf %330, %345 : vector<64x128xf32>
    %c55 = arith.constant 55 : index
    %c0_113 = arith.constant 0 : index
    %347 = vector.load %arg4[%c55, %c0_113] : memref<144x128xf32, #tpu.memory_space<vmem>>, vector<1x128xf32>
    %348 = vector.broadcast %347 : vector<1x128xf32> to vector<64x128xf32>
    %349 = arith.mulf %348, %325 : vector<64x128xf32>
    %350 = arith.addf %334, %349 : vector<64x128xf32>
    %c91 = arith.constant 91 : index
    %c0_114 = arith.constant 0 : index
    %351 = vector.load %arg4[%c91, %c0_114] : memref<144x128xf32, #tpu.memory_space<vmem>>, vector<1x128xf32>
    %352 = vector.broadcast %351 : vector<1x128xf32> to vector<64x128xf32>
    %353 = arith.mulf %352, %325 : vector<64x128xf32>
    %354 = arith.addf %338, %353 : vector<64x128xf32>
    %c127 = arith.constant 127 : index
    %c0_115 = arith.constant 0 : index
    %355 = vector.load %arg4[%c127, %c0_115] : memref<144x128xf32, #tpu.memory_space<vmem>>, vector<1x128xf32>
    %356 = vector.broadcast %355 : vector<1x128xf32> to vector<64x128xf32>
    %357 = arith.mulf %356, %325 : vector<64x128xf32>
    %358 = arith.addf %342, %357 : vector<64x128xf32>
    %c63_i32_116 = arith.constant 63 : i32
    %359 = tpu.dynamic_rotate %325 by %c63_i32_116 dim 1 : vector<64x128xf32>, i32 -> vector<64x128xf32>
    %c20 = arith.constant 20 : index
    %c0_117 = arith.constant 0 : index
    %360 = vector.load %arg4[%c20, %c0_117] : memref<144x128xf32, #tpu.memory_space<vmem>>, vector<1x128xf32>
    %361 = vector.broadcast %360 : vector<1x128xf32> to vector<64x128xf32>
    %362 = arith.mulf %361, %359 : vector<64x128xf32>
    %363 = arith.addf %346, %362 : vector<64x128xf32>
    %c56 = arith.constant 56 : index
    %c0_118 = arith.constant 0 : index
    %364 = vector.load %arg4[%c56, %c0_118] : memref<144x128xf32, #tpu.memory_space<vmem>>, vector<1x128xf32>
    %365 = vector.broadcast %364 : vector<1x128xf32> to vector<64x128xf32>
    %366 = arith.mulf %365, %359 : vector<64x128xf32>
    %367 = arith.addf %350, %366 : vector<64x128xf32>
    %c92 = arith.constant 92 : index
    %c0_119 = arith.constant 0 : index
    %368 = vector.load %arg4[%c92, %c0_119] : memref<144x128xf32, #tpu.memory_space<vmem>>, vector<1x128xf32>
    %369 = vector.broadcast %368 : vector<1x128xf32> to vector<64x128xf32>
    %370 = arith.mulf %369, %359 : vector<64x128xf32>
    %371 = arith.addf %354, %370 : vector<64x128xf32>
    %c128 = arith.constant 128 : index
    %c0_120 = arith.constant 0 : index
    %372 = vector.load %arg4[%c128, %c0_120] : memref<144x128xf32, #tpu.memory_space<vmem>>, vector<1x128xf32>
    %373 = vector.broadcast %372 : vector<1x128xf32> to vector<64x128xf32>
    %374 = arith.mulf %373, %359 : vector<64x128xf32>
    %375 = arith.addf %358, %374 : vector<64x128xf32>
    %c1_i32_121 = arith.constant 1 : i32
    %376 = tpu.dynamic_rotate %324 by %c1_i32_121 dim 1 : vector<64x128xf32>, i32 -> vector<64x128xf32>
    %c21 = arith.constant 21 : index
    %c0_122 = arith.constant 0 : index
    %377 = vector.load %arg4[%c21, %c0_122] : memref<144x128xf32, #tpu.memory_space<vmem>>, vector<1x128xf32>
    %378 = vector.broadcast %377 : vector<1x128xf32> to vector<64x128xf32>
    %379 = arith.mulf %378, %376 : vector<64x128xf32>
    %380 = arith.addf %363, %379 : vector<64x128xf32>
    %c57 = arith.constant 57 : index
    %c0_123 = arith.constant 0 : index
    %381 = vector.load %arg4[%c57, %c0_123] : memref<144x128xf32, #tpu.memory_space<vmem>>, vector<1x128xf32>
    %382 = vector.broadcast %381 : vector<1x128xf32> to vector<64x128xf32>
    %383 = arith.mulf %382, %376 : vector<64x128xf32>
    %384 = arith.addf %367, %383 : vector<64x128xf32>
    %c93 = arith.constant 93 : index
    %c0_124 = arith.constant 0 : index
    %385 = vector.load %arg4[%c93, %c0_124] : memref<144x128xf32, #tpu.memory_space<vmem>>, vector<1x128xf32>
    %386 = vector.broadcast %385 : vector<1x128xf32> to vector<64x128xf32>
    %387 = arith.mulf %386, %376 : vector<64x128xf32>
    %388 = arith.addf %371, %387 : vector<64x128xf32>
    %c129 = arith.constant 129 : index
    %c0_125 = arith.constant 0 : index
    %389 = vector.load %arg4[%c129, %c0_125] : memref<144x128xf32, #tpu.memory_space<vmem>>, vector<1x128xf32>
    %390 = vector.broadcast %389 : vector<1x128xf32> to vector<64x128xf32>
    %391 = arith.mulf %390, %376 : vector<64x128xf32>
    %392 = arith.addf %375, %391 : vector<64x128xf32>
    %c22 = arith.constant 22 : index
    %c0_126 = arith.constant 0 : index
    %393 = vector.load %arg4[%c22, %c0_126] : memref<144x128xf32, #tpu.memory_space<vmem>>, vector<1x128xf32>
    %394 = vector.broadcast %393 : vector<1x128xf32> to vector<64x128xf32>
    %395 = arith.mulf %394, %324 : vector<64x128xf32>
    %396 = arith.addf %380, %395 : vector<64x128xf32>
    %c58 = arith.constant 58 : index
    %c0_127 = arith.constant 0 : index
    %397 = vector.load %arg4[%c58, %c0_127] : memref<144x128xf32, #tpu.memory_space<vmem>>, vector<1x128xf32>
    %398 = vector.broadcast %397 : vector<1x128xf32> to vector<64x128xf32>
    %399 = arith.mulf %398, %324 : vector<64x128xf32>
    %400 = arith.addf %384, %399 : vector<64x128xf32>
    %c94 = arith.constant 94 : index
    %c0_128 = arith.constant 0 : index
    %401 = vector.load %arg4[%c94, %c0_128] : memref<144x128xf32, #tpu.memory_space<vmem>>, vector<1x128xf32>
    %402 = vector.broadcast %401 : vector<1x128xf32> to vector<64x128xf32>
    %403 = arith.mulf %402, %324 : vector<64x128xf32>
    %404 = arith.addf %388, %403 : vector<64x128xf32>
    %c130 = arith.constant 130 : index
    %c0_129 = arith.constant 0 : index
    %405 = vector.load %arg4[%c130, %c0_129] : memref<144x128xf32, #tpu.memory_space<vmem>>, vector<1x128xf32>
    %406 = vector.broadcast %405 : vector<1x128xf32> to vector<64x128xf32>
    %407 = arith.mulf %406, %324 : vector<64x128xf32>
    %408 = arith.addf %392, %407 : vector<64x128xf32>
    %c63_i32_130 = arith.constant 63 : i32
    %409 = tpu.dynamic_rotate %324 by %c63_i32_130 dim 1 : vector<64x128xf32>, i32 -> vector<64x128xf32>
    %c23 = arith.constant 23 : index
    %c0_131 = arith.constant 0 : index
    %410 = vector.load %arg4[%c23, %c0_131] : memref<144x128xf32, #tpu.memory_space<vmem>>, vector<1x128xf32>
    %411 = vector.broadcast %410 : vector<1x128xf32> to vector<64x128xf32>
    %412 = arith.mulf %411, %409 : vector<64x128xf32>
    %413 = arith.addf %396, %412 : vector<64x128xf32>
    %c59 = arith.constant 59 : index
    %c0_132 = arith.constant 0 : index
    %414 = vector.load %arg4[%c59, %c0_132] : memref<144x128xf32, #tpu.memory_space<vmem>>, vector<1x128xf32>
    %415 = vector.broadcast %414 : vector<1x128xf32> to vector<64x128xf32>
    %416 = arith.mulf %415, %409 : vector<64x128xf32>
    %417 = arith.addf %400, %416 : vector<64x128xf32>
    %c95 = arith.constant 95 : index
    %c0_133 = arith.constant 0 : index
    %418 = vector.load %arg4[%c95, %c0_133] : memref<144x128xf32, #tpu.memory_space<vmem>>, vector<1x128xf32>
    %419 = vector.broadcast %418 : vector<1x128xf32> to vector<64x128xf32>
    %420 = arith.mulf %419, %409 : vector<64x128xf32>
    %421 = arith.addf %404, %420 : vector<64x128xf32>
    %c131 = arith.constant 131 : index
    %c0_134 = arith.constant 0 : index
    %422 = vector.load %arg4[%c131, %c0_134] : memref<144x128xf32, #tpu.memory_space<vmem>>, vector<1x128xf32>
    %423 = vector.broadcast %422 : vector<1x128xf32> to vector<64x128xf32>
    %424 = arith.mulf %423, %409 : vector<64x128xf32>
    %425 = arith.addf %408, %424 : vector<64x128xf32>
    %c63_i32_135 = arith.constant 63 : i32
    %426 = tpu.dynamic_rotate %324 by %c63_i32_135 dim 0 : vector<64x128xf32>, i32 -> vector<64x128xf32>
    %c1_i32_136 = arith.constant 1 : i32
    %427 = tpu.dynamic_rotate %426 by %c1_i32_136 dim 1 : vector<64x128xf32>, i32 -> vector<64x128xf32>
    %c24 = arith.constant 24 : index
    %c0_137 = arith.constant 0 : index
    %428 = vector.load %arg4[%c24, %c0_137] : memref<144x128xf32, #tpu.memory_space<vmem>>, vector<1x128xf32>
    %429 = vector.broadcast %428 : vector<1x128xf32> to vector<64x128xf32>
    %430 = arith.mulf %429, %427 : vector<64x128xf32>
    %431 = arith.addf %413, %430 : vector<64x128xf32>
    %c60 = arith.constant 60 : index
    %c0_138 = arith.constant 0 : index
    %432 = vector.load %arg4[%c60, %c0_138] : memref<144x128xf32, #tpu.memory_space<vmem>>, vector<1x128xf32>
    %433 = vector.broadcast %432 : vector<1x128xf32> to vector<64x128xf32>
    %434 = arith.mulf %433, %427 : vector<64x128xf32>
    %435 = arith.addf %417, %434 : vector<64x128xf32>
    %c96 = arith.constant 96 : index
    %c0_139 = arith.constant 0 : index
    %436 = vector.load %arg4[%c96, %c0_139] : memref<144x128xf32, #tpu.memory_space<vmem>>, vector<1x128xf32>
    %437 = vector.broadcast %436 : vector<1x128xf32> to vector<64x128xf32>
    %438 = arith.mulf %437, %427 : vector<64x128xf32>
    %439 = arith.addf %421, %438 : vector<64x128xf32>
    %c132 = arith.constant 132 : index
    %c0_140 = arith.constant 0 : index
    %440 = vector.load %arg4[%c132, %c0_140] : memref<144x128xf32, #tpu.memory_space<vmem>>, vector<1x128xf32>
    %441 = vector.broadcast %440 : vector<1x128xf32> to vector<64x128xf32>
    %442 = arith.mulf %441, %427 : vector<64x128xf32>
    %443 = arith.addf %425, %442 : vector<64x128xf32>
    %c25 = arith.constant 25 : index
    %c0_141 = arith.constant 0 : index
    %444 = vector.load %arg4[%c25, %c0_141] : memref<144x128xf32, #tpu.memory_space<vmem>>, vector<1x128xf32>
    %445 = vector.broadcast %444 : vector<1x128xf32> to vector<64x128xf32>
    %446 = arith.mulf %445, %426 : vector<64x128xf32>
    %447 = arith.addf %431, %446 : vector<64x128xf32>
    %c61 = arith.constant 61 : index
    %c0_142 = arith.constant 0 : index
    %448 = vector.load %arg4[%c61, %c0_142] : memref<144x128xf32, #tpu.memory_space<vmem>>, vector<1x128xf32>
    %449 = vector.broadcast %448 : vector<1x128xf32> to vector<64x128xf32>
    %450 = arith.mulf %449, %426 : vector<64x128xf32>
    %451 = arith.addf %435, %450 : vector<64x128xf32>
    %c97 = arith.constant 97 : index
    %c0_143 = arith.constant 0 : index
    %452 = vector.load %arg4[%c97, %c0_143] : memref<144x128xf32, #tpu.memory_space<vmem>>, vector<1x128xf32>
    %453 = vector.broadcast %452 : vector<1x128xf32> to vector<64x128xf32>
    %454 = arith.mulf %453, %426 : vector<64x128xf32>
    %455 = arith.addf %439, %454 : vector<64x128xf32>
    %c133 = arith.constant 133 : index
    %c0_144 = arith.constant 0 : index
    %456 = vector.load %arg4[%c133, %c0_144] : memref<144x128xf32, #tpu.memory_space<vmem>>, vector<1x128xf32>
    %457 = vector.broadcast %456 : vector<1x128xf32> to vector<64x128xf32>
    %458 = arith.mulf %457, %426 : vector<64x128xf32>
    %459 = arith.addf %443, %458 : vector<64x128xf32>
    %c63_i32_145 = arith.constant 63 : i32
    %460 = tpu.dynamic_rotate %426 by %c63_i32_145 dim 1 : vector<64x128xf32>, i32 -> vector<64x128xf32>
    %c26 = arith.constant 26 : index
    %c0_146 = arith.constant 0 : index
    %461 = vector.load %arg4[%c26, %c0_146] : memref<144x128xf32, #tpu.memory_space<vmem>>, vector<1x128xf32>
    %462 = vector.broadcast %461 : vector<1x128xf32> to vector<64x128xf32>
    %463 = arith.mulf %462, %460 : vector<64x128xf32>
    %464 = arith.addf %447, %463 : vector<64x128xf32>
    %c62 = arith.constant 62 : index
    %c0_147 = arith.constant 0 : index
    %465 = vector.load %arg4[%c62, %c0_147] : memref<144x128xf32, #tpu.memory_space<vmem>>, vector<1x128xf32>
    %466 = vector.broadcast %465 : vector<1x128xf32> to vector<64x128xf32>
    %467 = arith.mulf %466, %460 : vector<64x128xf32>
    %468 = arith.addf %451, %467 : vector<64x128xf32>
    %c98 = arith.constant 98 : index
    %c0_148 = arith.constant 0 : index
    %469 = vector.load %arg4[%c98, %c0_148] : memref<144x128xf32, #tpu.memory_space<vmem>>, vector<1x128xf32>
    %470 = vector.broadcast %469 : vector<1x128xf32> to vector<64x128xf32>
    %471 = arith.mulf %470, %460 : vector<64x128xf32>
    %472 = arith.addf %455, %471 : vector<64x128xf32>
    %c134 = arith.constant 134 : index
    %c0_149 = arith.constant 0 : index
    %473 = vector.load %arg4[%c134, %c0_149] : memref<144x128xf32, #tpu.memory_space<vmem>>, vector<1x128xf32>
    %474 = vector.broadcast %473 : vector<1x128xf32> to vector<64x128xf32>
    %475 = arith.mulf %474, %460 : vector<64x128xf32>
    %476 = arith.addf %459, %475 : vector<64x128xf32>
    %c0_150 = arith.constant 0 : index
    %c1_151 = arith.constant 1 : index
    %c0_152 = arith.constant 0 : index
    %c0_153 = arith.constant 0 : index
    %477 = vector.load %arg2[%c0_150, %c1_151, %c0_152, %c0_153] : memref<1x2x64x64xf32, #tpu.memory_space<vmem>>, vector<1x1x64x64xf32>
    %478 = vector.shape_cast %477 : vector<1x1x64x64xf32> to vector<64x64xf32>
    %479 = tpu.concatenate %478, %478 in 1 : vector<64x64xf32>, vector<64x64xf32> -> vector<64x128xf32>
    %c1_i32_154 = arith.constant 1 : i32
    %480 = tpu.dynamic_rotate %479 by %c1_i32_154 dim 0 : vector<64x128xf32>, i32 -> vector<64x128xf32>
    %c1_i32_155 = arith.constant 1 : i32
    %481 = tpu.dynamic_rotate %480 by %c1_i32_155 dim 1 : vector<64x128xf32>, i32 -> vector<64x128xf32>
    %c27 = arith.constant 27 : index
    %c0_156 = arith.constant 0 : index
    %482 = vector.load %arg4[%c27, %c0_156] : memref<144x128xf32, #tpu.memory_space<vmem>>, vector<1x128xf32>
    %483 = vector.broadcast %482 : vector<1x128xf32> to vector<64x128xf32>
    %484 = arith.mulf %483, %481 : vector<64x128xf32>
    %485 = arith.addf %464, %484 : vector<64x128xf32>
    %c63 = arith.constant 63 : index
    %c0_157 = arith.constant 0 : index
    %486 = vector.load %arg4[%c63, %c0_157] : memref<144x128xf32, #tpu.memory_space<vmem>>, vector<1x128xf32>
    %487 = vector.broadcast %486 : vector<1x128xf32> to vector<64x128xf32>
    %488 = arith.mulf %487, %481 : vector<64x128xf32>
    %489 = arith.addf %468, %488 : vector<64x128xf32>
    %c99 = arith.constant 99 : index
    %c0_158 = arith.constant 0 : index
    %490 = vector.load %arg4[%c99, %c0_158] : memref<144x128xf32, #tpu.memory_space<vmem>>, vector<1x128xf32>
    %491 = vector.broadcast %490 : vector<1x128xf32> to vector<64x128xf32>
    %492 = arith.mulf %491, %481 : vector<64x128xf32>
    %493 = arith.addf %472, %492 : vector<64x128xf32>
    %c135 = arith.constant 135 : index
    %c0_159 = arith.constant 0 : index
    %494 = vector.load %arg4[%c135, %c0_159] : memref<144x128xf32, #tpu.memory_space<vmem>>, vector<1x128xf32>
    %495 = vector.broadcast %494 : vector<1x128xf32> to vector<64x128xf32>
    %496 = arith.mulf %495, %481 : vector<64x128xf32>
    %497 = arith.addf %476, %496 : vector<64x128xf32>
    %c28 = arith.constant 28 : index
    %c0_160 = arith.constant 0 : index
    %498 = vector.load %arg4[%c28, %c0_160] : memref<144x128xf32, #tpu.memory_space<vmem>>, vector<1x128xf32>
    %499 = vector.broadcast %498 : vector<1x128xf32> to vector<64x128xf32>
    %500 = arith.mulf %499, %480 : vector<64x128xf32>
    %501 = arith.addf %485, %500 : vector<64x128xf32>
    %c64 = arith.constant 64 : index
    %c0_161 = arith.constant 0 : index
    %502 = vector.load %arg4[%c64, %c0_161] : memref<144x128xf32, #tpu.memory_space<vmem>>, vector<1x128xf32>
    %503 = vector.broadcast %502 : vector<1x128xf32> to vector<64x128xf32>
    %504 = arith.mulf %503, %480 : vector<64x128xf32>
    %505 = arith.addf %489, %504 : vector<64x128xf32>
    %c100 = arith.constant 100 : index
    %c0_162 = arith.constant 0 : index
    %506 = vector.load %arg4[%c100, %c0_162] : memref<144x128xf32, #tpu.memory_space<vmem>>, vector<1x128xf32>
    %507 = vector.broadcast %506 : vector<1x128xf32> to vector<64x128xf32>
    %508 = arith.mulf %507, %480 : vector<64x128xf32>
    %509 = arith.addf %493, %508 : vector<64x128xf32>
    %c136 = arith.constant 136 : index
    %c0_163 = arith.constant 0 : index
    %510 = vector.load %arg4[%c136, %c0_163] : memref<144x128xf32, #tpu.memory_space<vmem>>, vector<1x128xf32>
    %511 = vector.broadcast %510 : vector<1x128xf32> to vector<64x128xf32>
    %512 = arith.mulf %511, %480 : vector<64x128xf32>
    %513 = arith.addf %497, %512 : vector<64x128xf32>
    %c63_i32_164 = arith.constant 63 : i32
    %514 = tpu.dynamic_rotate %480 by %c63_i32_164 dim 1 : vector<64x128xf32>, i32 -> vector<64x128xf32>
    %c29 = arith.constant 29 : index
    %c0_165 = arith.constant 0 : index
    %515 = vector.load %arg4[%c29, %c0_165] : memref<144x128xf32, #tpu.memory_space<vmem>>, vector<1x128xf32>
    %516 = vector.broadcast %515 : vector<1x128xf32> to vector<64x128xf32>
    %517 = arith.mulf %516, %514 : vector<64x128xf32>
    %518 = arith.addf %501, %517 : vector<64x128xf32>
    %c65 = arith.constant 65 : index
    %c0_166 = arith.constant 0 : index
    %519 = vector.load %arg4[%c65, %c0_166] : memref<144x128xf32, #tpu.memory_space<vmem>>, vector<1x128xf32>
    %520 = vector.broadcast %519 : vector<1x128xf32> to vector<64x128xf32>
    %521 = arith.mulf %520, %514 : vector<64x128xf32>
    %522 = arith.addf %505, %521 : vector<64x128xf32>
    %c101 = arith.constant 101 : index
    %c0_167 = arith.constant 0 : index
    %523 = vector.load %arg4[%c101, %c0_167] : memref<144x128xf32, #tpu.memory_space<vmem>>, vector<1x128xf32>
    %524 = vector.broadcast %523 : vector<1x128xf32> to vector<64x128xf32>
    %525 = arith.mulf %524, %514 : vector<64x128xf32>
    %526 = arith.addf %509, %525 : vector<64x128xf32>
    %c137 = arith.constant 137 : index
    %c0_168 = arith.constant 0 : index
    %527 = vector.load %arg4[%c137, %c0_168] : memref<144x128xf32, #tpu.memory_space<vmem>>, vector<1x128xf32>
    %528 = vector.broadcast %527 : vector<1x128xf32> to vector<64x128xf32>
    %529 = arith.mulf %528, %514 : vector<64x128xf32>
    %530 = arith.addf %513, %529 : vector<64x128xf32>
    %c1_i32_169 = arith.constant 1 : i32
    %531 = tpu.dynamic_rotate %479 by %c1_i32_169 dim 1 : vector<64x128xf32>, i32 -> vector<64x128xf32>
    %c30 = arith.constant 30 : index
    %c0_170 = arith.constant 0 : index
    %532 = vector.load %arg4[%c30, %c0_170] : memref<144x128xf32, #tpu.memory_space<vmem>>, vector<1x128xf32>
    %533 = vector.broadcast %532 : vector<1x128xf32> to vector<64x128xf32>
    %534 = arith.mulf %533, %531 : vector<64x128xf32>
    %535 = arith.addf %518, %534 : vector<64x128xf32>
    %c66 = arith.constant 66 : index
    %c0_171 = arith.constant 0 : index
    %536 = vector.load %arg4[%c66, %c0_171] : memref<144x128xf32, #tpu.memory_space<vmem>>, vector<1x128xf32>
    %537 = vector.broadcast %536 : vector<1x128xf32> to vector<64x128xf32>
    %538 = arith.mulf %537, %531 : vector<64x128xf32>
    %539 = arith.addf %522, %538 : vector<64x128xf32>
    %c102 = arith.constant 102 : index
    %c0_172 = arith.constant 0 : index
    %540 = vector.load %arg4[%c102, %c0_172] : memref<144x128xf32, #tpu.memory_space<vmem>>, vector<1x128xf32>
    %541 = vector.broadcast %540 : vector<1x128xf32> to vector<64x128xf32>
    %542 = arith.mulf %541, %531 : vector<64x128xf32>
    %543 = arith.addf %526, %542 : vector<64x128xf32>
    %c138 = arith.constant 138 : index
    %c0_173 = arith.constant 0 : index
    %544 = vector.load %arg4[%c138, %c0_173] : memref<144x128xf32, #tpu.memory_space<vmem>>, vector<1x128xf32>
    %545 = vector.broadcast %544 : vector<1x128xf32> to vector<64x128xf32>
    %546 = arith.mulf %545, %531 : vector<64x128xf32>
    %547 = arith.addf %530, %546 : vector<64x128xf32>
    %c31 = arith.constant 31 : index
    %c0_174 = arith.constant 0 : index
    %548 = vector.load %arg4[%c31, %c0_174] : memref<144x128xf32, #tpu.memory_space<vmem>>, vector<1x128xf32>
    %549 = vector.broadcast %548 : vector<1x128xf32> to vector<64x128xf32>
    %550 = arith.mulf %549, %479 : vector<64x128xf32>
    %551 = arith.addf %535, %550 : vector<64x128xf32>
    %c67 = arith.constant 67 : index
    %c0_175 = arith.constant 0 : index
    %552 = vector.load %arg4[%c67, %c0_175] : memref<144x128xf32, #tpu.memory_space<vmem>>, vector<1x128xf32>
    %553 = vector.broadcast %552 : vector<1x128xf32> to vector<64x128xf32>
    %554 = arith.mulf %553, %479 : vector<64x128xf32>
    %555 = arith.addf %539, %554 : vector<64x128xf32>
    %c103 = arith.constant 103 : index
    %c0_176 = arith.constant 0 : index
    %556 = vector.load %arg4[%c103, %c0_176] : memref<144x128xf32, #tpu.memory_space<vmem>>, vector<1x128xf32>
    %557 = vector.broadcast %556 : vector<1x128xf32> to vector<64x128xf32>
    %558 = arith.mulf %557, %479 : vector<64x128xf32>
    %559 = arith.addf %543, %558 : vector<64x128xf32>
    %c139 = arith.constant 139 : index
    %c0_177 = arith.constant 0 : index
    %560 = vector.load %arg4[%c139, %c0_177] : memref<144x128xf32, #tpu.memory_space<vmem>>, vector<1x128xf32>
    %561 = vector.broadcast %560 : vector<1x128xf32> to vector<64x128xf32>
    %562 = arith.mulf %561, %479 : vector<64x128xf32>
    %563 = arith.addf %547, %562 : vector<64x128xf32>
    %c63_i32_178 = arith.constant 63 : i32
    %564 = tpu.dynamic_rotate %479 by %c63_i32_178 dim 1 : vector<64x128xf32>, i32 -> vector<64x128xf32>
    %c32 = arith.constant 32 : index
    %c0_179 = arith.constant 0 : index
    %565 = vector.load %arg4[%c32, %c0_179] : memref<144x128xf32, #tpu.memory_space<vmem>>, vector<1x128xf32>
    %566 = vector.broadcast %565 : vector<1x128xf32> to vector<64x128xf32>
    %567 = arith.mulf %566, %564 : vector<64x128xf32>
    %568 = arith.addf %551, %567 : vector<64x128xf32>
    %c68 = arith.constant 68 : index
    %c0_180 = arith.constant 0 : index
    %569 = vector.load %arg4[%c68, %c0_180] : memref<144x128xf32, #tpu.memory_space<vmem>>, vector<1x128xf32>
    %570 = vector.broadcast %569 : vector<1x128xf32> to vector<64x128xf32>
    %571 = arith.mulf %570, %564 : vector<64x128xf32>
    %572 = arith.addf %555, %571 : vector<64x128xf32>
    %c104 = arith.constant 104 : index
    %c0_181 = arith.constant 0 : index
    %573 = vector.load %arg4[%c104, %c0_181] : memref<144x128xf32, #tpu.memory_space<vmem>>, vector<1x128xf32>
    %574 = vector.broadcast %573 : vector<1x128xf32> to vector<64x128xf32>
    %575 = arith.mulf %574, %564 : vector<64x128xf32>
    %576 = arith.addf %559, %575 : vector<64x128xf32>
    %c140 = arith.constant 140 : index
    %c0_182 = arith.constant 0 : index
    %577 = vector.load %arg4[%c140, %c0_182] : memref<144x128xf32, #tpu.memory_space<vmem>>, vector<1x128xf32>
    %578 = vector.broadcast %577 : vector<1x128xf32> to vector<64x128xf32>
    %579 = arith.mulf %578, %564 : vector<64x128xf32>
    %580 = arith.addf %563, %579 : vector<64x128xf32>
    %c63_i32_183 = arith.constant 63 : i32
    %581 = tpu.dynamic_rotate %479 by %c63_i32_183 dim 0 : vector<64x128xf32>, i32 -> vector<64x128xf32>
    %c1_i32_184 = arith.constant 1 : i32
    %582 = tpu.dynamic_rotate %581 by %c1_i32_184 dim 1 : vector<64x128xf32>, i32 -> vector<64x128xf32>
    %c33 = arith.constant 33 : index
    %c0_185 = arith.constant 0 : index
    %583 = vector.load %arg4[%c33, %c0_185] : memref<144x128xf32, #tpu.memory_space<vmem>>, vector<1x128xf32>
    %584 = vector.broadcast %583 : vector<1x128xf32> to vector<64x128xf32>
    %585 = arith.mulf %584, %582 : vector<64x128xf32>
    %586 = arith.addf %568, %585 : vector<64x128xf32>
    %c69 = arith.constant 69 : index
    %c0_186 = arith.constant 0 : index
    %587 = vector.load %arg4[%c69, %c0_186] : memref<144x128xf32, #tpu.memory_space<vmem>>, vector<1x128xf32>
    %588 = vector.broadcast %587 : vector<1x128xf32> to vector<64x128xf32>
    %589 = arith.mulf %588, %582 : vector<64x128xf32>
    %590 = arith.addf %572, %589 : vector<64x128xf32>
    %c105 = arith.constant 105 : index
    %c0_187 = arith.constant 0 : index
    %591 = vector.load %arg4[%c105, %c0_187] : memref<144x128xf32, #tpu.memory_space<vmem>>, vector<1x128xf32>
    %592 = vector.broadcast %591 : vector<1x128xf32> to vector<64x128xf32>
    %593 = arith.mulf %592, %582 : vector<64x128xf32>
    %594 = arith.addf %576, %593 : vector<64x128xf32>
    %c141 = arith.constant 141 : index
    %c0_188 = arith.constant 0 : index
    %595 = vector.load %arg4[%c141, %c0_188] : memref<144x128xf32, #tpu.memory_space<vmem>>, vector<1x128xf32>
    %596 = vector.broadcast %595 : vector<1x128xf32> to vector<64x128xf32>
    %597 = arith.mulf %596, %582 : vector<64x128xf32>
    %598 = arith.addf %580, %597 : vector<64x128xf32>
    %c34 = arith.constant 34 : index
    %c0_189 = arith.constant 0 : index
    %599 = vector.load %arg4[%c34, %c0_189] : memref<144x128xf32, #tpu.memory_space<vmem>>, vector<1x128xf32>
    %600 = vector.broadcast %599 : vector<1x128xf32> to vector<64x128xf32>
    %601 = arith.mulf %600, %581 : vector<64x128xf32>
    %602 = arith.addf %586, %601 : vector<64x128xf32>
    %c70 = arith.constant 70 : index
    %c0_190 = arith.constant 0 : index
    %603 = vector.load %arg4[%c70, %c0_190] : memref<144x128xf32, #tpu.memory_space<vmem>>, vector<1x128xf32>
    %604 = vector.broadcast %603 : vector<1x128xf32> to vector<64x128xf32>
    %605 = arith.mulf %604, %581 : vector<64x128xf32>
    %606 = arith.addf %590, %605 : vector<64x128xf32>
    %c106 = arith.constant 106 : index
    %c0_191 = arith.constant 0 : index
    %607 = vector.load %arg4[%c106, %c0_191] : memref<144x128xf32, #tpu.memory_space<vmem>>, vector<1x128xf32>
    %608 = vector.broadcast %607 : vector<1x128xf32> to vector<64x128xf32>
    %609 = arith.mulf %608, %581 : vector<64x128xf32>
    %610 = arith.addf %594, %609 : vector<64x128xf32>
    %c142 = arith.constant 142 : index
    %c0_192 = arith.constant 0 : index
    %611 = vector.load %arg4[%c142, %c0_192] : memref<144x128xf32, #tpu.memory_space<vmem>>, vector<1x128xf32>
    %612 = vector.broadcast %611 : vector<1x128xf32> to vector<64x128xf32>
    %613 = arith.mulf %612, %581 : vector<64x128xf32>
    %614 = arith.addf %598, %613 : vector<64x128xf32>
    %c63_i32_193 = arith.constant 63 : i32
    %615 = tpu.dynamic_rotate %581 by %c63_i32_193 dim 1 : vector<64x128xf32>, i32 -> vector<64x128xf32>
    %c35 = arith.constant 35 : index
    %c0_194 = arith.constant 0 : index
    %616 = vector.load %arg4[%c35, %c0_194] : memref<144x128xf32, #tpu.memory_space<vmem>>, vector<1x128xf32>
    %617 = vector.broadcast %616 : vector<1x128xf32> to vector<64x128xf32>
    %618 = arith.mulf %617, %615 : vector<64x128xf32>
    %619 = arith.addf %602, %618 : vector<64x128xf32>
    %c71 = arith.constant 71 : index
    %c0_195 = arith.constant 0 : index
    %620 = vector.load %arg4[%c71, %c0_195] : memref<144x128xf32, #tpu.memory_space<vmem>>, vector<1x128xf32>
    %621 = vector.broadcast %620 : vector<1x128xf32> to vector<64x128xf32>
    %622 = arith.mulf %621, %615 : vector<64x128xf32>
    %623 = arith.addf %606, %622 : vector<64x128xf32>
    %c107 = arith.constant 107 : index
    %c0_196 = arith.constant 0 : index
    %624 = vector.load %arg4[%c107, %c0_196] : memref<144x128xf32, #tpu.memory_space<vmem>>, vector<1x128xf32>
    %625 = vector.broadcast %624 : vector<1x128xf32> to vector<64x128xf32>
    %626 = arith.mulf %625, %615 : vector<64x128xf32>
    %627 = arith.addf %610, %626 : vector<64x128xf32>
    %c143 = arith.constant 143 : index
    %c0_197 = arith.constant 0 : index
    %628 = vector.load %arg4[%c143, %c0_197] : memref<144x128xf32, #tpu.memory_space<vmem>>, vector<1x128xf32>
    %629 = vector.broadcast %628 : vector<1x128xf32> to vector<64x128xf32>
    %630 = arith.mulf %629, %615 : vector<64x128xf32>
    %631 = arith.addf %614, %630 : vector<64x128xf32>
    %cst = arith.constant 5.000000e-01 : f32
    %632 = vector.broadcast %cst : f32 to vector<64x128xf32>
    %633 = arith.mulf %632, %619 : vector<64x128xf32>
    %634 = math.tanh %633 : vector<64x128xf32>
    %cst_198 = arith.constant 1.000000e+00 : f32
    %635 = vector.broadcast %cst_198 : f32 to vector<64x128xf32>
    %636 = arith.addf %634, %635 : vector<64x128xf32>
    %cst_199 = arith.constant 5.000000e-01 : f32
    %637 = vector.broadcast %cst_199 : f32 to vector<64x128xf32>
    %638 = arith.mulf %637, %636 : vector<64x128xf32>
    %639 = vector.extract_strided_slice %638 {offsets = [0, 0], sizes = [64, 64], strides = [1, 1]} : vector<64x128xf32> to vector<64x64xf32>
    %640 = vector.extract_strided_slice %638 {offsets = [0, 64], sizes = [64, 64], strides = [1, 1]} : vector<64x128xf32> to vector<64x64xf32>
    %641 = vector.extract_strided_slice %623 {offsets = [0, 0], sizes = [64, 64], strides = [1, 1]} : vector<64x128xf32> to vector<64x64xf32>
    %642 = math.tanh %641 : vector<64x64xf32>
    %643 = vector.extract_strided_slice %623 {offsets = [0, 64], sizes = [64, 64], strides = [1, 1]} : vector<64x128xf32> to vector<64x64xf32>
    %cst_200 = arith.constant 5.000000e-01 : f32
    %644 = vector.broadcast %cst_200 : f32 to vector<64x64xf32>
    %645 = arith.mulf %644, %643 : vector<64x64xf32>
    %646 = math.tanh %645 : vector<64x64xf32>
    %cst_201 = arith.constant 1.000000e+00 : f32
    %647 = vector.broadcast %cst_201 : f32 to vector<64x64xf32>
    %648 = arith.addf %646, %647 : vector<64x64xf32>
    %cst_202 = arith.constant 5.000000e-01 : f32
    %649 = vector.broadcast %cst_202 : f32 to vector<64x64xf32>
    %650 = arith.mulf %649, %648 : vector<64x64xf32>
    %c0_203 = arith.constant 0 : index
    %c0_204 = arith.constant 0 : index
    %c0_205 = arith.constant 0 : index
    %c0_206 = arith.constant 0 : index
    %651 = vector.load %arg3[%c0_203, %c0_204, %c0_205, %c0_206] : memref<1x2x64x64xf32, #tpu.memory_space<vmem>>, vector<1x1x64x64xf32>
    %652 = vector.shape_cast %651 : vector<1x1x64x64xf32> to vector<64x64xf32>
    %653 = arith.mulf %640, %652 : vector<64x64xf32>
    %654 = arith.mulf %639, %642 : vector<64x64xf32>
    %655 = arith.addf %653, %654 : vector<64x64xf32>
    %656 = math.tanh %655 : vector<64x64xf32>
    %657 = arith.mulf %650, %656 : vector<64x64xf32>
    %c0_207 = arith.constant 0 : index
    %c0_208 = arith.constant 0 : index
    %c0_209 = arith.constant 0 : index
    %c0_210 = arith.constant 0 : index
    %658 = vector.load %arg6[%c0_207, %c0_208, %c0_209, %c0_210] : memref<1x2x64x64xf32, #tpu.memory_space<vmem>>, vector<1x1x64x64xf32>
    %659 = vector.shape_cast %658 : vector<1x1x64x64xf32> to vector<64x64xf32>
    %660 = vector.shape_cast %657 : vector<64x64xf32> to vector<1x1x64x64xf32>
    tpu.vector_store %arg6[%c0_207, %c0_208, %c0_209, %c0_210], %660 {strides = array<i32>} : memref<1x2x64x64xf32, #tpu.memory_space<vmem>>, vector<1x1x64x64xf32>,
    %c0_211 = arith.constant 0 : index
    %c0_212 = arith.constant 0 : index
    %c0_213 = arith.constant 0 : index
    %c0_214 = arith.constant 0 : index
    %661 = vector.load %arg7[%c0_211, %c0_212, %c0_213, %c0_214] : memref<1x2x64x64xf32, #tpu.memory_space<vmem>>, vector<1x1x64x64xf32>
    %662 = vector.shape_cast %661 : vector<1x1x64x64xf32> to vector<64x64xf32>
    %663 = vector.shape_cast %655 : vector<64x64xf32> to vector<1x1x64x64xf32>
    tpu.vector_store %arg7[%c0_211, %c0_212, %c0_213, %c0_214], %663 {strides = array<i32>} : memref<1x2x64x64xf32, #tpu.memory_space<vmem>>, vector<1x1x64x64xf32>,
    %cst_215 = arith.constant 5.000000e-01 : f32
    %664 = vector.broadcast %cst_215 : f32 to vector<64x128xf32>
    %665 = arith.mulf %664, %627 : vector<64x128xf32>
    %666 = math.tanh %665 : vector<64x128xf32>
    %cst_216 = arith.constant 1.000000e+00 : f32
    %667 = vector.broadcast %cst_216 : f32 to vector<64x128xf32>
    %668 = arith.addf %666, %667 : vector<64x128xf32>
    %cst_217 = arith.constant 5.000000e-01 : f32
    %669 = vector.broadcast %cst_217 : f32 to vector<64x128xf32>
    %670 = arith.mulf %669, %668 : vector<64x128xf32>
    %671 = vector.extract_strided_slice %670 {offsets = [0, 0], sizes = [64, 64], strides = [1, 1]} : vector<64x128xf32> to vector<64x64xf32>
    %672 = vector.extract_strided_slice %670 {offsets = [0, 64], sizes = [64, 64], strides = [1, 1]} : vector<64x128xf32> to vector<64x64xf32>
    %673 = vector.extract_strided_slice %631 {offsets = [0, 0], sizes = [64, 64], strides = [1, 1]} : vector<64x128xf32> to vector<64x64xf32>
    %674 = math.tanh %673 : vector<64x64xf32>
    %675 = vector.extract_strided_slice %631 {offsets = [0, 64], sizes = [64, 64], strides = [1, 1]} : vector<64x128xf32> to vector<64x64xf32>
    %cst_218 = arith.constant 5.000000e-01 : f32
    %676 = vector.broadcast %cst_218 : f32 to vector<64x64xf32>
    %677 = arith.mulf %676, %675 : vector<64x64xf32>
    %678 = math.tanh %677 : vector<64x64xf32>
    %cst_219 = arith.constant 1.000000e+00 : f32
    %679 = vector.broadcast %cst_219 : f32 to vector<64x64xf32>
    %680 = arith.addf %678, %679 : vector<64x64xf32>
    %cst_220 = arith.constant 5.000000e-01 : f32
    %681 = vector.broadcast %cst_220 : f32 to vector<64x64xf32>
    %682 = arith.mulf %681, %680 : vector<64x64xf32>
    %c0_221 = arith.constant 0 : index
    %c1_222 = arith.constant 1 : index
    %c0_223 = arith.constant 0 : index
    %c0_224 = arith.constant 0 : index
    %683 = vector.load %arg3[%c0_221, %c1_222, %c0_223, %c0_224] : memref<1x2x64x64xf32, #tpu.memory_space<vmem>>, vector<1x1x64x64xf32>
    %684 = vector.shape_cast %683 : vector<1x1x64x64xf32> to vector<64x64xf32>
    %685 = arith.mulf %672, %684 : vector<64x64xf32>
    %686 = arith.mulf %671, %674 : vector<64x64xf32>
    %687 = arith.addf %685, %686 : vector<64x64xf32>
    %688 = math.tanh %687 : vector<64x64xf32>
    %689 = arith.mulf %682, %688 : vector<64x64xf32>
    %c0_225 = arith.constant 0 : index
    %c1_226 = arith.constant 1 : index
    %c0_227 = arith.constant 0 : index
    %c0_228 = arith.constant 0 : index
    %690 = vector.load %arg6[%c0_225, %c1_226, %c0_227, %c0_228] : memref<1x2x64x64xf32, #tpu.memory_space<vmem>>, vector<1x1x64x64xf32>
    %691 = vector.shape_cast %690 : vector<1x1x64x64xf32> to vector<64x64xf32>
    %692 = vector.shape_cast %689 : vector<64x64xf32> to vector<1x1x64x64xf32>
    tpu.vector_store %arg6[%c0_225, %c1_226, %c0_227, %c0_228], %692 {strides = array<i32>} : memref<1x2x64x64xf32, #tpu.memory_space<vmem>>, vector<1x1x64x64xf32>,
    %c0_229 = arith.constant 0 : index
    %c1_230 = arith.constant 1 : index
    %c0_231 = arith.constant 0 : index
    %c0_232 = arith.constant 0 : index
    %693 = vector.load %arg7[%c0_229, %c1_230, %c0_231, %c0_232] : memref<1x2x64x64xf32, #tpu.memory_space<vmem>>, vector<1x1x64x64xf32>
    %694 = vector.shape_cast %693 : vector<1x1x64x64xf32> to vector<64x64xf32>
    %695 = vector.shape_cast %687 : vector<64x64xf32> to vector<1x1x64x64xf32>
    tpu.vector_store %arg7[%c0_229, %c1_230, %c0_231, %c0_232], %695 {strides = array<i32>} : memref<1x2x64x64xf32, #tpu.memory_space<vmem>>, vector<1x1x64x64xf32>,
    return
  }
  func.func @transform_0(%arg0: i32) -> (i32, i32, i32, i32) {
    %c0_i32 = arith.constant 0 : i32
    %c0_i32_0 = arith.constant 0 : i32
    %c0_i32_1 = arith.constant 0 : i32
    %c0_i32_2 = arith.constant 0 : i32
    return %arg0, %c0_i32, %c0_i32_0, %c0_i32_1 : i32, i32, i32, i32
  }
  func.func @transform_1(%arg0: i32) -> (i32, i32, i32, i32) {
    %c0_i32 = arith.constant 0 : i32
    %c0_i32_0 = arith.constant 0 : i32
    %c0_i32_1 = arith.constant 0 : i32
    %c0_i32_2 = arith.constant 0 : i32
    return %arg0, %c0_i32, %c0_i32_0, %c0_i32_1 : i32, i32, i32, i32
  }
  func.func @transform_2(%arg0: i32) -> (i32, i32, i32, i32) {
    %c0_i32 = arith.constant 0 : i32
    %c0_i32_0 = arith.constant 0 : i32
    %c0_i32_1 = arith.constant 0 : i32
    %c0_i32_2 = arith.constant 0 : i32
    return %arg0, %c0_i32, %c0_i32_0, %c0_i32_1 : i32, i32, i32, i32
  }
  func.func @transform_3(%arg0: i32) -> (i32, i32) {
    %c0_i32 = arith.constant 0 : i32
    %c0_i32_0 = arith.constant 0 : i32
    %c0_i32_1 = arith.constant 0 : i32
    return %c0_i32, %c0_i32_0 : i32, i32
  }
  func.func @transform_4(%arg0: i32) -> (i32, i32) {
    %c0_i32 = arith.constant 0 : i32
    %c0_i32_0 = arith.constant 0 : i32
    %c0_i32_1 = arith.constant 0 : i32
    return %c0_i32, %c0_i32_0 : i32, i32
  }
  func.func @transform_5(%arg0: i32) -> (i32, i32, i32, i32) {
    %c0_i32 = arith.constant 0 : i32
    %c0_i32_0 = arith.constant 0 : i32
    %c0_i32_1 = arith.constant 0 : i32
    %c0_i32_2 = arith.constant 0 : i32
    return %arg0, %c0_i32, %c0_i32_0, %c0_i32_1 : i32, i32, i32, i32
  }
  func.func @transform_6(%arg0: i32) -> (i32, i32, i32, i32) {
    %c0_i32 = arith.constant 0 : i32
    %c0_i32_0 = arith.constant 0 : i32
    %c0_i32_1 = arith.constant 0 : i32
    %c0_i32_2 = arith.constant 0 : i32
    return %arg0, %c0_i32, %c0_i32_0, %c0_i32_1 : i32, i32, i32, i32
  }
}

</mosaic_0001>

<bundles_post_ra>
// kernel: convlstm_cell.1
= control target key start
LH: loop header
LB: loop body
LE: loop exit
PB: predicated region body
PF: predicated region fallthrough
CT: control target
= control target key end

     0   :  { %12 = vsyncpa [#allocation3], 0  ;;  %s11723_s0 = inlined_call_operand.vmem [shape: f32[2,2,64,64], index: 0, kind: input, shape index: {}]   ;;  %s11724_s1 = inlined_call_operand.vmem [shape: f32[2,2,64,64], index: 1, kind: input, shape index: {}]   ;;  %s11725_s2 = inlined_call_operand.vmem [shape: f32[2,2,64,64], index: 2, kind: input, shape index: {}]   ;;  %s11726_s3 = inlined_call_operand.vmem [shape: f32[144,128], index: 3, kind: input, shape index: {}]   ;;  %s11727_s4 = inlined_call_operand.vmem [shape: f32[4,128], index: 4, kind: input, shape index: {}]   ;;  %s11728_s5 = inlined_call_operand.hbm [shape: f32[2,2,64,64], index: 5, kind: output, shape index: {0}]   ;;  %s11729_s6 = inlined_call_operand.hbm [shape: f32[2,2,64,64], index: 6, kind: output, shape index: {1}]  }
   0x1   :  { %14 = vsyncpa [#allocation3 + $0x1], 0 }
   0x2   :  { %15 = vsyncpa [#allocation5], 0 }
   0x3   :  { %17 = vsyncpa [#allocation5 + $0x1], 0  ;;  %s4829_s21 = smov 0   ;;  %s4831_s22 = smov 0  }
   0x4   :  { %s4833_s23 = smov 0   ;;  %s4835_s24 = smov 0  }
   0x5 LB: > { %s4850_s25 = sadd.s32 4294967295, %s4787_s24   ;;  %s4300_s26 = sadd.s32 4294967294, %s4787_s24   ;;  %s4787_s24 = sphi %s4835_s24, %s13136_s24   ;;  %s4783_s23 = sphi %s4833_s23, %s13135_s23   ;;  %s4779_s22 = sphi %s4831_s22, %s13134_s22   ;;  %s4775_s21 = sphi %s4829_s21, %s13133_s21  }
   0x6   : > { %s4854_s27 = sadd.s32 1, %s4787_s24   ;;  %s150_s28 = sadd.s32 1, %s4783_s23 }
   0x7   : > { %s147_s29 = ssub.s32 %s4787_s24, %s4854_s27  ;;  %p160_p0 = scmp.ne.s32.totalorder %s4783_s23, %s4779_s22 }
   0x8   : > { %p148_p1 = scmp.eq.s32.totalorder %s147_s29, 0  ;;  %p161_p2 = scmp.eq.s32.totalorder %s4850_s25, 1 }
   0x9   : > { %p166_p3 = scmp.ne.s32.totalorder %s4779_s22, %s4775_s21  ;;  %p167_p4 = scmp.eq.s32.totalorder %s4300_s26, 1 }
   0xa   : > { %s4865_s30 = scalar_select %p148_p1, %s4783_s23, %s150_s28  }
   0xb   : > { %p4867_p5 = por %p161_p2, %p160_p0  ;;  %p4871_p6 = por %p167_p4, %p166_p3 }
   0xc   : > { %p4303_p7 = scmp.ge.s32.totalorder %s4787_s24, 1  ;;  %p241_p8 = scmp.lt.s32.totalorder %s4787_s24, 3 }
   0xe   : > { %p242_p9 = pnand %p4303_p7, %p241_p8 }
  0x10   : > { %245 = sbr.rel (%p242_p9) target bundleno = 1708 (0x6ac), region = 40 }
  0x15   : > { %p286_p10 = scmp.lt.s32.totalorder %s4850_s25, 1  ;;  %s4789_s14 = smov 64   ;;  %v366_v9 = vlaneseq  ;;  %vm349_vm0 = vcmask 523264   ;;  %v4996_v45 = vld [vmem:[%s11726_s3 + $0x49] ss:$0 sm:$0xff] }
  0x16   : > { %s4790_s15 = smov 1   ;;  %s4791_s16 = smov 63   ;;  %v5001_v46 = vld [vmem:[%s11726_s3 + $0x6d] ss:$0 sm:$0xff]  ;;  %v5020_v49 = vld [vmem:[%s11726_s3 + $0x4c] ss:$0 sm:$0xff] }
  0x17   : > { %s287_s9 = scalar_select %p286_p10, %s4850_s25, 1  ;;  %v4906_v14 = vshrl.u32 %v366_v9, 7  ;;  %12045 = vst [vmem:[#allocation19_spill] sm:$0xff] %v5020_v49  ;;  %v5025_v50 = vld [vmem:[%s11726_s3 + $0x70] ss:$0 sm:$0xff] }
  0x18   : > { %12046 = vst [vmem:[#allocation20_spill] sm:$0xff] %v5025_v50 }
  0x19   : > { %s4879_s10 = sshll.u32 %s287_s9, 7  ;;  %12034 = vst [vmem:[#allocation8_spill] sm:$0xff] %v4906_v14  ;;  %vm881_vm1 = vcmp.lt.s32.totalorder %v4906_v14, 7  ;;  %vm368_vm2 = vcmp.lt.s32.totalorder %v4906_v14, 1  ;;  %s11527_s9 = sand.u32 1, %s4779_s22  }
  0x1a   : > { %s4885_s13 = scalar_lea.vmem %s11723_s0, %s4879_s10  ;;  %s6991_s17 = scalar_lea.vmem %s11724_s1, %s4879_s10 }
  0x1b   : > { %v311_v0 = vld [vmem:[%s4885_s13 + $0x10] sm:$0xff]  ;;  %v309_v1 = vld [vmem:[%s4885_s13] sm:$0xff]  ;;  %v312_v3 = vld [vmem:[%s4885_s13 + $0x18] sm:$0xff]  ;;  %s10324_s20 = scalar_lea.vmem %s11725_s2, %s4879_s10  ;;  %s4144_s19 = scalar_lea.sflag [#allocation3], %s11527_s9 }
  0x1c   : > { %329 = vrot.lane.b32.xlu1 %v311_v0, %s4789_s14  ;;  %325 = vrot.lane.b32.xlu0 %v309_v1, %s4789_s14  ;;  %v313_v2 = vld [vmem:[%s4885_s13 + $0x20] sm:$0xff]  ;;  %v310_v4 = vld [vmem:[%s4885_s13 + $0x8] sm:$0xff] }
  0x1d   : > { %333 = vrot.lane.b32.xlu2 %v313_v2, %s4789_s14  ;;  %v314_v5 = vld [vmem:[%s4885_s13 + $0x28] sm:$0xff]  ;;  %v316_v6 = vld [vmem:[%s4885_s13 + $0x38] sm:$0xff]  ;;  %v315_v7 = vld [vmem:[%s4885_s13 + $0x30] sm:$0xff] }
  0x24   : > { %331 = vrot.lane.b32.xlu1 %v312_v3, %s4789_s14  ;;  %327 = vrot.lane.b32.xlu0 %v310_v4, %s4789_s14 }
  0x25   : > { %335 = vrot.lane.b32.xlu2 %v314_v5, %s4789_s14 }
  0x2c   : > { %339 = vrot.lane.b32.xlu1 %v316_v6, %s4789_s14  ;;  %337 = vrot.lane.b32.xlu0 %v315_v7, %s4789_s14 }
  0x77   : > { %v334_v8 = vpop.permute.xlu2 %333 }
  0x78   : > { %v4904_v11 = vsel %vm349_vm0, %v313_v2, %v334_v8 }
  0x79   : > { %v877_v18 = vrot.slane %v4904_v11, 1  ;;  %v362_v62 = vrot.slane %v4904_v11, 7 }
  0x7f   : > { %v336_v10 = vpop.permute.xlu2 %335 }
  0x80   : > { %v4919_v17 = vsel %vm349_vm0, %v314_v5, %v336_v10  ;;  %v5158_v10 = vld [vmem:[%s4885_s13 + $0x48] sm:$0xff] }
  0x81   : > { %12035 = vst [vmem:[#allocation9_spill] sm:$0xff] %v4919_v17  ;;  %v878_v19 = vrot.slane %v4919_v17, 1  ;;  %v363_v37 = vrot.slane %v4919_v17, 7 }
  0x82   : > { %12054 = vst [vmem:[#allocation28_spill] sm:$0xff] %v5158_v10 }
  0x83   : > { %v4926_v20 = vsel %vm881_vm1, %v877_v18, %v878_v19 }
  0x84   : > { %12036 = vst [vmem:[#allocation10_spill] sm:$0xff] %v4926_v20 }
  0x8e   : > { %v330_v12 = vpop.permute.xlu1 %329  ;;  %v326_v13 = vpop.permute.xlu0 %325 }
  0x8f   : > { %v4909_v15 = vsel %vm349_vm0, %v311_v0, %v330_v12  ;;  %v4912_v16 = vsel %vm349_vm0, %v309_v1, %v326_v13  ;;  %v5081_v0 = vsel %vm368_vm2, %v362_v62, %v363_v37  ;;  %v5161_v12 = vld [vmem:[%s4885_s13 + $0x40] sm:$0xff] }
  0x90   : > { %629 = vrot.lane.b32.xlu2 %v4909_v15, %s4790_s15  ;;  %625 = vrot.lane.b32.xlu0 %v4912_v16, %s4790_s15  ;;  %v873_v27 = vrot.slane %v4912_v16, 1  ;;  %v875_v28 = vrot.slane %v4909_v15, 1  ;;  %v358_v54 = vrot.slane %v4912_v16, 7  ;;  %v360_v58 = vrot.slane %v4909_v15, 7  ;;  %12055 = vst [vmem:[#allocation29_spill] sm:$0xff] %v5161_v12 }
  0x96   : > { %v332_v21 = vpop.permute.xlu1 %331  ;;  %v328_v22 = vpop.permute.xlu0 %327 }
  0x97   : > { %v4929_v23 = vsel %vm349_vm0, %v312_v3, %v332_v21  ;;  %v4932_v24 = vsel %vm349_vm0, %v310_v4, %v328_v22  ;;  %v5176_v21 = vld [vmem:[%s4885_s13 + $0x60] sm:$0xff]  ;;  %v5179_v22 = vld [vmem:[%s4885_s13 + $0x58] sm:$0xff] }
  0x98   : > { %635 = vrot.lane.b32.xlu2 %v4919_v17, %s4790_s15  ;;  %631 = vrot.lane.b32.xlu0 %v4929_v23, %s4790_s15  ;;  %v874_v25 = vrot.slane %v4932_v24, 1  ;;  %v876_v26 = vrot.slane %v4929_v23, 1  ;;  %v359_v56 = vrot.slane %v4932_v24, 7  ;;  %v361_v57 = vrot.slane %v4929_v23, 7  ;;  %12057 = vst [vmem:[#allocation31_spill] sm:$0xff] %v5176_v21 }
  0x99   : > { %627 = vrot.lane.b32.xlu1 %v4932_v24, %s4790_s15  ;;  %12058 = vst [vmem:[#allocation32_spill] sm:$0xff] %v5179_v22 }
  0x9a   : > { %v4946_v29 = vsel %vm881_vm1, %v873_v27, %v874_v25  ;;  %v4950_v30 = vsel %vm881_vm1, %v874_v25, %v875_v28  ;;  %v4954_v31 = vsel %vm881_vm1, %v875_v28, %v876_v26  ;;  %v4958_v32 = vsel %vm881_vm1, %v876_v26, %v877_v18  ;;  %v5182_v25 = vld [vmem:[%s4885_s13 + $0x50] sm:$0xff] }
  0x9b   : > { %12037 = vst [vmem:[#allocation11_spill] sm:$0xff] %v4946_v29  ;;  %v5058_v59 = vsel %vm368_vm2, %v360_v58, %v361_v57  ;;  %v5062_v60 = vsel %vm368_vm2, %v358_v54, %v359_v56  ;;  %v5066_v61 = vsel %vm368_vm2, %v359_v56, %v360_v58  ;;  %v5077_v63 = vsel %vm368_vm2, %v361_v57, %v362_v62  ;;  %v5233_v56 = vld [vmem:[%s11727_s4 + $0x3] ss:$0 sm:$0xff] }
  0x9c   : > { %12038 = vst [vmem:[#allocation12_spill] sm:$0xff] %v4950_v30 }
  0x9d   : > { %12039 = vst [vmem:[#allocation13_spill] sm:$0xff] %v4954_v31 }
  0x9e   : > { %12040 = vst [vmem:[#allocation14_spill] sm:$0xff] %v4958_v32  ;;  %v340_v33 = vpop.permute.xlu1 %339  ;;  %v338_v34 = vpop.permute.xlu0 %337 }
  0x9f   : > { %v4961_v35 = vsel %vm349_vm0, %v316_v6, %v340_v33  ;;  %v4964_v36 = vsel %vm349_vm0, %v315_v7, %v338_v34  ;;  %12059 = vst [vmem:[#allocation33_spill] sm:$0xff] %v5182_v25  ;;  %v5197_v33 = vld [vmem:[%s4885_s13 + $0x78] sm:$0xff]  ;;  %v5200_v34 = vld [vmem:[%s4885_s13 + $0x70] sm:$0xff] }
  0xa0   : > { %12041 = vst [vmem:[#allocation15_spill] sm:$0xff] %v4964_v36  ;;  %785 = vrot.lane.b32.xlu2 %v4912_v16, %s4791_s16  ;;  %637 = vrot.lane.b32.xlu0 %v4964_v36, %s4790_s15  ;;  %v364_v38 = vrot.slane %v4964_v36, 7  ;;  %v879_v39 = vrot.slane %v4964_v36, 1  ;;  %v880_v40 = vrot.slane %v4961_v35, 1  ;;  %v5029_v51 = vmul.f32 %v5020_v49, %v4964_v36 }
  0xa1   : > { %633 = vrot.lane.b32.xlu1 %v4904_v11, %s4790_s15  ;;  %v5033_v52 = vmul.f32 %v5025_v50, %v4964_v36  ;;  %v365_v53 = vrot.slane %v4961_v35, 7  ;;  %12061 = vst [vmem:[#allocation35_spill] sm:$0xff] %v5197_v33 }
  0xa2   : > { %v4979_v41 = vsel %vm881_vm1, %v878_v19, %v879_v39  ;;  %v4983_v42 = vsel %vm368_vm2, %v363_v37, %v364_v38  ;;  %v4987_v43 = vsel %vm881_vm1, %v879_v39, %v880_v40  ;;  %v4991_v44 = vsel %vm881_vm1, %v880_v40, %v873_v27  ;;  %12047 = vst [vmem:[#allocation21_spill] sm:$0xff] %v5029_v51  ;;  %v5203_v37 = vld [vmem:[%s4885_s13 + $0x68] sm:$0xff] }
  0xa3   : > { %12042 = vst [vmem:[#allocation16_spill] sm:$0xff] %v4979_v41  ;;  %v5005_v47 = vmul.f32 %v4996_v45, %v4983_v42  ;;  %v5009_v48 = vmul.f32 %v5001_v46, %v4983_v42  ;;  %v5045_v55 = vsel %vm368_vm2, %v365_v53, %v358_v54  ;;  %v5091_v1 = vsel %vm368_vm2, %v364_v38, %v365_v53  ;;  %v5212_v38 = vld [vmem:[%s11726_s3 + $0x48] ss:$0 sm:$0xff]  ;;  %v5217_v39 = vld [vmem:[%s11726_s3 + $0x6c] ss:$0 sm:$0xff] }
  0xa4   : > { %12043 = vst [vmem:[#allocation17_spill] sm:$0xff] %v4987_v43  ;;  %v5228_v54 = vld [vmem:[%s11727_s4 + $0x2] ss:$0 sm:$0xff]  ;;  %v5374_v51 = vmul.f32 %v5020_v49, %v4904_v11 }
  0xa5   : > { %12044 = vst [vmem:[#allocation18_spill] sm:$0xff] %v4991_v44 }
  0xa6   : > { %12048 = vst [vmem:[#allocation22_spill] sm:$0xff] %v5033_v52 }
  0xa7   : > { %12062 = vst [vmem:[#allocation36_spill] sm:$0xff] %v5200_v34 }
  0xa8   : > { %791 = vrot.lane.b32.xlu2 %v4929_v23, %s4791_s16  ;;  %787 = vrot.lane.b32.xlu0 %v4932_v24, %s4791_s16  ;;  %12063 = vst [vmem:[#allocation37_spill] sm:$0xff] %v5203_v37 }
  0xa9   : > { %639 = vrot.lane.b32.xlu1 %v4961_v35, %s4790_s15  ;;  %12064 = vst [vmem:[#allocation38_spill] sm:$0xff] %v5212_v38 }
  0xaa   : > { %12086 = vst [vmem:[#allocation60_spill] sm:$0xff] %v5374_v51  ;;  %v5539_v51 = vmul.f32 %v5001_v46, %v5081_v0 }
  0xac   : > { %12110 = vst [vmem:[#allocation84_spill] sm:$0xff] %v5539_v51 }
  0xb0   : > { %797 = vrot.lane.b32.xlu2 %v4964_v36, %s4791_s16  ;;  %793 = vrot.lane.b32.xlu0 %v4904_v11, %s4791_s16 }
  0xb1   : > { %789 = vrot.lane.b32.xlu1 %v4909_v15, %s4791_s16 }
  0xb8   : > { %377 = vrot.lane.b32.xlu2 %v5045_v55, %s4790_s15  ;;  %799 = vrot.lane.b32.xlu0 %v4961_v35, %s4791_s16 }
  0xb9   : > { %795 = vrot.lane.b32.xlu1 %v4919_v17, %s4791_s16 }
  0xc0   : > { %383 = vrot.lane.b32.xlu2 %v5058_v59, %s4790_s15  ;;  %379 = vrot.lane.b32.xlu0 %v5062_v60, %s4790_s15 }
  0xc1   : > { %381 = vrot.lane.b32.xlu1 %v5066_v61, %s4790_s15 }
  0xc8   : > { %385 = vrot.lane.b32.xlu0 %v5077_v63, %s4790_s15  ;;  %389 = vrot.lane.b32.xlu2 %v4983_v42, %s4790_s15 }
  0xc9   : > { %387 = vrot.lane.b32.xlu1 %v5081_v0, %s4790_s15 }
  0xd0   : > { %539 = vrot.lane.b32.xlu2 %v5062_v60, %s4791_s16  ;;  %391 = vrot.lane.b32.xlu0 %v5091_v1, %s4790_s15 }
  0xd1   : > { %537 = vrot.lane.b32.xlu1 %v5045_v55, %s4791_s16 }
  0xd8   : > { %545 = vrot.lane.b32.xlu2 %v5077_v63, %s4791_s16  ;;  %541 = vrot.lane.b32.xlu0 %v5066_v61, %s4791_s16 }
  0xd9   : > { %543 = vrot.lane.b32.xlu1 %v5058_v59, %s4791_s16 }
  0xe0   : > { %551 = vrot.lane.b32.xlu2 %v5091_v1, %s4791_s16  ;;  %547 = vrot.lane.b32.xlu0 %v5081_v0, %s4791_s16 }
  0xe1   : > { %549 = vrot.lane.b32.xlu1 %v4983_v42, %s4791_s16 }
  0xe8   : > { %892 = vrot.lane.b32.xlu2 %v4950_v30, %s4790_s15  ;;  %894 = vrot.lane.b32.xlu0 %v4954_v31, %s4790_s15 }
  0xe9   : > { %890 = vrot.lane.b32.xlu1 %v4946_v29, %s4790_s15 }
  0xea   : > { %v5117_v2 = vpop.permute.xlu2 %629 }
  0xf0   : > { %898 = vrot.lane.b32.xlu2 %v4926_v20, %s4790_s15  ;;  %900 = vrot.lane.b32.xlu0 %v4979_v41, %s4790_s15 }
  0xf1   : > { %896 = vrot.lane.b32.xlu1 %v4958_v32, %s4790_s15 }
  0xf2   : > { %v5125_v3 = vpop.permute.xlu2 %635 }
  0xf3   : > { %12049 = vst [vmem:[#allocation23_spill] sm:$0xff] %v5125_v3 }
  0xf8   : > { %904 = vrot.lane.b32.xlu2 %v4991_v44, %s4790_s15  ;;  %1050 = vrot.lane.b32.xlu0 %v4946_v29, %s4791_s16 }
  0xf9   : > { %902 = vrot.lane.b32.xlu1 %v4987_v43, %s4790_s15 }
  0xfa   : > { %v5133_v4 = vpop.permute.xlu2 %785 }
  0xfb   : > { %12050 = vst [vmem:[#allocation24_spill] sm:$0xff] %v5133_v4 }
 0x100   : > { %1054 = vrot.lane.b32.xlu2 %v4954_v31, %s4791_s16  ;;  %1056 = vrot.lane.b32.xlu0 %v4958_v32, %s4791_s16  ;;  %v5259_v32 = vld [vmem:[%s11726_s3 + $0x25] ss:$0 sm:$0xff]  ;;  %v5281_v31 = vmul.f32 %v5025_v50, %v4912_v16 }
 0x101   : > { %1052 = vrot.lane.b32.xlu1 %v4950_v30, %s4791_s16  ;;  %v5316_v14 = vmul.f32 %v5259_v32, %v5062_v60  ;;  %v5392_v3 = vmul.f32 %v5259_v32, %v5045_v55 }
 0x102   : > { %v5141_v5 = vpop.permute.xlu2 %791  ;;  %v5143_v6 = vpop.permute.xlu0 %625  ;;  %12075 = vst [vmem:[#allocation49_spill] sm:$0xff] %v5281_v31  ;;  %v5415_v31 = vmul.f32 %v5001_v46, %v5091_v1 }
 0x103   : > { %12051 = vst [vmem:[#allocation25_spill] sm:$0xff] %v5141_v5  ;;  %v5249_v5 = vld [vmem:[%s11726_s3 + $0x28] ss:$0 sm:$0xff] }
 0x104   : > { %12069 = vst [vmem:[#allocation43_spill] sm:$0xff] %v5249_v5 }
 0x105   : > { %12091 = vst [vmem:[#allocation65_spill] sm:$0xff] %v5415_v31 }
 0x108   : > { %1060 = vrot.lane.b32.xlu2 %v4979_v41, %s4791_s16  ;;  %1062 = vrot.lane.b32.xlu0 %v4987_v43, %s4791_s16  ;;  %v5277_v41 = vmul.f32 %v5020_v49, %v4912_v16 }
 0x109   : > { %1058 = vrot.lane.b32.xlu1 %v4926_v20, %s4791_s16  ;;  %v5358_v20 = vmul.f32 %v4996_v45, %v5058_v59 }
 0x10a   : > { %v5151_v7 = vpop.permute.xlu2 %797  ;;  %v5153_v8 = vpop.permute.xlu0 %631  ;;  %12074 = vst [vmem:[#allocation48_spill] sm:$0xff] %v5277_v41 }
 0x10b   : > { %12052 = vst [vmem:[#allocation26_spill] sm:$0xff] %v5151_v7  ;;  %v5155_v9 = vpop.permute.xlu1 %627  ;;  %v5378_v7 = vmul.f32 %v5025_v50, %v4904_v11 }
 0x10c   : > { %12053 = vst [vmem:[#allocation27_spill] sm:$0xff] %v5153_v8 }
 0x10d   : > { %12082 = vst [vmem:[#allocation56_spill] sm:$0xff] %v5358_v20  ;;  %v5527_v20 = vld [vmem:[%s11726_s3 + $0x6e] ss:$0 sm:$0xff] }
 0x10e   : > { %12087 = vst [vmem:[#allocation61_spill] sm:$0xff] %v5378_v7  ;;  %v5531_v7 = vmul.f32 %v5259_v32, %v5081_v0 }
 0x110   : > { %1157 = vrot.lane.b32.xlu0 %v5158_v10, %s4789_s14  ;;  %1155 = vrot.lane.b32.xlu2 %v5161_v12, %s4789_s14  ;;  %v5339_v10 = vmul.f32 %v5259_v32, %v5077_v63  ;;  %v5343_v12 = vmul.f32 %v4996_v45, %v5077_v63  ;;  %12108 = vst [vmem:[#allocation82_spill] sm:$0xff] %v5531_v7 }
 0x111   : > { %1064 = vrot.lane.b32.xlu1 %v4991_v44, %s4791_s16  ;;  %v4434_v44 = vld [vmem:[%s11726_s3 + $0x1] ss:$0 sm:$0xff] }
 0x112   : > { %v5169_v13 = vpop.permute.xlu2 %377  ;;  %v5171_v18 = vpop.permute.xlu0 %637  ;;  %v5350_v43 = vmul.f32 %v4434_v44, %v5058_v59  ;;  %v5381_v36 = vmul.f32 %v4434_v44, %v5066_v61  ;;  %v5388_v17 = vmul.f32 %v4434_v44, %v5045_v55 }
 0x113   : > { %12056 = vst [vmem:[#allocation30_spill] sm:$0xff] %v5171_v18  ;;  %v5173_v19 = vpop.permute.xlu1 %633 }
 0x114   : > { %12088 = vst [vmem:[#allocation62_spill] sm:$0xff] %v5381_v36  ;;  %v5493_v36 = vmul.f32 %v5020_v49, %v4929_v23 }
 0x116   : > { %12107 = vst [vmem:[#allocation81_spill] sm:$0xff] %v5493_v36 }
 0x118   : > { %1163 = vrot.lane.b32.xlu0 %v5176_v21, %s4789_s14  ;;  %1161 = vrot.lane.b32.xlu2 %v5179_v22, %s4789_s14  ;;  %v5320_v21 = vmul.f32 %v5020_v49, %v4932_v24  ;;  %v5324_v22 = vmul.f32 %v5025_v50, %v4932_v24 }
 0x119   : > { %1159 = vrot.lane.b32.xlu1 %v5182_v25, %s4789_s14  ;;  %v5335_v25 = vmul.f32 %v4434_v44, %v5077_v63 }
 0x11a   : > { %v5190_v26 = vpop.permute.xlu2 %383  ;;  %v5192_v27 = vpop.permute.xlu0 %787 }
 0x11b   : > { %12060 = vst [vmem:[#allocation34_spill] sm:$0xff] %v5192_v27  ;;  %v5194_v28 = vpop.permute.xlu1 %639  ;;  %v5244_v27 = vld [vmem:[%s11726_s3 + $0x4] ss:$0 sm:$0xff] }
 0x11c   : > { %12068 = vst [vmem:[#allocation42_spill] sm:$0xff] %v5244_v27  ;;  %v5366_v52 = vmul.f32 %v5244_v27, %v4904_v11 }
 0x11e   : > { %12084 = vst [vmem:[#allocation58_spill] sm:$0xff] %v5366_v52 }
 0x120   : > { %1169 = vrot.lane.b32.xlu0 %v5197_v33, %s4789_s14  ;;  %1167 = vrot.lane.b32.xlu2 %v5200_v34, %s4789_s14  ;;  %v5299_v34 = vmul.f32 %v5249_v5, %v4932_v24 }
 0x121   : > { %1165 = vrot.lane.b32.xlu1 %v5203_v37, %s4789_s14  ;;  %v5307_v37 = vmul.f32 %v5025_v50, %v4909_v15 }
 0x122   : > { %v5221_v40 = vpop.permute.xlu2 %389  ;;  %v5223_v53 = vpop.permute.xlu0 %793 }
 0x123   : > { %12065 = vst [vmem:[#allocation39_spill] sm:$0xff] %v5221_v40  ;;  %v5235_v57 = vpop.permute.xlu1 %789  ;;  %v437_v58 = vmul.f32 %v5212_v38, %v5221_v40  ;;  %v455_v62 = vmul.f32 %v5217_v39, %v5221_v40  ;;  %v5498_v40 = vld [vmem:[%s11727_s4] ss:$0 sm:$0xff] }
 0x124   : > { %12066 = vst [vmem:[#allocation40_spill] sm:$0xff] %v5223_v53  ;;  %v5362_v53 = vmul.f32 %v5001_v46, %v5058_v59 }
 0x125   : > { %12067 = vst [vmem:[#allocation41_spill] sm:$0xff] %v5235_v57  ;;  %v445_v4 = vadd.f32 %v5228_v54, %v437_v58  ;;  %v463_v57 = vadd.f32 %v5233_v56, %v455_v62  ;;  %v5269_v58 = vmul.f32 %v5244_v27, %v4912_v16  ;;  %v5273_v62 = vmul.f32 %v5249_v5, %v4912_v16 }
 0x126   : > { %v5303_v16 = vmul.f32 %v5020_v49, %v4909_v15  ;;  %12080 = vst [vmem:[#allocation54_spill] sm:$0xff] %v5307_v37  ;;  %v5396_v37 = vmul.f32 %v4996_v45, %v5045_v55 }
 0x127   : > { %v5262_v30 = vadd.f32 %v5005_v47, %v445_v4  ;;  %v5265_v29 = vadd.f32 %v5009_v48, %v463_v57  ;;  %12072 = vst [vmem:[#allocation46_spill] sm:$0xff] %v5269_v58  ;;  %v5285_v47 = vmul.f32 %v5244_v27, %v4909_v15  ;;  %v5289_v48 = vmul.f32 %v5249_v5, %v4909_v15 }
 0x128   : > { %12073 = vst [vmem:[#allocation47_spill] sm:$0xff] %v5273_v62  ;;  %v5295_v57 = vmul.f32 %v5244_v27, %v4932_v24  ;;  %v5328_v15 = vmul.f32 %v4996_v45, %v5062_v60  ;;  %v5347_v24 = vmul.f32 %v5001_v46, %v5077_v63  ;;  %v5370_v63 = vmul.f32 %v5249_v5, %v4904_v11 }
 0x129   : > { %12070 = vst [vmem:[#allocation44_spill] sm:$0xff] %v5262_v30  ;;  %v5400_v11 = vmul.f32 %v5001_v46, %v5045_v55  ;;  %v5419_v55 = vmul.f32 %v4996_v45, %v5066_v61  ;;  %v5423_v62 = vmul.f32 %v5001_v46, %v5066_v61  ;;  %v5426_v58 = vmul.f32 %v4434_v44, %v4983_v42  ;;  %v5440_v30 = vld [vmem:[%s11726_s3] ss:$0 sm:$0xff] }
 0x12a   : > { %12071 = vst [vmem:[#allocation45_spill] sm:$0xff] %v5265_v29  ;;  %v5291_v4 = vpop.permute.xlu0 %799  ;;  %v5430_v29 = vmul.f32 %v5259_v32, %v4983_v42  ;;  %v5451_v42 = vmul.f32 %v5244_v27, %v4961_v35 }
 0x12b   : > { %12076 = vst [vmem:[#allocation50_spill] sm:$0xff] %v5285_v47  ;;  %v5309_v33 = vpop.permute.xlu1 %795  ;;  %v5411_v47 = vmul.f32 %v4996_v45, %v5091_v1 }
 0x12c   : > { %12077 = vst [vmem:[#allocation51_spill] sm:$0xff] %v5289_v48  ;;  %v5407_v48 = vmul.f32 %v5259_v32, %v5091_v1 }
 0x12d   : > { %12078 = vst [vmem:[#allocation52_spill] sm:$0xff] %v5291_v4  ;;  %v5312_v4 = vmul.f32 %v4434_v44, %v5062_v60 }
 0x12e   : > { %12079 = vst [vmem:[#allocation53_spill] sm:$0xff] %v5303_v16  ;;  %v5403_v16 = vmul.f32 %v4434_v44, %v5091_v1  ;;  %v5435_v1 = vld [vmem:[%s11726_s3 + $0x3] ss:$0 sm:$0xff] }
 0x12f   : > { %12081 = vst [vmem:[#allocation55_spill] sm:$0xff] %v5309_v33  ;;  %v5332_v33 = vmul.f32 %v5001_v46, %v5062_v60  ;;  %v5354_v60 = vmul.f32 %v5259_v32, %v5058_v59  ;;  %v5385_v59 = vmul.f32 %v5259_v32, %v5066_v61  ;;  %v5445_v61 = vld [vmem:[%s11726_s3 + $0x24] ss:$0 sm:$0xff] }
 0x130   : > { %12083 = vst [vmem:[#allocation57_spill] sm:$0xff] %v5362_v53  ;;  %v5522_v53 = vld [vmem:[%s11726_s3 + $0x4a] ss:$0 sm:$0xff] }
 0x131   : > { %12085 = vst [vmem:[#allocation59_spill] sm:$0xff] %v5370_v63  ;;  %v5543_v63 = vmul.f32 %v5025_v50, %v4929_v23 }
 0x132   : > { %12089 = vst [vmem:[#allocation63_spill] sm:$0xff] %v5385_v59  ;;  %v380_v41 = vpop.permute.xlu0 %379  ;;  %v5468_v59 = vld [vmem:[%s11726_s3 + $0x27] ss:$0 sm:$0xff] }
 0x133   : > { %12090 = vst [vmem:[#allocation64_spill] sm:$0xff] %v5411_v47  ;;  %v432_v36 = vmul.f32 %v5212_v38, %v380_v41  ;;  %v5555_v46 = vmul.f32 %v5468_v59, %v5117_v2 }
 0x134   : > { %12092 = vst [vmem:[#allocation66_spill] sm:$0xff] %v5419_v55  ;;  %v5463_v55 = vmul.f32 %v5025_v50, %v4961_v35 }
 0x135   : > { %12093 = vst [vmem:[#allocation67_spill] sm:$0xff] %v5423_v62  ;;  %v5459_v62 = vmul.f32 %v5020_v49, %v4961_v35  ;;  %v414_v49 = vmul.f32 %v5445_v61, %v380_v41  ;;  %v440_v47 = vadd.f32 %v5228_v54, %v432_v36 }
 0x136   : > { %12094 = vst [vmem:[#allocation68_spill] sm:$0xff] %v5426_v58  ;;  %v5447_v58 = vpop.permute.xlu1 %381 }
 0x137   : > { %12095 = vst [vmem:[#allocation69_spill] sm:$0xff] %v5430_v29  ;;  %v5455_v29 = vmul.f32 %v5249_v5, %v4961_v35  ;;  %v5485_v35 = vmul.f32 %v5244_v27, %v4929_v23  ;;  %v5508_v27 = vld [vmem:[%s11726_s3 + $0x2] ss:$0 sm:$0xff] }
 0x138   : > { %12096 = vst [vmem:[#allocation70_spill] sm:$0xff] %v5435_v1 }
 0x139   : > { %12097 = vst [vmem:[#allocation71_spill] sm:$0xff] %v5451_v42  ;;  %v5473_v42 = vld [vmem:[%s11726_s3 + $0x4b] ss:$0 sm:$0xff] }
 0x13a   : > { %12098 = vst [vmem:[#allocation72_spill] sm:$0xff] %v5455_v29  ;;  %v5478_v29 = vld [vmem:[%s11726_s3 + $0x6f] ss:$0 sm:$0xff]  ;;  %v386_v7 = vpop.permute.xlu0 %385 }
 0x13b   : > { %12099 = vst [vmem:[#allocation73_spill] sm:$0xff] %v5459_v62  ;;  %v5481_v62 = vmul.f32 %v4434_v44, %v5081_v0  ;;  %v5503_v44 = vld [vmem:[%s11727_s4 + $0x1] ss:$0 sm:$0xff] }
 0x13c   : > { %12100 = vst [vmem:[#allocation74_spill] sm:$0xff] %v5463_v55  ;;  %v5489_v55 = vmul.f32 %v5249_v5, %v4929_v23  ;;  %v540_v5 = vpop.permute.xlu2 %539  ;;  %v422_v31 = vadd.f32 %v5503_v44, %v414_v49  ;;  %v5559_v23 = vmul.f32 %v5473_v42, %v5117_v2 }
 0x13d   : > { %12101 = vst [vmem:[#allocation75_spill] sm:$0xff] %v5468_v59  ;;  %v556_v50 = vmul.f32 %v5508_v27, %v540_v5  ;;  %v592_v51 = vmul.f32 %v5522_v53, %v540_v5 }
 0x13e   : > { %12102 = vst [vmem:[#allocation76_spill] sm:$0xff] %v5473_v42  ;;  %v494_v49 = vadd.f32 %v5316_v14, %v422_v31  ;;  %v5579_v14 = vmul.f32 %v5468_v59, %v5143_v6  ;;  %v395_v31 = vmul.f32 %v5440_v30, %v5169_v13 }
 0x13f   : > { %12103 = vst [vmem:[#allocation77_spill] sm:$0xff] %v5478_v29 }
 0x140   : > { %12104 = vst [vmem:[#allocation78_spill] sm:$0xff] %v5481_v62  ;;  %v5517_v62 = vld [vmem:[%s11726_s3 + $0x26] ss:$0 sm:$0xff] }
 0x141   : > { %12105 = vst [vmem:[#allocation79_spill] sm:$0xff] %v5485_v35  ;;  %v450_v35 = vmul.f32 %v5217_v39, %v380_v41 }
 0x142   : > { %12106 = vst [vmem:[#allocation80_spill] sm:$0xff] %v5489_v55  ;;  %v396_v55 = vmul.f32 %v5440_v30, %v380_v41  ;;  %v5535_v41 = vmul.f32 %v4996_v45, %v5081_v0  ;;  %v5551_v45 = vmul.f32 %v5435_v1, %v5117_v2  ;;  %v5563_v0 = vmul.f32 %v5478_v29, %v5117_v2 }
 0x143   : > { %12111 = vst [vmem:[#allocation85_spill] sm:$0xff] %v5543_v63  ;;  %v458_v32 = vadd.f32 %v5233_v56, %v450_v35  ;;  %v574_v63 = vmul.f32 %v5517_v62, %v540_v5  ;;  %v5575_v2 = vmul.f32 %v5435_v1, %v5143_v6 }
 0x144   : > { %12109 = vst [vmem:[#allocation83_spill] sm:$0xff] %v5535_v41  ;;  %v404_v52 = vadd.f32 %v5498_v40, %v396_v55  ;;  %v512_v55 = vadd.f32 %v5328_v15, %v440_v47  ;;  %v610_v41 = vmul.f32 %v5527_v20, %v540_v5 }
 0x145   : > { %12112 = vst [vmem:[#allocation86_spill] sm:$0xff] %v5551_v45  ;;  %v530_v35 = vadd.f32 %v5332_v33, %v458_v32  ;;  %v5585_v33 = vpop.permute.xlu1 %387  ;;  %v5589_v32 = vmul.f32 %v5473_v42, %v5143_v6 }
 0x146   : > { %12113 = vst [vmem:[#allocation87_spill] sm:$0xff] %v5555_v46  ;;  %v476_v36 = vadd.f32 %v5312_v4, %v404_v52  ;;  %v413_v52 = vmul.f32 %v5445_v61, %v5169_v13  ;;  %v582_v4 = vadd.f32 %v574_v63, %v494_v49  ;;  %v600_v5 = vadd.f32 %v592_v51, %v512_v55 }
 0x147   : > { %12114 = vst [vmem:[#allocation88_spill] sm:$0xff] %v5559_v23  ;;  %v618_v15 = vadd.f32 %v610_v41, %v530_v35  ;;  %v644_v23 = vmul.f32 %v5435_v1, %v5155_v9  ;;  %v662_v46 = vmul.f32 %v5468_v59, %v5155_v9  ;;  %v698_v51 = vmul.f32 %v5478_v29, %v5155_v9  ;;  %v546_v35 = vpop.permute.xlu2 %545 }
 0x148   : > { %12115 = vst [vmem:[#allocation89_spill] sm:$0xff] %v5563_v0  ;;  %v564_v47 = vadd.f32 %v556_v50, %v476_v36  ;;  %v5593_v0 = vmul.f32 %v5478_v29, %v5143_v6  ;;  %v680_v50 = vmul.f32 %v5473_v42, %v5155_v9  ;;  %v5605_v63 = vmul.f32 %v5435_v1, %v5153_v8 }
 0x149   : > { %12116 = vst [vmem:[#allocation90_spill] sm:$0xff] %v5575_v2  ;;  %v5609_v6 = vmul.f32 %v5468_v59, %v5153_v8  ;;  %v403_v41 = vadd.f32 %v5498_v40, %v395_v31  ;;  %v421_v36 = vadd.f32 %v5503_v44, %v413_v52  ;;  %v431_v49 = vmul.f32 %v5212_v38, %v5169_v13 }
 0x14a   : > { %12117 = vst [vmem:[#allocation91_spill] sm:$0xff] %v5579_v14  ;;  %v449_v55 = vmul.f32 %v5217_v39, %v5169_v13  ;;  %v652_v9 = vadd.f32 %v644_v23, %v564_v47  ;;  %v670_v45 = vadd.f32 %v662_v46, %v582_v4  ;;  %v417_v8 = vmul.f32 %v5445_v61, %v386_v7  ;;  %v392_v23 = vpop.permute.xlu0 %391 }
 0x14b   : > { %12118 = vst [vmem:[#allocation92_spill] sm:$0xff] %v5585_v33  ;;  %v688_v33 = vadd.f32 %v680_v50, %v600_v5  ;;  %v453_v31 = vmul.f32 %v5217_v39, %v386_v7  ;;  %v5635_v47 = vmul.f32 %v5435_v1, %v5173_v19  ;;  %v398_v4 = vmul.f32 %v5440_v30, %v5190_v26 }
 0x14c   : > { %12119 = vst [vmem:[#allocation93_spill] sm:$0xff] %v5589_v32  ;;  %v5622_v52 = vadd.f32 %v5295_v57, %v652_v9  ;;  %v5625_v32 = vadd.f32 %v5299_v34, %v670_v45  ;;  %v439_v57 = vadd.f32 %v5228_v54, %v431_v49  ;;  %v457_v34 = vadd.f32 %v5233_v56, %v449_v55 }
 0x14d   : > { %12120 = vst [vmem:[#allocation94_spill] sm:$0xff] %v5593_v0  ;;  %v706_v0 = vadd.f32 %v698_v51, %v618_v15  ;;  %v5628_v13 = vadd.f32 %v5320_v21, %v688_v33  ;;  %v5643_v45 = vpop.permute.xlu1 %537  ;;  %v683_v21 = vmul.f32 %v5473_v42, %v5173_v19  ;;  %v5655_v33 = vmul.f32 %v5478_v29, %v5171_v18 }
 0x14e   : > { %12121 = vst [vmem:[#allocation95_spill] sm:$0xff] %v5605_v63  ;;  %v399_v63 = vmul.f32 %v5440_v30, %v386_v7  ;;  %v416_v5 = vmul.f32 %v5445_v61, %v5190_v26  ;;  %v5662_v15 = vadd.f32 %v5388_v17, %v403_v41  ;;  %v5665_v50 = vadd.f32 %v5392_v3, %v421_v36 }
 0x14f   : > { %12122 = vst [vmem:[#allocation96_spill] sm:$0xff] %v5609_v6  ;;  %v435_v6 = vmul.f32 %v5212_v38, %v386_v7  ;;  %v5631_v46 = vadd.f32 %v5324_v22, %v706_v0  ;;  %v5639_v7 = vmul.f32 %v5468_v59, %v5173_v19  ;;  %v701_v22 = vmul.f32 %v5478_v29, %v5173_v19 }
 0x150   : > { %12123 = vst [vmem:[#allocation97_spill] sm:$0xff] %v5622_v52  ;;  %v5651_v0 = vmul.f32 %v5473_v42, %v5171_v18  ;;  %v407_v19 = vadd.f32 %v5498_v40, %v399_v63  ;;  %v425_v51 = vadd.f32 %v5503_v44, %v417_v8  ;;  %v461_v55 = vadd.f32 %v5233_v56, %v453_v31  ;;  %v552_v31 = vpop.permute.xlu2 %551 }
 0x151   : > { %12124 = vst [vmem:[#allocation98_spill] sm:$0xff] %v5625_v32  ;;  %v443_v49 = vadd.f32 %v5228_v54, %v435_v6  ;;  %v434_v9 = vmul.f32 %v5212_v38, %v5190_v26  ;;  %v5676_v17 = vadd.f32 %v5396_v37, %v439_v57  ;;  %v5679_v3 = vadd.f32 %v5400_v11, %v457_v34 }
 0x152   : > { %12125 = vst [vmem:[#allocation99_spill] sm:$0xff] %v5628_v13  ;;  %v5683_v63 = vmul.f32 %v5435_v1, %v5194_v28  ;;  %v5687_v8 = vmul.f32 %v5468_v59, %v5194_v28  ;;  %v5691_v6 = vmul.f32 %v5473_v42, %v5194_v28  ;;  %v406_v37 = vadd.f32 %v5498_v40, %v398_v4  ;;  %v5705_v52 = vpop.permute.xlu0 %541 }
 0x153   : > { %12126 = vst [vmem:[#allocation100_spill] sm:$0xff] %v5631_v46  ;;  %v452_v46 = vmul.f32 %v5217_v39, %v5190_v26  ;;  %v5695_v26 = vmul.f32 %v5478_v29, %v5194_v28  ;;  %v424_v11 = vadd.f32 %v5503_v44, %v416_v5  ;;  %v559_v41 = vmul.f32 %v5508_v27, %v546_v35 }
 0x154   : > { %v577_v36 = vmul.f32 %v5517_v62, %v546_v35  ;;  %v479_v57 = vadd.f32 %v5335_v25, %v407_v19  ;;  %v497_v34 = vadd.f32 %v5339_v10, %v425_v51  ;;  %v515_v13 = vadd.f32 %v5343_v12, %v443_v49  ;;  %12127 = vst [vmem:[#allocation101_spill] sm:$0xff] %v5705_v52 }
 0x155   : > { %v533_v32 = vadd.f32 %v5347_v24, %v461_v55  ;;  %v402_v28 = vmul.f32 %v5440_v30, %v392_v23  ;;  %v420_v4 = vmul.f32 %v5445_v61, %v392_v23  ;;  %v438_v5 = vmul.f32 %v5212_v38, %v392_v23  ;;  %v5711_v59 = vpop.permute.xlu1 %543 }
 0x156   : > { %v456_v18 = vmul.f32 %v5217_v39, %v392_v23  ;;  %v397_v25 = vmul.f32 %v5440_v30, %v5447_v58  ;;  %v415_v10 = vmul.f32 %v5445_v61, %v5447_v58  ;;  %v595_v12 = vmul.f32 %v5522_v53, %v546_v35 }
 0x157   : > { %v613_v24 = vmul.f32 %v5527_v20, %v546_v35  ;;  %v442_v19 = vadd.f32 %v5228_v54, %v434_v9  ;;  %v460_v51 = vadd.f32 %v5233_v56, %v452_v46  ;;  %v433_v49 = vmul.f32 %v5212_v38, %v5447_v58 }
 0x158   : > { %v451_v23 = vmul.f32 %v5217_v39, %v5447_v58  ;;  %v567_v55 = vadd.f32 %v559_v41, %v479_v57  ;;  %v585_v1 = vadd.f32 %v577_v36, %v497_v34  ;;  %v603_v29 = vadd.f32 %v595_v12, %v515_v13 }
 0x159   : > { %v621_v42 = vadd.f32 %v613_v24, %v533_v32  ;;  %v410_v14 = vadd.f32 %v5498_v40, %v402_v28  ;;  %v428_v2 = vadd.f32 %v5503_v44, %v420_v4  ;;  %v446_v35 = vadd.f32 %v5228_v54, %v438_v5  ;;  %v12131_v24 = vld [vmem:[#allocation58_spill] sm:$0xff] }
 0x15a   : > { %v464_v9 = vadd.f32 %v5233_v56, %v456_v18  ;;  %v405_v46 = vadd.f32 %v5498_v40, %v397_v25  ;;  %v423_v52 = vadd.f32 %v5503_v44, %v415_v10  ;;  %v5732_v38 = vadd.f32 %v5350_v43, %v406_v37  ;;  %v5743_v4 = vpop.permute.xlu0 %547  ;;  %v5745_v43 = vpop.permute.xlu2 %892  ;;  %v12130_v25 = vld [vmem:[#allocation65_spill] sm:$0xff] }
 0x15b   : > { %v5735_v58 = vadd.f32 %v5354_v60, %v424_v11  ;;  %v441_v32 = vadd.f32 %v5228_v54, %v433_v49  ;;  %v459_v13 = vadd.f32 %v5233_v56, %v451_v23  ;;  %v562_v41 = vmul.f32 %v5508_v27, %v552_v31  ;;  %12128 = vst [vmem:[#allocation102_spill] sm:$0xff] %v5745_v43  ;;  %v12129_v11 = vld [vmem:[#allocation64_spill] sm:$0xff] }
 0x15c   : > { %v580_v36 = vmul.f32 %v5517_v62, %v552_v31  ;;  %v655_v18 = vadd.f32 %v5635_v47, %v567_v55  ;;  %v673_v57 = vadd.f32 %v5639_v7, %v585_v1  ;;  %v691_v34 = vadd.f32 %v683_v21, %v603_v29  ;;  %v12132_v1 = vld [vmem:[#allocation59_spill] sm:$0xff]  ;;  %v12134_v21 = vld [vmem:[#allocation61_spill] sm:$0xff]  ;;  %v12135_v55 = vld [vmem:[#allocation56_spill] sm:$0xff] }
 0x15d   : > { %v709_v28 = vadd.f32 %v701_v22, %v621_v42  ;;  %v482_v60 = vadd.f32 %v5403_v16, %v410_v14  ;;  %v500_v37 = vadd.f32 %v5407_v48, %v428_v2  ;;  %v518_v5 = vadd.f32 %v12129_v11, %v446_v35  ;;  %v5751_v12 = vpop.permute.xlu1 %549  ;;  %v12133_v42 = vld [vmem:[#allocation60_spill] sm:$0xff]  ;;  %v12137_v11 = vld [vmem:[#allocation39_spill] sm:$0xff] }
 0x15e   : > { %v536_v10 = vadd.f32 %v12130_v25, %v464_v9  ;;  %v5754_v47 = vadd.f32 %v12131_v24, %v655_v18  ;;  %v5757_v29 = vadd.f32 %v12132_v1, %v673_v57  ;;  %v5760_v7 = vadd.f32 %v12133_v42, %v691_v34  ;;  %v12136_v9 = vld [vmem:[#allocation57_spill] sm:$0xff]  ;;  %v12138_v1 = vld [vmem:[#allocation62_spill] sm:$0xff] }
 0x15f   : > { %v5763_v22 = vadd.f32 %v12134_v21, %v709_v28  ;;  %v598_v48 = vmul.f32 %v5522_v53, %v552_v31  ;;  %v616_v16 = vmul.f32 %v5527_v20, %v552_v31  ;;  %v555_v2 = vmul.f32 %v5508_v27, %v5643_v45  ;;  %v12139_v21 = vld [vmem:[#allocation63_spill] sm:$0xff] }
 0x160   : > { %v573_v14 = vmul.f32 %v5517_v62, %v5643_v45  ;;  %v591_v49 = vmul.f32 %v5522_v53, %v5643_v45  ;;  %v609_v23 = vmul.f32 %v5527_v20, %v5643_v45  ;;  %v514_v35 = vadd.f32 %v12135_v55, %v442_v19  ;;  %v12140_v55 = vld [vmem:[#allocation66_spill] sm:$0xff] }
 0x161   : > { %v532_v18 = vadd.f32 %v12136_v9, %v460_v51  ;;  %v570_v57 = vadd.f32 %v562_v41, %v482_v60  ;;  %v588_v34 = vadd.f32 %v580_v36, %v500_v37  ;;  %v606_v28 = vadd.f32 %v598_v48, %v518_v5  ;;  %v12141_v41 = vld [vmem:[#allocation67_spill] sm:$0xff]  ;;  %v12143_v48 = vld [vmem:[#allocation44_spill] sm:$0xff] }
 0x162   : > { %v624_v31 = vadd.f32 %v616_v16, %v536_v10  ;;  %v401_v25 = vmul.f32 %v5440_v30, %v12137_v11  ;;  %v419_v24 = vmul.f32 %v5445_v61, %v12137_v11  ;;  %v477_v42 = vadd.f32 %v12138_v1, %v405_v46  ;;  %v5793_v10 = vpop.permute.xlu0 %894 }
 0x163   : > { %v495_v43 = vadd.f32 %v12139_v21, %v423_v52  ;;  %v563_v45 = vadd.f32 %v555_v2, %v5662_v15  ;;  %v581_v19 = vadd.f32 %v573_v14, %v5665_v50  ;;  %v513_v51 = vadd.f32 %v12140_v55, %v441_v32  ;;  %v12144_v2 = vld [vmem:[#allocation45_spill] sm:$0xff] }
 0x164   : > { %v531_v36 = vadd.f32 %v12141_v41, %v459_v13  ;;  %v599_v60 = vadd.f32 %v591_v49, %v5676_v17  ;;  %v617_v37 = vadd.f32 %v609_v23, %v5679_v3  ;;  %v597_v5 = vmul.f32 %v5522_v53, %v5751_v12  ;;  %v5807_v49 = vpop.permute.xlu2 %898  ;;  %v12149_v21 = vld [vmem:[#allocation101_spill] sm:$0xff] }
 0x165   : > { %v615_v46 = vmul.f32 %v5527_v20, %v5751_v12  ;;  %v658_v52 = vadd.f32 %v5683_v63, %v570_v57  ;;  %v676_v15 = vadd.f32 %v5687_v8, %v588_v34  ;;  %v694_v50 = vadd.f32 %v5691_v6, %v606_v28  ;;  %v5799_v13 = vpop.permute.xlu1 %890  ;;  %v12145_v63 = vld [vmem:[#allocation71_spill] sm:$0xff]  ;;  %v12146_v6 = vld [vmem:[#allocation72_spill] sm:$0xff]  ;;  %v12148_v57 = vld [vmem:[#allocation74_spill] sm:$0xff] }
 0x166   : > { %v712_v32 = vadd.f32 %v5695_v26, %v624_v31  ;;  %12142 = vst [vmem:[#allocation64_spill] sm:$0xff] %v5799_v13  ;;  %v558_v17 = vmul.f32 %v5508_v27, %v5711_v59  ;;  %v576_v3 = vmul.f32 %v5517_v62, %v5711_v59  ;;  %v605_v16 = vadd.f32 %v597_v5, %v12143_v48  ;;  %v12147_v26 = vld [vmem:[#allocation73_spill] sm:$0xff] }
 0x167   : > { %v623_v14 = vadd.f32 %v615_v46, %v12144_v2  ;;  %v5810_v8 = vadd.f32 %v12145_v63, %v658_v52  ;;  %v5813_v23 = vadd.f32 %v12146_v6, %v676_v15  ;;  %v5816_v9 = vadd.f32 %v12147_v26, %v694_v50  ;;  %v12150_v52 = vld [vmem:[#allocation90_spill] sm:$0xff]  ;;  %v12151_v15 = vld [vmem:[#allocation91_spill] sm:$0xff]  ;;  %v12152_v50 = vld [vmem:[#allocation93_spill] sm:$0xff] }
 0x168   : > { %v5819_v34 = vadd.f32 %v12148_v57, %v712_v32  ;;  %v594_v28 = vmul.f32 %v5522_v53, %v5711_v59  ;;  %v612_v31 = vmul.f32 %v5527_v20, %v5711_v59  ;;  %v5826_v11 = vadd.f32 %v5651_v0, %v605_v16  ;;  %v12154_v16 = vld [vmem:[#allocation92_spill] sm:$0xff]  ;;  %v12155_v63 = vld [vmem:[#allocation38_spill] sm:$0xff] }
 0x169   : > { %v5829_v1 = vadd.f32 %v5655_v33, %v623_v14  ;;  %v557_v55 = vmul.f32 %v5508_v27, %v12149_v21  ;;  %v575_v41 = vmul.f32 %v5517_v62, %v12149_v21  ;;  %v593_v5 = vmul.f32 %v5522_v53, %v12149_v21  ;;  %v12153_v33 = vld [vmem:[#allocation94_spill] sm:$0xff] }
 0x16a   : > { %v611_v46 = vmul.f32 %v5527_v20, %v12149_v21  ;;  %v651_v59 = vadd.f32 %v12150_v52, %v563_v45  ;;  %v669_v0 = vadd.f32 %v12151_v15, %v581_v19  ;;  %v687_v32 = vadd.f32 %v12152_v50, %v599_v60  ;;  %v5853_v21 = vpop.permute.xlu0 %900 }
 0x16b   : > { %v705_v48 = vadd.f32 %v12153_v33, %v617_v37  ;;  %v400_v2 = vmul.f32 %v5440_v30, %v12154_v16  ;;  %v418_v14 = vmul.f32 %v5445_v61, %v12154_v16  ;;  %v436_v6 = vmul.f32 %v12155_v63, %v12154_v16  ;;  %12156 = vst [vmem:[#allocation65_spill] sm:$0xff] %v5853_v21  ;;  %v12158_v61 = vld [vmem:[#allocation46_spill] sm:$0xff]  ;;  %v12159_v63 = vld [vmem:[#allocation47_spill] sm:$0xff] }
 0x16c   : > { %v454_v26 = vmul.f32 %v5217_v39, %v12154_v16  ;;  %v566_v45 = vadd.f32 %v558_v17, %v5732_v38  ;;  %v584_v19 = vadd.f32 %v576_v3, %v5735_v58  ;;  %v602_v57 = vadd.f32 %v594_v28, %v514_v35  ;;  %v12160_v39 = vld [vmem:[#allocation48_spill] sm:$0xff]  ;;  %v12161_v58 = vld [vmem:[#allocation49_spill] sm:$0xff] }
 0x16d   : > { %v620_v60 = vadd.f32 %v612_v31, %v532_v18  ;;  %v565_v37 = vadd.f32 %v557_v55, %v477_v42  ;;  %v583_v52 = vadd.f32 %v575_v41, %v495_v43  ;;  %v601_v30 = vadd.f32 %v593_v5, %v513_v51  ;;  %v5855_v50 = vpop.permute.xlu1 %896  ;;  %v12162_v18 = vld [vmem:[#allocation27_spill] sm:$0xff]  ;;  %v12163_v17 = vld [vmem:[#allocation76_spill] sm:$0xff]  ;;  %v12164_v43 = vld [vmem:[#allocation77_spill] sm:$0xff] }
 0x16e   : > { %v619_v15 = vadd.f32 %v611_v46, %v531_v36  ;;  %12157 = vst [vmem:[#allocation58_spill] sm:$0xff] %v5855_v50  ;;  %v5858_v33 = vadd.f32 %v12158_v61, %v651_v59  ;;  %v5861_v13 = vadd.f32 %v12159_v63, %v669_v0  ;;  %v5864_v38 = vadd.f32 %v12160_v39, %v687_v32  ;;  %v12165_v5 = vld [vmem:[#allocation86_spill] sm:$0xff]  ;;  %v12166_v59 = vld [vmem:[#allocation87_spill] sm:$0xff]  ;;  %v12167_v32 = vld [vmem:[#allocation88_spill] sm:$0xff]  ;;  %v5883_v63 = vpop.permute.xlu2 %904 }
 0x16f   : > { %v5867_v35 = vadd.f32 %v12161_v58, %v705_v48  ;;  %v682_v42 = vmul.f32 %v12163_v17, %v12162_v18  ;;  %v700_v51 = vmul.f32 %v12164_v43, %v12162_v18  ;;  %v409_v36 = vadd.f32 %v5498_v40, %v401_v25  ;;  %v12168_v16 = vld [vmem:[#allocation89_spill] sm:$0xff]  ;;  %v12169_v25 = vld [vmem:[#allocation95_spill] sm:$0xff]  ;;  %v12170_v39 = vld [vmem:[#allocation96_spill] sm:$0xff] }
 0x170   : > { %v427_v3 = vadd.f32 %v5503_v44, %v419_v24  ;;  %v408_v28 = vadd.f32 %v5498_v40, %v400_v2  ;;  %v426_v31 = vadd.f32 %v5503_v44, %v418_v14  ;;  %v444_v55 = vadd.f32 %v5228_v54, %v436_v6  ;;  %v12176_v58 = vld [vmem:[#allocation50_spill] sm:$0xff] }
 0x171   : > { %v462_v41 = vadd.f32 %v5233_v56, %v454_v26  ;;  %v653_v46 = vadd.f32 %v12165_v5, %v565_v37  ;;  %v671_v0 = vadd.f32 %v12166_v59, %v583_v52  ;;  %v689_v48 = vadd.f32 %v12167_v32, %v601_v30  ;;  %v12171_v26 = vld [vmem:[#allocation78_spill] sm:$0xff]  ;;  %v12173_v30 = vld [vmem:[#allocation83_spill] sm:$0xff]  ;;  %v12182_v59 = vld [vmem:[#allocation69_spill] sm:$0xff] }
 0x172   : > { %v707_v61 = vadd.f32 %v12168_v16, %v619_v15  ;;  %v654_v24 = vadd.f32 %v12169_v25, %v566_v45  ;;  %v672_v40 = vadd.f32 %v12170_v39, %v584_v19  ;;  %v690_v2 = vadd.f32 %v682_v42, %v602_v57  ;;  %v12172_v52 = vld [vmem:[#allocation82_spill] sm:$0xff]  ;;  %v12174_v57 = vld [vmem:[#allocation84_spill] sm:$0xff]  ;;  %v5899_v15 = vpop.permute.xlu0 %1050  ;;  %v12177_v42 = vld [vmem:[#allocation51_spill] sm:$0xff] }
 0x173   : > { %v708_v44 = vadd.f32 %v700_v51, %v620_v60  ;;  %v560_v54 = vmul.f32 %v5508_v27, %v5743_v4  ;;  %v578_v56 = vmul.f32 %v5517_v62, %v5743_v4  ;;  %v596_v14 = vmul.f32 %v5522_v53, %v5743_v4  ;;  %12175 = vst [vmem:[#allocation59_spill] sm:$0xff] %v5899_v15  ;;  %v12178_v53 = vld [vmem:[#allocation53_spill] sm:$0xff]  ;;  %v12183_v39 = vld [vmem:[#allocation79_spill] sm:$0xff] }
 0x174   : > { %v614_v6 = vmul.f32 %v5527_v20, %v5743_v4  ;;  %v480_v37 = vadd.f32 %v12171_v26, %v408_v28  ;;  %v498_v45 = vadd.f32 %v12172_v52, %v426_v31  ;;  %v516_v19 = vadd.f32 %v12173_v30, %v444_v55  ;;  %v12179_v20 = vld [vmem:[#allocation54_spill] sm:$0xff]  ;;  %v12181_v31 = vld [vmem:[#allocation68_spill] sm:$0xff]  ;;  %v12186_v30 = vld [vmem:[#allocation81_spill] sm:$0xff] }
 0x175   : > { %v534_v60 = vadd.f32 %v12174_v57, %v462_v41  ;;  %v5902_v18 = vadd.f32 %v12176_v58, %v653_v46  ;;  %v5905_v51 = vadd.f32 %v12177_v42, %v671_v0  ;;  %v5908_v5 = vadd.f32 %v12178_v53, %v689_v48  ;;  %v5913_v28 = vpop.permute.xlu1 %902  ;;  %v12191_v58 = vld [vmem:[#allocation70_spill] sm:$0xff] }
 0x176   : > { %v5911_v4 = vadd.f32 %v12179_v20, %v707_v61  ;;  %12180 = vst [vmem:[#allocation60_spill] sm:$0xff] %v5913_v28  ;;  %v481_v55 = vadd.f32 %v12181_v31, %v409_v36  ;;  %v499_v41 = vadd.f32 %v12182_v59, %v427_v3  ;;  %v561_v32 = vmul.f32 %v5508_v27, %v5751_v12  ;;  %v12184_v61 = vld [vmem:[#allocation80_spill] sm:$0xff]  ;;  %v12188_v3 = vld [vmem:[#allocation85_spill] sm:$0xff]  ;;  %v12190_v27 = vld [vmem:[#allocation23_spill] sm:$0xff] }
 0x177   : > { %v579_v46 = vmul.f32 %v5517_v62, %v5751_v12  ;;  %v568_v0 = vadd.f32 %v560_v54, %v480_v37  ;;  %v586_v16 = vadd.f32 %v578_v56, %v498_v45  ;;  %v604_v25 = vadd.f32 %v596_v14, %v516_v19  ;;  %v12192_v62 = vld [vmem:[#allocation75_spill] sm:$0xff]  ;;  %v12193_v45 = vld [vmem:[#allocation30_spill] sm:$0xff] }
 0x178   : > { %v622_v48 = vadd.f32 %v614_v6, %v534_v60  ;;  %v5922_v26 = vadd.f32 %v12183_v39, %v654_v24  ;;  %v5925_v52 = vadd.f32 %v12184_v61, %v672_v40  ;;  %v5928_v36 = vadd.f32 %v12186_v30, %v690_v2  ;;  %v12196_v20 = vld [vmem:[#allocation42_spill] sm:$0xff]  ;;  %v12198_v59 = vld [vmem:[#allocation19_spill] sm:$0xff] }
 0x179   : > { %v5931_v57 = vadd.f32 %v12188_v3, %v708_v44  ;;  %v648_v42 = vmul.f32 %v12191_v58, %v12190_v27  ;;  %v666_v12 = vmul.f32 %v12192_v62, %v12190_v27  ;;  %v684_v54 = vmul.f32 %v12163_v17, %v12190_v27  ;;  %v5941_v44 = vpop.permute.xlu2 %1054  ;;  %v12195_v17 = vld [vmem:[#allocation9_spill] sm:$0xff]  ;;  %v5967_v39 = vld [vmem:[%s11726_s3 + $0x71] ss:$0 sm:$0xff] }
 0x17a   : > { %12185 = vst [vmem:[#allocation61_spill] sm:$0xff] %v5925_v52  ;;  %v702_v24 = vmul.f32 %v12164_v43, %v12190_v27  ;;  %v569_v40 = vadd.f32 %v561_v32, %v481_v55  ;;  %v587_v56 = vadd.f32 %v579_v46, %v499_v41  ;;  %v649_v19 = vmul.f32 %v12191_v58, %v12193_v45  ;;  %v5947_v53 = vpop.permute.xlu0 %1056  ;;  %v12197_v43 = vld [vmem:[#allocation43_spill] sm:$0xff]  ;;  %v12199_v32 = vld [vmem:[#allocation20_spill] sm:$0xff] }
 0x17b   : > { %12187 = vst [vmem:[#allocation56_spill] sm:$0xff] %v5928_v36  ;;  %v656_v14 = vadd.f32 %v648_v42, %v568_v0  ;;  %v674_v2 = vadd.f32 %v666_v12, %v586_v16  ;;  %v692_v6 = vadd.f32 %v684_v54, %v604_v25  ;;  %v667_v60 = vmul.f32 %v12192_v62, %v12193_v45  ;;  %v12205_v58 = vld [vmem:[#allocation15_spill] sm:$0xff]  ;;  %v12206_v12 = vld [vmem:[#allocation26_spill] sm:$0xff]  ;;  %v5996_v45 = vld [vmem:[%s11726_s3 + $0x5] ss:$0 sm:$0xff] }
 0x17c   : > { %12189 = vst [vmem:[#allocation57_spill] sm:$0xff] %v5931_v57  ;;  %v710_v37 = vadd.f32 %v702_v24, %v622_v48  ;;  %v720_v31 = vmul.f32 %v12196_v20, %v12195_v17  ;;  %v738_v55 = vmul.f32 %v12197_v43, %v12195_v17  ;;  %v756_v41 = vmul.f32 %v12198_v59, %v12195_v17  ;;  %v5962_v48 = vld [vmem:[%s11726_s3 + $0x4d] ss:$0 sm:$0xff] }
 0x17d   : > { %12194 = vst [vmem:[#allocation39_spill] sm:$0xff] %v5947_v53  ;;  %v774_v46 = vmul.f32 %v12199_v32, %v12195_v17  ;;  %v5957_v0 = vpop.permute.xlu1 %1052  ;;  %v657_v16 = vadd.f32 %v649_v19, %v569_v40  ;;  %v675_v25 = vadd.f32 %v667_v60, %v587_v56  ;;  %v721_v42 = vmul.f32 %v12196_v20, %v12205_v58  ;;  %v6001_v19 = vld [vmem:[%s11726_s3 + $0x29] ss:$0 sm:$0xff]  ;;  %v6006_v60 = vld [vmem:[%s11726_s3 + $0x4e] ss:$0 sm:$0xff] }
 0x17e   : > { %12200 = vst [vmem:[#allocation62_spill] sm:$0xff] %v5957_v0  ;;  %v5969_v61 = vadd.f32 %v720_v31, %v656_v14  ;;  %v5971_v30 = vadd.f32 %v738_v55, %v674_v2  ;;  %v5973_v3 = vadd.f32 %v756_v41, %v692_v6  ;;  %v739_v62 = vmul.f32 %v12197_v43, %v12205_v58  ;;  %v12209_v14 = vld [vmem:[#allocation21_spill] sm:$0xff]  ;;  %v12210_v6 = vld [vmem:[#allocation22_spill] sm:$0xff]  ;;  %v6018_v31 = vld [vmem:[%s11726_s3 + $0x6] ss:$0 sm:$0xff] }
 0x17f   : > { %v5975_v27 = vadd.f32 %v774_v46, %v710_v37  ;;  %v845_v54 = vmul.f32 %v5962_v48, %v12206_v12  ;;  %v863_v24 = vmul.f32 %v5967_v39, %v12206_v12  ;;  %v5985_v40 = vadd.f32 %v721_v42, %v657_v16  ;;  %v6023_v43 = vld [vmem:[%s11726_s3 + $0x2a] ss:$0 sm:$0xff]  ;;  %v12214_v41 = vld [vmem:[#allocation40_spill] sm:$0xff] }
 0x180   : > { %12201 = vst [vmem:[#allocation63_spill] sm:$0xff] %v5969_v61  ;;  %v5987_v56 = vadd.f32 %v739_v62, %v675_v25  ;;  %v765_v2 = vadd.f32 %v12209_v14, %v5826_v11  ;;  %v783_v37 = vadd.f32 %v12210_v6, %v5829_v1  ;;  %v6011_v11 = vld [vmem:[%s11726_s3 + $0x72] ss:$0 sm:$0xff]  ;;  %v807_v32 = vmul.f32 %v5996_v45, %v12214_v41  ;;  %v6056_v0 = vld [vmem:[%s11726_s3 + $0x7] ss:$0 sm:$0xff] }
 0x181   : > { %12202 = vst [vmem:[#allocation66_spill] sm:$0xff] %v5971_v30  ;;  %v6025_v55 = vpop.permute.xlu2 %1060  ;;  %v825_v46 = vmul.f32 %v6001_v19, %v12214_v41  ;;  %v950_v16 = vmul.f32 %v6006_v60, %v5913_v28  ;;  %v968_v25 = vmul.f32 %v6011_v11, %v5913_v28  ;;  %v843_v58 = vmul.f32 %v5962_v48, %v12214_v41 }
 0x182   : > { %12203 = vst [vmem:[#allocation67_spill] sm:$0xff] %v5973_v3  ;;  %v853_v1 = vadd.f32 %v845_v54, %v765_v2  ;;  %v871_v17 = vadd.f32 %v863_v24, %v783_v37  ;;  %v6013_v20 = vpop.permute.xlu0 %1062  ;;  %v861_v42 = vmul.f32 %v5967_v39, %v12214_v41  ;;  %v912_v62 = vmul.f32 %v6018_v31, %v5807_v49  ;;  %v12293_v3 = vld [vmem:[#allocation55_spill] sm:$0xff] }
 0x183   : > { %12204 = vst [vmem:[#allocation44_spill] sm:$0xff] %v5975_v27  ;;  %v930_v54 = vmul.f32 %v6023_v43, %v5807_v49  ;;  %v948_v24 = vmul.f32 %v6006_v60, %v5807_v49  ;;  %v966_v14 = vmul.f32 %v6011_v11, %v5807_v49  ;;  %v815_v37 = vadd.f32 %v807_v32, %v5754_v47  ;;  %v6061_v49 = vld [vmem:[%s11726_s3 + $0x2b] ss:$0 sm:$0xff]  ;;  %v6066_v47 = vld [vmem:[%s11726_s3 + $0x4f] ss:$0 sm:$0xff] }
 0x184   : > { %12207 = vst [vmem:[#allocation45_spill] sm:$0xff] %v5985_v40  ;;  %v958_v2 = vadd.f32 %v950_v16, %v853_v1  ;;  %v976_v6 = vadd.f32 %v968_v25, %v871_v17  ;;  %v851_v41 = vadd.f32 %v843_v58, %v5760_v7  ;;  %v869_v53 = vadd.f32 %v861_v42, %v5763_v22 }
 0x185   : > { %12208 = vst [vmem:[#allocation71_spill] sm:$0xff] %v5987_v56  ;;  %v6027_v59 = vpop.permute.xlu1 %1058  ;;  %v920_v15 = vadd.f32 %v912_v62, %v815_v37  ;;  %v12221_v62 = vld [vmem:[#allocation17_spill] sm:$0xff]  ;;  %v6411_v30 = vmul.f32 %v6001_v19, %v12293_v3  ;;  %v6415_v61 = vmul.f32 %v5962_v48, %v12293_v3  ;;  %v969_v57 = vmul.f32 %v6011_v11, %v5883_v63 }
 0x186   : > { %12211 = vst [vmem:[#allocation72_spill] sm:$0xff] %v6013_v20  ;;  %v956_v56 = vadd.f32 %v948_v24, %v851_v41  ;;  %v974_v40 = vadd.f32 %v966_v14, %v869_v53  ;;  %v12216_v53 = vld [vmem:[#allocation10_spill] sm:$0xff] }
 0x187   : > { %12212 = vst [vmem:[#allocation73_spill] sm:$0xff] %v6025_v55  ;;  %v984_v17 = vmul.f32 %v6056_v0, %v12216_v53  ;;  %v1020_v32 = vmul.f32 %v6066_v47, %v12216_v53  ;;  %v6098_v14 = vld [vmem:[%s11726_s3 + $0x50] ss:$0 sm:$0xff] }
 0x188   : > { %12213 = vst [vmem:[#allocation74_spill] sm:$0xff] %v6027_v59  ;;  %v833_v59 = vadd.f32 %v825_v46, %v5757_v29  ;;  %v6071_v29 = vld [vmem:[%s11726_s3 + $0x73] ss:$0 sm:$0xff]  ;;  %v1110_v37 = vmul.f32 %v6098_v14, %v6013_v20 }
 0x189   : > { %v1156_v1 = vpop.permute.xlu2 %1155  ;;  %v1038_v46 = vmul.f32 %v6071_v29, %v12216_v53  ;;  %v6083_v16 = vadd.f32 %v984_v17, %v920_v15  ;;  %v6087_v58 = vadd.f32 %v1020_v32, %v956_v56  ;;  %v1040_v24 = vmul.f32 %v6071_v29, %v12221_v62  ;;  %v6103_v15 = vld [vmem:[%s11726_s3 + $0x74] ss:$0 sm:$0xff] }
 0x18a   : > { %v938_v28 = vadd.f32 %v930_v54, %v833_v59  ;;  %v1158_v7 = vpop.permute.xlu0 %1157  ;;  %v1002_v59 = vmul.f32 %v6061_v49, %v12216_v53  ;;  %v1022_v54 = vmul.f32 %v6066_v47, %v12221_v62  ;;  %v1128_v41 = vmul.f32 %v6103_v15, %v6013_v20 }
 0x18b   : > { %12217 = vst [vmem:[#allocation90_spill] sm:$0xff] %v6083_v16  ;;  %v6089_v42 = vadd.f32 %v1038_v46, %v974_v40  ;;  %v1048_v56 = vadd.f32 %v1040_v24, %v976_v6  ;;  %v12224_v46 = vld [vmem:[#allocation29_spill] sm:$0xff] }
 0x18c   : > { %v6085_v25 = vadd.f32 %v1002_v59, %v938_v28  ;;  %12219 = vst [vmem:[#allocation93_spill] sm:$0xff] %v6087_v58  ;;  %v1030_v28 = vadd.f32 %v1022_v54, %v958_v2  ;;  %v12226_v58 = vld [vmem:[#allocation28_spill] sm:$0xff]  ;;  %v12228_v6 = vld [vmem:[#allocation33_spill] sm:$0xff] }
 0x18d   : > { %v6073_v22 = vpop.permute.xlu1 %1064  ;;  %12220 = vst [vmem:[#allocation94_spill] sm:$0xff] %v6089_v42  ;;  %v6111_v59 = vadd.f32 %v1128_v41, %v1048_v56  ;;  %v6115_v42 = vsel %vm349_vm0, %v12224_v46, %v1156_v1  ;;  %v6119_v2 = vsel %vm349_vm0, %v12226_v58, %v1158_v7  ;;  %v12232_v1 = vld [vmem:[#allocation31_spill] sm:$0xff]  ;;  %v12292_v58 = vld [vmem:[#allocation41_spill] sm:$0xff] }
 0x18e   : > { %12215 = vst [vmem:[#allocation101_spill] sm:$0xff] %v6073_v22  ;;  %v6109_v17 = vadd.f32 %v1110_v37, %v1030_v28  ;;  %v1187_v24 = vrot.slane %v6115_v42, 7  ;;  %v1188_v28 = vrot.slane %v6119_v2, 7  ;;  %v12230_v37 = vld [vmem:[#allocation32_spill] sm:$0xff]  ;;  %v805_v55 = vmul.f32 %v5996_v45, %v12292_v58 }
 0x18f   : > { %12218 = vst [vmem:[#allocation91_spill] sm:$0xff] %v6085_v25  ;;  %v12244_v25 = vld [vmem:[#allocation36_spill] sm:$0xff] }
 0x190   : > { %12222 = vst [vmem:[#allocation92_spill] sm:$0xff] %v6109_v17  ;;  %v12237_v17 = vld [vmem:[#allocation35_spill] sm:$0xff] }
 0x191   : > { %12223 = vst [vmem:[#allocation38_spill] sm:$0xff] %v6111_v59  ;;  %v1162_v32 = vpop.permute.xlu2 %1161  ;;  %v6138_v59 = vsel %vm368_vm2, %v1187_v24, %v1188_v28 }
 0x192   : > { %v1164_v40 = vpop.permute.xlu0 %1163  ;;  %12225 = vst [vmem:[#allocation46_spill] sm:$0xff] %v6115_v42  ;;  %v6130_v41 = vsel %vm349_vm0, %v12230_v37, %v1162_v32  ;;  %1205 = vrot.lane.b32.xlu2 %v6138_v59, %s4790_s15 }
 0x193   : > { %12227 = vst [vmem:[#allocation47_spill] sm:$0xff] %v6119_v2  ;;  %v6134_v46 = vsel %vm349_vm0, %v12232_v1, %v1164_v40  ;;  %v12239_v40 = vld [vmem:[#allocation37_spill] sm:$0xff] }
 0x194   : > { %12231 = vst [vmem:[#allocation49_spill] sm:$0xff] %v6130_v41  ;;  %v1191_v1 = vrot.slane %v6134_v46, 7 }
 0x195   : > { %v1160_v53 = vpop.permute.xlu1 %1159  ;;  %12233 = vst [vmem:[#allocation27_spill] sm:$0xff] %v6134_v46 }
 0x196   : > { %v6123_v54 = vsel %vm349_vm0, %v12228_v6, %v1160_v53  ;;  %12235 = vst [vmem:[#allocation76_spill] sm:$0xff] %v6138_v59 }
 0x197   : > { %12229 = vst [vmem:[#allocation48_spill] sm:$0xff] %v6123_v54  ;;  %v1189_v56 = vrot.slane %v6123_v54, 7 }
 0x199   : > { %v6142_v53 = vsel %vm368_vm2, %v1188_v28, %v1189_v56  ;;  %v1190_v28 = vrot.slane %v6130_v41, 7 }
 0x19a   : > { %v1170_v7 = vpop.permute.xlu0 %1169  ;;  %12236 = vst [vmem:[#allocation77_spill] sm:$0xff] %v6142_v53  ;;  %1207 = vrot.lane.b32.xlu0 %v6142_v53, %s4790_s15 }
 0x19b   : > { %v6146_v20 = vsel %vm349_vm0, %v12237_v17, %v1170_v7  ;;  %v1168_v7 = vpop.permute.xlu2 %1167 }
 0x19c   : > { %12238 = vst [vmem:[#allocation86_spill] sm:$0xff] %v6146_v20  ;;  %v1194_v37 = vrot.slane %v6146_v20, 7  ;;  %v6176_v16 = vsel %vm349_vm0, %v12244_v25, %v1168_v7 }
 0x19d   : > { %v1166_v6 = vpop.permute.xlu1 %1165  ;;  %12245 = vst [vmem:[#allocation96_spill] sm:$0xff] %v6176_v16  ;;  %v1193_v27 = vrot.slane %v6176_v16, 7 }
 0x19e   : > { %v6154_v32 = vsel %vm349_vm0, %v12239_v40, %v1166_v6  ;;  %v6162_v17 = vsel %vm368_vm2, %v1194_v37, %v1187_v24  ;;  %v6168_v6 = vsel %vm368_vm2, %v1190_v28, %v1191_v1  ;;  %v6184_v24 = vsel %vm368_vm2, %v1189_v56, %v1190_v28  ;;  %v12253_v28 = vld [vmem:[#allocation13_spill] sm:$0xff] }
 0x19f   : > { %12240 = vst [vmem:[#allocation87_spill] sm:$0xff] %v6154_v32  ;;  %v1192_v22 = vrot.slane %v6154_v32, 7  ;;  %1203 = vrot.lane.b32.xlu1 %v6162_v17, %s4790_s15  ;;  %1211 = vrot.lane.b32.xlu2 %v6168_v6, %s4790_s15  ;;  %v6241_v7 = vmul.f32 %v6056_v0, %v12253_v28 }
 0x1a0   : > { %12241 = vst [vmem:[#allocation88_spill] sm:$0xff] %v6162_v17 }
 0x1a1   : > { %12242 = vst [vmem:[#allocation89_spill] sm:$0xff] %v6168_v6  ;;  %v6172_v40 = vsel %vm368_vm2, %v1191_v1, %v1192_v22  ;;  %v6191_v1 = vsel %vm368_vm2, %v1193_v27, %v1194_v37  ;;  %v6199_v25 = vsel %vm368_vm2, %v1192_v22, %v1193_v27  ;;  %v6222_v27 = vld [vmem:[%s11726_s3 + $0x52] ss:$0 sm:$0xff]  ;;  %v6227_v22 = vld [vmem:[%s11726_s3 + $0x76] ss:$0 sm:$0xff] }
 0x1a2   : > { %12243 = vst [vmem:[#allocation95_spill] sm:$0xff] %v6172_v40  ;;  %1213 = vrot.lane.b32.xlu0 %v6172_v40, %s4790_s15  ;;  %v6233_v56 = vmul.f32 %v6222_v27, %v6199_v25  ;;  %v6237_v37 = vmul.f32 %v6227_v22, %v6199_v25 }
 0x1a3   : > { %12246 = vst [vmem:[#allocation78_spill] sm:$0xff] %v6184_v24 }
 0x1a4   : > { %12247 = vst [vmem:[#allocation82_spill] sm:$0xff] %v6191_v1 }
 0x1a5   : > { %12248 = vst [vmem:[#allocation83_spill] sm:$0xff] %v6199_v25 }
 0x1a6   : > { %12249 = vst [vmem:[#allocation84_spill] sm:$0xff] %v6222_v27 }
 0x1a7   : > { %1209 = vrot.lane.b32.xlu1 %v6184_v24, %s4790_s15  ;;  %1217 = vrot.lane.b32.xlu2 %v6191_v1, %s4790_s15  ;;  %12250 = vst [vmem:[#allocation50_spill] sm:$0xff] %v6227_v22 }
 0x1a8   : > { %12251 = vst [vmem:[#allocation51_spill] sm:$0xff] %v6233_v56  ;;  %v12257_v56 = vld [vmem:[#allocation16_spill] sm:$0xff] }
 0x1a9   : > { %12252 = vst [vmem:[#allocation53_spill] sm:$0xff] %v6237_v37  ;;  %v6261_v37 = vmul.f32 %v6061_v49, %v12257_v56 }
 0x1aa   : > { %1363 = vrot.lane.b32.xlu0 %v6162_v17, %s4791_s16  ;;  %v6249_v17 = vmul.f32 %v6066_v47, %v12253_v28  ;;  %12295 = vst [vmem:[#allocation13_spill] sm:$0xff] %v6411_v30 }
 0x1ab   : > { %12259 = vst [vmem:[#allocation80_spill] sm:$0xff] %v6261_v37 }
 0x1ac   : > { %12255 = vst [vmem:[#allocation68_spill] sm:$0xff] %v6249_v17  ;;  %v12302_v17 = vld [vmem:[#allocation99_spill] sm:$0xff] }
 0x1ad   : > { %12296 = vst [vmem:[#allocation16_spill] sm:$0xff] %v6415_v61 }
 0x1af   : > { %1215 = vrot.lane.b32.xlu1 %v6199_v25, %s4790_s15  ;;  %1367 = vrot.lane.b32.xlu2 %v6142_v53, %s4791_s16  ;;  %v12262_v53 = vld [vmem:[#allocation11_spill] sm:$0xff] }
 0x1b0   : > { %v6277_v22 = vmul.f32 %v6061_v49, %v12262_v53  ;;  %v6281_v27 = vmul.f32 %v6066_v47, %v12262_v53 }
 0x1b2   : > { %1369 = vrot.lane.b32.xlu0 %v6184_v24, %s4791_s16  ;;  %v6245_v24 = vmul.f32 %v6061_v49, %v12253_v28  ;;  %12264 = vst [vmem:[#allocation70_spill] sm:$0xff] %v6277_v22 }
 0x1b3   : > { %12265 = vst [vmem:[#allocation75_spill] sm:$0xff] %v6281_v27 }
 0x1b4   : > { %12254 = vst [vmem:[#allocation54_spill] sm:$0xff] %v6245_v24 }
 0x1b7   : > { %1365 = vrot.lane.b32.xlu1 %v6138_v59, %s4791_s16  ;;  %1373 = vrot.lane.b32.xlu2 %v6172_v40, %s4791_s16  ;;  %v6265_v40 = vmul.f32 %v6066_v47, %v12257_v56  ;;  %v6285_v59 = vmul.f32 %v6071_v29, %v12262_v53 }
 0x1b9   : > { %12260 = vst [vmem:[#allocation81_spill] sm:$0xff] %v6265_v40 }
 0x1ba   : > { %1375 = vrot.lane.b32.xlu0 %v6199_v25, %s4791_s16  ;;  %v6257_v25 = vmul.f32 %v6056_v0, %v12257_v56  ;;  %12266 = vst [vmem:[#allocation30_spill] sm:$0xff] %v6285_v59  ;;  %v12272_v59 = vld [vmem:[#allocation14_spill] sm:$0xff] }
 0x1bb   : > { %v6313_v40 = vmul.f32 %v6061_v49, %v12272_v59 }
 0x1bc   : > { %12258 = vst [vmem:[#allocation79_spill] sm:$0xff] %v6257_v25 }
 0x1bd   : > { %12274 = vst [vmem:[#allocation15_spill] sm:$0xff] %v6313_v40 }
 0x1bf   : > { %1371 = vrot.lane.b32.xlu1 %v6168_v6, %s4791_s16  ;;  %1451 = vrot.lane.b32.xlu2 %v6115_v42, %s4790_s15  ;;  %v6269_v6 = vmul.f32 %v6071_v29, %v12257_v56  ;;  %v12267_v56 = vld [vmem:[#allocation12_spill] sm:$0xff] }
 0x1c0   : > { %v6297_v22 = vmul.f32 %v6061_v49, %v12267_v56  ;;  %v6301_v27 = vmul.f32 %v6066_v47, %v12267_v56 }
 0x1c1   : > { %12261 = vst [vmem:[#allocation85_spill] sm:$0xff] %v6269_v6  ;;  %v6309_v6 = vmul.f32 %v6056_v0, %v12272_v59 }
 0x1c2   : > { %1453 = vrot.lane.b32.xlu0 %v6119_v2, %s4790_s15  ;;  %12269 = vst [vmem:[#allocation42_spill] sm:$0xff] %v6297_v22  ;;  %v6321_v22 = vmul.f32 %v6071_v29, %v12272_v59 }
 0x1c3   : > { %12270 = vst [vmem:[#allocation43_spill] sm:$0xff] %v6301_v27 }
 0x1c4   : > { %12273 = vst [vmem:[#allocation20_spill] sm:$0xff] %v6309_v6  ;;  %v12279_v6 = vld [vmem:[#allocation18_spill] sm:$0xff] }
 0x1c5   : > { %12276 = vst [vmem:[#allocation21_spill] sm:$0xff] %v6321_v22  ;;  %v6333_v27 = vmul.f32 %v6056_v0, %v12279_v6  ;;  %v6337_v40 = vmul.f32 %v6061_v49, %v12279_v6 }
 0x1c7   : > { %1377 = vrot.lane.b32.xlu1 %v6191_v1, %s4791_s16  ;;  %v6253_v1 = vmul.f32 %v6071_v29, %v12253_v28  ;;  %v6273_v28 = vmul.f32 %v6056_v0, %v12262_v53  ;;  %1457 = vrot.lane.b32.xlu2 %v6130_v41, %s4790_s15  ;;  %v6305_v53 = vmul.f32 %v6071_v29, %v12267_v56  ;;  %v12299_v41 = vld [vmem:[#allocation102_spill] sm:$0xff] }
 0x1c8   : > { %12280 = vst [vmem:[#allocation10_spill] sm:$0xff] %v6333_v27  ;;  %v927_v61 = vmul.f32 %v6023_v43, %v12299_v41 }
 0x1c9   : > { %12256 = vst [vmem:[#allocation69_spill] sm:$0xff] %v6253_v1 }
 0x1ca   : > { %12263 = vst [vmem:[#allocation23_spill] sm:$0xff] %v6273_v28  ;;  %1459 = vrot.lane.b32.xlu0 %v6134_v46, %s4790_s15  ;;  %v6293_v28 = vmul.f32 %v6056_v0, %v12267_v56  ;;  %v6325_v56 = vmul.f32 %v6056_v0, %v12221_v62  ;;  %v6351_v0 = vmul.f32 %v6071_v29, %v12279_v6 }
 0x1cb   : > { %12271 = vst [vmem:[#allocation19_spill] sm:$0xff] %v6305_v53  ;;  %v6329_v53 = vmul.f32 %v6061_v49, %v12221_v62  ;;  %v6347_v62 = vmul.f32 %v6066_v47, %v12279_v6 }
 0x1cc   : > { %12268 = vst [vmem:[#allocation9_spill] sm:$0xff] %v6293_v28  ;;  %v6317_v28 = vmul.f32 %v6066_v47, %v12272_v59  ;;  %v12282_v59 = vld [vmem:[#allocation24_spill] sm:$0xff] }
 0x1cd   : > { %12277 = vst [vmem:[#allocation22_spill] sm:$0xff] %v6325_v56  ;;  %v803_v22 = vmul.f32 %v5996_v45, %v12282_v59  ;;  %v821_v56 = vmul.f32 %v6001_v19, %v12282_v59  ;;  %v6355_v49 = vmul.f32 %v5962_v48, %v12282_v59 }
 0x1ce   : > { %12275 = vst [vmem:[#allocation26_spill] sm:$0xff] %v6317_v28 }
 0x1cf   : > { %12278 = vst [vmem:[#allocation40_spill] sm:$0xff] %v6329_v53  ;;  %1455 = vrot.lane.b32.xlu1 %v6123_v54, %s4790_s15  ;;  %v6359_v53 = vmul.f32 %v5967_v39, %v12282_v59  ;;  %v6379_v59 = vmul.f32 %v5996_v45, %v12206_v12  ;;  %1463 = vrot.lane.b32.xlu2 %v6176_v16, %s4790_s15 }
 0x1d0   : > { %12281 = vst [vmem:[#allocation17_spill] sm:$0xff] %v6337_v40  ;;  %v12285_v40 = vld [vmem:[#allocation25_spill] sm:$0xff]  ;;  %v6419_v16 = vmul.f32 %v5967_v39, %v12293_v3 }
 0x1d1   : > { %12283 = vst [vmem:[#allocation29_spill] sm:$0xff] %v6347_v62  ;;  %v6363_v27 = vmul.f32 %v5996_v45, %v12285_v40  ;;  %v6367_v47 = vmul.f32 %v6001_v19, %v12285_v40  ;;  %v6371_v29 = vmul.f32 %v5962_v48, %v12285_v40  ;;  %v6375_v6 = vmul.f32 %v5967_v39, %v12285_v40  ;;  %v12291_v62 = vld [vmem:[#allocation34_spill] sm:$0xff] }
 0x1d2   : > { %12284 = vst [vmem:[#allocation28_spill] sm:$0xff] %v6351_v0  ;;  %v6383_v0 = vmul.f32 %v6001_v19, %v12206_v12  ;;  %v804_v28 = vmul.f32 %v5996_v45, %v12291_v62  ;;  %v822_v37 = vmul.f32 %v6001_v19, %v12291_v62  ;;  %v840_v25 = vmul.f32 %v5962_v48, %v12291_v62 }
 0x1d3   : > { %12286 = vst [vmem:[#allocation33_spill] sm:$0xff] %v6367_v47  ;;  %v858_v40 = vmul.f32 %v5967_v39, %v12291_v62  ;;  %v841_v12 = vmul.f32 %v5962_v48, %v12292_v58  ;;  %1465 = vrot.lane.b32.xlu0 %v6146_v20, %s4790_s15  ;;  %v6407_v62 = vmul.f32 %v5996_v45, %v12293_v3  ;;  %v12298_v20 = vld [vmem:[#allocation52_spill] sm:$0xff] }
 0x1d4   : > { %12287 = vst [vmem:[#allocation32_spill] sm:$0xff] %v6371_v29  ;;  %v810_v50 = vmul.f32 %v5996_v45, %v12298_v20  ;;  %v846_v30 = vmul.f32 %v5962_v48, %v12298_v20  ;;  %v864_v21 = vmul.f32 %v5967_v39, %v12298_v20  ;;  %v945_v3 = vmul.f32 %v6006_v60, %v12299_v41  ;;  %v12300_v45 = vld [vmem:[#allocation97_spill] sm:$0xff] }
 0x1d5   : > { %12288 = vst [vmem:[#allocation31_spill] sm:$0xff] %v6375_v6  ;;  %v915_v48 = vmul.f32 %v6018_v31, %v5883_v63  ;;  %v848_v24 = vadd.f32 %v840_v25, %v12302_v17  ;;  %v951_v6 = vmul.f32 %v6006_v60, %v5883_v63 }
 0x1d6   : > { %12289 = vst [vmem:[#allocation35_spill] sm:$0xff] %v6379_v59  ;;  %v823_v59 = vmul.f32 %v6001_v19, %v12292_v58  ;;  %v854_v17 = vadd.f32 %v846_v30, %v5816_v9  ;;  %v872_v25 = vadd.f32 %v864_v21, %v5819_v34  ;;  %v811_v9 = vadd.f32 %v803_v22, %v5858_v33  ;;  %v6479_v34 = vld [vmem:[%s11726_s3 + $0x8] ss:$0 sm:$0xff]  ;;  %v12304_v30 = vld [vmem:[#allocation64_spill] sm:$0xff] }
 0x1d7   : > { %12290 = vst [vmem:[#allocation37_spill] sm:$0xff] %v6383_v0  ;;  %v859_v0 = vmul.f32 %v5967_v39, %v12292_v58  ;;  %v828_v58 = vmul.f32 %v6001_v19, %v12298_v20  ;;  %1461 = vrot.lane.b32.xlu1 %v6154_v32, %s4790_s15  ;;  %v812_v19 = vadd.f32 %v804_v28, %v12300_v45  ;;  %v12301_v20 = vld [vmem:[#allocation98_spill] sm:$0xff]  ;;  %v12303_v28 = vld [vmem:[#allocation100_spill] sm:$0xff] }
 0x1d8   : > { %12294 = vst [vmem:[#allocation36_spill] sm:$0xff] %v6407_v62  ;;  %v909_v62 = vmul.f32 %v6018_v31, %v12299_v41  ;;  %v933_v39 = vmul.f32 %v6023_v43, %v5883_v63  ;;  %v830_v1 = vadd.f32 %v822_v37, %v12301_v20  ;;  %v866_v45 = vadd.f32 %v858_v40, %v12303_v28  ;;  %v12307_v28 = vld [vmem:[#allocation56_spill] sm:$0xff] }
 0x1d9   : > { %12297 = vst [vmem:[#allocation11_spill] sm:$0xff] %v6419_v16  ;;  %v963_v16 = vmul.f32 %v6011_v11, %v12299_v41  ;;  %v818_v41 = vadd.f32 %v810_v50, %v5810_v8  ;;  %v836_v36 = vadd.f32 %v828_v58, %v5813_v23  ;;  %v6457_v52 = vadd.f32 %v945_v3, %v848_v24 }
 0x1da   : > { %v6451_v29 = vadd.f32 %v909_v62, %v812_v19  ;;  %v6455_v47 = vadd.f32 %v927_v61, %v830_v1  ;;  %1613 = vrot.lane.b32.xlu2 %v6119_v2, %s4791_s16  ;;  %v6471_v8 = vadd.f32 %v951_v6, %v854_v17  ;;  %v6473_v23 = vadd.f32 %v969_v57, %v872_v25  ;;  %v12305_v19 = vld [vmem:[#allocation61_spill] sm:$0xff] }
 0x1db   : > { %v6461_v37 = vadd.f32 %v963_v16, %v866_v45  ;;  %v6463_v20 = vadd.f32 %v915_v48, %v818_v41  ;;  %v6465_v63 = vadd.f32 %v933_v39, %v836_v36  ;;  %1615 = vrot.lane.b32.xlu0 %v6123_v54, %s4791_s16  ;;  %v910_v21 = vmul.f32 %v6018_v31, %v5793_v10  ;;  %v6487_v36 = vld [vmem:[%s11726_s3 + $0x2c] ss:$0 sm:$0xff] }
 0x1dc   : > { %v829_v50 = vadd.f32 %v821_v56, %v5861_v13  ;;  %v928_v57 = vmul.f32 %v6023_v43, %v5793_v10  ;;  %v946_v33 = vmul.f32 %v6006_v60, %v5793_v10  ;;  %v964_v61 = vmul.f32 %v6011_v11, %v5793_v10  ;;  %v12306_v48 = vld [vmem:[#allocation33_spill] sm:$0xff]  ;;  %v12310_v17 = vld [vmem:[#allocation31_spill] sm:$0xff] }
 0x1dd   : > { %v908_v16 = vmul.f32 %v6018_v31, %v12304_v30  ;;  %v926_v13 = vmul.f32 %v6023_v43, %v12304_v30  ;;  %v944_v24 = vmul.f32 %v6006_v60, %v12304_v30  ;;  %v813_v1 = vadd.f32 %v805_v55, %v5902_v18  ;;  %v12309_v41 = vld [vmem:[#allocation57_spill] sm:$0xff] }
 0x1de   : > { %v962_v22 = vmul.f32 %v6011_v11, %v12304_v30  ;;  %v831_v56 = vadd.f32 %v823_v59, %v5905_v51  ;;  %v849_v10 = vadd.f32 %v841_v12, %v5908_v5  ;;  %v867_v6 = vadd.f32 %v859_v0, %v5911_v4 }
 0x1df   : > { %1611 = vrot.lane.b32.xlu1 %v6115_v42, %s4791_s16  ;;  %v847_v40 = vadd.f32 %v6355_v49, %v5864_v38  ;;  %v865_v62 = vadd.f32 %v6359_v53, %v5867_v35  ;;  %v6515_v18 = vmul.f32 %v6479_v34, %v5941_v44  ;;  %v918_v55 = vadd.f32 %v910_v21, %v813_v1  ;;  %v12316_v1 = vld [vmem:[#allocation58_spill] sm:$0xff] }
 0x1e0   : > { %v6519_v58 = vmul.f32 %v6487_v36, %v5941_v44  ;;  %v936_v51 = vadd.f32 %v928_v57, %v831_v56  ;;  %v954_v59 = vadd.f32 %v946_v33, %v849_v10  ;;  %v972_v5 = vadd.f32 %v964_v61, %v867_v6  ;;  %v12317_v10 = vld [vmem:[#allocation63_spill] sm:$0xff]  ;;  %v12318_v6 = vld [vmem:[#allocation36_spill] sm:$0xff] }
 0x1e1   : > { %v916_v12 = vadd.f32 %v908_v16, %v811_v9  ;;  %v934_v4 = vadd.f32 %v926_v13, %v829_v50  ;;  %v6523_v38 = vmul.f32 %v6098_v14, %v5941_v44  ;;  %v6527_v35 = vmul.f32 %v6103_v15, %v5941_v44  ;;  %v12308_v44 = vld [vmem:[#allocation32_spill] sm:$0xff]  ;;  %v12311_v9 = vld [vmem:[#allocation54_spill] sm:$0xff]  ;;  %v12313_v50 = vld [vmem:[#allocation69_spill] sm:$0xff] }
 0x1e2   : > { %v952_v53 = vadd.f32 %v944_v24, %v847_v40  ;;  %v970_v0 = vadd.f32 %v962_v22, %v865_v62  ;;  %v814_v49 = vadd.f32 %v6363_v27, %v5922_v26  ;;  %1619 = vrot.lane.b32.xlu2 %v6134_v46, %s4791_s16  ;;  %v6536_v3 = vadd.f32 %v6241_v7, %v918_v55  ;;  %v12312_v27 = vld [vmem:[#allocation68_spill] sm:$0xff]  ;;  %v12314_v7 = vld [vmem:[#allocation65_spill] sm:$0xff] }
 0x1e3   : > { %1621 = vrot.lane.b32.xlu0 %v6154_v32, %s4791_s16  ;;  %v832_v39 = vadd.f32 %v12306_v48, %v12305_v19  ;;  %v850_v45 = vadd.f32 %v12308_v44, %v12307_v28  ;;  %v868_v25 = vadd.f32 %v12310_v17, %v12309_v41  ;;  %v6545_v26 = vadd.f32 %v12311_v9, %v936_v51  ;;  %v12315_v24 = vld [vmem:[#allocation49_spill] sm:$0xff]  ;;  %v12321_v48 = vld [vmem:[#allocation67_spill] sm:$0xff]  ;;  %v12322_v28 = vld [vmem:[#allocation16_spill] sm:$0xff] }
 0x1e4   : > { %v6548_v21 = vadd.f32 %v12312_v27, %v954_v59  ;;  %v6551_v57 = vadd.f32 %v12313_v50, %v972_v5  ;;  %v913_v33 = vmul.f32 %v6018_v31, %v12314_v7  ;;  %v931_v61 = vmul.f32 %v6023_v43, %v12314_v7  ;;  %v12319_v59 = vld [vmem:[#allocation66_spill] sm:$0xff]  ;;  %v12320_v5 = vld [vmem:[#allocation13_spill] sm:$0xff]  ;;  %v12324_v27 = vld [vmem:[#allocation44_spill] sm:$0xff] }
 0x1e5   : > { %v949_v30 = vmul.f32 %v6006_v60, %v12314_v7  ;;  %v11833_v16 = vrot.slane %v6115_v42, 1  ;;  %v11834_v13 = vrot.slane %v6119_v2, 1  ;;  %v911_v22 = vmul.f32 %v6018_v31, %v12316_v1  ;;  %v12323_v41 = vld [vmem:[#allocation73_spill] sm:$0xff]  ;;  %v12325_v50 = vld [vmem:[#allocation11_spill] sm:$0xff] }
 0x1e6   : > { %v929_v56 = vmul.f32 %v6023_v43, %v12316_v1  ;;  %v816_v40 = vadd.f32 %v12318_v6, %v12317_v10  ;;  %v967_v62 = vmul.f32 %v6011_v11, %v12314_v7  ;;  %v947_v55 = vmul.f32 %v6006_v60, %v12316_v1  ;;  %v12403_v6 = vld [vmem:[#allocation88_spill] sm:$0xff] }
 0x1e7   : > { %1617 = vrot.lane.b32.xlu1 %v12315_v24, %s4791_s16  ;;  %v965_v51 = vmul.f32 %v6011_v11, %v12316_v1  ;;  %v834_v19 = vadd.f32 %v12320_v5, %v12319_v59  ;;  %v852_v44 = vadd.f32 %v12322_v28, %v12321_v48  ;;  %v6581_v17 = vmul.f32 %v6479_v34, %v12323_v41  ;;  %v12331_v28 = vld [vmem:[#allocation45_spill] sm:$0xff] }
 0x1e8   : > { %v6585_v9 = vmul.f32 %v6487_v36, %v12323_v41  ;;  %v870_v60 = vadd.f32 %v12325_v50, %v12324_v27  ;;  %v921_v7 = vadd.f32 %v913_v33, %v816_v40  ;;  %v6591_v11 = vmul.f32 %v6098_v14, %v12323_v41  ;;  %v12330_v40 = vld [vmem:[#allocation86_spill] sm:$0xff]  ;;  %v12333_v50 = vld [vmem:[#allocation79_spill] sm:$0xff] }
 0x1e9   : > { %v939_v1 = vadd.f32 %v931_v61, %v834_v19  ;;  %v957_v10 = vadd.f32 %v949_v30, %v852_v44  ;;  %v6599_v59 = vsel %vm881_vm1, %v11833_v16, %v11834_v13  ;;  %v919_v5 = vadd.f32 %v911_v22, %v814_v49  ;;  %v12332_v44 = vld [vmem:[#allocation35_spill] sm:$0xff]  ;;  %v12335_v22 = vld [vmem:[#allocation37_spill] sm:$0xff]  ;;  %v12336_v13 = vld [vmem:[#allocation60_spill] sm:$0xff] }
 0x1ea   : > { %12326 = vst [vmem:[#allocation12_spill] sm:$0xff] %v6591_v11  ;;  %v6603_v48 = vmul.f32 %v6103_v15, %v12323_v41  ;;  %v975_v33 = vadd.f32 %v967_v62, %v870_v60  ;;  %1625 = vrot.lane.b32.xlu2 %v12330_v40, %s4791_s16  ;;  %v937_v61 = vadd.f32 %v929_v56, %v832_v39  ;;  %v12334_v49 = vld [vmem:[#allocation71_spill] sm:$0xff]  ;;  %v12338_v39 = vld [vmem:[#allocation81_spill] sm:$0xff]  ;;  %v12350_v56 = vld [vmem:[#allocation42_spill] sm:$0xff] }
 0x1eb   : > { %12328 = vst [vmem:[#allocation14_spill] sm:$0xff] %v6599_v59  ;;  %1715 = vrot.lane.b32.xlu0 %v6599_v59, %s4790_s15  ;;  %v955_v30 = vadd.f32 %v947_v55, %v850_v45  ;;  %v973_v19 = vadd.f32 %v965_v51, %v868_v25  ;;  %v817_v27 = vadd.f32 %v12332_v44, %v12331_v28  ;;  %v1702_v25 = vrot.slane %v12315_v24, 1  ;;  %v12339_v55 = vld [vmem:[#allocation96_spill] sm:$0xff]  ;;  %v12340_v51 = vld [vmem:[#allocation85_spill] sm:$0xff]  ;;  %v12343_v44 = vld [vmem:[#allocation70_spill] sm:$0xff] }
 0x1ec   : > { %12329 = vst [vmem:[#allocation18_spill] sm:$0xff] %v6603_v48  ;;  %v6612_v16 = vadd.f32 %v12333_v50, %v921_v7  ;;  %v835_v41 = vadd.f32 %v12335_v22, %v12334_v49  ;;  %v914_v62 = vmul.f32 %v6018_v31, %v12336_v13  ;;  %v932_v60 = vmul.f32 %v6023_v43, %v12336_v13  ;;  %v12337_v48 = vld [vmem:[#allocation80_spill] sm:$0xff]  ;;  %v12342_v31 = vld [vmem:[#allocation23_spill] sm:$0xff] }
 0x1ed   : > { %v6621_v11 = vadd.f32 %v12337_v48, %v939_v1  ;;  %v6624_v45 = vadd.f32 %v12338_v39, %v957_v10  ;;  %v6631_v7 = vadd.f32 %v12340_v51, %v975_v33  ;;  %v988_v28 = vadd.f32 %v12342_v31, %v916_v12  ;;  %v12344_v13 = vld [vmem:[#allocation59_spill] sm:$0xff]  ;;  %v12348_v39 = vld [vmem:[#allocation30_spill] sm:$0xff]  ;;  %v12349_v31 = vld [vmem:[#allocation9_spill] sm:$0xff] }
 0x1ee   : > { %v1006_v43 = vadd.f32 %v12343_v44, %v934_v4  ;;  %v1068_v1 = vmul.f32 %v6479_v34, %v12344_v13  ;;  %v1086_v10 = vmul.f32 %v6487_v36, %v12344_v13  ;;  %v1104_v48 = vmul.f32 %v6098_v14, %v12344_v13  ;;  %v12347_v12 = vld [vmem:[#allocation75_spill] sm:$0xff] }
 0x1ef   : > { %1623 = vrot.lane.b32.xlu1 %v12339_v55, %s4791_s16  ;;  %12341 = vst [vmem:[#allocation24_spill] sm:$0xff] %v6631_v7  ;;  %v1122_v50 = vmul.f32 %v6103_v15, %v12344_v13  ;;  %v1701_v49 = vrot.slane %v6123_v54, 1  ;;  %v6644_v33 = vadd.f32 %v914_v62, %v817_v27  ;;  %v6646_v22 = vadd.f32 %v932_v60, %v835_v41 }
 0x1f0   : > { %v1024_v4 = vadd.f32 %v12347_v12, %v952_v53  ;;  %v1042_v51 = vadd.f32 %v12348_v39, %v970_v0  ;;  %v989_v44 = vadd.f32 %v12349_v31, %v6451_v29  ;;  %v1007_v24 = vadd.f32 %v12350_v56, %v6455_v47  ;;  %v12354_v53 = vld [vmem:[#allocation43_spill] sm:$0xff]  ;;  %v12358_v56 = vld [vmem:[#allocation62_spill] sm:$0xff]  ;;  %v1206_v12 = vpop.permute.xlu2 %1205 }
 0x1f1   : > { %12345 = vst [vmem:[#allocation25_spill] sm:$0xff] %v6644_v33  ;;  %v6656_v7 = vsel %vm881_vm1, %v1701_v49, %v1702_v25  ;;  %v12352_v13 = vrot.slane %v6134_v46, 1  ;;  %v6664_v41 = vadd.f32 %v1068_v1, %v988_v28  ;;  %v1025_v0 = vadd.f32 %v12354_v53, %v6457_v52  ;;  %v12355_v29 = vld [vmem:[#allocation19_spill] sm:$0xff] }
 0x1f2   : > { %12346 = vst [vmem:[#allocation34_spill] sm:$0xff] %v6646_v22  ;;  %v1043_v62 = vadd.f32 %v12355_v29, %v6461_v37  ;;  %1719 = vrot.lane.b32.xlu2 %v6656_v7, %s4790_s15  ;;  %v6674_v47 = vadd.f32 %v1086_v10, %v1006_v43  ;;  %v6676_v60 = vadd.f32 %v1104_v48, %v1024_v4  ;;  %v12359_v43 = vrot.slane %v6119_v2, 1  ;;  %v12361_v48 = vld [vmem:[#allocation20_spill] sm:$0xff]  ;;  %v12362_v4 = vld [vmem:[#allocation39_spill] sm:$0xff]  ;;  %v12366_v22 = vld [vmem:[#allocation21_spill] sm:$0xff] }
 0x1f3   : > { %12351 = vst [vmem:[#allocation41_spill] sm:$0xff] %v6656_v7  ;;  %v6662_v27 = vsel %vm881_vm1, %v1702_v25, %v12352_v13  ;;  %v6678_v25 = vadd.f32 %v1122_v50, %v1042_v51  ;;  %v1069_v28 = vmul.f32 %v6479_v34, %v12358_v56  ;;  %v1087_v52 = vmul.f32 %v6487_v36, %v12358_v56  ;;  %v12363_v13 = vld [vmem:[#allocation15_spill] sm:$0xff] }
 0x1f4   : > { %12353 = vst [vmem:[#allocation55_spill] sm:$0xff] %v6662_v27  ;;  %1721 = vrot.lane.b32.xlu0 %v6662_v27, %s4790_s15  ;;  %v1105_v37 = vmul.f32 %v6098_v14, %v12358_v56  ;;  %v1123_v1 = vmul.f32 %v6103_v15, %v12358_v56  ;;  %v6692_v10 = vsel %vm881_vm1, %v12359_v43, %v1701_v49  ;;  %v1705_v51 = vrot.slane %v12339_v55, 1  ;;  %v12364_v56 = vld [vmem:[#allocation26_spill] sm:$0xff] }
 0x1f5   : > { %12356 = vst [vmem:[#allocation52_spill] sm:$0xff] %v6676_v60  ;;  %v991_v50 = vadd.f32 %v12361_v48, %v919_v5  ;;  %v1071_v39 = vmul.f32 %v6479_v34, %v12362_v4  ;;  %v1009_v53 = vadd.f32 %v12363_v13, %v937_v61  ;;  %v1089_v29 = vmul.f32 %v6487_v36, %v12362_v4  ;;  %v12365_v48 = vld [vmem:[#allocation74_spill] sm:$0xff] }
 0x1f6   : > { %12357 = vst [vmem:[#allocation102_spill] sm:$0xff] %v6678_v25  ;;  %v1107_v49 = vmul.f32 %v6098_v14, %v12362_v4  ;;  %v1125_v5 = vmul.f32 %v6103_v15, %v12362_v4  ;;  %v1027_v43 = vadd.f32 %v12364_v56, %v955_v30  ;;  %v1072_v54 = vmul.f32 %v6479_v34, %v12365_v48  ;;  %v6720_v30 = vld [vmem:[%s11726_s3 + $0x9] ss:$0 sm:$0xff]  ;;  %v6725_v4 = vld [vmem:[%s11726_s3 + $0x2d] ss:$0 sm:$0xff] }
 0x1f7   : > { %12360 = vst [vmem:[#allocation97_spill] sm:$0xff] %v6692_v10  ;;  %1717 = vrot.lane.b32.xlu1 %v6692_v10, %s4790_s15  ;;  %v1090_v31 = vmul.f32 %v6487_v36, %v12365_v48  ;;  %v1704_v2 = vrot.slane %v6154_v32, 1  ;;  %v1077_v61 = vadd.f32 %v1069_v28, %v989_v44  ;;  %v1095_v13 = vadd.f32 %v1087_v52, %v1007_v24  ;;  %v6746_v28 = vld [vmem:[%s11726_s3 + $0x51] ss:$0 sm:$0xff]  ;;  %v6751_v52 = vld [vmem:[%s11726_s3 + $0x75] ss:$0 sm:$0xff] }
 0x1f8   : > { %v1113_v55 = vadd.f32 %v1105_v37, %v1025_v0  ;;  %v1045_v33 = vadd.f32 %v12366_v22, %v973_v19  ;;  %v1131_v25 = vadd.f32 %v1123_v1, %v1043_v62  ;;  %v6715_v60 = vadd.f32 %v1071_v39, %v991_v50  ;;  %v12372_v37 = vld [vmem:[#allocation90_spill] sm:$0xff] }
 0x1f9   : > { %v6729_v44 = vsel %vm881_vm1, %v1704_v2, %v1705_v51  ;;  %v12368_v24 = vrot.slane %v12330_v40, 1  ;;  %v6737_v22 = vadd.f32 %v1089_v29, %v1009_v53  ;;  %v6739_v0 = vadd.f32 %v1107_v49, %v1027_v43  ;;  %v12374_v53 = vld [vmem:[#allocation101_spill] sm:$0xff]  ;;  %v12377_v43 = vld [vmem:[#allocation10_spill] sm:$0xff] }
 0x1fa   : > { %12367 = vst [vmem:[#allocation98_spill] sm:$0xff] %v6715_v60  ;;  %v6741_v62 = vadd.f32 %v1125_v5, %v1045_v33  ;;  %1725 = vrot.lane.b32.xlu2 %v6729_v44, %s4790_s15  ;;  %v6758_v1 = vadd.f32 %v1072_v54, %v12372_v37  ;;  %v12373_v33 = vld [vmem:[#allocation91_spill] sm:$0xff]  ;;  %v1108_v39 = vmul.f32 %v6098_v14, %v12365_v48  ;;  %v1212_v54 = vpop.permute.xlu2 %1211  ;;  %v12375_v56 = vrot.slane %v6134_v46, 1 }
 0x1fb   : > { %v6735_v19 = vsel %vm881_vm1, %v1705_v51, %v12368_v24  ;;  %12369 = vst [vmem:[#allocation99_spill] sm:$0xff] %v6737_v22  ;;  %v6761_v50 = vadd.f32 %v1090_v31, %v12373_v33  ;;  %v1126_v51 = vmul.f32 %v6103_v15, %v12365_v48  ;;  %v1075_v29 = vmul.f32 %v6479_v34, %v12374_v53  ;;  %v12378_v48 = vld [vmem:[#allocation17_spill] sm:$0xff] }
 0x1fc   : > { %12370 = vst [vmem:[#allocation100_spill] sm:$0xff] %v6739_v0  ;;  %1727 = vrot.lane.b32.xlu0 %v6735_v19, %s4790_s15  ;;  %v1093_v49 = vmul.f32 %v6487_v36, %v12374_v53  ;;  %v1111_v5 = vmul.f32 %v6098_v14, %v12374_v53  ;;  %v6777_v31 = vsel %vm881_vm1, %v12375_v56, %v1704_v2  ;;  %v12379_v14 = vld [vmem:[#allocation29_spill] sm:$0xff]  ;;  %v12382_v0 = vld [vmem:[#allocation72_spill] sm:$0xff] }
 0x1fd   : > { %12371 = vst [vmem:[#allocation64_spill] sm:$0xff] %v6741_v62  ;;  %v995_v24 = vadd.f32 %v12377_v43, %v6463_v20  ;;  %v1013_v37 = vadd.f32 %v12378_v48, %v6465_v63  ;;  %v1129_v33 = vmul.f32 %v6103_v15, %v12374_v53  ;;  %v1222_v32 = vmul.f32 %v6720_v30, %v1206_v12  ;;  %v12380_v43 = vld [vmem:[#allocation93_spill] sm:$0xff]  ;;  %v12381_v63 = vld [vmem:[#allocation94_spill] sm:$0xff]  ;;  %v12384_v53 = vld [vmem:[#allocation28_spill] sm:$0xff] }
 0x1fe   : > { %12376 = vst [vmem:[#allocation61_spill] sm:$0xff] %v6777_v31  ;;  %v1031_v46 = vadd.f32 %v12379_v14, %v6471_v8  ;;  %v1240_v2 = vmul.f32 %v6725_v4, %v1206_v12  ;;  %v1258_v56 = vmul.f32 %v6746_v28, %v1206_v12  ;;  %v1276_v20 = vmul.f32 %v6751_v52, %v1206_v12  ;;  %v6804_v8 = vld [vmem:[%s11726_s3 + $0xa] ss:$0 sm:$0xff] }
 0x1ff   : > { %1723 = vrot.lane.b32.xlu1 %v6777_v31, %s4790_s15  ;;  %v1116_v62 = vadd.f32 %v1108_v39, %v12380_v43  ;;  %v1134_v48 = vadd.f32 %v1126_v51, %v12381_v63  ;;  %v6797_v15 = vmul.f32 %v6479_v34, %v12382_v0  ;;  %v1049_v22 = vadd.f32 %v12384_v53, %v6473_v23  ;;  %v6819_v34 = vld [vmem:[%s11726_s3 + $0x2e] ss:$0 sm:$0xff] }
 0x200   : > { %v6808_v14 = vmul.f32 %v6487_v36, %v12382_v0  ;;  %v6810_v12 = vadd.f32 %v1075_v29, %v995_v24  ;;  %v6812_v39 = vadd.f32 %v1093_v49, %v1013_v37  ;;  %v6814_v51 = vadd.f32 %v1111_v5, %v1031_v46  ;;  %v12392_v5 = vld [vmem:[#allocation12_spill] sm:$0xff] }
 0x201   : > { %12383 = vst [vmem:[#allocation33_spill] sm:$0xff] %v6797_v15  ;;  %v6821_v23 = vadd.f32 %v1129_v33, %v1049_v22  ;;  %v1230_v43 = vadd.f32 %v1222_v32, %v1077_v61  ;;  %v6825_v63 = vadd.f32 %v6515_v18, %v6536_v3  ;;  %v6829_v36 = vadd.f32 %v6519_v58, %v6545_v26  ;;  %v12386_v58 = vld [vmem:[#allocation76_spill] sm:$0xff]  ;;  %v12394_v33 = vld [vmem:[#allocation18_spill] sm:$0xff] }
 0x202   : > { %12385 = vst [vmem:[#allocation56_spill] sm:$0xff] %v6808_v14  ;;  %v1248_v0 = vadd.f32 %v1240_v2, %v1095_v13  ;;  %v1266_v29 = vadd.f32 %v1258_v56, %v1113_v55  ;;  %v1284_v46 = vadd.f32 %v1276_v20, %v1131_v25  ;;  %1875 = vrot.lane.b32.xlu2 %v6599_v59, %s4791_s16  ;;  %v1218_v55 = vpop.permute.xlu2 %1217  ;;  %v12387_v25 = vrot.slane %v6115_v42, 1  ;;  %v12393_v37 = vld [vmem:[#allocation24_spill] sm:$0xff] }
 0x203   : > { %v1114_v32 = vadd.f32 %v6523_v38, %v6548_v21  ;;  %v1132_v18 = vadd.f32 %v6527_v35, %v6551_v57  ;;  %v6841_v3 = vadd.f32 %v6581_v17, %v6612_v16  ;;  %v1294_v26 = vmul.f32 %v6804_v8, %v12386_v58  ;;  %v12389_v35 = vld [vmem:[#allocation84_spill] sm:$0xff]  ;;  %v12390_v57 = vld [vmem:[#allocation50_spill] sm:$0xff]  ;;  %v12391_v17 = vld [vmem:[#allocation77_spill] sm:$0xff] }
 0x204   : > { %1877 = vrot.lane.b32.xlu0 %v6692_v10, %s4791_s16  ;;  %v12388_v61 = vrot.slane %v12330_v40, 1  ;;  %v1312_v38 = vmul.f32 %v6819_v34, %v12386_v58  ;;  %v1330_v21 = vmul.f32 %v12389_v35, %v12386_v58  ;;  %v1348_v16 = vmul.f32 %v12390_v57, %v12386_v58 }
 0x205   : > { %v1295_v22 = vmul.f32 %v6804_v8, %v12391_v17  ;;  %v6865_v49 = vadd.f32 %v6585_v9, %v6621_v11  ;;  %v6869_v24 = vadd.f32 %v12392_v5, %v6624_v45  ;;  %v6873_v2 = vadd.f32 %v12394_v33, %v12393_v37 }
 0x206   : > { %v6851_v13 = vsel %vm881_vm1, %v12388_v61, %v12387_v25  ;;  %v6875_v56 = vadd.f32 %v1294_v26, %v1230_v43  ;;  %v6877_v20 = vadd.f32 %v1312_v38, %v1248_v0  ;;  %v6879_v53 = vadd.f32 %v1330_v21, %v1266_v29  ;;  %v12399_v29 = vld [vmem:[#allocation89_spill] sm:$0xff]  ;;  %v12400_v26 = vld [vmem:[#allocation95_spill] sm:$0xff] }
 0x207   : > { %1729 = vrot.lane.b32.xlu1 %v6851_v13, %s4790_s15  ;;  %v6881_v58 = vadd.f32 %v1348_v16, %v1284_v46  ;;  %v1225_v25 = vmul.f32 %v6720_v30, %v1212_v54  ;;  %v1243_v9 = vmul.f32 %v6725_v4, %v1212_v54  ;;  %v1261_v11 = vmul.f32 %v6746_v28, %v1212_v54 }
 0x208   : > { %12395 = vst [vmem:[#allocation32_spill] sm:$0xff] %v6875_v56  ;;  %v1279_v45 = vmul.f32 %v6751_v52, %v1212_v54  ;;  %v1313_v61 = vmul.f32 %v6819_v34, %v12391_v17  ;;  %v1331_v43 = vmul.f32 %v12389_v35, %v12391_v17  ;;  %v1349_v0 = vmul.f32 %v12390_v57, %v12391_v17 }
 0x209   : > { %12396 = vst [vmem:[#allocation57_spill] sm:$0xff] %v6877_v20  ;;  %v1297_v46 = vmul.f32 %v6804_v8, %v12399_v29  ;;  %v6897_v38 = vmul.f32 %v6804_v8, %v12400_v26  ;;  %v1315_v21 = vmul.f32 %v6819_v34, %v12399_v29  ;;  %v1333_v54 = vmul.f32 %v12389_v35, %v12399_v29 }
 0x20a   : > { %12397 = vst [vmem:[#allocation31_spill] sm:$0xff] %v6879_v53  ;;  %v1351_v16 = vmul.f32 %v12390_v57, %v12399_v29  ;;  %1881 = vrot.lane.b32.xlu2 %v6662_v27, %s4791_s16  ;;  %v6911_v17 = vmul.f32 %v6819_v34, %v12400_v26  ;;  %v6915_v5 = vmul.f32 %v12389_v35, %v12400_v26  ;;  %v6923_v20 = vpop.permute.xlu2 %1367 }
 0x20b   : > { %12398 = vst [vmem:[#allocation54_spill] sm:$0xff] %v6881_v58  ;;  %v6919_v37 = vmul.f32 %v12390_v57, %v12400_v26  ;;  %v1233_v33 = vadd.f32 %v1225_v25, %v6758_v1  ;;  %v1251_v29 = vadd.f32 %v1243_v9, %v6761_v50  ;;  %v1269_v58 = vadd.f32 %v1261_v11, %v1116_v62 }
 0x20c   : > { %1883 = vrot.lane.b32.xlu0 %v6777_v31, %s4791_s16  ;;  %v1287_v53 = vadd.f32 %v1279_v45, %v1134_v48  ;;  %12402 = vst [vmem:[#allocation69_spill] sm:$0xff] %v6923_v20  ;;  %v1208_v56 = vpop.permute.xlu0 %1207  ;;  %v1293_v31 = vmul.f32 %v6804_v8, %v12403_v6  ;;  %v1311_v42 = vmul.f32 %v6819_v34, %v12403_v6 }
 0x20d   : > { %12401 = vst [vmem:[#allocation68_spill] sm:$0xff] %v6919_v37  ;;  %v1329_v40 = vmul.f32 %v12389_v35, %v12403_v6  ;;  %v1347_v26 = vmul.f32 %v12390_v57, %v12403_v6  ;;  %v1228_v1 = vmul.f32 %v6720_v30, %v1218_v55  ;;  %v1246_v62 = vmul.f32 %v6725_v4, %v1218_v55 }
 0x20e   : > { %v1264_v50 = vmul.f32 %v6746_v28, %v1218_v55  ;;  %v1282_v48 = vmul.f32 %v6751_v52, %v1218_v55  ;;  %v1223_v25 = vmul.f32 %v6720_v30, %v1208_v56  ;;  %v1241_v9 = vmul.f32 %v6725_v4, %v1208_v56 }
 0x20f   : > { %1879 = vrot.lane.b32.xlu1 %v6656_v7, %s4791_s16  ;;  %v1259_v11 = vmul.f32 %v6746_v28, %v1208_v56  ;;  %v1277_v45 = vmul.f32 %v6751_v52, %v1208_v56  ;;  %v6943_v20 = vadd.f32 %v1297_v46, %v1233_v33  ;;  %v6945_v10 = vadd.f32 %v1315_v21, %v1251_v29  ;;  %v12408_v21 = vld [vmem:[#allocation52_spill] sm:$0xff] }
 0x210   : > { %v6947_v27 = vadd.f32 %v1333_v54, %v1269_v58  ;;  %v6949_v59 = vadd.f32 %v1351_v16, %v1287_v53  ;;  %v1231_v55 = vadd.f32 %v1223_v25, %v6825_v63  ;;  %v1249_v7 = vadd.f32 %v1241_v9, %v6829_v36  ;;  %v12409_v16 = vld [vmem:[#allocation102_spill] sm:$0xff]  ;;  %v7008_v25 = vld [vmem:[%s6991_s17 + $0x8] sm:$0xff] }
 0x211   : > { %v1204_v6 = vpop.permute.xlu1 %1203  ;;  %12404 = vst [vmem:[#allocation65_spill] sm:$0xff] %v6943_v20  ;;  %v1267_v14 = vadd.f32 %v1259_v11, %v1114_v32  ;;  %v1285_v15 = vadd.f32 %v1277_v45, %v1132_v18 }
 0x212   : > { %12405 = vst [vmem:[#allocation58_spill] sm:$0xff] %v6945_v10  ;;  %v1221_v60 = vmul.f32 %v6720_v30, %v1204_v6  ;;  %v1239_v37 = vmul.f32 %v6725_v4, %v1204_v6  ;;  %v1257_v56 = vmul.f32 %v6746_v28, %v1204_v6  ;;  %v1275_v46 = vmul.f32 %v6751_v52, %v1204_v6 }
 0x213   : > { %12406 = vst [vmem:[#allocation63_spill] sm:$0xff] %v6947_v27  ;;  %1887 = vrot.lane.b32.xlu2 %v6735_v19, %s4791_s16  ;;  %v6959_v58 = vadd.f32 %v1295_v22, %v1231_v55  ;;  %v6961_v53 = vadd.f32 %v1313_v61, %v1249_v7  ;;  %v6963_v63 = vadd.f32 %v1331_v43, %v1267_v14  ;;  %v6973_v22 = vpop.permute.xlu2 %1373  ;;  %v12410_v61 = vld [vmem:[#allocation82_spill] sm:$0xff] }
 0x214   : > { %12407 = vst [vmem:[#allocation36_spill] sm:$0xff] %v6949_v59  ;;  %v6965_v36 = vadd.f32 %v1349_v0, %v1285_v15  ;;  %1889 = vrot.lane.b32.xlu0 %v6851_v13, %s4791_s16  ;;  %v1229_v32 = vadd.f32 %v1221_v60, %v6664_v41  ;;  %v1247_v18 = vadd.f32 %v1239_v37, %v6674_v47  ;;  %v1214_v7 = vpop.permute.xlu0 %1213  ;;  %v7015_v55 = vld [vmem:[%s6991_s17 + $0x10] sm:$0xff] }
 0x215   : > { %v1265_v54 = vadd.f32 %v1257_v56, %v12408_v21  ;;  %v1283_v33 = vadd.f32 %v1275_v46, %v12409_v16  ;;  %v1300_v14 = vmul.f32 %v6804_v8, %v12410_v61  ;;  %v1318_v15 = vmul.f32 %v6819_v34, %v12410_v61  ;;  %v7034_v46 = vld [vmem:[%s6991_s17] sm:$0xff] }
 0x216   : > { %v1336_v43 = vmul.f32 %v12389_v35, %v12410_v61  ;;  %v1354_v41 = vmul.f32 %v12390_v57, %v12410_v61  ;;  %v1236_v47 = vadd.f32 %v1228_v1, %v6810_v12  ;;  %v1254_v60 = vadd.f32 %v1246_v62, %v6812_v39  ;;  %v12419_v16 = vld [vmem:[#allocation64_spill] sm:$0xff] }
 0x217   : > { %v1272_v0 = vadd.f32 %v1264_v50, %v6814_v51  ;;  %v1290_v37 = vadd.f32 %v1282_v48, %v6821_v23  ;;  %1885 = vrot.lane.b32.xlu1 %v6729_v44, %s4791_s16  ;;  %v1226_v29 = vmul.f32 %v6720_v30, %v1214_v7  ;;  %v1244_v12 = vmul.f32 %v6725_v4, %v1214_v7 }
 0x218   : > { %v1262_v39 = vmul.f32 %v6746_v28, %v1214_v7  ;;  %v1280_v51 = vmul.f32 %v6751_v52, %v1214_v7  ;;  %v6999_v23 = vadd.f32 %v1293_v31, %v1229_v32  ;;  %v7001_v62 = vadd.f32 %v1311_v42, %v1247_v18  ;;  %v12416_v32 = vld [vmem:[#allocation98_spill] sm:$0xff]  ;;  %v12417_v18 = vld [vmem:[#allocation99_spill] sm:$0xff] }
 0x219   : > { %v1210_v1 = vpop.permute.xlu1 %1209  ;;  %v7003_v50 = vadd.f32 %v1329_v40, %v1265_v54  ;;  %v7005_v48 = vadd.f32 %v1347_v26, %v1283_v33  ;;  %v1234_v9 = vadd.f32 %v1226_v29, %v6841_v3  ;;  %v1252_v11 = vadd.f32 %v1244_v12, %v6865_v49 }
 0x21a   : > { %v1270_v45 = vadd.f32 %v1262_v39, %v6869_v24  ;;  %v1288_v6 = vadd.f32 %v1280_v51, %v6873_v2  ;;  %v1224_v42 = vmul.f32 %v6720_v30, %v1210_v1  ;;  %v1242_v40 = vmul.f32 %v6725_v4, %v1210_v1  ;;  %v12414_v24 = vld [vmem:[#allocation68_spill] sm:$0xff]  ;;  %v12424_v51 = vld [vmem:[#allocation78_spill] sm:$0xff] }
 0x21b   : > { %v1260_v31 = vmul.f32 %v6746_v28, %v1210_v1  ;;  %v1278_v26 = vmul.f32 %v6751_v52, %v1210_v1  ;;  %v7022_v56 = vadd.f32 %v6897_v38, %v1234_v9  ;;  %v7025_v3 = vadd.f32 %v6911_v17, %v1252_v11  ;;  %1981 = vrot.lane.b32.xlu2 %v7008_v25, %s4789_s14  ;;  %v12418_v17 = vld [vmem:[#allocation100_spill] sm:$0xff]  ;;  %v7044_v33 = vpop.permute.xlu2 %1451 }
 0x21c   : > { %v7028_v49 = vadd.f32 %v6915_v5, %v1270_v45  ;;  %v7031_v2 = vadd.f32 %v12414_v24, %v1288_v6  ;;  %1983 = vrot.lane.b32.xlu0 %v7015_v55, %s4789_s14  ;;  %v1232_v38 = vadd.f32 %v1224_v42, %v12416_v32  ;;  %v1250_v21 = vadd.f32 %v1242_v40, %v12417_v18  ;;  %v7046_v7 = vpop.permute.xlu0 %1363  ;;  %v7084_v32 = vld [vmem:[%s6991_s17 + $0x28] sm:$0xff] }
 0x21d   : > { %12411 = vst [vmem:[#allocation66_spill] sm:$0xff] %v7022_v56  ;;  %v1268_v54 = vadd.f32 %v1260_v31, %v12418_v17  ;;  %v1286_v5 = vadd.f32 %v1278_v26, %v12419_v16  ;;  %v7048_v61 = vadd.f32 %v1300_v14, %v1236_v47  ;;  %v7050_v29 = vadd.f32 %v1318_v15, %v1254_v60  ;;  %v12426_v47 = vld [vmem:[#allocation22_spill] sm:$0xff]  ;;  %v12429_v31 = vld [vmem:[#allocation33_spill] sm:$0xff]  ;;  %v12430_v26 = vld [vmem:[#allocation56_spill] sm:$0xff] }
 0x21e   : > { %12412 = vst [vmem:[#allocation13_spill] sm:$0xff] %v7025_v3  ;;  %v7052_v12 = vadd.f32 %v1336_v43, %v1272_v0  ;;  %v7054_v39 = vadd.f32 %v1354_v41, %v1290_v37  ;;  %v1296_v1 = vmul.f32 %v6804_v8, %v12424_v51  ;;  %v1314_v9 = vmul.f32 %v6819_v34, %v12424_v51  ;;  %v12425_v43 = vld [vmem:[#allocation25_spill] sm:$0xff]  ;;  %v12427_v60 = vld [vmem:[#allocation34_spill] sm:$0xff]  ;;  %v12428_v0 = vld [vmem:[#allocation40_spill] sm:$0xff] }
 0x21f   : > { %12413 = vst [vmem:[#allocation67_spill] sm:$0xff] %v7028_v49  ;;  %1979 = vrot.lane.b32.xlu1 %v7034_v46, %s4789_s14  ;;  %v1332_v14 = vmul.f32 %v12389_v35, %v12424_v51  ;;  %v1350_v15 = vmul.f32 %v12390_v57, %v12424_v51  ;;  %v994_v41 = vadd.f32 %v12426_v47, %v12425_v43  ;;  %v7079_v35 = vld [vmem:[%s6991_s17 + $0x20] sm:$0xff] }
 0x220   : > { %12415 = vst [vmem:[#allocation16_spill] sm:$0xff] %v7031_v2  ;;  %v1012_v37 = vadd.f32 %v12428_v0, %v12427_v60  ;;  %v7070_v45 = vadd.f32 %v1296_v1, %v1232_v38  ;;  %v7072_v6 = vadd.f32 %v1314_v9, %v1250_v21  ;;  %v12431_v51 = vld [vmem:[#allocation92_spill] sm:$0xff]  ;;  %v12432_v1 = vld [vmem:[#allocation38_spill] sm:$0xff]  ;;  %v12434_v60 = vld [vmem:[#allocation51_spill] sm:$0xff] }
 0x221   : > { %12420 = vst [vmem:[#allocation73_spill] sm:$0xff] %v7048_v61  ;;  %v1216_v11 = vpop.permute.xlu1 %1215  ;;  %v7074_v42 = vadd.f32 %v1332_v14, %v1268_v54  ;;  %v7076_v40 = vadd.f32 %v1350_v15, %v1286_v5  ;;  %v1082_v57 = vadd.f32 %v12429_v31, %v994_v41  ;;  %v7091_v54 = vld [vmem:[%s6991_s17 + $0x18] sm:$0xff] }
 0x222   : > { %12421 = vst [vmem:[#allocation44_spill] sm:$0xff] %v7050_v29  ;;  %v1100_v24 = vadd.f32 %v12430_v26, %v1012_v37  ;;  %v1227_v18 = vmul.f32 %v6720_v30, %v1216_v11  ;;  %v1245_v17 = vmul.f32 %v6725_v4, %v1216_v11  ;;  %v1263_v38 = vmul.f32 %v6746_v28, %v1216_v11  ;;  %v12435_v37 = vld [vmem:[#allocation53_spill] sm:$0xff]  ;;  %v7118_v31 = vld [vmem:[%s6991_s17 + $0x38] sm:$0xff] }
 0x223   : > { %12422 = vst [vmem:[#allocation11_spill] sm:$0xff] %v7052_v12  ;;  %v1281_v21 = vmul.f32 %v6751_v52, %v1216_v11  ;;  %1987 = vrot.lane.b32.xlu2 %v7079_v35, %s4789_s14  ;;  %v7099_v9 = vpop.permute.xlu2 %1457  ;;  %v12433_v52 = vld [vmem:[#allocation83_spill] sm:$0xff] }
 0x224   : > { %12423 = vst [vmem:[#allocation45_spill] sm:$0xff] %v7054_v39  ;;  %1989 = vrot.lane.b32.xlu0 %v7084_v32, %s4789_s14  ;;  %v1235_v16 = vadd.f32 %v1227_v18, %v1082_v57  ;;  %v1253_v5 = vadd.f32 %v1245_v17, %v1100_v24  ;;  %v1271_v30 = vadd.f32 %v1263_v38, %v12431_v51  ;;  %v7101_v28 = vpop.permute.xlu0 %1369  ;;  %v7121_v57 = vld [vmem:[%s6991_s17 + $0x30] sm:$0xff]  ;;  %v7149_v17 = vld [vmem:[%s11726_s3 + $0x78] ss:$0 sm:$0xff] }
 0x225   : > { %v1289_v4 = vadd.f32 %v1281_v21, %v12432_v1  ;;  %v1299_v14 = vmul.f32 %v6804_v8, %v12433_v52  ;;  %v1317_v15 = vmul.f32 %v6819_v34, %v12433_v52  ;;  %v7128_v8 = vld [vmem:[%s11726_s3 + $0x53] ss:$0 sm:$0xff]  ;;  %v7133_v34 = vld [vmem:[%s11726_s3 + $0x77] ss:$0 sm:$0xff]  ;;  %v7144_v18 = vld [vmem:[%s11726_s3 + $0x54] ss:$0 sm:$0xff] }
 0x226   : > { %v1343_v0 = vadd.f32 %v12434_v60, %v1271_v30 }
 0x227   : > { %1985 = vrot.lane.b32.xlu1 %v7091_v54, %s4789_s14  ;;  %v7111_v47 = vadd.f32 %v1299_v14, %v1235_v16  ;;  %v7113_v41 = vadd.f32 %v1317_v15, %v1253_v5  ;;  %v1361_v11 = vadd.f32 %v12435_v37, %v1289_v4 }
 0x229   : > { %v7109_v43 = vpop.permute.xlu1 %1365 }
 0x22b   : > { %1993 = vrot.lane.b32.xlu2 %v7118_v31, %s4789_s14  ;;  %v7135_v26 = vpop.permute.xlu2 %1463 }
 0x22c   : > { %v7137_v24 = vpop.permute.xlu0 %1375  ;;  %v1511_v5 = vmul.f32 %v7144_v18, %v7135_v26  ;;  %v1529_v51 = vmul.f32 %v7149_v17, %v7135_v26 }
 0x22d   : > { %v1423_v38 = vmul.f32 %v7128_v8, %v7137_v24  ;;  %v1441_v21 = vmul.f32 %v7133_v34, %v7137_v24 }
 0x22f   : > { %1991 = vrot.lane.b32.xlu1 %v7121_v57, %s4789_s14  ;;  %v1431_v30 = vadd.f32 %v1423_v38, %v1343_v0  ;;  %v1449_v1 = vadd.f32 %v1441_v21, %v1361_v11  ;;  %v7182_v11 = vld [vmem:[%s11726_s3 + $0x55] ss:$0 sm:$0xff]  ;;  %v7187_v38 = vld [vmem:[%s11726_s3 + $0x79] ss:$0 sm:$0xff]  ;;  %v12444_v21 = vld [vmem:[#allocation96_spill] sm:$0xff] }
 0x231   : > { %v7155_v16 = vpop.permute.xlu1 %1371  ;;  %v1519_v4 = vadd.f32 %v1511_v5, %v1431_v30  ;;  %v1537_v52 = vadd.f32 %v1529_v51, %v1449_v1  ;;  %v1583_v5 = vmul.f32 %v7182_v11, %v12444_v21  ;;  %v1601_v51 = vmul.f32 %v7187_v38, %v12444_v21 }
 0x234   : > { %v7161_v14 = vpop.permute.xlu2 %1613  ;;  %v7163_v15 = vpop.permute.xlu0 %1453 }
 0x235   : > { %12436 = vst [vmem:[#allocation35_spill] sm:$0xff] %v7161_v14 }
 0x239   : > { %v7165_v60 = vpop.permute.xlu1 %1377 }
 0x23a   : > { %12437 = vst [vmem:[#allocation79_spill] sm:$0xff] %v7165_v60 }
 0x23c   : > { %v7167_v37 = vpop.permute.xlu2 %1619  ;;  %v7169_v39 = vpop.permute.xlu0 %1459 }
 0x23d   : > { %12438 = vst [vmem:[#allocation71_spill] sm:$0xff] %v7167_v37 }
 0x23e   : > { %12439 = vst [vmem:[#allocation37_spill] sm:$0xff] %v7169_v39 }
 0x241   : > { %v7171_v12 = vpop.permute.xlu1 %1455 }
 0x242   : > { %12440 = vst [vmem:[#allocation60_spill] sm:$0xff] %v7171_v12 }
 0x244   : > { %v7173_v29 = vpop.permute.xlu2 %1625 }
 0x245   : > { %12441 = vst [vmem:[#allocation80_spill] sm:$0xff] %v7173_v29  ;;  %v7175_v61 = vpop.permute.xlu0 %1465  ;;  %v1609_v29 = vadd.f32 %v1601_v51, %v1537_v52 }
 0x246   : > { %12442 = vst [vmem:[#allocation81_spill] sm:$0xff] %v7175_v61 }
 0x249   : > { %v7177_v0 = vpop.permute.xlu1 %1461 }
 0x24a   : > { %12443 = vst [vmem:[#allocation85_spill] sm:$0xff] %v7177_v0  ;;  %v1591_v0 = vadd.f32 %v1583_v5, %v1519_v4  ;;  %v7217_v4 = vld [vmem:[%s11726_s3 + $0x7a] ss:$0 sm:$0xff] }
 0x24b   : > { %12454 = vst [vmem:[#allocation62_spill] sm:$0xff] %v7217_v4 }
 0x24c   : > { %v7193_v30 = vpop.permute.xlu2 %1719 }
 0x24d   : > { %12445 = vst [vmem:[#allocation23_spill] sm:$0xff] %v7193_v30  ;;  %v7195_v1 = vpop.permute.xlu0 %1615  ;;  %v7212_v30 = vld [vmem:[%s11726_s3 + $0x56] ss:$0 sm:$0xff] }
 0x24e   : > { %12446 = vst [vmem:[#allocation70_spill] sm:$0xff] %v7195_v1  ;;  %v7239_v1 = vld [vmem:[%s11726_s3 + $0x7b] ss:$0 sm:$0xff] }
 0x24f   : > { %12453 = vst [vmem:[#allocation19_spill] sm:$0xff] %v7212_v30 }
 0x250   : > { %12460 = vst [vmem:[#allocation21_spill] sm:$0xff] %v7239_v1 }
 0x251   : > { %v7197_v61 = vpop.permute.xlu1 %1611 }
 0x252   : > { %12447 = vst [vmem:[#allocation59_spill] sm:$0xff] %v7197_v61  ;;  %v7234_v61 = vld [vmem:[%s11726_s3 + $0x57] ss:$0 sm:$0xff] }
 0x253   : > { %12459 = vst [vmem:[#allocation74_spill] sm:$0xff] %v7234_v61 }
 0x254   : > { %v7199_v12 = vpop.permute.xlu2 %1725 }
 0x255   : > { %12448 = vst [vmem:[#allocation75_spill] sm:$0xff] %v7199_v12  ;;  %v7201_v37 = vpop.permute.xlu0 %1621 }
 0x256   : > { %12449 = vst [vmem:[#allocation30_spill] sm:$0xff] %v7201_v37 }
 0x259   : > { %v7203_v39 = vpop.permute.xlu1 %1617 }
 0x25a   : > { %12450 = vst [vmem:[#allocation9_spill] sm:$0xff] %v7203_v39 }
 0x25c   : > { %v7205_v60 = vpop.permute.xlu2 %1875 }
 0x25d   : > { %12451 = vst [vmem:[#allocation42_spill] sm:$0xff] %v7205_v60  ;;  %v7207_v14 = vpop.permute.xlu0 %1715 }
 0x25e   : > { %12452 = vst [vmem:[#allocation43_spill] sm:$0xff] %v7207_v14 }
 0x261   : > { %v7219_v52 = vpop.permute.xlu1 %1623 }
 0x262   : > { %12455 = vst [vmem:[#allocation20_spill] sm:$0xff] %v7219_v52  ;;  %v1671_v5 = vmul.f32 %v7212_v30, %v7219_v52  ;;  %v1689_v51 = vmul.f32 %v7217_v4, %v7219_v52 }
 0x264   : > { %v1679_v60 = vadd.f32 %v1671_v5, %v1591_v0  ;;  %v1697_v14 = vadd.f32 %v1689_v51, %v1609_v29  ;;  %v7225_v39 = vpop.permute.xlu2 %1881  ;;  %v7248_v29 = vld [vmem:[%s11726_s3 + $0x58] ss:$0 sm:$0xff]  ;;  %v7253_v5 = vld [vmem:[%s11726_s3 + $0x7c] ss:$0 sm:$0xff] }
 0x265   : > { %12456 = vst [vmem:[#allocation39_spill] sm:$0xff] %v7225_v39  ;;  %v1847_v52 = vmul.f32 %v7248_v29, %v6735_v19 }
 0x266   : > { %v7227_v12 = vpop.permute.xlu0 %1721 }
 0x267   : > { %12457 = vst [vmem:[#allocation15_spill] sm:$0xff] %v7227_v12  ;;  %v1865_v12 = vmul.f32 %v7253_v5, %v6735_v19 }
 0x269   : > { %v7229_v37 = vpop.permute.xlu1 %1717 }
 0x26a   : > { %12458 = vst [vmem:[#allocation26_spill] sm:$0xff] %v7229_v37 }
 0x26d   : > { %v7243_v0 = vpop.permute.xlu2 %1887 }
 0x26e   : > { %v7241_v30 = vpop.permute.xlu0 %1727  ;;  %12462 = vst [vmem:[#allocation91_spill] sm:$0xff] %v7243_v0 }
 0x26f   : > { %12461 = vst [vmem:[#allocation90_spill] sm:$0xff] %v7241_v30  ;;  %v1775_v51 = vmul.f32 %v7234_v61, %v7241_v30  ;;  %v1793_v39 = vmul.f32 %v7239_v1, %v7241_v30  ;;  %v7281_v30 = vld [vmem:[%s11726_s3 + $0x31] ss:$0 sm:$0xff] }
 0x271   : > { %v7259_v37 = vpop.permute.xlu1 %1723  ;;  %v1783_v4 = vadd.f32 %v1775_v51, %v1679_v60  ;;  %v1801_v59 = vadd.f32 %v1793_v39, %v1697_v14  ;;  %v12467_v14 = vld [vmem:[#allocation47_spill] sm:$0xff] }
 0x272   : > { %12463 = vst [vmem:[#allocation101_spill] sm:$0xff] %v7259_v37  ;;  %v7276_v37 = vld [vmem:[%s11726_s3 + $0xd] ss:$0 sm:$0xff]  ;;  %v7309_v51 = vmul.f32 %v7187_v38, %v12467_v14 }
 0x273   : > { %v1855_v27 = vadd.f32 %v1847_v52, %v1783_v4  ;;  %v7265_v10 = vadd.f32 %v1865_v12, %v1801_v59  ;;  %v7286_v59 = vld [vmem:[%s11726_s3 + $0x10] ss:$0 sm:$0xff]  ;;  %v7291_v12 = vld [vmem:[%s11726_s3 + $0x34] ss:$0 sm:$0xff]  ;;  %v7297_v60 = vmul.f32 %v7276_v37, %v12467_v14  ;;  %v7301_v4 = vmul.f32 %v7281_v30, %v12467_v14 }
 0x274   : > { %v7305_v52 = vmul.f32 %v7182_v11, %v12467_v14  ;;  %12471 = vst [vmem:[#allocation28_spill] sm:$0xff] %v7309_v51 }
 0x275   : > { %v7269_v2 = vpop.permute.xlu2 %1981  ;;  %12468 = vst [vmem:[#allocation93_spill] sm:$0xff] %v7297_v60 }
 0x276   : > { %v7267_v20 = vpop.permute.xlu0 %1877  ;;  %12469 = vst [vmem:[#allocation94_spill] sm:$0xff] %v7301_v4 }
 0x277   : > { %12464 = vst [vmem:[#allocation10_spill] sm:$0xff] %v7267_v20 }
 0x278   : > { %12470 = vst [vmem:[#allocation72_spill] sm:$0xff] %v7305_v52  ;;  %v12477_v52 = vld [vmem:[#allocation27_spill] sm:$0xff] }
 0x279   : > { %v7271_v61 = vpop.permute.xlu1 %1729  ;;  %v7329_v14 = vmul.f32 %v7276_v37, %v12477_v52  ;;  %v7333_v51 = vmul.f32 %v7281_v30, %v12477_v52 }
 0x27a   : > { %12465 = vst [vmem:[#allocation17_spill] sm:$0xff] %v7271_v61  ;;  %v12472_v61 = vld [vmem:[#allocation14_spill] sm:$0xff] }
 0x27b   : > { %v7313_v20 = vmul.f32 %v7286_v59, %v12472_v61  ;;  %v7321_v1 = vmul.f32 %v7248_v29, %v12472_v61  ;;  %12478 = vst [vmem:[#allocation12_spill] sm:$0xff] %v7329_v14 }
 0x27c   : > { %12479 = vst [vmem:[#allocation24_spill] sm:$0xff] %v7333_v51 }
 0x27d   : > { %12473 = vst [vmem:[#allocation76_spill] sm:$0xff] %v7313_v20  ;;  %v7325_v60 = vpop.permute.xlu2 %1987  ;;  %v7337_v20 = vmul.f32 %v7182_v11, %v12477_v52 }
 0x27e   : > { %v7293_v39 = vpop.permute.xlu0 %1883  ;;  %12475 = vst [vmem:[#allocation50_spill] sm:$0xff] %v7321_v1  ;;  %v12483_v1 = vld [vmem:[#allocation55_spill] sm:$0xff] }
 0x27f   : > { %12466 = vst [vmem:[#allocation29_spill] sm:$0xff] %v7293_v39  ;;  %v7317_v39 = vmul.f32 %v7291_v12, %v12472_v61  ;;  %v7349_v49 = vmul.f32 %v7286_v59, %v12483_v1  ;;  %v7353_v14 = vmul.f32 %v7291_v12, %v12483_v1  ;;  %v7357_v51 = vmul.f32 %v7248_v29, %v12483_v1 }
 0x280   : > { %12480 = vst [vmem:[#allocation18_spill] sm:$0xff] %v7337_v20 }
 0x281   : > { %12474 = vst [vmem:[#allocation84_spill] sm:$0xff] %v7317_v39  ;;  %v7323_v4 = vpop.permute.xlu1 %1879  ;;  %v7341_v39 = vmul.f32 %v7253_v5, %v12472_v61  ;;  %v7361_v61 = vmul.f32 %v7253_v5, %v12483_v1 }
 0x282   : > { %12476 = vst [vmem:[#allocation77_spill] sm:$0xff] %v7323_v4  ;;  %v7345_v4 = vmul.f32 %v7187_v38, %v12477_v52 }
 0x283   : > { %12481 = vst [vmem:[#allocation89_spill] sm:$0xff] %v7341_v39  ;;  %v12488_v39 = vld [vmem:[#allocation97_spill] sm:$0xff] }
 0x284   : > { %12482 = vst [vmem:[#allocation95_spill] sm:$0xff] %v7345_v4  ;;  %v7365_v52 = vmul.f32 %v7286_v59, %v12488_v39  ;;  %v7369_v4 = vmul.f32 %v7291_v12, %v12488_v39 }
 0x285   : > { %12484 = vst [vmem:[#allocation88_spill] sm:$0xff] %v7349_v49  ;;  %v7373_v49 = vmul.f32 %v7248_v29, %v12488_v39 }
 0x286   : > { %12485 = vst [vmem:[#allocation52_spill] sm:$0xff] %v7353_v14  ;;  %v12492_v14 = vld [vmem:[#allocation86_spill] sm:$0xff] }
 0x287   : > { %12486 = vst [vmem:[#allocation102_spill] sm:$0xff] %v7357_v51  ;;  %v7377_v20 = vmul.f32 %v7276_v37, %v12492_v14  ;;  %v7381_v1 = vmul.f32 %v7281_v30, %v12492_v14  ;;  %v12499_v51 = vld [vmem:[#allocation46_spill] sm:$0xff] }
 0x288   : > { %12487 = vst [vmem:[#allocation82_spill] sm:$0xff] %v7361_v61  ;;  %v7385_v61 = vmul.f32 %v7182_v11, %v12492_v14 }
 0x289   : > { %12489 = vst [vmem:[#allocation68_spill] sm:$0xff] %v7365_v52  ;;  %v7398_v52 = vmul.f32 %v7187_v38, %v12492_v14 }
 0x28a   : > { %12490 = vst [vmem:[#allocation98_spill] sm:$0xff] %v7369_v4  ;;  %v7390_v4 = vld [vmem:[%s11726_s3 + $0x59] ss:$0 sm:$0xff] }
 0x28b   : > { %12491 = vst [vmem:[#allocation99_spill] sm:$0xff] %v7373_v49  ;;  %v7394_v49 = vmul.f32 %v7253_v5, %v12488_v39  ;;  %v7414_v39 = vmul.f32 %v7187_v38, %v12499_v51  ;;  %v1935_v14 = vmul.f32 %v7390_v4, %v7243_v0 }
 0x28c   : > { %12493 = vst [vmem:[#allocation100_spill] sm:$0xff] %v7377_v20  ;;  %v7410_v20 = vmul.f32 %v7182_v11, %v12499_v51 }
 0x28d   : > { %12494 = vst [vmem:[#allocation64_spill] sm:$0xff] %v7381_v1  ;;  %v7402_v1 = vmul.f32 %v7276_v37, %v12499_v51  ;;  %v7463_v3 = vadd.f32 %v1935_v14, %v1855_v27  ;;  %v12525_v14 = vld [vmem:[#allocation41_spill] sm:$0xff] }
 0x28e   : > { %12495 = vst [vmem:[#allocation78_spill] sm:$0xff] %v7385_v61  ;;  %v7406_v61 = vmul.f32 %v7281_v30, %v12499_v51 }
 0x28f   : > { %12496 = vst [vmem:[#allocation25_spill] sm:$0xff] %v7390_v4 }
 0x290   : > { %12497 = vst [vmem:[#allocation22_spill] sm:$0xff] %v7394_v49  ;;  %v7420_v49 = vmul.f32 %v7286_v59, %v6735_v19 }
 0x291   : > { %12498 = vst [vmem:[#allocation34_spill] sm:$0xff] %v7398_v52  ;;  %v7424_v52 = vmul.f32 %v7291_v12, %v6735_v19  ;;  %v12512_v19 = vld [vmem:[#allocation61_spill] sm:$0xff] }
 0x292   : > { %12500 = vst [vmem:[#allocation40_spill] sm:$0xff] %v7402_v1  ;;  %v12507_v1 = vld [vmem:[#allocation48_spill] sm:$0xff]  ;;  %v7485_v27 = vmul.f32 %v7253_v5, %v12512_v19 }
 0x293   : > { %12501 = vst [vmem:[#allocation33_spill] sm:$0xff] %v7406_v61  ;;  %v7426_v61 = vpop.permute.xlu0 %1889  ;;  %v7434_v51 = vmul.f32 %v7281_v30, %v12507_v1  ;;  %v7438_v4 = vmul.f32 %v7182_v11, %v12507_v1 }
 0x294   : > { %12502 = vst [vmem:[#allocation56_spill] sm:$0xff] %v7410_v20  ;;  %v7430_v20 = vmul.f32 %v7276_v37, %v12507_v1 }
 0x295   : > { %12503 = vst [vmem:[#allocation92_spill] sm:$0xff] %v7414_v39  ;;  %v7461_v39 = vpop.permute.xlu1 %1885 }
 0x296   : > { %12504 = vst [vmem:[#allocation38_spill] sm:$0xff] %v7420_v49  ;;  %v7443_v49 = vld [vmem:[%s11726_s3 + $0x7d] ss:$0 sm:$0xff] }
 0x297   : > { %12505 = vst [vmem:[#allocation83_spill] sm:$0xff] %v7424_v52  ;;  %v7451_v52 = vmul.f32 %v7187_v38, %v12507_v1 }
 0x298   : > { %12506 = vst [vmem:[#allocation51_spill] sm:$0xff] %v7426_v61  ;;  %v7447_v61 = vmul.f32 %v7286_v59, %v12512_v19 }
 0x299   : > { %12508 = vst [vmem:[#allocation53_spill] sm:$0xff] %v7430_v20  ;;  %v12515_v20 = vld [vmem:[#allocation49_spill] sm:$0xff] }
 0x29a   : > { %12509 = vst [vmem:[#allocation96_spill] sm:$0xff] %v7434_v51  ;;  %v7455_v51 = vmul.f32 %v7276_v37, %v12515_v20  ;;  %v7467_v56 = vmul.f32 %v7182_v11, %v12515_v20  ;;  %v7471_v1 = vmul.f32 %v7187_v38, %v12515_v20 }
 0x29b   : > { %12510 = vst [vmem:[#allocation47_spill] sm:$0xff] %v7438_v4  ;;  %v7459_v4 = vmul.f32 %v7281_v30, %v12515_v20  ;;  %v7493_v20 = vmul.f32 %v7291_v12, %v12525_v14 }
 0x29c   : > { %12511 = vst [vmem:[#allocation14_spill] sm:$0xff] %v7443_v49 }
 0x29d   : > { %12513 = vst [vmem:[#allocation27_spill] sm:$0xff] %v7447_v61  ;;  %v1953_v61 = vmul.f32 %v7443_v49, %v7243_v0  ;;  %v1994_v0 = vpop.permute.xlu2 %1993 }
 0x29e   : > { %12514 = vst [vmem:[#allocation55_spill] sm:$0xff] %v7451_v52  ;;  %v7477_v52 = vmul.f32 %v7291_v12, %v12512_v19 }
 0x29f   : > { %12516 = vst [vmem:[#allocation97_spill] sm:$0xff] %v7455_v51 }
 0x2a0   : > { %12517 = vst [vmem:[#allocation86_spill] sm:$0xff] %v7459_v4 }
 0x2a1   : > { %12518 = vst [vmem:[#allocation46_spill] sm:$0xff] %v7461_v39  ;;  %v7481_v39 = vmul.f32 %v7248_v29, %v12512_v19  ;;  %v7505_v19 = vmul.f32 %v7286_v59, %v6851_v13 }
 0x2a2   : > { %12519 = vst [vmem:[#allocation48_spill] sm:$0xff] %v7463_v3  ;;  %v7489_v3 = vmul.f32 %v7286_v59, %v12525_v14 }
 0x2a3   : > { %12520 = vst [vmem:[#allocation61_spill] sm:$0xff] %v7467_v56 }
 0x2a4   : > { %12521 = vst [vmem:[#allocation49_spill] sm:$0xff] %v7471_v1 }
 0x2a5   : > { %12522 = vst [vmem:[#allocation103_spill] sm:$0xff] %v7477_v52  ;;  %v7497_v52 = vmul.f32 %v7248_v29, %v12525_v14 }
 0x2a6   : > { %12523 = vst [vmem:[#allocation104_spill] sm:$0xff] %v7481_v39  ;;  %v7501_v39 = vmul.f32 %v7253_v5, %v12525_v14  ;;  %v7521_v14 = vmul.f32 %v7291_v12, %v6851_v13 }
 0x2a7   : > { %12524 = vst [vmem:[#allocation105_spill] sm:$0xff] %v7485_v27  ;;  %v7508_v27 = vadd.f32 %v1953_v61, %v7265_v10  ;;  %v7529_v10 = vmul.f32 %v7253_v5, %v6851_v13  ;;  %v7534_v61 = vld [vmem:[%s11726_s3 + $0x2f] ss:$0 sm:$0xff] }
 0x2a8   : > { %12526 = vst [vmem:[#allocation41_spill] sm:$0xff] %v7489_v3  ;;  %v12532_v3 = vld [vmem:[#allocation87_spill] sm:$0xff] }
 0x2a9   : > { %12527 = vst [vmem:[#allocation106_spill] sm:$0xff] %v7493_v20  ;;  %v7513_v20 = vld [vmem:[%s11726_s3 + $0xb] ss:$0 sm:$0xff]  ;;  %v7517_v49 = vmul.f32 %v7276_v37, %v12532_v3 }
 0x2aa   : > { %12528 = vst [vmem:[#allocation107_spill] sm:$0xff] %v7497_v52  ;;  %v7633_v52 = vmul.f32 %v7534_v61, %v6973_v22 }
 0x2ab   : > { %12529 = vst [vmem:[#allocation108_spill] sm:$0xff] %v7501_v39  ;;  %v7525_v39 = vmul.f32 %v7248_v29, %v6851_v13  ;;  %v7551_v13 = vsel %vm349_vm0, %v7118_v31, %v1994_v0  ;;  %v7571_v31 = vmul.f32 %v7291_v12, %v6729_v44  ;;  %v1980_v12 = vpop.permute.xlu1 %1979 }
 0x2ac   : > { %12530 = vst [vmem:[#allocation109_spill] sm:$0xff] %v7505_v19  ;;  %v7559_v19 = vmul.f32 %v7276_v37, %v12444_v21  ;;  %v7579_v37 = vmul.f32 %v7253_v5, %v6729_v44  ;;  %v7602_v5 = vsel %vm349_vm0, %v7034_v46, %v1980_v12  ;;  %v12575_v46 = vld [vmem:[#allocation58_spill] sm:$0xff] }
 0x2ad   : > { %12531 = vst [vmem:[#allocation110_spill] sm:$0xff] %v7508_v27  ;;  %v7538_v27 = vmul.f32 %v7281_v30, %v12532_v3 }
 0x2ae   : > { %12533 = vst [vmem:[#allocation87_spill] sm:$0xff] %v7517_v49 }
 0x2af   : > { %12534 = vst [vmem:[#allocation111_spill] sm:$0xff] %v7521_v14  ;;  %v7542_v14 = vmul.f32 %v7182_v11, %v12532_v3  ;;  %v7563_v11 = vmul.f32 %v7281_v30, %v12444_v21  ;;  %v12549_v21 = vld [vmem:[#allocation69_spill] sm:$0xff] }
 0x2b0   : > { %12535 = vst [vmem:[#allocation112_spill] sm:$0xff] %v7525_v39  ;;  %v7547_v39 = vsel %vm349_vm0, %v7008_v25, %v7269_v2  ;;  %v7567_v25 = vmul.f32 %v7286_v59, %v6729_v44  ;;  %v1984_v2 = vpop.permute.xlu0 %1983  ;;  %v7587_v30 = vmul.f32 %v7513_v20, %v12549_v21 }
 0x2b1   : > { %12536 = vst [vmem:[#allocation113_spill] sm:$0xff] %v7529_v10  ;;  %v7555_v10 = vmul.f32 %v7187_v38, %v12532_v3  ;;  %v7575_v3 = vmul.f32 %v7248_v29, %v6729_v44  ;;  %v7583_v38 = vsel %vm349_vm0, %v7015_v55, %v1984_v2  ;;  %v2012_v0 = vrot.slane %v7547_v39, 7 }
 0x2b2   : > { %12537 = vst [vmem:[#allocation114_spill] sm:$0xff] %v7538_v27  ;;  %v2013_v59 = vrot.slane %v7583_v38, 7  ;;  %v1381_v44 = vmul.f32 %v7513_v20, %v7046_v7  ;;  %v1399_v55 = vmul.f32 %v7534_v61, %v7046_v7  ;;  %v7606_v2 = vmul.f32 %v7128_v8, %v12549_v21 }
 0x2b3   : > { %12538 = vst [vmem:[#allocation115_spill] sm:$0xff] %v7542_v14  ;;  %v7610_v29 = vmul.f32 %v7133_v34, %v12549_v21  ;;  %v1417_v14 = vmul.f32 %v7128_v8, %v7046_v7  ;;  %v1435_v27 = vmul.f32 %v7133_v34, %v7046_v7  ;;  %v1986_v51 = vpop.permute.xlu1 %1985 }
 0x2b4   : > { %12539 = vst [vmem:[#allocation116_spill] sm:$0xff] %v7547_v39  ;;  %v7624_v12 = vsel %vm368_vm2, %v2012_v0, %v2013_v59  ;;  %v7664_v39 = vsel %vm349_vm0, %v7079_v35, %v7325_v60  ;;  %v1402_v60 = vmul.f32 %v7534_v61, %v7101_v28 }
 0x2b5   : > { %12540 = vst [vmem:[#allocation117_spill] sm:$0xff] %v7551_v13  ;;  %2031 = vrot.lane.b32.xlu2 %v7624_v12, %s4790_s15  ;;  %v1425_v1 = vadd.f32 %v1417_v14, %v7003_v50  ;;  %v2015_v56 = vrot.slane %v7664_v39, 7 }
 0x2b6   : > { %12541 = vst [vmem:[#allocation118_spill] sm:$0xff] %v7555_v10  ;;  %v7641_v10 = vmul.f32 %v7133_v34, %v6973_v22 }
 0x2b7   : > { %12542 = vst [vmem:[#allocation119_spill] sm:$0xff] %v7559_v19 }
 0x2b8   : > { %12543 = vst [vmem:[#allocation120_spill] sm:$0xff] %v7563_v11  ;;  %v12555_v11 = vrot.slane %v7551_v13, 7  ;;  %v1990_v35 = vpop.permute.xlu0 %1989 }
 0x2b9   : > { %12544 = vst [vmem:[#allocation121_spill] sm:$0xff] %v7567_v25  ;;  %v2011_v25 = vrot.slane %v7602_v5, 7 }
 0x2ba   : > { %12545 = vst [vmem:[#allocation122_spill] sm:$0xff] %v7571_v31  ;;  %v7620_v31 = vld [vmem:[%s11726_s3 + $0x30] ss:$0 sm:$0xff] }
 0x2bb   : > { %12546 = vst [vmem:[#allocation123_spill] sm:$0xff] %v7575_v3  ;;  %v7594_v3 = vmul.f32 %v7534_v61, %v12549_v21  ;;  %v7629_v21 = vmul.f32 %v7513_v20, %v6973_v22  ;;  %v7651_v49 = vsel %vm368_vm2, %v2011_v25, %v2012_v0  ;;  %v7657_v19 = vsel %vm368_vm2, %v12555_v11, %v2011_v25 }
 0x2bc   : > { %12547 = vst [vmem:[#allocation124_spill] sm:$0xff] %v7579_v37  ;;  %v7615_v37 = vld [vmem:[%s11726_s3 + $0xc] ss:$0 sm:$0xff]  ;;  %2029 = vrot.lane.b32.xlu1 %v7651_v49, %s4790_s15  ;;  %2027 = vrot.lane.b32.xlu0 %v7657_v19, %s4790_s15  ;;  %v1487_v11 = vmul.f32 %v7620_v31, %v7044_v33  ;;  %v1420_v25 = vmul.f32 %v7128_v8, %v7101_v28 }
 0x2bd   : > { %12548 = vst [vmem:[#allocation125_spill] sm:$0xff] %v7583_v38  ;;  %v7637_v38 = vmul.f32 %v7128_v8, %v6973_v22  ;;  %v1389_v22 = vadd.f32 %v1381_v44, %v6999_v23  ;;  %v1469_v7 = vmul.f32 %v7615_v37, %v7044_v33  ;;  %v1505_v23 = vmul.f32 %v7144_v18, %v7044_v33 }
 0x2be   : > { %12550 = vst [vmem:[#allocation69_spill] sm:$0xff] %v7602_v5  ;;  %v1407_v5 = vadd.f32 %v1399_v55, %v7001_v62  ;;  %v1384_v62 = vmul.f32 %v7513_v20, %v7101_v28  ;;  %v1438_v0 = vmul.f32 %v7133_v34, %v7101_v28  ;;  %v7686_v44 = vsel %vm349_vm0, %v7084_v32, %v1990_v35 }
 0x2bf   : > { %12552 = vst [vmem:[#allocation126_spill] sm:$0xff] %v7624_v12  ;;  %v1523_v55 = vmul.f32 %v7149_v17, %v7044_v33  ;;  %v2016_v4 = vrot.slane %v7686_v44, 7  ;;  %v7694_v12 = vadd.f32 %v1469_v7, %v1389_v22  ;;  %v7700_v32 = vsel %vm349_vm0, %v7091_v54, %v1986_v51 }
 0x2c0   : > { %12553 = vst [vmem:[#allocation127_spill] sm:$0xff] %v7641_v10  ;;  %v7696_v10 = vadd.f32 %v1487_v11, %v1407_v5  ;;  %v1472_v33 = vmul.f32 %v7615_v37, %v7099_v9  ;;  %v1392_v50 = vadd.f32 %v1384_v62, %v7070_v45  ;;  %v2014_v14 = vrot.slane %v7700_v32, 7 }
 0x2c1   : > { %12554 = vst [vmem:[#allocation128_spill] sm:$0xff] %v7651_v49  ;;  %v1443_v49 = vadd.f32 %v1435_v27, %v7005_v48  ;;  %v7707_v28 = vsel %vm368_vm2, %v2015_v56, %v2016_v4  ;;  %v1410_v48 = vadd.f32 %v1402_v60, %v7072_v6  ;;  %v1428_v27 = vadd.f32 %v1420_v25, %v7074_v42 }
 0x2c2   : > { %12556 = vst [vmem:[#allocation129_spill] sm:$0xff] %v7657_v19  ;;  %v1446_v5 = vadd.f32 %v1438_v0, %v7076_v40  ;;  %v1382_v54 = vmul.f32 %v7513_v20, %v7109_v43  ;;  %2037 = vrot.lane.b32.xlu2 %v7707_v28, %s4790_s15  ;;  %v1400_v45 = vmul.f32 %v7534_v61, %v7109_v43 }
 0x2c3   : > { %12557 = vst [vmem:[#allocation130_spill] sm:$0xff] %v7686_v44  ;;  %v1418_v51 = vmul.f32 %v7128_v8, %v7109_v43  ;;  %v7723_v22 = vsel %vm368_vm2, %v2014_v14, %v2015_v56  ;;  %v7727_v6 = vsel %vm368_vm2, %v2013_v59, %v2014_v14  ;;  %v1490_v42 = vmul.f32 %v7620_v31, %v7099_v9  ;;  %v12561_v14 = vld [vmem:[#allocation32_spill] sm:$0xff] }
 0x2c4   : > { %12558 = vst [vmem:[#allocation131_spill] sm:$0xff] %v7707_v28  ;;  %v1508_v40 = vmul.f32 %v7144_v18, %v7099_v9  ;;  %v1436_v7 = vmul.f32 %v7133_v34, %v7109_v43  ;;  %2035 = vrot.lane.b32.xlu1 %v7723_v22, %s4790_s15  ;;  %2033 = vrot.lane.b32.xlu0 %v7727_v6, %s4790_s15 }
 0x2c5   : > { %12559 = vst [vmem:[#allocation132_spill] sm:$0xff] %v7723_v22  ;;  %v1526_v56 = vmul.f32 %v7149_v17, %v7099_v9  ;;  %v7741_v59 = vadd.f32 %v1505_v23, %v1425_v1  ;;  %v7743_v11 = vadd.f32 %v1523_v55, %v1443_v49  ;;  %v7745_v62 = vadd.f32 %v1472_v33, %v1392_v50  ;;  %v12562_v1 = vld [vmem:[#allocation57_spill] sm:$0xff]  ;;  %v12563_v49 = vld [vmem:[#allocation31_spill] sm:$0xff]  ;;  %v1992_v33 = vpop.permute.xlu1 %1991  ;;  %v12564_v50 = vld [vmem:[#allocation54_spill] sm:$0xff] }
 0x2c6   : > { %12560 = vst [vmem:[#allocation133_spill] sm:$0xff] %v7727_v6  ;;  %v7747_v35 = vadd.f32 %v1490_v42, %v1410_v48  ;;  %v7749_v60 = vadd.f32 %v1508_v40, %v1428_v27  ;;  %v1387_v43 = vmul.f32 %v7513_v20, %v7137_v24  ;;  %v1405_v25 = vmul.f32 %v7534_v61, %v7137_v24 }
 0x2c7   : > { %v7755_v0 = vadd.f32 %v1526_v56, %v1446_v5  ;;  %v1390_v9 = vadd.f32 %v1382_v54, %v12561_v14  ;;  %v1408_v23 = vadd.f32 %v1400_v45, %v12562_v1  ;;  %v1426_v55 = vadd.f32 %v1418_v51, %v12563_v49  ;;  %v7811_v51 = vld [vmem:[%s11726_s3 + $0xe] ss:$0 sm:$0xff]  ;;  %v12571_v14 = vld [vmem:[#allocation67_spill] sm:$0xff] }
 0x2c8   : > { %v1444_v48 = vadd.f32 %v1436_v7, %v12564_v50  ;;  %v7763_v27 = vadd.f32 %v7587_v30, %v6959_v58  ;;  %v7767_v42 = vadd.f32 %v7594_v3, %v6961_v53  ;;  %v7771_v24 = vsel %vm349_vm0, %v7121_v57, %v1992_v33  ;;  %v12569_v7 = vld [vmem:[#allocation66_spill] sm:$0xff] }
 0x2c9   : > { %12565 = vst [vmem:[#allocation32_spill] sm:$0xff] %v7771_v24  ;;  %v1475_v5 = vmul.f32 %v7615_v37, %v7135_v26  ;;  %v7777_v54 = vadd.f32 %v7606_v2, %v6963_v63  ;;  %v7781_v45 = vadd.f32 %v7610_v29, %v6965_v36  ;;  %v2017_v58 = vrot.slane %v7771_v24, 7  ;;  %v12577_v24 = vld [vmem:[#allocation36_spill] sm:$0xff] }
 0x2ca   : > { %v1395_v53 = vadd.f32 %v1387_v43, %v7111_v47  ;;  %v1413_v3 = vadd.f32 %v1405_v25, %v7113_v41  ;;  %v1385_v57 = vmul.f32 %v7513_v20, %v7155_v16  ;;  %v1403_v30 = vmul.f32 %v7534_v61, %v7155_v16  ;;  %2187 = vrot.lane.b32.xlu2 %v7657_v19, %s4791_s16  ;;  %v12570_v43 = vld [vmem:[#allocation13_spill] sm:$0xff] }
 0x2cb   : > { %v1421_v63 = vmul.f32 %v7128_v8, %v7155_v16  ;;  %v1439_v36 = vmul.f32 %v7133_v34, %v7155_v16  ;;  %v12566_v29 = vrot.slane %v7551_v13, 7  ;;  %v7804_v41 = vsel %vm368_vm2, %v2016_v4, %v2017_v58  ;;  %v7816_v16 = vld [vmem:[%s11726_s3 + $0x32] ss:$0 sm:$0xff] }
 0x2cc   : > { %12568 = vst [vmem:[#allocation31_spill] sm:$0xff] %v7804_v41  ;;  %v1493_v2 = vmul.f32 %v7620_v31, %v7135_v26  ;;  %v1470_v40 = vmul.f32 %v7615_v37, %v7163_v15  ;;  %v1488_v4 = vmul.f32 %v7620_v31, %v7163_v15  ;;  %2039 = vrot.lane.b32.xlu0 %v7804_v41, %s4790_s15 }
 0x2cd   : > { %v7800_v47 = vsel %vm368_vm2, %v2017_v58, %v12566_v29  ;;  %v1506_v26 = vmul.f32 %v7144_v18, %v7163_v15  ;;  %v7830_v56 = vadd.f32 %v7629_v21, %v12569_v7  ;;  %v7834_v25 = vadd.f32 %v7633_v52, %v12570_v43  ;;  %v12572_v58 = vld [vmem:[#allocation16_spill] sm:$0xff]  ;;  %v12573_v29 = vld [vmem:[#allocation127_spill] sm:$0xff]  ;;  %v12574_v21 = vld [vmem:[#allocation65_spill] sm:$0xff] }
 0x2ce   : > { %12567 = vst [vmem:[#allocation57_spill] sm:$0xff] %v7800_v47  ;;  %2041 = vrot.lane.b32.xlu1 %v7800_v47, %s4790_s15  ;;  %v7838_v1 = vadd.f32 %v7637_v38, %v12571_v14  ;;  %v7840_v49 = vadd.f32 %v1475_v5, %v1395_v53  ;;  %v7842_v33 = vadd.f32 %v1493_v2, %v1413_v3  ;;  %v12576_v43 = vld [vmem:[#allocation63_spill] sm:$0xff] }
 0x2cf   : > { %v1524_v50 = vmul.f32 %v7149_v17, %v7163_v15  ;;  %v7848_v19 = vadd.f32 %v12573_v29, %v12572_v58  ;;  %v1393_v7 = vadd.f32 %v1385_v57, %v12574_v21  ;;  %v1411_v52 = vadd.f32 %v1403_v30, %v12575_v46  ;;  %v12578_v14 = vld [vmem:[#allocation35_spill] sm:$0xff]  ;;  %v12580_v46 = vld [vmem:[#allocation62_spill] sm:$0xff] }
 0x2d0   : > { %v1429_v44 = vadd.f32 %v1421_v63, %v12576_v43  ;;  %v1447_v38 = vadd.f32 %v1439_v36, %v12577_v24  ;;  %v7856_v5 = vmul.f32 %v7811_v51, %v12578_v14  ;;  %v7860_v53 = vmul.f32 %v7816_v16, %v12578_v14  ;;  %v12579_v2 = vld [vmem:[#allocation19_spill] sm:$0xff]  ;;  %v12582_v24 = vld [vmem:[#allocation40_spill] sm:$0xff] }
 0x2d1   : > { %v1478_v15 = vadd.f32 %v1470_v40, %v1390_v9  ;;  %v1496_v3 = vadd.f32 %v1488_v4, %v1408_v23  ;;  %v7864_v58 = vmul.f32 %v12579_v2, %v12578_v14  ;;  %v7868_v57 = vmul.f32 %v12580_v46, %v12578_v14  ;;  %v12583_v29 = vld [vmem:[#allocation79_spill] sm:$0xff]  ;;  %v12584_v40 = vld [vmem:[#allocation33_spill] sm:$0xff] }
 0x2d2   : > { %v1514_v30 = vadd.f32 %v1506_v26, %v1426_v55  ;;  %v7872_v63 = vadd.f32 %v12582_v24, %v7694_v12  ;;  %v1532_v36 = vadd.f32 %v1524_v50, %v1444_v48  ;;  %v1388_v21 = vmul.f32 %v7513_v20, %v12583_v29  ;;  %2193 = vrot.lane.b32.xlu2 %v7727_v6, %s4791_s16  ;;  %v12585_v48 = vld [vmem:[#allocation56_spill] sm:$0xff]  ;;  %v12587_v26 = vld [vmem:[#allocation93_spill] sm:$0xff]  ;;  %v12588_v50 = vld [vmem:[#allocation94_spill] sm:$0xff] }
 0x2d3   : > { %12581 = vst [vmem:[#allocation54_spill] sm:$0xff] %v7868_v57  ;;  %v1406_v9 = vmul.f32 %v7534_v61, %v12583_v29  ;;  %v1424_v23 = vmul.f32 %v7128_v8, %v12583_v29  ;;  %v1442_v55 = vmul.f32 %v7133_v34, %v12583_v29  ;;  %v7886_v12 = vadd.f32 %v12584_v40, %v7696_v10  ;;  %v12586_v20 = vld [vmem:[#allocation92_spill] sm:$0xff]  ;;  %v12589_v14 = vld [vmem:[#allocation37_spill] sm:$0xff]  ;;  %v12590_v10 = vld [vmem:[#allocation126_spill] sm:$0xff] }
 0x2d4   : > { %v7890_v4 = vadd.f32 %v12585_v48, %v7741_v59  ;;  %v7894_v61 = vadd.f32 %v12586_v20, %v7743_v11  ;;  %v7897_v8 = vadd.f32 %v12587_v26, %v1478_v15  ;;  %v7900_v43 = vadd.f32 %v12588_v50, %v1496_v3  ;;  %v12591_v24 = vld [vmem:[#allocation128_spill] sm:$0xff]  ;;  %v12594_v20 = vld [vmem:[#allocation73_spill] sm:$0xff] }
 0x2d5   : > { %v1473_v34 = vmul.f32 %v7615_v37, %v12589_v14  ;;  %2189 = vrot.lane.b32.xlu0 %v12591_v24, %s4791_s16  ;;  %v12592_v59 = vld [vmem:[#allocation72_spill] sm:$0xff]  ;;  %v1491_v11 = vmul.f32 %v7620_v31, %v12589_v14  ;;  %v1509_v15 = vmul.f32 %v7144_v18, %v12589_v14  ;;  %v1527_v3 = vmul.f32 %v7149_v17, %v12589_v14  ;;  %v12596_v24 = vld [vmem:[#allocation11_spill] sm:$0xff] }
 0x2d6   : > { %2191 = vrot.lane.b32.xlu1 %v12590_v10, %s4791_s16  ;;  %v7909_v29 = vadd.f32 %v12592_v59, %v1514_v30  ;;  %v12593_v40 = vld [vmem:[#allocation28_spill] sm:$0xff]  ;;  %v1396_v26 = vadd.f32 %v1388_v21, %v12594_v20  ;;  %v1432_v10 = vadd.f32 %v1424_v23, %v12596_v24  ;;  %v12597_v30 = vld [vmem:[#allocation71_spill] sm:$0xff]  ;;  %v12604_v20 = vld [vmem:[#allocation97_spill] sm:$0xff] }
 0x2d7   : > { %v7918_v48 = vadd.f32 %v12593_v40, %v1532_v36  ;;  %v12595_v50 = vld [vmem:[#allocation44_spill] sm:$0xff]  ;;  %v7925_v59 = vmul.f32 %v7811_v51, %v12597_v30  ;;  %v7929_v13 = vmul.f32 %v7816_v16, %v12597_v30  ;;  %v7933_v14 = vmul.f32 %v12579_v2, %v12597_v30  ;;  %v12601_v36 = vld [vmem:[#allocation45_spill] sm:$0xff] }
 0x2d8   : > { %v1414_v6 = vadd.f32 %v1406_v9, %v12595_v50  ;;  %v1450_v40 = vadd.f32 %v1442_v55, %v12601_v36  ;;  %v7938_v21 = vmul.f32 %v12580_v46, %v12597_v30  ;;  %v1481_v9 = vadd.f32 %v1473_v34, %v1393_v7  ;;  %v12603_v23 = vld [vmem:[#allocation60_spill] sm:$0xff]  ;;  %v12605_v7 = vld [vmem:[#allocation81_spill] sm:$0xff]  ;;  %v12606_v36 = vld [vmem:[#allocation86_spill] sm:$0xff] }
 0x2d9   : > { %12598 = vst [vmem:[#allocation66_spill] sm:$0xff] %v7925_v59  ;;  %v1471_v24 = vmul.f32 %v7615_v37, %v12603_v23  ;;  %v7944_v50 = vadd.f32 %v12604_v20, %v7745_v62  ;;  %v1499_v59 = vadd.f32 %v1491_v11, %v1411_v52  ;;  %v1535_v57 = vadd.f32 %v1527_v3, %v1447_v38  ;;  %v12607_v38 = vld [vmem:[#allocation61_spill] sm:$0xff] }
 0x2da   : > { %12599 = vst [vmem:[#allocation13_spill] sm:$0xff] %v7929_v13  ;;  %v1517_v13 = vadd.f32 %v1509_v15, %v1429_v44  ;;  %v1507_v55 = vmul.f32 %v7144_v18, %v12603_v23  ;;  %v1525_v30 = vmul.f32 %v7149_v17, %v12603_v23  ;;  %v1476_v34 = vmul.f32 %v7615_v37, %v12605_v7  ;;  %v12608_v15 = vld [vmem:[#allocation12_spill] sm:$0xff] }
 0x2db   : > { %12600 = vst [vmem:[#allocation67_spill] sm:$0xff] %v7933_v14  ;;  %v1489_v14 = vmul.f32 %v7620_v31, %v12603_v23  ;;  %2199 = vrot.lane.b32.xlu2 %v7804_v41, %s4791_s16  ;;  %v1494_v44 = vmul.f32 %v7620_v31, %v12605_v7  ;;  %v1512_v62 = vmul.f32 %v7144_v18, %v12605_v7  ;;  %v12609_v23 = vld [vmem:[#allocation49_spill] sm:$0xff] }
 0x2dc   : > { %12602 = vst [vmem:[#allocation16_spill] sm:$0xff] %v7938_v21  ;;  %v7956_v21 = vadd.f32 %v12606_v36, %v7747_v35  ;;  %v1530_v52 = vmul.f32 %v7149_v17, %v12605_v7  ;;  %v7968_v11 = vadd.f32 %v12607_v38, %v7749_v60  ;;  %v7971_v3 = vadd.f32 %v12608_v15, %v1481_v9  ;;  %v12610_v7 = vld [vmem:[#allocation24_spill] sm:$0xff]  ;;  %v12611_v60 = vld [vmem:[#allocation18_spill] sm:$0xff]  ;;  %v12612_v9 = vld [vmem:[#allocation95_spill] sm:$0xff] }
 0x2dd   : > { %v1479_v35 = vadd.f32 %v1471_v24, %v7763_v27  ;;  %v7976_v20 = vadd.f32 %v12609_v23, %v7755_v0  ;;  %2195 = vrot.lane.b32.xlu0 %v7723_v22, %s4791_s16  ;;  %v7983_v36 = vadd.f32 %v12610_v7, %v1499_v59  ;;  %v7986_v38 = vadd.f32 %v12611_v60, %v1517_v13  ;;  %v12613_v24 = vld [vmem:[#allocation80_spill] sm:$0xff] }
 0x2de   : > { %2197 = vrot.lane.b32.xlu1 %v7707_v28, %s4791_s16  ;;  %v7989_v15 = vadd.f32 %v12612_v9, %v1535_v57  ;;  %v1497_v27 = vadd.f32 %v1489_v14, %v7767_v42  ;;  %v7994_v0 = vmul.f32 %v7811_v51, %v12613_v24  ;;  %v1515_v23 = vadd.f32 %v1507_v55, %v7777_v54  ;;  %v12615_v14 = vld [vmem:[#allocation85_spill] sm:$0xff]  ;;  %v12620_v9 = vld [vmem:[#allocation55_spill] sm:$0xff] }
 0x2df   : > { %v1533_v28 = vadd.f32 %v1525_v30, %v7781_v45  ;;  %v1484_v22 = vadd.f32 %v1476_v34, %v1396_v26  ;;  %v8000_v59 = vmul.f32 %v7816_v16, %v12613_v24  ;;  %v1502_v13 = vadd.f32 %v1494_v44, %v1414_v6  ;;  %v12616_v45 = vld [vmem:[#allocation53_spill] sm:$0xff]  ;;  %v12618_v34 = vld [vmem:[#allocation100_spill] sm:$0xff] }
 0x2e0   : > { %v1520_v7 = vadd.f32 %v1512_v62, %v1432_v10  ;;  %v1538_v60 = vadd.f32 %v1530_v52, %v1450_v40  ;;  %v8004_v57 = vmul.f32 %v12579_v2, %v12613_v24  ;;  %v8008_v42 = vmul.f32 %v12580_v46, %v12613_v24  ;;  %v12617_v40 = vld [vmem:[#allocation96_spill] sm:$0xff]  ;;  %v12619_v62 = vld [vmem:[#allocation47_spill] sm:$0xff]  ;;  %v12621_v24 = vld [vmem:[#allocation70_spill] sm:$0xff] }
 0x2e1   : > { %v1474_v54 = vmul.f32 %v7615_v37, %v12615_v14  ;;  %v1551_v26 = vadd.f32 %v12616_v45, %v1479_v35  ;;  %v1492_v55 = vmul.f32 %v7620_v31, %v12615_v14  ;;  %v1510_v6 = vmul.f32 %v7144_v18, %v12615_v14  ;;  %v12622_v31 = vld [vmem:[#allocation116_spill] sm:$0xff]  ;;  %v8032_v18 = vld [vmem:[%s11726_s3 + $0xf] ss:$0 sm:$0xff] }
 0x2e2   : > { %12614 = vst [vmem:[#allocation127_spill] sm:$0xff] %v8008_v42  ;;  %v1528_v10 = vmul.f32 %v7149_v17, %v12615_v14  ;;  %v1569_v30 = vadd.f32 %v12617_v40, %v1497_v27  ;;  %v8021_v44 = vadd.f32 %v12618_v34, %v1484_v22  ;;  %v1587_v52 = vadd.f32 %v12619_v62, %v1515_v23  ;;  %v8037_v17 = vld [vmem:[%s11726_s3 + $0x33] ss:$0 sm:$0xff]  ;;  %v12623_v22 = vld [vmem:[#allocation64_spill] sm:$0xff] }
 0x2e3   : > { %v1605_v37 = vadd.f32 %v12620_v9, %v1533_v28  ;;  %v1631_v35 = vmul.f32 %v7811_v51, %v12621_v24  ;;  %2277 = vrot.lane.b32.xlu2 %v12622_v31, %s4790_s15  ;;  %v8040_v27 = vadd.f32 %v12623_v22, %v1502_v13  ;;  %v12624_v28 = vld [vmem:[#allocation78_spill] sm:$0xff]  ;;  %v1649_v40 = vmul.f32 %v7816_v16, %v12621_v24  ;;  %v12626_v13 = vld [vmem:[#allocation69_spill] sm:$0xff]  ;;  %v12629_v22 = vld [vmem:[#allocation119_spill] sm:$0xff] }
 0x2e4   : > { %v8043_v23 = vadd.f32 %v12624_v28, %v1520_v7  ;;  %v12625_v14 = vld [vmem:[#allocation34_spill] sm:$0xff]  ;;  %v1482_v34 = vadd.f32 %v1474_v54, %v7830_v56  ;;  %v1667_v62 = vmul.f32 %v12579_v2, %v12621_v24  ;;  %v1685_v9 = vmul.f32 %v12580_v46, %v12621_v24  ;;  %v8062_v7 = vld [vmem:[%s11726_s3 + $0x5b] ss:$0 sm:$0xff]  ;;  %v8067_v56 = vld [vmem:[%s11726_s3 + $0x7f] ss:$0 sm:$0xff] }
 0x2e5   : > { %v8046_v45 = vadd.f32 %v12625_v14, %v1538_v60  ;;  %2201 = vrot.lane.b32.xlu0 %v7800_v47, %s4791_s16  ;;  %12627 = vst [vmem:[#allocation65_spill] sm:$0xff] %v8062_v7  ;;  %v1500_v60 = vadd.f32 %v1492_v55, %v7834_v25  ;;  %v1518_v54 = vadd.f32 %v1510_v6, %v7838_v1  ;;  %v12631_v47 = vld [vmem:[#allocation120_spill] sm:$0xff]  ;;  %v12635_v1 = vld [vmem:[#allocation23_spill] sm:$0xff] }
 0x2e6   : > { %2275 = vrot.lane.b32.xlu1 %v12626_v13, %s4790_s15  ;;  %12628 = vst [vmem:[#allocation58_spill] sm:$0xff] %v8067_v56  ;;  %v1536_v24 = vadd.f32 %v1528_v10, %v7848_v19  ;;  %v8074_v28 = vadd.f32 %v12629_v22, %v7840_v49  ;;  %v1639_v14 = vadd.f32 %v1631_v35, %v1551_v26  ;;  %v12636_v26 = vld [vmem:[#allocation74_spill] sm:$0xff]  ;;  %v12638_v22 = vld [vmem:[#allocation87_spill] sm:$0xff] }
 0x2e7   : > { %v8078_v13 = vadd.f32 %v12631_v47, %v7842_v33  ;;  %v8082_v31 = vmul.f32 %v8062_v7, %v7804_v41  ;;  %v8086_v25 = vmul.f32 %v8067_v56, %v7804_v41  ;;  %v1735_v19 = vmul.f32 %v8032_v18, %v12635_v1  ;;  %v12637_v47 = vld [vmem:[#allocation21_spill] sm:$0xff]  ;;  %v12639_v7 = vld [vmem:[#allocation59_spill] sm:$0xff] }
 0x2e8   : > { %12630 = vst [vmem:[#allocation63_spill] sm:$0xff] %v8074_v28  ;;  %v1753_v49 = vmul.f32 %v8037_v17, %v12635_v1  ;;  %v1771_v55 = vmul.f32 %v12636_v26, %v12635_v1  ;;  %v1657_v6 = vadd.f32 %v1649_v40, %v1569_v30  ;;  %v1789_v33 = vmul.f32 %v12637_v47, %v12635_v1  ;;  %v12640_v40 = vld [vmem:[#allocation114_spill] sm:$0xff] }
 0x2e9   : > { %12632 = vst [vmem:[#allocation36_spill] sm:$0xff] %v8078_v13  ;;  %v1675_v10 = vadd.f32 %v1667_v62, %v1587_v52  ;;  %v1693_v35 = vadd.f32 %v1685_v9, %v1605_v37  ;;  %v1647_v41 = vmul.f32 %v7816_v16, %v12639_v7  ;;  %v1665_v56 = vmul.f32 %v12579_v2, %v12639_v7  ;;  %v12641_v52 = vld [vmem:[#allocation115_spill] sm:$0xff]  ;;  %v12642_v62 = vld [vmem:[#allocation118_spill] sm:$0xff] }
 0x2ea   : > { %12633 = vst [vmem:[#allocation35_spill] sm:$0xff] %v8082_v31  ;;  %v1554_v31 = vadd.f32 %v12638_v22, %v1482_v34  ;;  %v1683_v13 = vmul.f32 %v12580_v46, %v12639_v7  ;;  %v8105_v30 = vadd.f32 %v1735_v19, %v1639_v14  ;;  %v1572_v1 = vadd.f32 %v12640_v40, %v1500_v60  ;;  %v12643_v22 = vld [vmem:[#allocation30_spill] sm:$0xff]  ;;  %v12649_v40 = vld [vmem:[#allocation13_spill] sm:$0xff] }
 0x2eb   : > { %12634 = vst [vmem:[#allocation19_spill] sm:$0xff] %v8086_v25  ;;  %v1629_v25 = vmul.f32 %v7811_v51, %v12639_v7  ;;  %v1590_v37 = vadd.f32 %v12641_v52, %v1518_v54  ;;  %v1608_v34 = vadd.f32 %v12642_v62, %v1536_v24  ;;  %2283 = vrot.lane.b32.xlu2 %v7664_v39, %s4790_s15  ;;  %v12644_v24 = vld [vmem:[#allocation125_spill] sm:$0xff]  ;;  %v12650_v52 = vld [vmem:[#allocation67_spill] sm:$0xff]  ;;  %v12651_v62 = vld [vmem:[#allocation16_spill] sm:$0xff] }
 0x2ec   : > { %v8112_v9 = vadd.f32 %v1753_v49, %v1657_v6  ;;  %v1634_v28 = vmul.f32 %v7811_v51, %v12643_v22  ;;  %v1652_v42 = vmul.f32 %v7816_v16, %v12643_v22  ;;  %v1670_v7 = vmul.f32 %v12579_v2, %v12643_v22 }
 0x2ed   : > { %v8120_v14 = vadd.f32 %v1771_v55, %v1675_v10  ;;  %v8122_v60 = vadd.f32 %v1789_v33, %v1693_v35  ;;  %v1688_v54 = vmul.f32 %v12580_v46, %v12643_v22  ;;  %2279 = vrot.lane.b32.xlu0 %v12644_v24, %s4790_s15  ;;  %v1637_v19 = vadd.f32 %v1629_v25, %v7872_v63  ;;  %v12645_v63 = vld [vmem:[#allocation54_spill] sm:$0xff] }
 0x2ee   : > { %2281 = vrot.lane.b32.xlu1 %v7700_v32, %s4790_s15  ;;  %v1655_v49 = vadd.f32 %v1647_v41, %v7886_v12  ;;  %v1673_v6 = vadd.f32 %v1665_v56, %v7890_v4  ;;  %v1691_v55 = vadd.f32 %v1683_v13, %v7894_v61  ;;  %v8136_v33 = vadd.f32 %v7856_v5, %v7897_v8  ;;  %v12646_v41 = vld [vmem:[#allocation75_spill] sm:$0xff]  ;;  %v12648_v56 = vld [vmem:[#allocation66_spill] sm:$0xff] }
 0x2ef   : > { %v8140_v10 = vadd.f32 %v7860_v53, %v7900_v43  ;;  %v8144_v35 = vadd.f32 %v7864_v58, %v7909_v29  ;;  %v8148_v25 = vadd.f32 %v12645_v63, %v7918_v48  ;;  %v1738_v12 = vmul.f32 %v8032_v18, %v12646_v41  ;;  %v12647_v43 = vld [vmem:[#allocation9_spill] sm:$0xff] }
 0x2f0   : > { %v1642_v4 = vadd.f32 %v1634_v28, %v1554_v31  ;;  %v1660_v61 = vadd.f32 %v1652_v42, %v1572_v1  ;;  %v1678_v13 = vadd.f32 %v1670_v7, %v1590_v37  ;;  %v1756_v5 = vmul.f32 %v8037_v17, %v12646_v41 }
 0x2f1   : > { %v1774_v53 = vmul.f32 %v12636_v26, %v12646_v41  ;;  %v1696_v8 = vadd.f32 %v1688_v54, %v1608_v34  ;;  %v1632_v58 = vmul.f32 %v7811_v51, %v12647_v43  ;;  %v1792_v29 = vmul.f32 %v12637_v47, %v12646_v41 }
 0x2f2   : > { %v1650_v48 = vmul.f32 %v7816_v16, %v12647_v43  ;;  %v1668_v42 = vmul.f32 %v12579_v2, %v12647_v43  ;;  %v1686_v31 = vmul.f32 %v12580_v46, %v12647_v43  ;;  %v8168_v28 = vadd.f32 %v12648_v56, %v7971_v3  ;;  %v12652_v2 = vld [vmem:[#allocation117_spill] sm:$0xff]  ;;  %v8187_v46 = vld [vmem:[%s11726_s3 + $0x11] ss:$0 sm:$0xff]  ;;  %v8192_v3 = vld [vmem:[%s11726_s3 + $0x35] ss:$0 sm:$0xff] }
 0x2f3   : > { %v8172_v1 = vadd.f32 %v12649_v40, %v7983_v36  ;;  %v8176_v37 = vadd.f32 %v12650_v52, %v7986_v38  ;;  %v8180_v34 = vadd.f32 %v12651_v62, %v7989_v15  ;;  %2289 = vrot.lane.b32.xlu2 %v12652_v2, %s4790_s15  ;;  %v8194_v36 = vadd.f32 %v1738_v12, %v1642_v4  ;;  %v12653_v15 = vld [vmem:[#allocation43_spill] sm:$0xff]  ;;  %v12654_v43 = vld [vmem:[#allocation32_spill] sm:$0xff]  ;;  %v12655_v12 = vld [vmem:[#allocation130_spill] sm:$0xff] }
 0x2f4   : > { %v8196_v38 = vadd.f32 %v1756_v5, %v1660_v61  ;;  %v8198_v22 = vadd.f32 %v1774_v53, %v1678_v13  ;;  %v1733_v7 = vmul.f32 %v8032_v18, %v12653_v15  ;;  %v8202_v54 = vadd.f32 %v1792_v29, %v1696_v8  ;;  %v12662_v40 = vld [vmem:[#allocation41_spill] sm:$0xff] }
 0x2f5   : > { %v1640_v63 = vadd.f32 %v1632_v58, %v7944_v50  ;;  %v1751_v41 = vmul.f32 %v8037_v17, %v12653_v15  ;;  %2285 = vrot.lane.b32.xlu0 %v12655_v12, %s4790_s15  ;;  %v1658_v4 = vadd.f32 %v1650_v48, %v7956_v21  ;;  %v1676_v61 = vadd.f32 %v1668_v42, %v7968_v11  ;;  %v12656_v11 = vld [vmem:[#allocation42_spill] sm:$0xff]  ;;  %v12657_v58 = vld [vmem:[#allocation127_spill] sm:$0xff] }
 0x2f6   : > { %2287 = vrot.lane.b32.xlu1 %v12654_v43, %s4790_s15  ;;  %v1694_v13 = vadd.f32 %v1686_v31, %v7976_v20  ;;  %v8216_v5 = vadd.f32 %v7994_v0, %v8021_v44  ;;  %v1769_v50 = vmul.f32 %v12636_v26, %v12653_v15  ;;  %v1787_v53 = vmul.f32 %v12637_v47, %v12653_v15  ;;  %v12660_v31 = vld [vmem:[#allocation14_spill] sm:$0xff] }
 0x2f7   : > { %v8224_v8 = vadd.f32 %v8000_v59, %v8040_v27  ;;  %v8228_v21 = vadd.f32 %v8004_v57, %v8043_v23  ;;  %v8232_v20 = vmul.f32 %v8187_v46, %v12656_v11  ;;  %v8236_v0 = vmul.f32 %v8192_v3, %v12656_v11  ;;  %v12658_v59 = vld [vmem:[#allocation25_spill] sm:$0xff]  ;;  %v12659_v57 = vld [vmem:[#allocation15_spill] sm:$0xff]  ;;  %v12663_v15 = vld [vmem:[#allocation106_spill] sm:$0xff] }
 0x2f8   : > { %v1741_v44 = vadd.f32 %v1733_v7, %v1637_v19  ;;  %v8240_v29 = vadd.f32 %v12657_v58, %v8046_v45  ;;  %v8244_v27 = vmul.f32 %v12658_v59, %v12656_v11  ;;  %v1759_v48 = vadd.f32 %v1751_v41, %v1655_v49  ;;  %v12665_v41 = vld [vmem:[#allocation107_spill] sm:$0xff]  ;;  %v12667_v58 = vld [vmem:[#allocation76_spill] sm:$0xff] }
 0x2f9   : > { %v1736_v23 = vmul.f32 %v8032_v18, %v12659_v57  ;;  %v1754_v42 = vmul.f32 %v8037_v17, %v12659_v57  ;;  %v8252_v56 = vmul.f32 %v12660_v31, %v12656_v11  ;;  %v1772_v19 = vmul.f32 %v12636_v26, %v12659_v57 }
 0x2fa   : > { %v1790_v45 = vmul.f32 %v12637_v47, %v12659_v57  ;;  %v8260_v52 = vadd.f32 %v12662_v40, %v8105_v30  ;;  %v1777_v49 = vadd.f32 %v1769_v50, %v1673_v6  ;;  %v1795_v62 = vadd.f32 %v1787_v53, %v1691_v55  ;;  %v12668_v57 = vld [vmem:[#allocation20_spill] sm:$0xff] }
 0x2fb   : > { %12661 = vst [vmem:[#allocation62_spill] sm:$0xff] %v8252_v56  ;;  %v8264_v7 = vadd.f32 %v12663_v15, %v8112_v9  ;;  %v8268_v11 = vadd.f32 %v12665_v41, %v8120_v14  ;;  %2439 = vrot.lane.b32.xlu2 %v12644_v24, %s4791_s16  ;;  %v8273_v56 = vadd.f32 %v12667_v58, %v1741_v44  ;;  %v12669_v55 = vld [vmem:[#allocation108_spill] sm:$0xff]  ;;  %v12673_v44 = vld [vmem:[#allocation69_spill] sm:$0xff]  ;;  %v12674_v58 = vld [vmem:[#allocation26_spill] sm:$0xff] }
 0x2fc   : > { %v1635_v30 = vmul.f32 %v7811_v51, %v12668_v57  ;;  %v1653_v6 = vmul.f32 %v7816_v16, %v12668_v57  ;;  %v8281_v9 = vadd.f32 %v12669_v55, %v8122_v60  ;;  %v12671_v50 = vld [vmem:[#allocation84_spill] sm:$0xff]  ;;  %v1744_v14 = vadd.f32 %v1736_v23, %v1640_v63  ;;  %v12675_v57 = vld [vmem:[#allocation50_spill] sm:$0xff] }
 0x2fd   : > { %12664 = vst [vmem:[#allocation40_spill] sm:$0xff] %v8264_v7  ;;  %v8284_v53 = vadd.f32 %v12671_v50, %v1759_v48  ;;  %v1762_v40 = vadd.f32 %v1754_v42, %v1658_v4  ;;  %v12672_v15 = vld [vmem:[#allocation116_spill] sm:$0xff]  ;;  %2435 = vrot.lane.b32.xlu0 %v12673_v44, %s4791_s16  ;;  %v1780_v41 = vadd.f32 %v1772_v19, %v1676_v61  ;;  %v12676_v48 = vld [vmem:[#allocation89_spill] sm:$0xff]  ;;  %v12677_v61 = vld [vmem:[#allocation39_spill] sm:$0xff] }
 0x2fe   : > { %12666 = vst [vmem:[#allocation79_spill] sm:$0xff] %v8268_v11  ;;  %2437 = vrot.lane.b32.xlu1 %v12672_v15, %s4791_s16  ;;  %v1798_v51 = vadd.f32 %v1790_v45, %v1694_v13  ;;  %v1734_v16 = vmul.f32 %v8032_v18, %v12674_v58  ;;  %v1752_v60 = vmul.f32 %v8037_v17, %v12674_v58  ;;  %v12679_v19 = vld [vmem:[#allocation63_spill] sm:$0xff]  ;;  %v12685_v7 = vld [vmem:[#allocation102_spill] sm:$0xff] }
 0x2ff   : > { %12670 = vst [vmem:[#allocation33_spill] sm:$0xff] %v8281_v9  ;;  %v8295_v55 = vadd.f32 %v12675_v57, %v1777_v49  ;;  %v8298_v63 = vadd.f32 %v12676_v48, %v1795_v62  ;;  %v1770_v4 = vmul.f32 %v12636_v26, %v12674_v58  ;;  %v1788_v23 = vmul.f32 %v12637_v47, %v12674_v58  ;;  %v12680_v49 = vld [vmem:[#allocation36_spill] sm:$0xff] }
 0x300   : > { %v8306_v13 = vmul.f32 %v8187_v46, %v12677_v61  ;;  %v8310_v42 = vmul.f32 %v8192_v3, %v12677_v61  ;;  %v1643_v45 = vadd.f32 %v1635_v30, %v12679_v19  ;;  %v1661_v50 = vadd.f32 %v1653_v6, %v12680_v49  ;;  %v12683_v58 = vld [vmem:[#allocation88_spill] sm:$0xff]  ;;  %v12686_v30 = vld [vmem:[#allocation82_spill] sm:$0xff] }
 0x301   : > { %v8316_v62 = vmul.f32 %v12658_v59, %v12677_v61  ;;  %v8320_v57 = vmul.f32 %v12660_v31, %v12677_v61  ;;  %v8323_v48 = vadd.f32 %v12683_v58, %v1744_v14  ;;  %v12684_v9 = vld [vmem:[#allocation52_spill] sm:$0xff]  ;;  %v8332_v19 = vadd.f32 %v12686_v30, %v1798_v51 }
 0x302   : > { %12678 = vst [vmem:[#allocation56_spill] sm:$0xff] %v8310_v42  ;;  %v8326_v11 = vadd.f32 %v12684_v9, %v1762_v40  ;;  %v8329_v42 = vadd.f32 %v12685_v7, %v1780_v41  ;;  %v1742_v6 = vadd.f32 %v1734_v16, %v8136_v33  ;;  %v1760_v49 = vadd.f32 %v1752_v60, %v8140_v10  ;;  %v12689_v9 = vld [vmem:[#allocation121_spill] sm:$0xff]  ;;  %v12694_v16 = vld [vmem:[#allocation123_spill] sm:$0xff] }
 0x303   : > { %12681 = vst [vmem:[#allocation92_spill] sm:$0xff] %v8316_v62  ;;  %v1778_v62 = vadd.f32 %v1770_v4, %v8144_v35  ;;  %v1796_v61 = vadd.f32 %v1788_v23, %v8148_v25  ;;  %v8342_v40 = vadd.f32 %v12689_v9, %v8194_v36  ;;  %2445 = vrot.lane.b32.xlu2 %v12655_v12, %s4791_s16  ;;  %v12691_v33 = vld [vmem:[#allocation101_spill] sm:$0xff]  ;;  %v12692_v25 = vld [vmem:[#allocation122_spill] sm:$0xff]  ;;  %v12696_v4 = vld [vmem:[#allocation91_spill] sm:$0xff] }
 0x304   : > { %12682 = vst [vmem:[#allocation93_spill] sm:$0xff] %v8320_v57  ;;  %v12688_v57 = vld [vmem:[#allocation90_spill] sm:$0xff]  ;;  %v1737_v10 = vmul.f32 %v8032_v18, %v12691_v33  ;;  %v1755_v35 = vmul.f32 %v8037_v17, %v12691_v33  ;;  %v8354_v41 = vadd.f32 %v12692_v25, %v8196_v38  ;;  %v1773_v36 = vmul.f32 %v12636_v26, %v12691_v33  ;;  %v12700_v9 = vld [vmem:[#allocation68_spill] sm:$0xff] }
 0x305   : > { %12687 = vst [vmem:[#allocation94_spill] sm:$0xff] %v8332_v19  ;;  %v1739_v14 = vmul.f32 %v8032_v18, %v12688_v57  ;;  %v1757_v7 = vmul.f32 %v8037_v17, %v12688_v57  ;;  %v1791_v51 = vmul.f32 %v12637_v47, %v12691_v33  ;;  %v8362_v60 = vadd.f32 %v12694_v16, %v8198_v22  ;;  %v12699_v57 = vld [vmem:[#allocation124_spill] sm:$0xff]  ;;  %v12701_v25 = vld [vmem:[#allocation98_spill] sm:$0xff] }
 0x306   : > { %12690 = vst [vmem:[#allocation37_spill] sm:$0xff] %v8342_v40  ;;  %2443 = vrot.lane.b32.xlu1 %v7664_v39, %s4791_s16  ;;  %2441 = vrot.lane.b32.xlu0 %v7700_v32, %s4791_s16  ;;  %v8370_v38 = vmul.f32 %v8187_v46, %v12696_v4  ;;  %v8374_v23 = vmul.f32 %v8192_v3, %v12696_v4  ;;  %v2524_v4 = vrot.slane %v12672_v15, 1 }
 0x307   : > { %12693 = vst [vmem:[#allocation72_spill] sm:$0xff] %v8354_v41  ;;  %v8378_v58 = vadd.f32 %v12699_v57, %v8202_v54  ;;  %v1747_v30 = vadd.f32 %v1739_v14, %v1643_v45  ;;  %v1814_v33 = vadd.f32 %v12700_v9, %v1742_v6  ;;  %v1832_v16 = vadd.f32 %v12701_v25, %v1760_v49  ;;  %v12703_v57 = vld [vmem:[#allocation22_spill] sm:$0xff]  ;;  %v12712_v9 = vld [vmem:[#allocation103_spill] sm:$0xff] }
 0x308   : > { %12695 = vst [vmem:[#allocation28_spill] sm:$0xff] %v8362_v60  ;;  %v12702_v60 = vld [vmem:[#allocation99_spill] sm:$0xff]  ;;  %v1765_v40 = vadd.f32 %v1757_v7, %v1661_v50  ;;  %v1763_v19 = vadd.f32 %v1755_v35, %v8172_v1  ;;  %v1799_v54 = vadd.f32 %v1791_v51, %v8180_v34  ;;  %v1868_v22 = vadd.f32 %v12703_v57, %v1796_v61  ;;  %v12704_v45 = vld [vmem:[#allocation10_spill] sm:$0xff] }
 0x309   : > { %12697 = vst [vmem:[#allocation73_spill] sm:$0xff] %v8370_v38  ;;  %v1850_v41 = vadd.f32 %v12702_v60, %v1778_v62  ;;  %v1745_v38 = vadd.f32 %v1737_v10, %v8168_v28  ;;  %v1894_v6 = vmul.f32 %v8187_v46, %v12704_v45  ;;  %v1912_v49 = vmul.f32 %v8192_v3, %v12704_v45  ;;  %v12705_v28 = vld [vmem:[#allocation17_spill] sm:$0xff]  ;;  %v12709_v34 = vld [vmem:[#allocation38_spill] sm:$0xff]  ;;  %v12711_v60 = vld [vmem:[#allocation27_spill] sm:$0xff] }
 0x30a   : > { %12698 = vst [vmem:[#allocation44_spill] sm:$0xff] %v8374_v23  ;;  %v1781_v23 = vadd.f32 %v1773_v36, %v8176_v37  ;;  %v1930_v50 = vmul.f32 %v12658_v59, %v12704_v45  ;;  %v1740_v1 = vmul.f32 %v8032_v18, %v12705_v28  ;;  %v12706_v62 = vrot.slane %v12673_v44, 1  ;;  %v12710_v18 = vld [vmem:[#allocation83_spill] sm:$0xff] }
 0x30b   : > { %v8405_v61 = vadd.f32 %v12709_v34, %v1747_v30  ;;  %v1948_v7 = vmul.f32 %v12660_v31, %v12704_v45  ;;  %v1758_v10 = vmul.f32 %v8037_v17, %v12705_v28  ;;  %v1776_v35 = vmul.f32 %v12636_v26, %v12705_v28  ;;  %v12713_v45 = vld [vmem:[#allocation104_spill] sm:$0xff] }
 0x30c   : > { %v8402_v37 = vsel %vm881_vm1, %v12706_v62, %v2524_v4  ;;  %v8416_v36 = vadd.f32 %v12710_v18, %v1765_v40  ;;  %v1794_v51 = vmul.f32 %v12637_v47, %v12705_v28  ;;  %v1817_v30 = vadd.f32 %v12711_v60, %v1745_v38  ;;  %v12714_v62 = vld [vmem:[#allocation105_spill] sm:$0xff] }
 0x30d   : > { %12708 = vst [vmem:[#allocation11_spill] sm:$0xff] %v8402_v37  ;;  %2539 = vrot.lane.b32.xlu2 %v8402_v37, %s4790_s15  ;;  %v1835_v25 = vadd.f32 %v12712_v9, %v1763_v19  ;;  %v8422_v57 = vadd.f32 %v1894_v6, %v1814_v33  ;;  %v1853_v17 = vadd.f32 %v12713_v45, %v1781_v23  ;;  %v2526_v19 = vrot.slane %v7700_v32, 1  ;;  %v12722_v60 = vld [vmem:[#allocation113_spill] sm:$0xff] }
 0x30e   : > { %v1871_v34 = vadd.f32 %v12714_v62, %v1799_v54  ;;  %2449 = vrot.lane.b32.xlu1 %v12652_v2, %s4791_s16  ;;  %2447 = vrot.lane.b32.xlu0 %v12654_v43, %s4791_s16  ;;  %v8430_v26 = vadd.f32 %v1912_v49, %v1832_v16  ;;  %v8432_v40 = vadd.f32 %v1930_v50, %v1850_v41  ;;  %v12715_v16 = vld [vmem:[#allocation29_spill] sm:$0xff]  ;;  %v2527_v49 = vrot.slane %v7664_v39, 1 }
 0x30f   : > { %v1748_v47 = vadd.f32 %v1740_v1, %v8216_v5  ;;  %v8436_v38 = vadd.f32 %v1948_v7, %v1868_v22  ;;  %v1766_v23 = vadd.f32 %v1758_v10, %v8224_v8  ;;  %v1784_v33 = vadd.f32 %v1776_v35, %v8228_v21  ;;  %v12718_v1 = vld [vmem:[#allocation62_spill] sm:$0xff]  ;;  %v12719_v10 = vld [vmem:[#allocation77_spill] sm:$0xff]  ;;  %v12721_v35 = vld [vmem:[#allocation112_spill] sm:$0xff] }
 0x310   : > { %v8442_v54 = vadd.f32 %v8232_v20, %v8273_v56  ;;  %v1802_v6 = vadd.f32 %v1794_v51, %v8240_v29  ;;  %v1897_v41 = vmul.f32 %v8187_v46, %v12715_v16  ;;  %v2525_v5 = vrot.slane %v12644_v24, 1  ;;  %v12716_v56 = vld [vmem:[#allocation109_spill] sm:$0xff] }
 0x311   : > { %v1915_v22 = vmul.f32 %v8192_v3, %v12715_v16  ;;  %v1933_v8 = vmul.f32 %v12658_v59, %v12715_v16  ;;  %v8455_v21 = vadd.f32 %v8236_v0, %v8284_v53  ;;  %v8459_v20 = vadd.f32 %v8244_v27, %v8295_v55  ;;  %v12720_v53 = vld [vmem:[#allocation111_spill] sm:$0xff] }
 0x312   : > { %v1951_v29 = vmul.f32 %v12660_v31, %v12715_v16  ;;  %v1820_v50 = vadd.f32 %v12716_v56, %v1748_v47  ;;  %v8466_v28 = vsel %vm881_vm1, %v2526_v19, %v2527_v49  ;;  %v8470_v7 = vadd.f32 %v12718_v1, %v8298_v63 }
 0x313   : > { %12717 = vst [vmem:[#allocation71_spill] sm:$0xff] %v8466_v28  ;;  %v1895_v0 = vmul.f32 %v8187_v46, %v12719_v10  ;;  %v1913_v27 = vmul.f32 %v8192_v3, %v12719_v10  ;;  %v1838_v55 = vadd.f32 %v12720_v53, %v1766_v23  ;;  %v1856_v18 = vadd.f32 %v12721_v35, %v1784_v33  ;;  %v2032_v33 = vpop.permute.xlu2 %2031 }
 0x314   : > { %v8480_v51 = vadd.f32 %v1897_v41, %v1817_v30  ;;  %v1874_v9 = vadd.f32 %v12722_v60, %v1802_v6  ;;  %v8485_v63 = vsel %vm881_vm1, %v2525_v5, %v2526_v19  ;;  %v8489_v45 = vsel %vm881_vm1, %v2524_v4, %v2525_v5  ;;  %v12727_v6 = vld [vmem:[#allocation40_spill] sm:$0xff]  ;;  %v8542_v60 = vld [vmem:[%s11726_s3 + $0x12] ss:$0 sm:$0xff] }
 0x315   : > { %2545 = vrot.lane.b32.xlu2 %v8466_v28, %s4790_s15  ;;  %12723 = vst [vmem:[#allocation45_spill] sm:$0xff] %v8485_v63  ;;  %v8491_v62 = vadd.f32 %v1915_v22, %v1835_v25  ;;  %v8493_v47 = vadd.f32 %v1933_v8, %v1853_v17  ;;  %v1931_v23 = vmul.f32 %v12658_v59, %v12719_v10  ;;  %v2529_v25 = vrot.slane %v12654_v43, 1  ;;  %v12728_v41 = vld [vmem:[#allocation56_spill] sm:$0xff]  ;;  %v12732_v8 = vld [vmem:[#allocation51_spill] sm:$0xff] }
 0x316   : > { %12724 = vst [vmem:[#allocation60_spill] sm:$0xff] %v8489_v45  ;;  %2543 = vrot.lane.b32.xlu1 %v8485_v63, %s4790_s15  ;;  %2541 = vrot.lane.b32.xlu0 %v8489_v45, %s4790_s15  ;;  %v8501_v30 = vadd.f32 %v1951_v29, %v1871_v34  ;;  %v1949_v4 = vmul.f32 %v12660_v31, %v12719_v10  ;;  %v12730_v34 = vld [vmem:[#allocation92_spill] sm:$0xff] }
 0x317   : > { %v8508_v17 = vadd.f32 %v8306_v13, %v8323_v48  ;;  %v1903_v19 = vadd.f32 %v1895_v0, %v8260_v52  ;;  %v1921_v16 = vadd.f32 %v1913_v27, %v12727_v6  ;;  %v8514_v5 = vadd.f32 %v12728_v41, %v8326_v11  ;;  %v12733_v48 = vld [vmem:[#allocation79_spill] sm:$0xff] }
 0x318   : > { %12725 = vst [vmem:[#allocation97_spill] sm:$0xff] %v8501_v30  ;;  %v8518_v22 = vadd.f32 %v12730_v34, %v8329_v42  ;;  %v1900_v29 = vmul.f32 %v8187_v46, %v12732_v8  ;;  %v1918_v56 = vmul.f32 %v8192_v3, %v12732_v8  ;;  %v2530_v13 = vrot.slane %v12652_v2, 1  ;;  %v12734_v42 = vld [vmem:[#allocation46_spill] sm:$0xff]  ;;  %v8567_v41 = vld [vmem:[%s11726_s3 + $0x7e] ss:$0 sm:$0xff] }
 0x319   : > { %12726 = vst [vmem:[#allocation81_spill] sm:$0xff] %v8508_v17  ;;  %v2528_v52 = vrot.slane %v12655_v12, 1  ;;  %v1939_v1 = vadd.f32 %v1931_v23, %v12733_v48  ;;  %v1936_v11 = vmul.f32 %v12658_v59, %v12732_v8  ;;  %v1954_v10 = vmul.f32 %v12660_v31, %v12732_v8  ;;  %v12738_v34 = vld [vmem:[#allocation94_spill] sm:$0xff]  ;;  %v12740_v48 = vld [vmem:[#allocation73_spill] sm:$0xff] }
 0x31a   : > { %12729 = vst [vmem:[#allocation86_spill] sm:$0xff] %v8514_v5  ;;  %v1898_v0 = vmul.f32 %v8187_v46, %v12734_v42  ;;  %v1916_v27 = vmul.f32 %v8192_v3, %v12734_v42  ;;  %v1934_v53 = vmul.f32 %v12658_v59, %v12734_v42  ;;  %v1952_v35 = vmul.f32 %v12660_v31, %v12734_v42  ;;  %v8551_v46 = vld [vmem:[%s11726_s3 + $0x16] ss:$0 sm:$0xff]  ;;  %v12737_v3 = vld [vmem:[#allocation33_spill] sm:$0xff]  ;;  %v8562_v31 = vld [vmem:[%s11726_s3 + $0x5a] ss:$0 sm:$0xff] }
 0x31b   : > { %12731 = vst [vmem:[#allocation61_spill] sm:$0xff] %v8518_v22  ;;  %v8546_v23 = vsel %vm881_vm1, %v2529_v25, %v2530_v13  ;;  %v1957_v6 = vadd.f32 %v1949_v4, %v12737_v3  ;;  %v8557_v59 = vld [vmem:[%s11726_s3 + $0x36] ss:$0 sm:$0xff]  ;;  %v12739_v4 = vld [vmem:[#allocation93_spill] sm:$0xff]  ;;  %v8577_v42 = vadd.f32 %v12740_v48, %v8405_v61  ;;  %v12742_v3 = vld [vmem:[#allocation44_spill] sm:$0xff]  ;;  %v8583_v5 = vadd.f32 %v1900_v29, %v1820_v50 }
 0x31c   : > { %12735 = vst [vmem:[#allocation12_spill] sm:$0xff] %v8546_v23  ;;  %v8573_v8 = vadd.f32 %v12739_v4, %v12738_v34  ;;  %v8581_v22 = vadd.f32 %v12742_v3, %v8416_v36  ;;  %v8585_v17 = vadd.f32 %v1918_v56, %v1838_v55  ;;  %v8589_v30 = vsel %vm881_vm1, %v2528_v52, %v2529_v25  ;;  %v8598_v61 = vld [vmem:[%s11726_s3 + $0x3a] ss:$0 sm:$0xff]  ;;  %v8603_v36 = vld [vmem:[%s11726_s3 + $0x5e] ss:$0 sm:$0xff]  ;;  %v8617_v56 = vpop.permute.xlu2 %2037 }
 0x31d   : > { %12736 = vst [vmem:[#allocation49_spill] sm:$0xff] %v8551_v46  ;;  %2551 = vrot.lane.b32.xlu2 %v8546_v23, %s4790_s15  ;;  %v8593_v34 = vsel %vm881_vm1, %v2527_v49, %v2528_v52  ;;  %v8608_v50 = vld [vmem:[%s11726_s3 + $0x82] ss:$0 sm:$0xff]  ;;  %v8610_v55 = vadd.f32 %v1936_v11, %v1856_v18  ;;  %v8612_v25 = vadd.f32 %v1954_v10, %v1874_v9  ;;  %v12753_v49 = vld [vmem:[#allocation37_spill] sm:$0xff]  ;;  %v8626_v52 = vld [vmem:[%s11726_s3 + $0x13] ss:$0 sm:$0xff] }
 0x31e   : > { %12741 = vst [vmem:[#allocation24_spill] sm:$0xff] %v8577_v42  ;;  %v8615_v29 = vadd.f32 %v1898_v0, %v12753_v49  ;;  %2549 = vrot.lane.b32.xlu1 %v8589_v30, %s4790_s15  ;;  %2547 = vrot.lane.b32.xlu0 %v8593_v34, %s4790_s15  ;;  %v12754_v18 = vld [vmem:[#allocation72_spill] sm:$0xff]  ;;  %v8635_v0 = vadd.f32 %v1952_v35, %v8378_v58  ;;  %v8640_v4 = vld [vmem:[%s11726_s3 + $0x37] ss:$0 sm:$0xff] }
 0x31f   : > { %12743 = vst [vmem:[#allocation18_spill] sm:$0xff] %v8581_v22  ;;  %v8629_v11 = vadd.f32 %v1916_v27, %v12754_v18  ;;  %v12755_v9 = vld [vmem:[#allocation28_spill] sm:$0xff]  ;;  %v8644_v48 = vmul.f32 %v8551_v46, %v12672_v15  ;;  %v2047_v3 = vmul.f32 %v8542_v60, %v2032_v33  ;;  %v2065_v27 = vmul.f32 %v8557_v59, %v2032_v33  ;;  %v12766_v42 = vld [vmem:[#allocation58_spill] sm:$0xff] }
 0x320   : > { %12744 = vst [vmem:[#allocation95_spill] sm:$0xff] %v8583_v5  ;;  %v8632_v10 = vadd.f32 %v1934_v53, %v12755_v9  ;;  %v2083_v49 = vmul.f32 %v8562_v31, %v2032_v33  ;;  %v2101_v53 = vmul.f32 %v8567_v41, %v2032_v33  ;;  %v8652_v58 = vmul.f32 %v8598_v61, %v12672_v15 }
 0x321   : > { %12745 = vst [vmem:[#allocation80_spill] sm:$0xff] %v8585_v17  ;;  %v8656_v35 = vmul.f32 %v8603_v36, %v12672_v15  ;;  %v8660_v18 = vmul.f32 %v8608_v50, %v12672_v15  ;;  %v8664_v9 = vmul.f32 %v8551_v46, %v7664_v39  ;;  %v8670_v33 = vmul.f32 %v8598_v61, %v7664_v39 }
 0x322   : > { %12746 = vst [vmem:[#allocation85_spill] sm:$0xff] %v8589_v30  ;;  %v2073_v17 = vadd.f32 %v2065_v27, %v1921_v16  ;;  %v2109_v5 = vadd.f32 %v2101_v53, %v1957_v6 }
 0x323   : > { %12747 = vst [vmem:[#allocation53_spill] sm:$0xff] %v8593_v34 }
 0x324   : > { %12748 = vst [vmem:[#allocation96_spill] sm:$0xff] %v8598_v61  ;;  %v8710_v16 = vpop.permute.xlu2 %2187 }
 0x325   : > { %12749 = vst [vmem:[#allocation100_spill] sm:$0xff] %v8603_v36  ;;  %2701 = vrot.lane.b32.xlu2 %v8489_v45, %s4791_s16 }
 0x326   : > { %12750 = vst [vmem:[#allocation47_spill] sm:$0xff] %v8608_v50  ;;  %2699 = vrot.lane.b32.xlu1 %v8402_v37, %s4791_s16 }
 0x327   : > { %12751 = vst [vmem:[#allocation55_spill] sm:$0xff] %v8610_v55  ;;  %v2055_v55 = vadd.f32 %v2047_v3, %v1903_v19  ;;  %v8708_v19 = vmul.f32 %v8608_v50, %v12673_v44 }
 0x328   : > { %12752 = vst [vmem:[#allocation70_spill] sm:$0xff] %v8612_v25 }
 0x329   : > { %12756 = vst [vmem:[#allocation64_spill] sm:$0xff] %v8644_v48  ;;  %v12761_v48 = vld [vmem:[#allocation126_spill] sm:$0xff] }
 0x32a   : > { %12757 = vst [vmem:[#allocation78_spill] sm:$0xff] %v8652_v58  ;;  %v2119_v22 = vmul.f32 %v8626_v52, %v12761_v48  ;;  %v8674_v58 = vmul.f32 %v8603_v36, %v7664_v39  ;;  %v2137_v15 = vmul.f32 %v8640_v4, %v12761_v48  ;;  %v2173_v25 = vmul.f32 %v12766_v42, %v12761_v48 }
 0x32b   : > { %12758 = vst [vmem:[#allocation34_spill] sm:$0xff] %v8656_v35  ;;  %v8678_v35 = vmul.f32 %v8608_v50, %v7664_v39  ;;  %v12768_v39 = vrot.slane %v12673_v44, 1 }
 0x32c   : > { %12759 = vst [vmem:[#allocation119_spill] sm:$0xff] %v8660_v18  ;;  %v8740_v14 = vadd.f32 %v2119_v22, %v2055_v55  ;;  %v8742_v37 = vadd.f32 %v2137_v15, %v2073_v17  ;;  %v8770_v55 = vmul.f32 %v8551_v46, %v7700_v32  ;;  %v8790_v15 = vmul.f32 %v8551_v46, %v12644_v24 }
 0x32d   : > { %12760 = vst [vmem:[#allocation120_spill] sm:$0xff] %v8664_v9  ;;  %v12765_v9 = vld [vmem:[#allocation65_spill] sm:$0xff]  ;;  %2707 = vrot.lane.b32.xlu2 %v8593_v34, %s4791_s16 }
 0x32e   : > { %12762 = vst [vmem:[#allocation23_spill] sm:$0xff] %v8670_v33  ;;  %v2155_v18 = vmul.f32 %v12765_v9, %v12761_v48  ;;  %v8688_v33 = vmul.f32 %v8551_v46, %v12673_v44  ;;  %v8700_v48 = vmul.f32 %v8598_v61, %v12673_v44  ;;  %2705 = vrot.lane.b32.xlu1 %v8466_v28, %s4791_s16 }
 0x32f   : > { %12763 = vst [vmem:[#allocation74_spill] sm:$0xff] %v8674_v58  ;;  %v2091_v58 = vadd.f32 %v2083_v49, %v1939_v1  ;;  %v12775_v49 = vld [vmem:[#allocation128_spill] sm:$0xff]  ;;  %v8850_v28 = vmul.f32 %v8598_v61, %v12655_v12 }
 0x330   : > { %12764 = vst [vmem:[#allocation21_spill] sm:$0xff] %v8678_v35  ;;  %v8696_v35 = vsel %vm881_vm1, %v2530_v13, %v12768_v39  ;;  %v12773_v13 = vld [vmem:[#allocation129_spill] sm:$0xff]  ;;  %v2118_v53 = vmul.f32 %v8626_v52, %v12775_v49  ;;  %v2136_v39 = vmul.f32 %v8640_v4, %v12775_v49 }
 0x331   : > { %12767 = vst [vmem:[#allocation87_spill] sm:$0xff] %v8688_v33  ;;  %v8704_v33 = vmul.f32 %v8603_v36, %v12673_v44  ;;  %2553 = vrot.lane.b32.xlu0 %v8696_v35, %s4790_s15  ;;  %v8718_v1 = vmul.f32 %v8626_v52, %v12773_v13  ;;  %v8722_v6 = vmul.f32 %v8640_v4, %v12773_v13 }
 0x332   : > { %12769 = vst [vmem:[#allocation59_spill] sm:$0xff] %v8696_v35  ;;  %v8726_v44 = vmul.f32 %v8551_v46, %v12652_v2  ;;  %v8730_v3 = vmul.f32 %v12765_v9, %v12773_v13  ;;  %v8734_v27 = vmul.f32 %v12766_v42, %v12773_v13  ;;  %v8744_v45 = vadd.f32 %v2155_v18, %v2091_v58 }
 0x333   : > { %12770 = vst [vmem:[#allocation114_spill] sm:$0xff] %v8700_v48  ;;  %v2172_v13 = vmul.f32 %v12766_v42, %v12775_v49  ;;  %v8778_v58 = vmul.f32 %v8598_v61, %v7700_v32  ;;  %v8782_v18 = vmul.f32 %v8603_v36, %v7700_v32 }
 0x334   : > { %12771 = vst [vmem:[#allocation115_spill] sm:$0xff] %v8704_v33  ;;  %v12780_v33 = vld [vmem:[#allocation131_spill] sm:$0xff] }
 0x335   : > { %12772 = vst [vmem:[#allocation118_spill] sm:$0xff] %v8708_v19  ;;  %v2154_v19 = vmul.f32 %v12765_v9, %v12775_v49  ;;  %v8754_v48 = vmul.f32 %v8626_v52, %v12780_v33  ;;  %v8758_v22 = vmul.f32 %v8640_v4, %v12780_v33  ;;  %v8762_v17 = vmul.f32 %v12765_v9, %v12780_v33  ;;  %v12791_v49 = vld [vmem:[#allocation133_spill] sm:$0xff] }
 0x336   : > { %12774 = vst [vmem:[#allocation30_spill] sm:$0xff] %v8726_v44  ;;  %v8746_v44 = vadd.f32 %v2173_v25, %v2109_v5  ;;  %v8766_v5 = vmul.f32 %v12766_v42, %v12780_v33  ;;  %v8774_v25 = vmul.f32 %v8598_v61, %v12652_v2  ;;  %v8786_v33 = vmul.f32 %v8608_v50, %v7700_v32 }
 0x337   : > { %12776 = vst [vmem:[#allocation125_spill] sm:$0xff] %v8740_v14  ;;  %v8800_v2 = vmul.f32 %v8598_v61, %v12644_v24  ;;  %v8808_v32 = vmul.f32 %v8608_v50, %v12644_v24  ;;  %v8816_v34 = vmul.f32 %v12765_v9, %v12791_v49  ;;  %v8870_v61 = vmul.f32 %v8603_v36, %v12654_v43 }
 0x338   : > { %12777 = vst [vmem:[#allocation54_spill] sm:$0xff] %v8742_v37  ;;  %v2028_v37 = vpop.permute.xlu0 %2027  ;;  %2713 = vrot.lane.b32.xlu2 %v8696_v35, %s4791_s16  ;;  %2711 = vrot.lane.b32.xlu1 %v8546_v23, %s4791_s16  ;;  %v12817_v35 = vld [vmem:[#allocation18_spill] sm:$0xff] }
 0x339   : > { %12778 = vst [vmem:[#allocation75_spill] sm:$0xff] %v8744_v45  ;;  %2703 = vrot.lane.b32.xlu0 %v8485_v63, %s4791_s16  ;;  %v8854_v63 = vmul.f32 %v8603_v36, %v12655_v12  ;;  %v2030_v45 = vpop.permute.xlu1 %2029 }
 0x33a   : > { %12779 = vst [vmem:[#allocation9_spill] sm:$0xff] %v8746_v44  ;;  %v8858_v44 = vmul.f32 %v8608_v50, %v12655_v12 }
 0x33b   : > { %12781 = vst [vmem:[#allocation66_spill] sm:$0xff] %v8754_v48 }
 0x33c   : > { %12782 = vst [vmem:[#allocation13_spill] sm:$0xff] %v8758_v22 }
 0x33d   : > { %12783 = vst [vmem:[#allocation67_spill] sm:$0xff] %v8762_v17  ;;  %v2081_v17 = vmul.f32 %v8562_v31, %v2028_v37 }
 0x33e   : > { %12784 = vst [vmem:[#allocation16_spill] sm:$0xff] %v8766_v5  ;;  %v2063_v5 = vmul.f32 %v8557_v59, %v2028_v37 }
 0x33f   : > { %12785 = vst [vmem:[#allocation43_spill] sm:$0xff] %v8770_v55  ;;  %v12795_v55 = vld [vmem:[#allocation132_spill] sm:$0xff]  ;;  %v2089_v48 = vadd.f32 %v2081_v17, %v8459_v20 }
 0x340   : > { %12786 = vst [vmem:[#allocation130_spill] sm:$0xff] %v8774_v25  ;;  %v8796_v25 = vmul.f32 %v8626_v52, %v12791_v49  ;;  %v2071_v22 = vadd.f32 %v2063_v5, %v8455_v21 }
 0x341   : > { %12787 = vst [vmem:[#allocation42_spill] sm:$0xff] %v8778_v58  ;;  %v8820_v58 = vmul.f32 %v12766_v42, %v12791_v49  ;;  %v8911_v21 = vadd.f32 %v8730_v3, %v2089_v48  ;;  %2709 = vrot.lane.b32.xlu0 %v8589_v30, %s4791_s16  ;;  %v2036_v48 = vpop.permute.xlu1 %2035 }
 0x342   : > { %12788 = vst [vmem:[#allocation127_spill] sm:$0xff] %v8782_v18  ;;  %v8804_v18 = vmul.f32 %v8603_v36, %v12644_v24  ;;  %v8834_v24 = vmul.f32 %v8640_v4, %v12795_v55  ;;  %v2099_v36 = vmul.f32 %v8567_v41, %v2028_v37 }
 0x343   : > { %12789 = vst [vmem:[#allocation25_spill] sm:$0xff] %v8786_v33  ;;  %v8812_v33 = vmul.f32 %v8640_v4, %v12791_v49  ;;  %v8838_v49 = vmul.f32 %v12765_v9, %v12795_v55 }
 0x344   : > { %12790 = vst [vmem:[#allocation15_spill] sm:$0xff] %v8790_v15  ;;  %v8846_v15 = vmul.f32 %v8551_v46, %v12655_v12  ;;  %v2046_v12 = vmul.f32 %v8542_v60, %v2030_v45 }
 0x345   : > { %12792 = vst [vmem:[#allocation14_spill] sm:$0xff] %v8800_v2  ;;  %v8824_v2 = vmul.f32 %v8626_v52, %v12795_v55 }
 0x346   : > { %12793 = vst [vmem:[#allocation41_spill] sm:$0xff] %v8804_v18  ;;  %v8826_v18 = vpop.permute.xlu2 %2193 }
 0x347   : > { %12794 = vst [vmem:[#allocation106_spill] sm:$0xff] %v8808_v32  ;;  %v8842_v32 = vmul.f32 %v12766_v42, %v12795_v55  ;;  %v12801_v55 = vld [vmem:[#allocation57_spill] sm:$0xff] }
 0x348   : > { %12796 = vst [vmem:[#allocation107_spill] sm:$0xff] %v8826_v18  ;;  %v8862_v14 = vmul.f32 %v8626_v52, %v12801_v55  ;;  %v8866_v46 = vmul.f32 %v8640_v4, %v12801_v55  ;;  %v2045_v18 = vmul.f32 %v8542_v60, %v2028_v37 }
 0x349   : > { %12797 = vst [vmem:[#allocation76_spill] sm:$0xff] %v8846_v15  ;;  %v2100_v15 = vmul.f32 %v8567_v41, %v2030_v45 }
 0x34a   : > { %12798 = vst [vmem:[#allocation20_spill] sm:$0xff] %v8850_v28  ;;  %v2082_v28 = vmul.f32 %v8562_v31, %v2030_v45 }
 0x34b   : > { %12799 = vst [vmem:[#allocation108_spill] sm:$0xff] %v8854_v63  ;;  %v8874_v63 = vmul.f32 %v8608_v50, %v12654_v43 }
 0x34c   : > { %12800 = vst [vmem:[#allocation84_spill] sm:$0xff] %v8858_v44  ;;  %v2064_v44 = vmul.f32 %v8557_v59, %v2030_v45  ;;  %v2090_v50 = vadd.f32 %v2082_v28, %v8432_v40  ;;  %v2053_v45 = vadd.f32 %v2045_v18, %v8442_v54  ;;  %v8908_v54 = vadd.f32 %v8722_v6, %v2071_v22  ;;  %v12807_v18 = vld [vmem:[#allocation97_spill] sm:$0xff] }
 0x34d   : > { %12802 = vst [vmem:[#allocation116_spill] sm:$0xff] %v8866_v46  ;;  %v2107_v46 = vadd.f32 %v2099_v36, %v8470_v7  ;;  %v8926_v7 = vmul.f32 %v12766_v42, %v12801_v55  ;;  %v2050_v36 = vmul.f32 %v8542_v60, %v8617_v56  ;;  %v2104_v42 = vmul.f32 %v8567_v41, %v8617_v56 }
 0x34e   : > { %12803 = vst [vmem:[#allocation69_spill] sm:$0xff] %v8870_v61  ;;  %v2054_v61 = vadd.f32 %v2046_v12, %v8422_v57  ;;  %v2072_v43 = vadd.f32 %v2064_v44, %v8430_v26  ;;  %v8898_v26 = vadd.f32 %v2154_v19, %v2090_v50  ;;  %v8905_v28 = vadd.f32 %v8718_v1, %v2053_v45  ;;  %v2034_v19 = vpop.permute.xlu0 %2033  ;;  %v8949_v44 = vld [vmem:[%s6991_s17 + $0x50] sm:$0xff]  ;;  %v8973_v12 = vld [vmem:[%s11726_s3 + $0x5c] ss:$0 sm:$0xff]  ;;  %v8978_v45 = vld [vmem:[%s11726_s3 + $0x80] ss:$0 sm:$0xff] }
 0x34f   : > { %12804 = vst [vmem:[#allocation26_spill] sm:$0xff] %v8874_v63  ;;  %v2108_v63 = vadd.f32 %v2100_v15, %v8436_v38  ;;  %v8902_v38 = vpop.permute.xlu2 %2199  ;;  %v8914_v20 = vadd.f32 %v8734_v27, %v2107_v46  ;;  %v2068_v50 = vmul.f32 %v8557_v59, %v8617_v56  ;;  %v2085_v1 = vmul.f32 %v8562_v31, %v2036_v48 }
 0x350   : > { %v8894_v37 = vadd.f32 %v2118_v53, %v2054_v61  ;;  %v8896_v57 = vadd.f32 %v2136_v39, %v2072_v43  ;;  %v8922_v43 = vmul.f32 %v12765_v9, %v12801_v55  ;;  %v2086_v9 = vmul.f32 %v8562_v31, %v8617_v56  ;;  %12806 = vst [vmem:[#allocation50_spill] sm:$0xff] %v8949_v44  ;;  %v8958_v39 = vld [vmem:[%s11726_s3 + $0x14] ss:$0 sm:$0xff]  ;;  %v4321_v55 = vld [vmem:[%s6991_s17 + $0x48] sm:$0xff] }
 0x351   : > { %v8900_v40 = vadd.f32 %v2172_v13, %v2108_v63  ;;  %v12805_v63 = vld [vmem:[#allocation31_spill] sm:$0xff]  ;;  %v2103_v6 = vmul.f32 %v8567_v41, %v2036_v48  ;;  %v2048_v3 = vmul.f32 %v8542_v60, %v2034_v19  ;;  %v2066_v27 = vmul.f32 %v8557_v59, %v2034_v19  ;;  %2808 = vrot.lane.b32.xlu2 %v8949_v44, %s4789_s14 }
 0x352   : > { %v8930_v61 = vmul.f32 %v8626_v52, %v12805_v63  ;;  %v8934_v46 = vmul.f32 %v8640_v4, %v12805_v63  ;;  %v2049_v52 = vmul.f32 %v8542_v60, %v2036_v48  ;;  %v2067_v4 = vmul.f32 %v8557_v59, %v2036_v48  ;;  %v8963_v13 = vld [vmem:[%s11726_s3 + $0x38] ss:$0 sm:$0xff]  ;;  %v12808_v63 = vld [vmem:[#allocation81_spill] sm:$0xff]  ;;  %2806 = vrot.lane.b32.xlu1 %v4321_v55, %s4789_s14 }
 0x353   : > { %v2084_v56 = vmul.f32 %v8562_v31, %v2034_v19  ;;  %v2102_v53 = vmul.f32 %v8567_v41, %v2034_v19  ;;  %v2093_v5 = vadd.f32 %v2085_v1, %v8493_v47  ;;  %v2111_v15 = vadd.f32 %v2103_v6, %v12807_v18 }
 0x354   : > { %v2057_v22 = vadd.f32 %v2049_v52, %v8480_v51  ;;  %v2075_v17 = vadd.f32 %v2067_v4, %v8491_v62  ;;  %v2056_v48 = vadd.f32 %v2048_v3, %v12808_v63  ;;  %v12809_v51 = vld [vmem:[#allocation86_spill] sm:$0xff]  ;;  %v12810_v62 = vld [vmem:[#allocation61_spill] sm:$0xff]  ;;  %v4320_v4 = vld [vmem:[%s6991_s17 + $0x40] sm:$0xff] }
 0x355   : > { %v2074_v19 = vadd.f32 %v2066_v27, %v12809_v51  ;;  %v2092_v52 = vadd.f32 %v2084_v56, %v12810_v62  ;;  %v2110_v47 = vadd.f32 %v2102_v53, %v8573_v8  ;;  %v8994_v18 = vadd.f32 %v8838_v49, %v2093_v5  ;;  %2804 = vrot.lane.b32.xlu0 %v4320_v4, %s4789_s14  ;;  %v12813_v63 = vld [vmem:[#allocation80_spill] sm:$0xff]  ;;  %v12814_v51 = vld [vmem:[#allocation55_spill] sm:$0xff]  ;;  %v12815_v62 = vld [vmem:[#allocation70_spill] sm:$0xff] }
 0x356   : > { %v8988_v1 = vadd.f32 %v8824_v2, %v2057_v22  ;;  %v8991_v6 = vadd.f32 %v8834_v24, %v2075_v17  ;;  %v8997_v3 = vadd.f32 %v8842_v32, %v2111_v15  ;;  %v9002_v8 = vadd.f32 %v8796_v25, %v2056_v48  ;;  %v12812_v15 = vld [vmem:[#allocation95_spill] sm:$0xff]  ;;  %v12816_v4 = vld [vmem:[#allocation24_spill] sm:$0xff] }
 0x357   : > { %v8999_v27 = vpop.permute.xlu2 %2277  ;;  %v9005_v56 = vadd.f32 %v8812_v33, %v2074_v19  ;;  %v9008_v2 = vadd.f32 %v8816_v34, %v2092_v52  ;;  %v9011_v24 = vadd.f32 %v8820_v58, %v2110_v47  ;;  %v2058_v32 = vadd.f32 %v2050_v36, %v8615_v29  ;;  %v2040_v36 = vpop.permute.xlu0 %2039  ;;  %v4324_v47 = vld [vmem:[%s6991_s17 + $0x60] sm:$0xff] }
 0x358   : > { %v2076_v49 = vadd.f32 %v2068_v50, %v8629_v11  ;;  %v2094_v53 = vadd.f32 %v2086_v9, %v8632_v10  ;;  %v2112_v25 = vadd.f32 %v2104_v42, %v8635_v0  ;;  %v2205_v34 = vmul.f32 %v8958_v39, %v8710_v16  ;;  %v2042_v11 = vpop.permute.xlu1 %2041  ;;  %v9032_v42 = vld [vmem:[%s6991_s17 + $0x68] sm:$0xff] }
 0x359   : > { %v2223_v58 = vmul.f32 %v8963_v13, %v8710_v16  ;;  %v2241_v33 = vmul.f32 %v8973_v12, %v8710_v16  ;;  %v2259_v29 = vmul.f32 %v8978_v45, %v8710_v16  ;;  %v2052_v10 = vmul.f32 %v8542_v60, %v2042_v11  ;;  %12811 = vst [vmem:[#allocation89_spill] sm:$0xff] %v9032_v42 }
 0x35a   : > { %v2070_v0 = vmul.f32 %v8557_v59, %v2042_v11  ;;  %v2088_v50 = vmul.f32 %v8562_v31, %v2042_v11  ;;  %v2106_v9 = vmul.f32 %v8567_v41, %v2042_v11  ;;  %v2051_v22 = vmul.f32 %v8542_v60, %v2040_v36  ;;  %v12818_v60 = vld [vmem:[#allocation48_spill] sm:$0xff]  ;;  %2814 = vrot.lane.b32.xlu2 %v9032_v42, %s4789_s14 }
 0x35b   : > { %v2069_v17 = vmul.f32 %v8557_v59, %v2040_v36  ;;  %v2087_v16 = vmul.f32 %v8562_v31, %v2040_v36  ;;  %v2105_v5 = vmul.f32 %v8567_v41, %v2040_v36  ;;  %v2060_v55 = vadd.f32 %v2052_v10, %v12812_v15  ;;  %v12819_v59 = vld [vmem:[#allocation110_spill] sm:$0xff]  ;;  %v9048_v31 = vld [vmem:[%s6991_s17 + $0x58] sm:$0xff]  ;;  %v12821_v36 = vld [vmem:[#allocation116_spill] sm:$0xff]  ;;  %2812 = vrot.lane.b32.xlu1 %v4324_v47, %s4789_s14 }
 0x35c   : > { %v2078_v48 = vadd.f32 %v2070_v0, %v12813_v63  ;;  %v2096_v19 = vadd.f32 %v2088_v50, %v12814_v51  ;;  %v2114_v52 = vadd.f32 %v2106_v9, %v12815_v62  ;;  %v2059_v11 = vadd.f32 %v2051_v22, %v12816_v4  ;;  %12820 = vst [vmem:[#allocation39_spill] sm:$0xff] %v9048_v31  ;;  %v9067_v50 = vld [vmem:[%s11726_s3 + $0x15] ss:$0 sm:$0xff]  ;;  %v12825_v15 = vld [vmem:[#allocation16_spill] sm:$0xff]  ;;  %v12827_v4 = vld [vmem:[#allocation35_spill] sm:$0xff] }
 0x35d   : > { %v2077_v44 = vadd.f32 %v2069_v17, %v12817_v35  ;;  %v2095_v30 = vadd.f32 %v2087_v16, %v12818_v60  ;;  %v2113_v23 = vadd.f32 %v2105_v5, %v12819_v59  ;;  %v9053_v41 = vadd.f32 %v8862_v14, %v2060_v55  ;;  %v12822_v22 = vld [vmem:[#allocation66_spill] sm:$0xff]  ;;  %v12823_v17 = vld [vmem:[#allocation13_spill] sm:$0xff]  ;;  %v12824_v5 = vld [vmem:[#allocation67_spill] sm:$0xff]  ;;  %2810 = vrot.lane.b32.xlu0 %v9048_v31, %s4789_s14 }
 0x35e   : > { %v9056_v10 = vadd.f32 %v12821_v36, %v2078_v48  ;;  %v9059_v0 = vadd.f32 %v8922_v43, %v2096_v19  ;;  %v9062_v35 = vadd.f32 %v8926_v7, %v2114_v52  ;;  %v9071_v14 = vadd.f32 %v12822_v22, %v2058_v32  ;;  %v12826_v55 = vld [vmem:[#allocation107_spill] sm:$0xff] }
 0x35f   : > { %v2284_v9 = vpop.permute.xlu2 %2283  ;;  %v9074_v16 = vadd.f32 %v12823_v17, %v2076_v49  ;;  %v9077_v43 = vadd.f32 %v12824_v5, %v2094_v53  ;;  %v9080_v7 = vadd.f32 %v12825_v15, %v2112_v25  ;;  %v2208_v63 = vmul.f32 %v8958_v39, %v12826_v55  ;;  %v9093_v49 = vld [vmem:[%s11726_s3 + $0x39] ss:$0 sm:$0xff]  ;;  %v9098_v53 = vld [vmem:[%s11726_s3 + $0x5d] ss:$0 sm:$0xff]  ;;  %v9103_v25 = vld [vmem:[%s11726_s3 + $0x81] ss:$0 sm:$0xff]  ;;  %v2190_v62 = vpop.permute.xlu0 %2189 }
 0x360   : > { %v2226_v48 = vmul.f32 %v8963_v13, %v12826_v55  ;;  %v2244_v51 = vmul.f32 %v8973_v12, %v12826_v55  ;;  %v2262_v32 = vmul.f32 %v8978_v45, %v12826_v55  ;;  %v2192_v19 = vpop.permute.xlu1 %2191  ;;  %v2131_v52 = vadd.f32 %v8930_v61, %v2059_v11  ;;  %v12828_v59 = vld [vmem:[#allocation19_spill] sm:$0xff] }
 0x361   : > { %v2149_v47 = vadd.f32 %v8934_v46, %v2077_v44  ;;  %v2167_v60 = vadd.f32 %v12827_v4, %v2095_v30  ;;  %v2185_v36 = vadd.f32 %v12828_v59, %v2113_v23  ;;  %v2211_v22 = vmul.f32 %v8958_v39, %v8902_v38 }
 0x362   : > { %v2229_v17 = vmul.f32 %v8963_v13, %v8902_v38  ;;  %v2247_v5 = vmul.f32 %v8973_v12, %v8902_v38  ;;  %v2265_v61 = vmul.f32 %v8978_v45, %v8902_v38  ;;  %v9120_v11 = vadd.f32 %v2205_v34, %v8905_v28 }
 0x363   : > { %v9123_v30 = vadd.f32 %v2223_v58, %v8908_v54  ;;  %v9126_v23 = vadd.f32 %v2241_v33, %v8911_v21  ;;  %v9129_v46 = vadd.f32 %v2259_v29, %v8914_v20  ;;  %v2294_v44 = vmul.f32 %v9067_v50, %v8999_v27  ;;  %v9140_v54 = vld [vmem:[%s6991_s17 + $0x78] sm:$0xff]  ;;  %v9147_v33 = vld [vmem:[%s6991_s17 + $0x70] sm:$0xff] }
 0x364   : > { %v2312_v15 = vmul.f32 %v9093_v49, %v8999_v27  ;;  %v2330_v38 = vmul.f32 %v9098_v53, %v8999_v27  ;;  %v2348_v28 = vmul.f32 %v9103_v25, %v8999_v27  ;;  %12831 = vst [vmem:[#allocation88_spill] sm:$0xff] %v9140_v54  ;;  %v2207_v21 = vmul.f32 %v8958_v39, %v2192_v19 }
 0x365   : > { %12829 = vst [vmem:[#allocation63_spill] sm:$0xff] %v9126_v23  ;;  %v2225_v34 = vmul.f32 %v8963_v13, %v2192_v19  ;;  %v2243_v20 = vmul.f32 %v8973_v12, %v2192_v19  ;;  %v2261_v58 = vmul.f32 %v8978_v45, %v2192_v19  ;;  %v2206_v29 = vmul.f32 %v8958_v39, %v2190_v62 }
 0x366   : > { %12830 = vst [vmem:[#allocation36_spill] sm:$0xff] %v9129_v46  ;;  %v2224_v55 = vmul.f32 %v8963_v13, %v2190_v62  ;;  %v9151_v4 = vadd.f32 %v2247_v5, %v2167_v60  ;;  %v9153_v59 = vadd.f32 %v2265_v61, %v2185_v36  ;;  %v2242_v31 = vmul.f32 %v8973_v12, %v2190_v62  ;;  %v12837_v5 = vld [vmem:[#allocation54_spill] sm:$0xff] }
 0x367   : > { %12832 = vst [vmem:[#allocation52_spill] sm:$0xff] %v9147_v33  ;;  %v2290_v27 = vpop.permute.xlu2 %2289  ;;  %v2260_v42 = vmul.f32 %v8978_v45, %v2190_v62  ;;  %2818 = vrot.lane.b32.xlu1 %v9140_v54, %s4789_s14  ;;  %v9160_v19 = vadd.f32 %v2208_v63, %v9002_v8  ;;  %v9163_v46 = vadd.f32 %v2226_v48, %v9005_v56  ;;  %v12836_v63 = vld [vmem:[#allocation125_spill] sm:$0xff] }
 0x368   : > { %12833 = vst [vmem:[#allocation102_spill] sm:$0xff] %v9151_v4  ;;  %v9166_v23 = vmul.f32 %v9067_v50, %v2284_v9  ;;  %v9169_v60 = vmul.f32 %v9093_v49, %v2284_v9  ;;  %2816 = vrot.lane.b32.xlu0 %v9147_v33, %s4789_s14  ;;  %v9174_v62 = vadd.f32 %v2244_v51, %v9008_v2  ;;  %v2198_v54 = vpop.permute.xlu1 %2197  ;;  %v2196_v33 = vpop.permute.xlu0 %2195  ;;  %v12839_v51 = vld [vmem:[#allocation9_spill] sm:$0xff] }
 0x369   : > { %12834 = vst [vmem:[#allocation82_spill] sm:$0xff] %v9153_v59  ;;  %v9177_v36 = vadd.f32 %v2262_v32, %v9011_v24  ;;  %v9180_v8 = vmul.f32 %v9098_v53, %v2284_v9  ;;  %v9183_v56 = vmul.f32 %v9103_v25, %v2284_v9  ;;  %v9186_v48 = vadd.f32 %v2207_v21, %v12836_v63  ;;  %v12838_v59 = vld [vmem:[#allocation75_spill] sm:$0xff] }
 0x36a   : > { %v9189_v61 = vadd.f32 %v2225_v34, %v12837_v5  ;;  %v9192_v2 = vadd.f32 %v2243_v20, %v12838_v59  ;;  %v9195_v24 = vadd.f32 %v2261_v58, %v12839_v51  ;;  %v2214_v32 = vadd.f32 %v2206_v29, %v8894_v37 }
 0x36b   : > { %12835 = vst [vmem:[#allocation90_spill] sm:$0xff] %v9177_v36  ;;  %v2232_v4 = vadd.f32 %v2224_v55, %v8896_v57  ;;  %v2250_v9 = vadd.f32 %v2242_v31, %v8898_v26  ;;  %v2268_v21 = vadd.f32 %v2260_v42, %v8900_v40  ;;  %v9201_v63 = vadd.f32 %v2211_v22, %v2131_v52 }
 0x36c   : > { %v9203_v34 = vadd.f32 %v2229_v17, %v2149_v47  ;;  %v2210_v5 = vmul.f32 %v8958_v39, %v2198_v54  ;;  %v2228_v20 = vmul.f32 %v8963_v13, %v2198_v54  ;;  %v2246_v59 = vmul.f32 %v8973_v12, %v2198_v54 }
 0x36d   : > { %12840 = vst [vmem:[#allocation121_spill] sm:$0xff] %v9201_v63  ;;  %v2264_v58 = vmul.f32 %v8978_v45, %v2198_v54  ;;  %v2209_v37 = vmul.f32 %v8958_v39, %v2196_v33  ;;  %v2227_v57 = vmul.f32 %v8963_v13, %v2196_v33  ;;  %v2245_v26 = vmul.f32 %v8973_v12, %v2196_v33 }
 0x36e   : > { %12841 = vst [vmem:[#allocation101_spill] sm:$0xff] %v9203_v34  ;;  %v2263_v40 = vmul.f32 %v8978_v45, %v2196_v33  ;;  %v2300_v42 = vmul.f32 %v9067_v50, %v2290_v27  ;;  %v2318_v31 = vmul.f32 %v9093_v49, %v2290_v27  ;;  %v2336_v52 = vmul.f32 %v9098_v53, %v2290_v27 }
 0x36f   : > { %v2354_v47 = vmul.f32 %v9103_v25, %v2290_v27  ;;  %v2440_v22 = vpop.permute.xlu2 %2439  ;;  %v2302_v17 = vadd.f32 %v2294_v44, %v2214_v32  ;;  %v2320_v29 = vadd.f32 %v2312_v15, %v2232_v4  ;;  %v2338_v54 = vadd.f32 %v2330_v38, %v2250_v9 }
 0x370   : > { %v2356_v55 = vadd.f32 %v2348_v28, %v2268_v21  ;;  %v9218_v51 = vadd.f32 %v2210_v5, %v9071_v14  ;;  %v9221_v34 = vadd.f32 %v2228_v20, %v9074_v16  ;;  %v9224_v33 = vadd.f32 %v2246_v59, %v9077_v43  ;;  %v2276_v38 = vpop.permute.xlu1 %2275  ;;  %v2202_v14 = vpop.permute.xlu0 %2201  ;;  %v9236_v16 = vld [vmem:[%s11726_s3 + $0x17] ss:$0 sm:$0xff]  ;;  %v12842_v5 = vld [vmem:[#allocation64_spill] sm:$0xff] }
 0x371   : > { %v9227_v63 = vadd.f32 %v2264_v58, %v9080_v7  ;;  %v2217_v36 = vadd.f32 %v2209_v37, %v8988_v1  ;;  %v2235_v27 = vadd.f32 %v2227_v57, %v8991_v6  ;;  %v2253_v44 = vadd.f32 %v2245_v26, %v8994_v18  ;;  %v9245_v6 = vld [vmem:[%s11726_s3 + $0x3b] ss:$0 sm:$0xff]  ;;  %v9250_v18 = vld [vmem:[%s11726_s3 + $0x5f] ss:$0 sm:$0xff]  ;;  %v12843_v59 = vld [vmem:[#allocation78_spill] sm:$0xff] }
 0x372   : > { %v2271_v15 = vadd.f32 %v2263_v40, %v8997_v3  ;;  %v2293_v43 = vmul.f32 %v9067_v50, %v2276_v38  ;;  %v2311_v7 = vmul.f32 %v9093_v49, %v2276_v38  ;;  %v2329_v28 = vmul.f32 %v9098_v53, %v2276_v38  ;;  %v9255_v3 = vld [vmem:[%s11726_s3 + $0x83] ss:$0 sm:$0xff]  ;;  %v12844_v37 = vld [vmem:[#allocation34_spill] sm:$0xff]  ;;  %v12845_v26 = vld [vmem:[#allocation119_spill] sm:$0xff] }
 0x373   : > { %v2347_v1 = vmul.f32 %v9103_v25, %v2276_v38  ;;  %v2212_v4 = vmul.f32 %v8958_v39, %v2202_v14  ;;  %v2230_v32 = vmul.f32 %v8963_v13, %v2202_v14  ;;  %v2248_v9 = vmul.f32 %v8973_v12, %v2202_v14 }
 0x374   : > { %v2266_v21 = vmul.f32 %v8978_v45, %v2202_v14  ;;  %v9262_v20 = vadd.f32 %v12842_v5, %v2302_v17  ;;  %v9265_v58 = vadd.f32 %v12843_v59, %v2320_v29  ;;  %v9268_v57 = vadd.f32 %v12844_v37, %v2338_v54  ;;  %v12846_v29 = vld [vmem:[#allocation63_spill] sm:$0xff]  ;;  %v12847_v5 = vld [vmem:[#allocation36_spill] sm:$0xff] }
 0x375   : > { %v9271_v40 = vadd.f32 %v12845_v26, %v2356_v55  ;;  %v2220_v39 = vadd.f32 %v2212_v4, %v9053_v41  ;;  %v2238_v13 = vadd.f32 %v2230_v32, %v9056_v10  ;;  %v2256_v12 = vadd.f32 %v2248_v9, %v9059_v0 }
 0x376   : > { %v2274_v45 = vadd.f32 %v2266_v21, %v9062_v35  ;;  %v2301_v17 = vadd.f32 %v2293_v43, %v9120_v11  ;;  %v2319_v38 = vadd.f32 %v2311_v7, %v9123_v30  ;;  %v2337_v14 = vadd.f32 %v2329_v28, %v12846_v29  ;;  %v12857_v29 = vld [vmem:[#allocation23_spill] sm:$0xff] }
 0x377   : > { %v2355_v54 = vadd.f32 %v2347_v1, %v12847_v5  ;;  %v9282_v59 = vmul.f32 %v9236_v16, %v2440_v22  ;;  %v9285_v55 = vmul.f32 %v9245_v6, %v2440_v22  ;;  %v9288_v41 = vmul.f32 %v9250_v18, %v2440_v22  ;;  %v2446_v0 = vpop.permute.xlu2 %2445  ;;  %v12858_v5 = vld [vmem:[#allocation74_spill] sm:$0xff] }
 0x378   : > { %v9291_v10 = vmul.f32 %v9255_v3, %v2440_v22  ;;  %v2305_v35 = vadd.f32 %v9166_v23, %v2217_v36  ;;  %v2323_v11 = vadd.f32 %v9169_v60, %v2235_v27  ;;  %v2341_v30 = vadd.f32 %v9180_v8, %v2253_v44  ;;  %v2282_v7 = vpop.permute.xlu1 %2281  ;;  %v2280_v28 = vpop.permute.xlu0 %2279  ;;  %v12852_v22 = vld [vmem:[#allocation87_spill] sm:$0xff]  ;;  %v12853_v23 = vld [vmem:[#allocation114_spill] sm:$0xff] }
 0x379   : > { %v2359_v43 = vadd.f32 %v9183_v56, %v2271_v15  ;;  %v9297_v1 = vadd.f32 %v2300_v42, %v2220_v39  ;;  %v9299_v4 = vadd.f32 %v2318_v31, %v2238_v13  ;;  %v9301_v32 = vadd.f32 %v2336_v52, %v2256_v12  ;;  %v12854_v60 = vld [vmem:[#allocation115_spill] sm:$0xff]  ;;  %v12855_v56 = vld [vmem:[#allocation118_spill] sm:$0xff] }
 0x37a   : > { %v9303_v9 = vadd.f32 %v2354_v47, %v2274_v45  ;;  %v9306_v21 = vadd.f32 %v12852_v22, %v2301_v17  ;;  %v9309_v36 = vadd.f32 %v12853_v23, %v2319_v38  ;;  %v9312_v8 = vadd.f32 %v12854_v60, %v2337_v14  ;;  %v12856_v17 = vld [vmem:[#allocation120_spill] sm:$0xff] }
 0x37b   : > { %12848 = vst [vmem:[#allocation122_spill] sm:$0xff] %v9297_v1  ;;  %v9315_v27 = vadd.f32 %v12855_v56, %v2355_v54  ;;  %v2295_v42 = vmul.f32 %v9067_v50, %v2280_v28  ;;  %v2313_v31 = vmul.f32 %v9093_v49, %v2280_v28  ;;  %v2331_v52 = vmul.f32 %v9098_v53, %v2280_v28  ;;  %v12869_v1 = vld [vmem:[#allocation43_spill] sm:$0xff] }
 0x37c   : > { %12849 = vst [vmem:[#allocation123_spill] sm:$0xff] %v9299_v4  ;;  %v2349_v47 = vmul.f32 %v9103_v25, %v2280_v28  ;;  %v2296_v44 = vmul.f32 %v9067_v50, %v2282_v7  ;;  %v2314_v15 = vmul.f32 %v9093_v49, %v2282_v7  ;;  %v2332_v37 = vmul.f32 %v9098_v53, %v2282_v7  ;;  %v12859_v28 = vld [vmem:[#allocation21_spill] sm:$0xff] }
 0x37d   : > { %12850 = vst [vmem:[#allocation91_spill] sm:$0xff] %v9301_v32  ;;  %v2350_v26 = vmul.f32 %v9103_v25, %v2282_v7  ;;  %v2303_v39 = vadd.f32 %v2295_v42, %v9186_v48  ;;  %v2321_v13 = vadd.f32 %v2313_v31, %v9189_v61  ;;  %v2339_v12 = vadd.f32 %v2331_v52, %v9192_v2  ;;  %v12860_v7 = vld [vmem:[#allocation90_spill] sm:$0xff]  ;;  %v12861_v42 = vld [vmem:[#allocation15_spill] sm:$0xff] }
 0x37e   : > { %12851 = vst [vmem:[#allocation124_spill] sm:$0xff] %v9303_v9  ;;  %v2357_v45 = vadd.f32 %v2349_v47, %v9195_v24  ;;  %v9330_v38 = vadd.f32 %v12856_v17, %v2305_v35  ;;  %v9333_v14 = vadd.f32 %v12857_v29, %v2323_v11  ;;  %v9336_v54 = vadd.f32 %v12858_v5, %v2341_v30  ;;  %v12862_v52 = vld [vmem:[#allocation14_spill] sm:$0xff]  ;;  %v12863_v17 = vld [vmem:[#allocation41_spill] sm:$0xff] }
 0x37f   : > { %v9339_v22 = vadd.f32 %v12859_v28, %v2359_v43  ;;  %v9342_v48 = vmul.f32 %v9236_v16, %v2446_v0  ;;  %v9345_v61 = vmul.f32 %v9245_v6, %v2446_v0  ;;  %v9348_v2 = vmul.f32 %v9250_v18, %v2446_v0  ;;  %v2540_v35 = vpop.permute.xlu2 %2539  ;;  %v12864_v29 = vld [vmem:[#allocation106_spill] sm:$0xff] }
 0x380   : > { %v9351_v24 = vmul.f32 %v9255_v3, %v2446_v0  ;;  %v2304_v11 = vadd.f32 %v2296_v44, %v9160_v19  ;;  %v2322_v30 = vadd.f32 %v2314_v15, %v9163_v46  ;;  %v9356_v43 = vadd.f32 %v2332_v37, %v9174_v62  ;;  %v2288_v60 = vpop.permute.xlu1 %2287  ;;  %v2286_v56 = vpop.permute.xlu0 %2285  ;;  %v9368_v46 = vld [vmem:[%s11726_s3 + $0x18] ss:$0 sm:$0xff]  ;;  %v9377_v37 = vld [vmem:[%s11726_s3 + $0x3c] ss:$0 sm:$0xff]  ;;  %v12868_v9 = vld [vmem:[#allocation82_spill] sm:$0xff] }
 0x381   : > { %v9359_v23 = vadd.f32 %v2350_v26, %v12860_v7  ;;  %v2375_v31 = vadd.f32 %v12861_v42, %v2303_v39  ;;  %v2393_v47 = vadd.f32 %v12862_v52, %v2321_v13  ;;  %v2411_v0 = vadd.f32 %v12863_v17, %v2339_v12  ;;  %v9382_v26 = vld [vmem:[%s11726_s3 + $0x60] ss:$0 sm:$0xff]  ;;  %v9387_v39 = vld [vmem:[%s11726_s3 + $0x84] ss:$0 sm:$0xff]  ;;  %v12865_v7 = vld [vmem:[#allocation121_spill] sm:$0xff] }
 0x382   : > { %v2429_v5 = vadd.f32 %v12864_v29, %v2357_v45  ;;  %v2299_v19 = vmul.f32 %v9067_v50, %v2288_v60  ;;  %v2317_v62 = vmul.f32 %v9093_v49, %v2288_v60  ;;  %v2335_v44 = vmul.f32 %v9098_v53, %v2288_v60  ;;  %v12866_v42 = vld [vmem:[#allocation101_spill] sm:$0xff]  ;;  %v12867_v17 = vld [vmem:[#allocation102_spill] sm:$0xff] }
 0x383   : > { %v2353_v15 = vmul.f32 %v9103_v25, %v2288_v60  ;;  %v2298_v13 = vmul.f32 %v9067_v50, %v2286_v56  ;;  %v2316_v12 = vmul.f32 %v9093_v49, %v2286_v56  ;;  %v2334_v45 = vmul.f32 %v9098_v53, %v2286_v56 }
 0x384   : > { %v2352_v28 = vmul.f32 %v9103_v25, %v2286_v56  ;;  %v9394_v60 = vadd.f32 %v2299_v19, %v12865_v7  ;;  %v9397_v52 = vadd.f32 %v2317_v62, %v12866_v42  ;;  %v2343_v29 = vadd.f32 %v2335_v44, %v12867_v17  ;;  %v12870_v56 = vld [vmem:[#allocation42_spill] sm:$0xff]  ;;  %v12871_v62 = vld [vmem:[#allocation69_spill] sm:$0xff] }
 0x385   : > { %v2361_v32 = vadd.f32 %v2353_v15, %v12868_v9  ;;  %v2306_v4 = vadd.f32 %v2298_v13, %v9218_v51  ;;  %v2324_v50 = vadd.f32 %v2316_v12, %v9221_v34  ;;  %v2342_v49 = vadd.f32 %v2334_v45, %v9224_v33  ;;  %v12872_v44 = vld [vmem:[#allocation26_spill] sm:$0xff]  ;;  %v12874_v15 = vld [vmem:[#allocation20_spill] sm:$0xff] }
 0x386   : > { %v2360_v53 = vadd.f32 %v2352_v28, %v9227_v63  ;;  %v9406_v25 = vadd.f32 %v12869_v1, %v2304_v11  ;;  %v9409_v19 = vadd.f32 %v12870_v56, %v2322_v30  ;;  %v9412_v7 = vadd.f32 %v12871_v62, %v2343_v29  ;;  %v12873_v1 = vld [vmem:[#allocation76_spill] sm:$0xff] }
 0x387   : > { %v9415_v42 = vadd.f32 %v12872_v44, %v2361_v32  ;;  %v2557_v51 = vmul.f32 %v9368_v46, %v2540_v35  ;;  %v2575_v34 = vmul.f32 %v9377_v37, %v2540_v35  ;;  %v2593_v33 = vmul.f32 %v9382_v26, %v2540_v35  ;;  %v2546_v9 = vpop.permute.xlu2 %2545  ;;  %v12875_v13 = vld [vmem:[#allocation108_spill] sm:$0xff] }
 0x388   : > { %v2611_v63 = vmul.f32 %v9387_v39, %v2540_v35  ;;  %v2378_v11 = vadd.f32 %v12873_v1, %v2306_v4  ;;  %v2396_v30 = vadd.f32 %v12874_v15, %v2324_v50  ;;  %v2414_v12 = vadd.f32 %v12875_v13, %v2342_v49  ;;  %v12876_v45 = vld [vmem:[#allocation84_spill] sm:$0xff]  ;;  %v2438_v17 = vpop.permute.xlu1 %2437  ;;  %v2436_v32 = vpop.permute.xlu0 %2435 }
 0x389   : > { %v2432_v28 = vadd.f32 %v12876_v45, %v2360_v53  ;;  %v9426_v29 = vadd.f32 %v9282_v59, %v2375_v31  ;;  %v9429_v56 = vadd.f32 %v9285_v55, %v2393_v47  ;;  %v9432_v62 = vadd.f32 %v9288_v41, %v2411_v0 }
 0x38a   : > { %v9435_v35 = vadd.f32 %v9291_v10, %v2429_v5  ;;  %v2454_v4 = vmul.f32 %v9236_v16, %v2438_v17  ;;  %v2472_v50 = vmul.f32 %v9245_v6, %v2438_v17  ;;  %v2490_v49 = vmul.f32 %v9250_v18, %v2438_v17 }
 0x38b   : > { %v2508_v53 = vmul.f32 %v9255_v3, %v2438_v17  ;;  %v2453_v59 = vmul.f32 %v9236_v16, %v2436_v32  ;;  %v2471_v31 = vmul.f32 %v9245_v6, %v2436_v32  ;;  %v2489_v55 = vmul.f32 %v9250_v18, %v2436_v32 }
 0x38c   : > { %v2507_v41 = vmul.f32 %v9255_v3, %v2436_v32  ;;  %v9446_v47 = vadd.f32 %v2454_v4, %v9262_v20  ;;  %v9449_v10 = vadd.f32 %v2472_v50, %v9265_v58  ;;  %v9452_v0 = vadd.f32 %v2490_v49, %v9268_v57 }
 0x38d   : > { %v9455_v5 = vadd.f32 %v2508_v53, %v9271_v40  ;;  %v2461_v44 = vadd.f32 %v2453_v59, %v9306_v21  ;;  %v2479_v1 = vadd.f32 %v2471_v31, %v9309_v36  ;;  %v2497_v15 = vadd.f32 %v2489_v55, %v9312_v8 }
 0x38e   : > { %v2515_v13 = vadd.f32 %v2507_v41, %v9315_v27  ;;  %v9462_v20 = vadd.f32 %v9342_v48, %v2378_v11  ;;  %v9465_v58 = vadd.f32 %v9345_v61, %v2396_v30  ;;  %v9468_v57 = vadd.f32 %v9348_v2, %v2414_v12  ;;  %v12877_v2 = vld [vmem:[#allocation127_spill] sm:$0xff] }
 0x38f   : > { %v9471_v40 = vadd.f32 %v9351_v24, %v2432_v28  ;;  %v2552_v45 = vpop.permute.xlu2 %2551  ;;  %v9473_v21 = vadd.f32 %v2557_v51, %v2461_v44  ;;  %v9475_v36 = vadd.f32 %v2575_v34, %v2479_v1  ;;  %v9477_v8 = vadd.f32 %v2593_v33, %v2497_v15  ;;  %v12878_v24 = vld [vmem:[#allocation25_spill] sm:$0xff] }
 0x390   : > { %v9479_v27 = vadd.f32 %v2611_v63, %v2515_v13  ;;  %v9482_v48 = vmul.f32 %v9382_v26, %v2552_v45  ;;  %v9485_v61 = vmul.f32 %v9387_v39, %v2552_v45  ;;  %v2412_v11 = vadd.f32 %v12877_v2, %v9356_v43  ;;  %v2444_v12 = vpop.permute.xlu1 %2443  ;;  %v2442_v28 = vpop.permute.xlu0 %2441  ;;  %v12879_v13 = vld [vmem:[#allocation117_spill] sm:$0xff]  ;;  %v12880_v2 = vld [vmem:[#allocation100_spill] sm:$0xff] }
 0x391   : > { %v2430_v30 = vadd.f32 %v12878_v24, %v9359_v23  ;;  %v2560_v51 = vmul.f32 %v9368_v46, %v2546_v9  ;;  %v2578_v34 = vmul.f32 %v9377_v37, %v2546_v9  ;;  %v2596_v33 = vmul.f32 %v9382_v26, %v2546_v9 }
 0x392   : > { %v2614_v63 = vmul.f32 %v9387_v39, %v2546_v9  ;;  %v2457_v17 = vmul.f32 %v9236_v16, %v2444_v12  ;;  %v2475_v32 = vmul.f32 %v9245_v6, %v2444_v12  ;;  %v2493_v4 = vmul.f32 %v9250_v18, %v2444_v12 }
 0x393   : > { %v2511_v43 = vmul.f32 %v9255_v3, %v2444_v12  ;;  %v2456_v23 = vmul.f32 %v9236_v16, %v2442_v28  ;;  %v2474_v50 = vmul.f32 %v9245_v6, %v2442_v28  ;;  %v2492_v49 = vmul.f32 %v9250_v18, %v2442_v28 }
 0x394   : > { %v2510_v53 = vmul.f32 %v9255_v3, %v2442_v28  ;;  %v9504_v9 = vadd.f32 %v2457_v17, %v9330_v38  ;;  %v9507_v59 = vadd.f32 %v2475_v32, %v9333_v14  ;;  %v9510_v31 = vadd.f32 %v2493_v4, %v9336_v54  ;;  %v12881_v38 = vld [vmem:[#allocation47_spill] sm:$0xff]  ;;  %v12882_v14 = vld [vmem:[#allocation32_spill] sm:$0xff]  ;;  %v12883_v28 = vld [vmem:[#allocation49_spill] sm:$0xff] }
 0x395   : > { %v9513_v55 = vadd.f32 %v2511_v43, %v9339_v22  ;;  %v2464_v41 = vadd.f32 %v2456_v23, %v9406_v25  ;;  %v2482_v44 = vadd.f32 %v2474_v50, %v9409_v19  ;;  %v2500_v1 = vadd.f32 %v2492_v49, %v2412_v11  ;;  %v12884_v54 = vld [vmem:[#allocation96_spill] sm:$0xff]  ;;  %v12885_v11 = vld [vmem:[#allocation122_spill] sm:$0xff]  ;;  %v12887_v23 = vld [vmem:[#allocation123_spill] sm:$0xff] }
 0x396   : > { %v2518_v15 = vadd.f32 %v2510_v53, %v2430_v30  ;;  %v2408_v24 = vmul.f32 %v12880_v2, %v12879_v13  ;;  %v2426_v12 = vmul.f32 %v12881_v38, %v12879_v13  ;;  %v2371_v17 = vmul.f32 %v12883_v28, %v12882_v14  ;;  %v12886_v30 = vld [vmem:[#allocation30_spill] sm:$0xff]  ;;  %v12889_v53 = vld [vmem:[#allocation91_spill] sm:$0xff]  ;;  %v12890_v2 = vld [vmem:[#allocation124_spill] sm:$0xff] }
 0x397   : > { %v2389_v32 = vmul.f32 %v12884_v54, %v12882_v14  ;;  %v9525_v22 = vadd.f32 %v2560_v51, %v2464_v41  ;;  %v9527_v4 = vadd.f32 %v2578_v34, %v2482_v44  ;;  %v9529_v25 = vadd.f32 %v2596_v33, %v2500_v1  ;;  %v12888_v50 = vld [vmem:[#allocation130_spill] sm:$0xff] }
 0x398   : > { %v9531_v19 = vadd.f32 %v2614_v63, %v2518_v15  ;;  %v2380_v43 = vadd.f32 %v12886_v30, %v12885_v11  ;;  %v2398_v49 = vadd.f32 %v12888_v50, %v12887_v23  ;;  %v2416_v13 = vadd.f32 %v2408_v24, %v12889_v53  ;;  %v2450_v34 = vpop.permute.xlu1 %2449  ;;  %v2448_v41 = vpop.permute.xlu0 %2447  ;;  %v9562_v11 = vld [vmem:[%s11726_s3 + $0x61] ss:$0 sm:$0xff] }
 0x399   : > { %v2434_v38 = vadd.f32 %v2426_v12, %v12890_v2  ;;  %v2563_v14 = vmul.f32 %v9368_v46, %v2552_v45  ;;  %v2581_v51 = vmul.f32 %v9377_v37, %v2552_v45  ;;  %v2379_v33 = vadd.f32 %v2371_v17, %v9394_v60  ;;  %12891 = vst [vmem:[#allocation68_spill] sm:$0xff] %v9562_v11 }
 0x39a   : > { %v2397_v63 = vadd.f32 %v2389_v32, %v9397_v52  ;;  %v2460_v44 = vmul.f32 %v9236_v16, %v2450_v34  ;;  %v2478_v1 = vmul.f32 %v9245_v6, %v2450_v34  ;;  %v2496_v15 = vmul.f32 %v9250_v18, %v2450_v34 }
 0x39b   : > { %v2514_v24 = vmul.f32 %v9255_v3, %v2450_v34  ;;  %v2459_v12 = vmul.f32 %v9236_v16, %v2448_v41  ;;  %v2477_v28 = vmul.f32 %v9245_v6, %v2448_v41  ;;  %v2495_v45 = vmul.f32 %v9250_v18, %v2448_v41  ;;  %v9567_v16 = vld [vmem:[%s11726_s3 + $0x85] ss:$0 sm:$0xff] }
 0x39c   : > { %v2513_v54 = vmul.f32 %v9255_v3, %v2448_v41  ;;  %v9551_v60 = vadd.f32 %v2460_v44, %v2380_v43  ;;  %v9553_v52 = vadd.f32 %v2478_v1, %v2398_v49  ;;  %v9555_v17 = vadd.f32 %v2496_v15, %v2416_v13  ;;  %v12892_v43 = vld [vmem:[#allocation12_spill] sm:$0xff] }
 0x39d   : > { %v9557_v32 = vadd.f32 %v2514_v24, %v2434_v38  ;;  %v2467_v6 = vadd.f32 %v2459_v12, %v2379_v33  ;;  %v2485_v18 = vadd.f32 %v2477_v28, %v2397_v63  ;;  %v2503_v3 = vadd.f32 %v2495_v45, %v9412_v7  ;;  %v9581_v38 = vpop.permute.xlu2 %2701 }
 0x39e   : > { %v2521_v30 = vadd.f32 %v2513_v54, %v9415_v42  ;;  %v2671_v23 = vmul.f32 %v9562_v11, %v12892_v43  ;;  %v2689_v50 = vmul.f32 %v9567_v16, %v12892_v43 }
 0x39f   : > { %v9575_v49 = vadd.f32 %v2563_v14, %v2467_v6  ;;  %v9577_v53 = vadd.f32 %v2581_v51, %v2485_v18  ;;  %v2607_v13 = vadd.f32 %v9482_v48, %v2503_v3  ;;  %v9594_v48 = vld [vmem:[%s11726_s3 + $0x19] ss:$0 sm:$0xff] }
 0x3a0   : > { %v2625_v2 = vadd.f32 %v9485_v61, %v2521_v30  ;;  %v2544_v34 = vpop.permute.xlu1 %2543  ;;  %v2542_v7 = vpop.permute.xlu0 %2541  ;;  %12896 = vst [vmem:[#allocation10_spill] sm:$0xff] %v9594_v48  ;;  %v9599_v61 = vld [vmem:[%s11726_s3 + $0x3d] ss:$0 sm:$0xff] }
 0x3a1   : > { %12893 = vst [vmem:[#allocation98_spill] sm:$0xff] %v9577_v53  ;;  %v9583_v33 = vadd.f32 %v2671_v23, %v2607_v13  ;;  %v2559_v63 = vmul.f32 %v9368_v46, %v2544_v34  ;;  %v2577_v41 = vmul.f32 %v9377_v37, %v2544_v34  ;;  %v2595_v14 = vmul.f32 %v9382_v26, %v2544_v34  ;;  %v12904_v13 = vld [vmem:[#allocation11_spill] sm:$0xff] }
 0x3a2   : > { %v9585_v42 = vadd.f32 %v2689_v50, %v2625_v2  ;;  %v2613_v51 = vmul.f32 %v9387_v39, %v2544_v34  ;;  %12897 = vst [vmem:[#allocation17_spill] sm:$0xff] %v9599_v61  ;;  %v2558_v44 = vmul.f32 %v9368_v46, %v2542_v7  ;;  %v2576_v1 = vmul.f32 %v9377_v37, %v2542_v7 }
 0x3a3   : > { %12894 = vst [vmem:[#allocation99_spill] sm:$0xff] %v9583_v33  ;;  %v2594_v15 = vmul.f32 %v9382_v26, %v2542_v7  ;;  %v2612_v24 = vmul.f32 %v9387_v39, %v2542_v7  ;;  %v9606_v12 = vadd.f32 %v2559_v63, %v9426_v29  ;;  %v9609_v28 = vadd.f32 %v2577_v41, %v9429_v56  ;;  %v12898_v56 = vld [vmem:[#allocation60_spill] sm:$0xff] }
 0x3a4   : > { %12895 = vst [vmem:[#allocation22_spill] sm:$0xff] %v9585_v42  ;;  %v9612_v45 = vadd.f32 %v2595_v14, %v9432_v62  ;;  %v9615_v54 = vadd.f32 %v2613_v51, %v9435_v35  ;;  %v9618_v6 = vadd.f32 %v2558_v44, %v9446_v47  ;;  %v9621_v18 = vadd.f32 %v2576_v1, %v9449_v10  ;;  %v12899_v10 = vld [vmem:[#allocation53_spill] sm:$0xff]  ;;  %v12905_v51 = vld [vmem:[#allocation71_spill] sm:$0xff] }
 0x3a5   : > { %v9624_v3 = vadd.f32 %v2594_v15, %v9452_v0  ;;  %v9627_v29 = vadd.f32 %v2612_v24, %v9455_v5  ;;  %v9631_v30 = vmul.f32 %v9594_v48, %v12898_v56  ;;  %v9635_v62 = vmul.f32 %v9599_v61, %v12898_v56 }
 0x3a6   : > { %v9639_v35 = vmul.f32 %v9562_v11, %v12898_v56  ;;  %v9643_v47 = vmul.f32 %v9567_v16, %v12898_v56  ;;  %v9647_v0 = vmul.f32 %v9594_v48, %v12899_v10  ;;  %v9651_v5 = vmul.f32 %v9599_v61, %v12899_v10 }
 0x3a7   : > { %v9655_v23 = vmul.f32 %v9562_v11, %v12899_v10  ;;  %v9659_v50 = vmul.f32 %v9567_v16, %v12899_v10  ;;  %v2629_v2 = vmul.f32 %v9594_v48, %v12904_v13  ;;  %v2647_v63 = vmul.f32 %v9599_v61, %v12904_v13  ;;  %v9675_v10 = vpop.permute.xlu2 %2707 }
 0x3a8   : > { %12900 = vst [vmem:[#allocation38_spill] sm:$0xff] %v9647_v0  ;;  %v2550_v34 = vpop.permute.xlu1 %2549  ;;  %v2548_v7 = vpop.permute.xlu0 %2547  ;;  %v2665_v41 = vmul.f32 %v9562_v11, %v12904_v13  ;;  %v2683_v14 = vmul.f32 %v9567_v16, %v12904_v13  ;;  %v2632_v44 = vmul.f32 %v9594_v48, %v12905_v51 }
 0x3a9   : > { %12901 = vst [vmem:[#allocation83_spill] sm:$0xff] %v9651_v5  ;;  %v2562_v1 = vmul.f32 %v9368_v46, %v2550_v34  ;;  %v2580_v15 = vmul.f32 %v9377_v37, %v2550_v34  ;;  %v2598_v24 = vmul.f32 %v9382_v26, %v2550_v34  ;;  %v2616_v56 = vmul.f32 %v9387_v39, %v2550_v34 }
 0x3aa   : > { %12902 = vst [vmem:[#allocation27_spill] sm:$0xff] %v9655_v23  ;;  %v2561_v42 = vmul.f32 %v9368_v46, %v2548_v7  ;;  %v2579_v33 = vmul.f32 %v9377_v37, %v2548_v7  ;;  %v2615_v13 = vmul.f32 %v9387_v39, %v2548_v7 }
 0x3ab   : > { %12903 = vst [vmem:[#allocation103_spill] sm:$0xff] %v9659_v50  ;;  %v2597_v50 = vmul.f32 %v9382_v26, %v2548_v7  ;;  %v9682_v23 = vadd.f32 %v2562_v1, %v9462_v20  ;;  %v9685_v5 = vadd.f32 %v2580_v15, %v9465_v58  ;;  %v9688_v0 = vadd.f32 %v2598_v24, %v9468_v57  ;;  %v9736_v1 = vld [vmem:[%s11726_s3 + $0x62] ss:$0 sm:$0xff]  ;;  %v9741_v15 = vld [vmem:[%s11726_s3 + $0x86] ss:$0 sm:$0xff] }
 0x3ac   : > { %12906 = vst [vmem:[#allocation104_spill] sm:$0xff] %v9675_v10  ;;  %v9691_v34 = vadd.f32 %v2616_v56, %v9471_v40  ;;  %v9694_v10 = vadd.f32 %v2561_v42, %v9504_v9  ;;  %v9697_v53 = vadd.f32 %v2579_v33, %v9507_v59  ;;  %v9703_v20 = vadd.f32 %v2615_v13, %v9513_v55  ;;  %v12914_v9 = vld [vmem:[#allocation45_spill] sm:$0xff]  ;;  %v9716_v59 = vld [vmem:[%s11726_s3 + $0x1a] ss:$0 sm:$0xff] }
 0x3ad   : > { %12907 = vst [vmem:[#allocation105_spill] sm:$0xff] %v9685_v5  ;;  %v9700_v7 = vadd.f32 %v2597_v50, %v9510_v31  ;;  %v2650_v58 = vmul.f32 %v9599_v61, %v12905_v51  ;;  %v2668_v57 = vmul.f32 %v9562_v11, %v12905_v51  ;;  %v2686_v40 = vmul.f32 %v9567_v16, %v12905_v51  ;;  %v9731_v51 = vld [vmem:[%s11726_s3 + $0x3e] ss:$0 sm:$0xff]  ;;  %v12915_v56 = vld [vmem:[#allocation85_spill] sm:$0xff] }
 0x3ae   : > { %12908 = vst [vmem:[#allocation29_spill] sm:$0xff] %v9688_v0  ;;  %v2631_v42 = vmul.f32 %v9594_v48, %v12914_v9  ;;  %v2649_v31 = vmul.f32 %v9599_v61, %v12914_v9  ;;  %v2667_v55 = vmul.f32 %v9562_v11, %v12914_v9  ;;  %v2685_v33 = vmul.f32 %v9567_v16, %v12914_v9 }
 0x3af   : > { %12909 = vst [vmem:[#allocation109_spill] sm:$0xff] %v9691_v34  ;;  %v9726_v50 = vmul.f32 %v9594_v48, %v12892_v43  ;;  %v9745_v24 = vmul.f32 %v9599_v61, %v12892_v43  ;;  %v9749_v13 = vmul.f32 %v9594_v48, %v12915_v56  ;;  %v9753_v9 = vmul.f32 %v9599_v61, %v12915_v56 }
 0x3b0   : > { %12910 = vst [vmem:[#allocation62_spill] sm:$0xff] %v9694_v10  ;;  %v2655_v34 = vadd.f32 %v2647_v63, %v9475_v36  ;;  %v2673_v43 = vadd.f32 %v2665_v41, %v9477_v8  ;;  %v2691_v0 = vadd.f32 %v2683_v14, %v9479_v27  ;;  %v2554_v5 = vpop.permute.xlu0 %2553  ;;  %v9779_v41 = vpop.permute.xlu2 %2713 }
 0x3b1   : > { %12911 = vst [vmem:[#allocation77_spill] sm:$0xff] %v9697_v53  ;;  %v2637_v53 = vadd.f32 %v2629_v2, %v9473_v21  ;;  %v2600_v21 = vmul.f32 %v9382_v26, %v2554_v5  ;;  %v2618_v36 = vmul.f32 %v9387_v39, %v2554_v5  ;;  %v2718_v39 = vmul.f32 %v9716_v59, %v9581_v38 }
 0x3b2   : > { %12912 = vst [vmem:[#allocation111_spill] sm:$0xff] %v9700_v7  ;;  %v2700_v7 = vpop.permute.xlu1 %2699 }
 0x3b3   : > { %12913 = vst [vmem:[#allocation112_spill] sm:$0xff] %v9703_v20  ;;  %v9757_v20 = vmul.f32 %v9562_v11, %v12915_v56  ;;  %v2717_v48 = vmul.f32 %v9716_v59, %v2700_v7  ;;  %v2735_v10 = vmul.f32 %v9731_v51, %v2700_v7  ;;  %v2753_v61 = vmul.f32 %v9736_v1, %v2700_v7 }
 0x3b4   : > { %12916 = vst [vmem:[#allocation113_spill] sm:$0xff] %v9753_v9  ;;  %v2771_v9 = vmul.f32 %v9741_v15, %v2700_v7  ;;  %v2564_v11 = vmul.f32 %v9368_v46, %v2554_v5  ;;  %v9791_v26 = vadd.f32 %v2618_v36, %v9557_v32  ;;  %v2694_v32 = vadd.f32 %v2686_v40, %v9531_v19  ;;  %v12921_v36 = vld [vmem:[#allocation105_spill] sm:$0xff] }
 0x3b5   : > { %12917 = vst [vmem:[#allocation40_spill] sm:$0xff] %v9757_v20  ;;  %v2582_v20 = vmul.f32 %v9377_v37, %v2554_v5  ;;  %v9771_v8 = vadd.f32 %v2717_v48, %v2637_v53  ;;  %v9773_v27 = vadd.f32 %v2735_v10, %v2655_v34  ;;  %v9775_v2 = vadd.f32 %v2753_v61, %v2673_v43  ;;  %v12920_v43 = vld [vmem:[#allocation38_spill] sm:$0xff] }
 0x3b6   : > { %v9777_v63 = vadd.f32 %v2771_v9, %v2691_v0  ;;  %v9782_v14 = vadd.f32 %v2564_v11, %v9551_v60  ;;  %v9788_v37 = vadd.f32 %v2600_v21, %v9555_v17  ;;  %v2736_v53 = vmul.f32 %v9731_v51, %v9581_v38 }
 0x3b7   : > { %v9785_v46 = vadd.f32 %v2582_v20, %v9553_v52  ;;  %v2754_v48 = vmul.f32 %v9736_v1, %v9581_v38  ;;  %v2688_v60 = vmul.f32 %v9567_v16, %v12915_v56  ;;  %v2640_v52 = vadd.f32 %v2632_v44, %v9525_v22  ;;  %v12919_v9 = vld [vmem:[#allocation62_spill] sm:$0xff] }
 0x3b8   : > { %v2658_v17 = vadd.f32 %v2650_v58, %v9527_v4  ;;  %v2676_v11 = vadd.f32 %v2668_v57, %v9529_v25  ;;  %v2639_v61 = vadd.f32 %v2631_v42, %v9606_v12  ;;  %v2657_v0 = vadd.f32 %v2649_v31, %v9609_v28  ;;  %v2704_v12 = vpop.permute.xlu0 %2703  ;;  %v2809_v40 = vpop.permute.xlu2 %2808 }
 0x3b9   : > { %v2675_v5 = vadd.f32 %v2667_v55, %v9612_v45  ;;  %v2693_v10 = vadd.f32 %v2685_v33, %v9615_v54  ;;  %v2638_v34 = vadd.f32 %v9631_v30, %v9618_v6  ;;  %v2656_v22 = vadd.f32 %v9635_v62, %v9621_v18  ;;  %v12918_v55 = vld [vmem:[#allocation98_spill] sm:$0xff] }
 0x3ba   : > { %v2674_v4 = vadd.f32 %v9639_v35, %v9624_v3  ;;  %v2692_v25 = vadd.f32 %v9643_v47, %v9627_v29  ;;  %v2706_v19 = vpop.permute.xlu1 %2705  ;;  %v2719_v6 = vmul.f32 %v9716_v59, %v2704_v12  ;;  %v2737_v18 = vmul.f32 %v9731_v51, %v2704_v12 }
 0x3bb   : > { %v2720_v28 = vmul.f32 %v9716_v59, %v2706_v19  ;;  %v2738_v45 = vmul.f32 %v9731_v51, %v2706_v19  ;;  %v2756_v54 = vmul.f32 %v9736_v1, %v2706_v19  ;;  %v2774_v44 = vmul.f32 %v9741_v15, %v2706_v19  ;;  %v12929_v19 = vld [vmem:[#allocation27_spill] sm:$0xff] }
 0x3bc   : > { %v2755_v30 = vmul.f32 %v9736_v1, %v2704_v12  ;;  %v2773_v3 = vmul.f32 %v9741_v15, %v2704_v12  ;;  %v9833_v7 = vadd.f32 %v2719_v6, %v2639_v61  ;;  %v9835_v20 = vadd.f32 %v2737_v18, %v2657_v0  ;;  %v12925_v0 = vld [vmem:[#allocation109_spill] sm:$0xff]  ;;  %v12930_v12 = vld [vmem:[#allocation112_spill] sm:$0xff] }
 0x3bd   : > { %v9825_v62 = vadd.f32 %v2720_v28, %v2640_v52  ;;  %v9827_v29 = vadd.f32 %v2738_v45, %v2658_v17  ;;  %v9829_v35 = vadd.f32 %v2756_v54, %v2676_v11  ;;  %v9831_v47 = vadd.f32 %v2774_v44, %v2694_v32  ;;  %v12922_v52 = vld [vmem:[#allocation113_spill] sm:$0xff]  ;;  %v12924_v32 = vld [vmem:[#allocation40_spill] sm:$0xff]  ;;  %v12931_v28 = vld [vmem:[#allocation103_spill] sm:$0xff] }
 0x3be   : > { %v9837_v58 = vadd.f32 %v2755_v30, %v2675_v5  ;;  %v9839_v57 = vadd.f32 %v2773_v3, %v2693_v10  ;;  %v2772_v42 = vmul.f32 %v9741_v15, %v9581_v38  ;;  %v2643_v31 = vadd.f32 %v9726_v50, %v9575_v49  ;;  %v12923_v11 = vld [vmem:[#allocation29_spill] sm:$0xff]  ;;  %v12927_v10 = vld [vmem:[#allocation83_spill] sm:$0xff] }
 0x3bf   : > { %v2661_v33 = vadd.f32 %v9745_v24, %v12918_v55  ;;  %v2642_v56 = vadd.f32 %v9749_v13, %v9682_v23  ;;  %v2641_v21 = vadd.f32 %v12920_v43, %v12919_v9  ;;  %v2660_v17 = vadd.f32 %v12922_v52, %v12921_v36  ;;  %v12926_v5 = vld [vmem:[#allocation77_spill] sm:$0xff]  ;;  %v12928_v50 = vld [vmem:[#allocation111_spill] sm:$0xff]  ;;  %v12932_v13 = vld [vmem:[#allocation50_spill] sm:$0xff] }
 0x3c0   : > { %v2678_v61 = vadd.f32 %v12924_v32, %v12923_v11  ;;  %v2696_v38 = vadd.f32 %v2688_v60, %v12925_v0  ;;  %v2659_v49 = vadd.f32 %v12927_v10, %v12926_v5  ;;  %v2677_v24 = vadd.f32 %v12929_v19, %v12928_v50  ;;  %v2710_v43 = vpop.permute.xlu0 %2709  ;;  %v12937_v5 = vld [vmem:[#allocation104_spill] sm:$0xff] }
 0x3c1   : > { %v2695_v23 = vadd.f32 %v12931_v28, %v12930_v12  ;;  %v9864_v45 = vsel %vm349_vm0, %v12932_v13, %v2809_v40  ;;  %v9866_v44 = vadd.f32 %v2718_v39, %v2638_v34  ;;  %v9868_v6 = vadd.f32 %v2736_v53, %v2656_v22  ;;  %v12942_v28 = vld [vmem:[#allocation59_spill] sm:$0xff]  ;;  %v12943_v13 = vld [vmem:[#allocation10_spill] sm:$0xff] }
 0x3c2   : > { %12933 = vst [vmem:[#allocation56_spill] sm:$0xff] %v9864_v45  ;;  %v2712_v54 = vpop.permute.xlu1 %2711  ;;  %v9870_v18 = vadd.f32 %v2754_v48, %v2674_v4  ;;  %v9872_v60 = vadd.f32 %v2772_v42, %v2692_v25  ;;  %v2722_v40 = vmul.f32 %v9716_v59, %v2710_v43  ;;  %v2740_v39 = vmul.f32 %v9731_v51, %v2710_v43  ;;  %v12934_v4 = vld [vmem:[#allocation99_spill] sm:$0xff]  ;;  %v12935_v42 = vld [vmem:[#allocation22_spill] sm:$0xff] }
 0x3c3   : > { %v2723_v30 = vmul.f32 %v9716_v59, %v2712_v54  ;;  %v2741_v3 = vmul.f32 %v9731_v51, %v2712_v54  ;;  %v2759_v55 = vmul.f32 %v9736_v1, %v2712_v54  ;;  %v2777_v9 = vmul.f32 %v9741_v15, %v2712_v54 }
 0x3c4   : > { %v2758_v53 = vmul.f32 %v9736_v1, %v2710_v43  ;;  %v2776_v48 = vmul.f32 %v9741_v15, %v2710_v43  ;;  %v9892_v52 = vadd.f32 %v2722_v40, %v2642_v56  ;;  %v9894_v11 = vadd.f32 %v2740_v39, %v2660_v17  ;;  %v2815_v40 = vpop.permute.xlu2 %2814 }
 0x3c5   : > { %v9882_v34 = vadd.f32 %v2723_v30, %v2643_v31  ;;  %v9884_v22 = vadd.f32 %v2741_v3, %v2661_v33  ;;  %v9887_v25 = vadd.f32 %v2759_v55, %v12934_v4  ;;  %v9890_v36 = vadd.f32 %v2777_v9, %v12935_v42  ;;  %v12944_v30 = vld [vmem:[#allocation17_spill] sm:$0xff] }
 0x3c6   : > { %v9896_v32 = vadd.f32 %v2758_v53, %v2678_v61  ;;  %v9898_v0 = vadd.f32 %v2776_v48, %v2696_v38  ;;  %v2721_v31 = vmul.f32 %v9716_v59, %v12937_v5  ;;  %v2739_v33 = vmul.f32 %v9731_v51, %v12937_v5  ;;  %v4690_v55 = vld [vmem:[%s6991_s17 + $0x48] sm:$0xff] }
 0x3c7   : > { %12936 = vst [vmem:[#allocation92_spill] sm:$0xff] %v9890_v36  ;;  %v2757_v10 = vmul.f32 %v9736_v1, %v12937_v5  ;;  %v2775_v56 = vmul.f32 %v9741_v15, %v12937_v5  ;;  %v2838_v17 = vrot.slane %v9864_v45, 7  ;;  %v2636_v54 = vmul.f32 %v12943_v13, %v12942_v28 }
 0x3c8   : > { %v9909_v61 = vadd.f32 %v2721_v31, %v2641_v21  ;;  %v9911_v38 = vadd.f32 %v2739_v33, %v2659_v49  ;;  %v2654_v3 = vmul.f32 %v12944_v30, %v12942_v28  ;;  %v2805_v43 = vpop.permute.xlu0 %2804  ;;  %v12946_v21 = vld [vmem:[#allocation68_spill] sm:$0xff] }
 0x3c9   : > { %v9913_v19 = vadd.f32 %v2757_v10, %v2677_v24  ;;  %v9915_v12 = vadd.f32 %v2775_v56, %v2695_v23  ;;  %v2672_v49 = vmul.f32 %v12946_v21, %v12942_v28  ;;  %v2690_v24 = vmul.f32 %v9567_v16, %v12942_v28  ;;  %v4691_v23 = vld [vmem:[%s6991_s17 + $0x40] sm:$0xff]  ;;  %v12949_v10 = vld [vmem:[#allocation89_spill] sm:$0xff] }
 0x3ca   : > { %v2807_v50 = vpop.permute.xlu1 %2806  ;;  %12938 = vst [vmem:[#allocation51_spill] sm:$0xff] %v9909_v61  ;;  %v9931_v39 = vsel %vm349_vm0, %v4691_v23, %v2805_v43  ;;  %v2644_v48 = vadd.f32 %v2636_v54, %v9782_v14  ;;  %v2662_v4 = vadd.f32 %v2654_v3, %v9785_v46  ;;  %v9945_v56 = vsel %vm349_vm0, %v12949_v10, %v2815_v40  ;;  %v12958_v23 = vld [vmem:[#allocation88_spill] sm:$0xff] }
 0x3cb   : > { %12939 = vst [vmem:[#allocation79_spill] sm:$0xff] %v9911_v38  ;;  %v9923_v9 = vsel %vm349_vm0, %v4690_v55, %v2807_v50  ;;  %v2836_v42 = vrot.slane %v9931_v39, 7  ;;  %v2680_v5 = vadd.f32 %v2672_v49, %v9788_v37  ;;  %v2698_v31 = vadd.f32 %v2690_v24, %v9791_v26 }
 0x3cc   : > { %12940 = vst [vmem:[#allocation46_spill] sm:$0xff] %v9913_v19  ;;  %v2837_v53 = vrot.slane %v9923_v9, 7  ;;  %v2724_v46 = vmul.f32 %v9716_v59, %v9779_v41  ;;  %v2742_v37 = vmul.f32 %v9731_v51, %v9779_v41  ;;  %v2760_v26 = vmul.f32 %v9736_v1, %v9779_v41  ;;  %v4692_v51 = vld [vmem:[%s6991_s17 + $0x60] sm:$0xff]  ;;  %s4304_s17 = sshll.u32 %s11527_s9, 7 }
 0x3cd   : > { %12941 = vst [vmem:[#allocation33_spill] sm:$0xff] %v9915_v12  ;;  %v2778_v50 = vmul.f32 %v9741_v15, %v9779_v41  ;;  %v2841_v28 = vrot.slane %v9945_v56, 7  ;;  %v12956_v15 = vld [vmem:[#allocation39_spill] sm:$0xff]  ;;  %s11556_s11 = scalar_lea.vmem [#allocation4], %s4304_s17 }
 0x3ce   : > { %12945 = vst [vmem:[#allocation94_spill] sm:$0xff] %v9923_v9  ;;  %v9941_v16 = vsel %vm368_vm2, %v2837_v53, %v2838_v17  ;;  %v9951_v14 = vsel %vm368_vm2, %v2836_v42, %v2837_v53  ;;  %v9964_v54 = vadd.f32 %v2724_v46, %v2644_v48  ;;  %v9966_v30 = vadd.f32 %v2742_v37, %v2662_v4  ;;  %v12960_v4 = vld [vmem:[#allocation52_spill] sm:$0xff] }
 0x3cf   : > { %12947 = vst [vmem:[#allocation93_spill] sm:$0xff] %v9931_v39  ;;  %2856 = vrot.lane.b32.xlu1 %v9941_v16, %s4790_s15  ;;  %2854 = vrot.lane.b32.xlu0 %v9951_v14, %s4790_s15  ;;  %v9968_v59 = vadd.f32 %v2760_v26, %v2680_v5  ;;  %v9970_v3 = vadd.f32 %v2778_v50, %v2698_v31  ;;  %v10050_v50 = vld [vmem:[%s11726_s3 + $0x88] ss:$0 sm:$0xff] }
 0x3d0   : > { %12950 = vst [vmem:[#allocation73_spill] sm:$0xff] %v9945_v56  ;;  %v2811_v55 = vpop.permute.xlu0 %2810 }
 0x3d1   : > { %12951 = vst [vmem:[#allocation44_spill] sm:$0xff] %v9964_v54  ;;  %v9978_v41 = vsel %vm349_vm0, %v12956_v15, %v2811_v55  ;;  %v3349_v55 = vrot.slane %v9923_v9, 1  ;;  %v10202_v54 = vmul.f32 %v10050_v50, %v9941_v16 }
 0x3d2   : > { %v2813_v13 = vpop.permute.xlu1 %2812  ;;  %12952 = vst [vmem:[#allocation37_spill] sm:$0xff] %v9966_v30  ;;  %v2839_v40 = vrot.slane %v9978_v41, 7 }
 0x3d3   : > { %12953 = vst [vmem:[#allocation72_spill] sm:$0xff] %v9968_v59  ;;  %v9974_v1 = vsel %vm349_vm0, %v4692_v51, %v2813_v13  ;;  %v11970_v51 = vrot.slane %v9931_v39, 1 }
 0x3d4   : > { %12954 = vst [vmem:[#allocation28_spill] sm:$0xff] %v9970_v3  ;;  %v2840_v43 = vrot.slane %v9974_v1, 7  ;;  %v10020_v26 = vsel %vm368_vm2, %v2838_v17, %v2839_v40  ;;  %v10045_v17 = vld [vmem:[%s11726_s3 + $0x64] ss:$0 sm:$0xff] }
 0x3d5   : > { %12955 = vst [vmem:[#allocation126_spill] sm:$0xff] %v9974_v1  ;;  %v10092_v15 = vsel %vm881_vm1, %v11970_v51, %v3349_v55  ;;  %v10192_v3 = vmul.f32 %v10045_v17, %v9941_v16 }
 0x3d6   : > { %12957 = vst [vmem:[#allocation65_spill] sm:$0xff] %v9978_v41  ;;  %v9984_v21 = vsel %vm368_vm2, %v2840_v43, %v2841_v28  ;;  %v9990_v49 = vsel %vm368_vm2, %v2839_v40, %v2840_v43  ;;  %v3351_v43 = vrot.slane %v9978_v41, 1  ;;  %v3352_v40 = vrot.slane %v9974_v1, 1 }
 0x3d7   : > { %2862 = vrot.lane.b32.xlu1 %v9984_v21, %s4790_s15  ;;  %2860 = vrot.lane.b32.xlu0 %v9990_v49, %s4790_s15  ;;  %12962 = vst [vmem:[#allocation128_spill] sm:$0xff] %v10050_v50 }
 0x3d8   : > { %12965 = vst [vmem:[#allocation132_spill] sm:$0xff] %v10092_v15 }
 0x3d9   : > { %12976 = vst [vmem:[#allocation24_spill] sm:$0xff] %v10202_v54 }
 0x3da   : > { %v2819_v24 = vpop.permute.xlu1 %2818  ;;  %v2817_v48 = vpop.permute.xlu0 %2816 }
 0x3db   : > { %v9996_v53 = vsel %vm349_vm0, %v12958_v23, %v2819_v24  ;;  %v10000_v5 = vsel %vm349_vm0, %v12960_v4, %v2817_v48  ;;  %v3350_v24 = vrot.slane %v9864_v45, 1  ;;  %v10105_v23 = vsel %vm881_vm1, %v3351_v43, %v3352_v40 }
 0x3dc   : > { %12959 = vst [vmem:[#allocation58_spill] sm:$0xff] %v9996_v53  ;;  %v2843_v31 = vrot.slane %v9996_v53, 7  ;;  %v2842_v10 = vrot.slane %v10000_v5, 7  ;;  %v3354_v4 = vrot.slane %v10000_v5, 1 }
 0x3dd   : > { %12961 = vst [vmem:[#allocation129_spill] sm:$0xff] %v10000_v5  ;;  %v10113_v48 = vsel %vm881_vm1, %v3350_v24, %v3351_v43 }
 0x3de   : > { %v10006_v46 = vsel %vm368_vm2, %v2843_v31, %v2836_v42  ;;  %v10014_v37 = vsel %vm368_vm2, %v2842_v10, %v2843_v31  ;;  %v10030_v42 = vsel %vm368_vm2, %v2841_v28, %v2842_v10  ;;  %12966 = vst [vmem:[#allocation57_spill] sm:$0xff] %v10105_v23  ;;  %v3355_v31 = vrot.slane %v9996_v53, 1 }
 0x3df   : > { %3012 = vrot.lane.b32.xlu1 %v10006_v46, %s4791_s16  ;;  %2852 = vrot.lane.b32.xlu2 %v10006_v46, %s4790_s15  ;;  %v10056_v28 = vmul.f32 %v10045_v17, %v10030_v42  ;;  %v10060_v13 = vmul.f32 %v10050_v50, %v10030_v42  ;;  %12967 = vst [vmem:[#allocation31_spill] sm:$0xff] %v10113_v48  ;;  %v3353_v10 = vrot.slane %v9945_v56, 1 }
 0x3e0   : > { %2866 = vrot.lane.b32.xlu0 %v10014_v37, %s4790_s15  ;;  %v10122_v51 = vsel %vm881_vm1, %v3354_v4, %v3355_v31  ;;  %v2996_v61 = vmul.f32 %v10050_v50, %v10006_v46  ;;  %v10276_v33 = vmul.f32 %v10045_v17, %v10014_v37 }
 0x3e1   : > { %12963 = vst [vmem:[#allocation131_spill] sm:$0xff] %v10056_v28  ;;  %v10130_v43 = vsel %vm881_vm1, %v3353_v10, %v3354_v4  ;;  %v10147_v4 = vsel %vm881_vm1, %v3349_v55, %v3350_v24  ;;  %v10196_v30 = vsel %vm881_vm1, %v3352_v40, %v3353_v10  ;;  %v2978_v10 = vmul.f32 %v10045_v17, %v10006_v46 }
 0x3e2   : > { %12964 = vst [vmem:[#allocation133_spill] sm:$0xff] %v10060_v13  ;;  %v10182_v13 = vmul.f32 %v10050_v50, %v9951_v14 }
 0x3e3   : > { %12968 = vst [vmem:[#allocation97_spill] sm:$0xff] %v10122_v51 }
 0x3e4   : > { %12969 = vst [vmem:[#allocation81_spill] sm:$0xff] %v10130_v43 }
 0x3e5   : > { %12970 = vst [vmem:[#allocation86_spill] sm:$0xff] %v10147_v4 }
 0x3e6   : > { %12974 = vst [vmem:[#allocation55_spill] sm:$0xff] %v10182_v13 }
 0x3e7   : > { %3018 = vrot.lane.b32.xlu1 %v10020_v26, %s4791_s16  ;;  %2858 = vrot.lane.b32.xlu2 %v10020_v26, %s4790_s15  ;;  %12975 = vst [vmem:[#allocation70_spill] sm:$0xff] %v10196_v30 }
 0x3e8   : > { %3016 = vrot.lane.b32.xlu0 %v9941_v16, %s4791_s16  ;;  %12982 = vst [vmem:[#allocation66_spill] sm:$0xff] %v10276_v33 }
 0x3ef   : > { %3024 = vrot.lane.b32.xlu1 %v10030_v42, %s4791_s16  ;;  %2864 = vrot.lane.b32.xlu2 %v10030_v42, %s4790_s15 }
 0x3f0   : > { %3022 = vrot.lane.b32.xlu0 %v9984_v21, %s4791_s16 }
 0x3f7   : > { %3102 = vrot.lane.b32.xlu1 %v9923_v9, %s4790_s15  ;;  %3014 = vrot.lane.b32.xlu2 %v9951_v14, %s4791_s16 }
 0x3f8   : > { %3100 = vrot.lane.b32.xlu0 %v9931_v39, %s4790_s15 }
 0x3ff   : > { %3108 = vrot.lane.b32.xlu1 %v9974_v1, %s4790_s15  ;;  %3020 = vrot.lane.b32.xlu2 %v9990_v49, %s4791_s16 }
 0x400   : > { %3106 = vrot.lane.b32.xlu0 %v9978_v41, %s4790_s15 }
 0x407   : > { %3114 = vrot.lane.b32.xlu1 %v9996_v53, %s4790_s15  ;;  %3026 = vrot.lane.b32.xlu2 %v10014_v37, %s4791_s16 }
 0x408   : > { %3112 = vrot.lane.b32.xlu0 %v10000_v5, %s4790_s15 }
 0x40f   : > { %3264 = vrot.lane.b32.xlu1 %v9864_v45, %s4791_s16  ;;  %3104 = vrot.lane.b32.xlu2 %v9864_v45, %s4790_s15  ;;  %v10157_v45 = vld [vmem:[%s11726_s3 + $0x63] ss:$0 sm:$0xff] }
 0x410   : > { %3262 = vrot.lane.b32.xlu0 %v9923_v9, %s4791_s16  ;;  %v10176_v9 = vmul.f32 %v10045_v17, %v9951_v14 }
 0x412   : > { %12973 = vst [vmem:[#allocation80_spill] sm:$0xff] %v10176_v9 }
 0x417   : > { %3270 = vrot.lane.b32.xlu1 %v9945_v56, %s4791_s16  ;;  %3110 = vrot.lane.b32.xlu2 %v9945_v56, %s4790_s15  ;;  %v10143_v56 = vld [vmem:[%s11726_s3 + $0x1b] ss:$0 sm:$0xff] }
 0x418   : > { %3268 = vrot.lane.b32.xlu0 %v9974_v1, %s4791_s16  ;;  %v4531_v1 = vld [vmem:[%s11726_s3 + $0x40] ss:$0 sm:$0xff] }
 0x419   : > { %v10172_v24 = vmul.f32 %v4531_v1, %v9951_v14  ;;  %v2960_v40 = vmul.f32 %v4531_v1, %v10006_v46  ;;  %v10226_v36 = vmul.f32 %v4531_v1, %v9990_v49 }
 0x41b   : > { %12972 = vst [vmem:[#allocation95_spill] sm:$0xff] %v10172_v24 }
 0x41f   : > { %3364 = vrot.lane.b32.xlu1 %v10092_v15, %s4790_s15  ;;  %3260 = vrot.lane.b32.xlu2 %v9931_v39, %s4791_s16 }
 0x420   : > { %3274 = vrot.lane.b32.xlu0 %v9996_v53, %s4791_s16  ;;  %v4530_v53 = vld [vmem:[%s11726_s3 + $0x1c] ss:$0 sm:$0xff] }
 0x421   : > { %v10169_v55 = vmul.f32 %v4530_v53, %v9951_v14  ;;  %v10185_v28 = vmul.f32 %v4530_v53, %v9941_v16  ;;  %v2963_v14 = vmul.f32 %v4531_v1, %v10020_v26  ;;  %v2942_v38 = vmul.f32 %v4530_v53, %v10006_v46 }
 0x423   : > { %12971 = vst [vmem:[#allocation61_spill] sm:$0xff] %v10169_v55  ;;  %v2999_v55 = vmul.f32 %v10050_v50, %v10020_v26 }
 0x427   : > { %3370 = vrot.lane.b32.xlu1 %v10105_v23, %s4790_s15  ;;  %3266 = vrot.lane.b32.xlu2 %v9978_v41, %s4791_s16  ;;  %v10162_v41 = vld [vmem:[%s11726_s3 + $0x87] ss:$0 sm:$0xff] }
 0x428   : > { %3368 = vrot.lane.b32.xlu0 %v10113_v48, %s4790_s15  ;;  %v10223_v48 = vmul.f32 %v4530_v53, %v9990_v49 }
 0x42f   : > { %3376 = vrot.lane.b32.xlu1 %v10122_v51, %s4790_s15  ;;  %3272 = vrot.lane.b32.xlu2 %v10000_v5, %s4791_s16  ;;  %v10152_v5 = vld [vmem:[%s11726_s3 + $0x3f] ss:$0 sm:$0xff] }
 0x430   : > { %3374 = vrot.lane.b32.xlu0 %v10130_v43, %s4790_s15 }
 0x437   : > { %3526 = vrot.lane.b32.xlu1 %v10147_v4, %s4791_s16  ;;  %3366 = vrot.lane.b32.xlu2 %v10147_v4, %s4790_s15  ;;  %v10188_v4 = vmul.f32 %v4531_v1, %v9941_v16 }
 0x438   : > { %3524 = vrot.lane.b32.xlu0 %v10092_v15, %s4791_s16  ;;  %v2945_v15 = vmul.f32 %v4530_v53, %v10020_v26 }
 0x439   : > { %v2853_v59 = vpop.permute.xlu2 %2852 }
 0x43a   : > { %v2870_v43 = vmul.f32 %v10143_v56, %v2853_v59  ;;  %v2888_v13 = vmul.f32 %v10152_v5, %v2853_v59  ;;  %v2906_v12 = vmul.f32 %v10157_v45, %v2853_v59  ;;  %v2924_v19 = vmul.f32 %v10162_v41, %v2853_v59 }
 0x43b   : > { %v2981_v59 = vmul.f32 %v10045_v17, %v10020_v26 }
 0x43c   : > { %v2878_v16 = vadd.f32 %v2870_v43, %v9771_v8  ;;  %v2896_v54 = vadd.f32 %v2888_v13, %v9773_v27  ;;  %v2914_v9 = vadd.f32 %v2906_v12, %v9775_v2  ;;  %v2932_v24 = vadd.f32 %v2924_v19, %v9777_v63 }
 0x43d   : > { %v10242_v63 = vmul.f32 %v10045_v17, %v9990_v49  ;;  %v10249_v19 = vmul.f32 %v4530_v53, %v9984_v21  ;;  %v10269_v43 = vmul.f32 %v4530_v53, %v10014_v37 }
 0x43e   : > { %v10228_v46 = vadd.f32 %v2942_v38, %v2878_v16  ;;  %v10230_v8 = vadd.f32 %v2960_v40, %v2896_v54  ;;  %v10232_v27 = vadd.f32 %v2978_v10, %v2914_v9  ;;  %v10234_v2 = vadd.f32 %v2996_v61, %v2932_v24 }
 0x43f   : > { %3532 = vrot.lane.b32.xlu1 %v10196_v30, %s4791_s16  ;;  %3372 = vrot.lane.b32.xlu2 %v10196_v30, %s4790_s15  ;;  %v10246_v38 = vmul.f32 %v10050_v50, %v9990_v49  ;;  %v12977_v61 = vrot.slane %v9931_v39, 1  ;;  %v10260_v9 = vmul.f32 %v4530_v53, %v10030_v42  ;;  %v10263_v54 = vmul.f32 %v4531_v1, %v10030_v42 }
 0x440   : > { %3530 = vrot.lane.b32.xlu0 %v10105_v23, %s4791_s16  ;;  %v10266_v49 = vmul.f32 %v4531_v1, %v9984_v21  ;;  %12980 = vst [vmem:[#allocation110_spill] sm:$0xff] %v10269_v43  ;;  %v10272_v24 = vmul.f32 %v4531_v1, %v10014_v37 }
 0x441   : > { %v10257_v12 = vsel %vm881_vm1, %v3355_v31, %v12977_v61  ;;  %v2857_v26 = vpop.permute.xlu1 %2856  ;;  %v2859_v13 = vpop.permute.xlu2 %2858  ;;  %v10280_v31 = vmul.f32 %v10050_v50, %v10014_v37 }
 0x442   : > { %12978 = vst [vmem:[#allocation18_spill] sm:$0xff] %v10257_v12  ;;  %v2872_v42 = vmul.f32 %v10143_v56, %v2857_v26  ;;  %v2890_v40 = vmul.f32 %v10152_v5, %v2857_v26  ;;  %v2908_v10 = vmul.f32 %v10157_v45, %v2857_v26  ;;  %v2926_v53 = vmul.f32 %v10162_v41, %v2857_v26  ;;  %v2855_v16 = vpop.permute.xlu0 %2854 }
 0x443   : > { %12979 = vst [vmem:[#allocation48_spill] sm:$0xff] %v10266_v49  ;;  %v2873_v1 = vmul.f32 %v10143_v56, %v2859_v13  ;;  %v2891_v61 = vmul.f32 %v10152_v5, %v2859_v13  ;;  %v2909_v23 = vmul.f32 %v10157_v45, %v2859_v13  ;;  %v2927_v30 = vmul.f32 %v10162_v41, %v2859_v13 }
 0x444   : > { %12981 = vst [vmem:[#allocation116_spill] sm:$0xff] %v10272_v24  ;;  %v2880_v37 = vadd.f32 %v2872_v42, %v9833_v7  ;;  %v2898_v39 = vadd.f32 %v2890_v40, %v9835_v20  ;;  %v2916_v49 = vadd.f32 %v2908_v10, %v9837_v58  ;;  %v2871_v50 = vmul.f32 %v10143_v56, %v2855_v16  ;;  %v3686_v40 = vld [vmem:[%s10324_s20 + $0x10] sm:$0xff] }
 0x445   : > { %12983 = vst [vmem:[#allocation13_spill] sm:$0xff] %v10280_v31  ;;  %v10294_v31 = vadd.f32 %v2926_v53, %v9839_v57  ;;  %v2881_v26 = vadd.f32 %v2873_v1, %v9825_v62  ;;  %v2899_v33 = vadd.f32 %v2891_v61, %v9827_v29  ;;  %v2917_v24 = vadd.f32 %v2909_v23, %v9829_v35  ;;  %v12986_v1 = vld [vmem:[#allocation92_spill] sm:$0xff]  ;;  %v3685_v61 = vld [vmem:[%s10324_s20 + $0x8] sm:$0xff] }
 0x446   : > { %v2935_v43 = vadd.f32 %v2927_v30, %v9831_v47  ;;  %v2889_v7 = vmul.f32 %v10152_v5, %v2855_v16  ;;  %v2907_v20 = vmul.f32 %v10157_v45, %v2855_v16  ;;  %v2925_v58 = vmul.f32 %v10162_v41, %v2855_v16 }
 0x447   : > { %3538 = vrot.lane.b32.xlu1 %v10257_v12, %s4791_s16  ;;  %3378 = vrot.lane.b32.xlu2 %v10257_v12, %s4790_s15  ;;  %v10308_v62 = vadd.f32 %v2945_v15, %v2881_v26  ;;  %v10310_v29 = vadd.f32 %v2963_v14, %v2899_v33  ;;  %v10312_v35 = vadd.f32 %v2981_v59, %v2917_v24  ;;  %v10389_v26 = vld [vmem:[%s11726_s3 + $0x89] ss:$0 sm:$0xff] }
 0x448   : > { %v2879_v47 = vadd.f32 %v2871_v50, %v9866_v44  ;;  %v2897_v57 = vadd.f32 %v2889_v7, %v9868_v6  ;;  %v2915_v30 = vadd.f32 %v2907_v20, %v9870_v18  ;;  %v2933_v23 = vadd.f32 %v2925_v58, %v9872_v60  ;;  %3536 = vrot.lane.b32.xlu0 %v10122_v51, %s4791_s16  ;;  %v12987_v7 = vld [vmem:[#allocation31_spill] sm:$0xff]  ;;  %v12988_v20 = vld [vmem:[#allocation61_spill] sm:$0xff] }
 0x449   : > { %v2863_v13 = vpop.permute.xlu1 %2862  ;;  %v2865_v42 = vpop.permute.xlu2 %2864  ;;  %v10326_v15 = vadd.f32 %v2999_v55, %v2935_v43  ;;  %v10329_v44 = vadd.f32 %v10185_v28, %v2880_v37  ;;  %v10332_v6 = vadd.f32 %v10188_v4, %v2898_v39  ;;  %v10335_v18 = vadd.f32 %v10192_v3, %v2916_v49  ;;  %v10384_v37 = vld [vmem:[%s11726_s3 + $0x65] ss:$0 sm:$0xff] }
 0x44a   : > { %v2875_v60 = vmul.f32 %v10143_v56, %v2863_v13  ;;  %v2893_v50 = vmul.f32 %v10152_v5, %v2863_v13  ;;  %v2911_v14 = vmul.f32 %v10157_v45, %v2863_v13  ;;  %v2929_v55 = vmul.f32 %v10162_v41, %v2863_v13  ;;  %v2861_v59 = vpop.permute.xlu0 %2860  ;;  %v12989_v13 = vld [vmem:[#allocation95_spill] sm:$0xff] }
 0x44b   : > { %12984 = vst [vmem:[#allocation67_spill] sm:$0xff] %v10329_v44  ;;  %v2876_v28 = vmul.f32 %v10143_v56, %v2865_v42  ;;  %v2894_v43 = vmul.f32 %v10152_v5, %v2865_v42  ;;  %v2912_v39 = vmul.f32 %v10157_v45, %v2865_v42  ;;  %v2930_v4 = vmul.f32 %v10162_v41, %v2865_v42 }
 0x44c   : > { %12985 = vst [vmem:[#allocation16_spill] sm:$0xff] %v10332_v6  ;;  %v10346_v3 = vadd.f32 %v2875_v60, %v9892_v52  ;;  %v10349_v49 = vadd.f32 %v2893_v50, %v9894_v11  ;;  %v10352_v24 = vadd.f32 %v2911_v14, %v9896_v32  ;;  %v10355_v33 = vadd.f32 %v2929_v55, %v9898_v0  ;;  %v10370_v11 = vld [vmem:[%s11726_s3 + $0x1d] ss:$0 sm:$0xff]  ;;  %v12990_v60 = vld [vmem:[#allocation80_spill] sm:$0xff] }
 0x44d   : > { %v2884_v10 = vadd.f32 %v2876_v28, %v9882_v34  ;;  %v2902_v53 = vadd.f32 %v2894_v43, %v9884_v22  ;;  %v10361_v16 = vadd.f32 %v2912_v39, %v9887_v25  ;;  %v10364_v52 = vadd.f32 %v2930_v4, %v12986_v1  ;;  %v10379_v25 = vld [vmem:[%s11726_s3 + $0x41] ss:$0 sm:$0xff]  ;;  %v12991_v14 = vld [vmem:[#allocation51_spill] sm:$0xff]  ;;  %v12993_v43 = vld [vmem:[#allocation46_spill] sm:$0xff] }
 0x44e   : > { %v2874_v32 = vmul.f32 %v10143_v56, %v2861_v59  ;;  %v2892_v0 = vmul.f32 %v10152_v5, %v2861_v59  ;;  %v2910_v34 = vmul.f32 %v10157_v45, %v2861_v59  ;;  %v2928_v22 = vmul.f32 %v10162_v41, %v2861_v59  ;;  %v12992_v59 = vld [vmem:[#allocation79_spill] sm:$0xff]  ;;  %v12994_v4 = vld [vmem:[#allocation33_spill] sm:$0xff] }
 0x44f   : > { %3704 = vrot.lane.b32.xlu1 %v3686_v40, %s4789_s14  ;;  %3528 = vrot.lane.b32.xlu2 %v12987_v7, %s4791_s16  ;;  %v2951_v58 = vadd.f32 %v12988_v20, %v2879_v47  ;;  %v2969_v42 = vadd.f32 %v12989_v13, %v2897_v57  ;;  %v2987_v50 = vadd.f32 %v12990_v60, %v2915_v30  ;;  %v12995_v6 = vld [vmem:[#allocation55_spill] sm:$0xff]  ;;  %v12996_v47 = vld [vmem:[#allocation24_spill] sm:$0xff]  ;;  %v3689_v60 = vld [vmem:[%s10324_s20 + $0x28] sm:$0xff] }
 0x450   : > { %v2882_v55 = vadd.f32 %v2874_v32, %v12991_v14  ;;  %v2900_v28 = vadd.f32 %v2892_v0, %v12992_v59  ;;  %v2918_v39 = vadd.f32 %v2910_v34, %v12993_v43  ;;  %v2936_v1 = vadd.f32 %v2928_v22, %v12994_v4  ;;  %3702 = vrot.lane.b32.xlu0 %v3685_v61, %s4789_s14 }
 0x451   : > { %v3013_v40 = vpop.permute.xlu1 %3012  ;;  %v3015_v51 = vpop.permute.xlu2 %3014  ;;  %v3005_v44 = vadd.f32 %v12995_v6, %v2933_v23  ;;  %v10405_v20 = vadd.f32 %v12996_v47, %v10294_v31  ;;  %v10408_v57 = vadd.f32 %v10260_v9, %v2884_v10  ;;  %v10411_v30 = vadd.f32 %v10263_v54, %v2902_v53 }
 0x452   : > { %v3030_v32 = vmul.f32 %v10370_v11, %v3013_v40  ;;  %v3048_v0 = vmul.f32 %v10379_v25, %v3013_v40  ;;  %v3066_v61 = vmul.f32 %v10384_v37, %v3013_v40  ;;  %v3084_v23 = vmul.f32 %v10389_v26, %v3013_v40  ;;  %v2867_v6 = vpop.permute.xlu0 %2866 }
 0x453   : > { %v3031_v31 = vmul.f32 %v10370_v11, %v3015_v51  ;;  %v3049_v34 = vmul.f32 %v10379_v25, %v3015_v51  ;;  %v3067_v9 = vmul.f32 %v10384_v37, %v3015_v51  ;;  %v3085_v10 = vmul.f32 %v10389_v26, %v3015_v51 }
 0x454   : > { %v10422_v54 = vadd.f32 %v3030_v32, %v10228_v46  ;;  %v10425_v53 = vadd.f32 %v3048_v0, %v10230_v8  ;;  %v10428_v22 = vadd.f32 %v3066_v61, %v10232_v27  ;;  %v10431_v13 = vadd.f32 %v3084_v23, %v10234_v2  ;;  %v3688_v46 = vld [vmem:[%s10324_s20 + $0x20] sm:$0xff]  ;;  %v12999_v2 = vld [vmem:[#allocation81_spill] sm:$0xff] }
 0x455   : > { %v10434_v14 = vadd.f32 %v3031_v31, %v2951_v58  ;;  %v10436_v59 = vadd.f32 %v3049_v34, %v2969_v42  ;;  %v10438_v43 = vadd.f32 %v3067_v9, %v2987_v50  ;;  %v10440_v51 = vadd.f32 %v3085_v10, %v3005_v44  ;;  %v13000_v50 = vld [vmem:[#allocation44_spill] sm:$0xff] }
 0x456   : > { %v2877_v4 = vmul.f32 %v10143_v56, %v2867_v6  ;;  %v2895_v8 = vmul.f32 %v10152_v5, %v2867_v6  ;;  %v2913_v27 = vmul.f32 %v10157_v45, %v2867_v6  ;;  %v2931_v40 = vmul.f32 %v10162_v41, %v2867_v6  ;;  %v13001_v56 = vld [vmem:[#allocation37_spill] sm:$0xff]  ;;  %v13002_v5 = vld [vmem:[#allocation72_spill] sm:$0xff] }
 0x457   : > { %12997 = vst [vmem:[#allocation107_spill] sm:$0xff] %v10434_v14  ;;  %3710 = vrot.lane.b32.xlu1 %v3689_v60, %s4789_s14  ;;  %3534 = vrot.lane.b32.xlu2 %v12999_v2, %s4791_s16  ;;  %v2954_v58 = vadd.f32 %v10223_v48, %v2882_v55  ;;  %v2972_v42 = vadd.f32 %v10226_v36, %v2900_v28  ;;  %v13003_v45 = vld [vmem:[#allocation28_spill] sm:$0xff]  ;;  %v13004_v48 = vld [vmem:[#allocation131_spill] sm:$0xff]  ;;  %v13005_v36 = vld [vmem:[#allocation133_spill] sm:$0xff] }
 0x458   : > { %12998 = vst [vmem:[#allocation35_spill] sm:$0xff] %v10436_v59  ;;  %v2990_v44 = vadd.f32 %v10242_v63, %v2918_v39  ;;  %v2885_v47 = vadd.f32 %v2877_v4, %v13000_v50  ;;  %v2903_v32 = vadd.f32 %v2895_v8, %v13001_v56  ;;  %v2921_v0 = vadd.f32 %v2913_v27, %v13002_v5  ;;  %v3684_v4 = vld [vmem:[%s10324_s20] sm:$0xff] }
 0x459   : > { %v2939_v61 = vadd.f32 %v2931_v40, %v13003_v45  ;;  %3708 = vrot.lane.b32.xlu0 %v3688_v46, %s4789_s14  ;;  %v3019_v41 = vpop.permute.xlu1 %3018  ;;  %v3021_v23 = vpop.permute.xlu2 %3020  ;;  %v3008_v6 = vadd.f32 %v10246_v38, %v2936_v1  ;;  %v2992_v55 = vadd.f32 %v13004_v48, %v10361_v16  ;;  %v3010_v63 = vadd.f32 %v13005_v36, %v10364_v52  ;;  %v13009_v56 = vld [vmem:[#allocation128_spill] sm:$0xff] }
 0x45a   : > { %v10465_v28 = vadd.f32 %v10249_v19, %v10346_v3  ;;  %v3033_v39 = vmul.f32 %v10370_v11, %v3019_v41  ;;  %v3051_v31 = vmul.f32 %v10379_v25, %v3019_v41  ;;  %v3069_v34 = vmul.f32 %v10384_v37, %v3019_v41  ;;  %v10471_v1 = vpop.permute.xlu0 %3016  ;;  %v13011_v5 = vld [vmem:[#allocation116_spill] sm:$0xff] }
 0x45b   : > { %v3087_v38 = vmul.f32 %v10389_v26, %v3019_v41  ;;  %v3034_v16 = vmul.f32 %v10370_v11, %v3021_v23  ;;  %v3052_v9 = vmul.f32 %v10379_v25, %v3021_v23  ;;  %v3070_v52 = vmul.f32 %v10384_v37, %v3021_v23  ;;  %v13012_v41 = vld [vmem:[#allocation66_spill] sm:$0xff] }
 0x45c   : > { %13006 = vst [vmem:[#allocation19_spill] sm:$0xff] %v10465_v28  ;;  %v3088_v19 = vmul.f32 %v10389_v26, %v3021_v23  ;;  %v10478_v3 = vadd.f32 %v3033_v39, %v10308_v62  ;;  %v10481_v10 = vadd.f32 %v3051_v31, %v10310_v29  ;;  %v10484_v60 = vadd.f32 %v3069_v34, %v10312_v35  ;;  %v3691_v62 = vld [vmem:[%s10324_s20 + $0x38] sm:$0xff]  ;;  %v13027_v28 = vld [vmem:[#allocation86_spill] sm:$0xff] }
 0x45d   : > { %v10487_v46 = vadd.f32 %v3087_v38, %v10326_v15  ;;  %v10490_v8 = vadd.f32 %v3034_v16, %v2954_v58  ;;  %v10492_v27 = vadd.f32 %v3052_v9, %v2972_v42  ;;  %v10494_v40 = vadd.f32 %v3070_v52, %v2990_v44  ;;  %v13010_v42 = vld [vmem:[#allocation110_spill] sm:$0xff] }
 0x45e   : > { %v10496_v50 = vadd.f32 %v3088_v19, %v3008_v6  ;;  %v3068_v29 = vmul.f32 %v10384_v37, %v10471_v1  ;;  %v3086_v35 = vmul.f32 %v10389_v26, %v10471_v1  ;;  %v2983_v15 = vmul.f32 %v10045_v17, %v9984_v21  ;;  %v13013_v6 = vld [vmem:[#allocation13_spill] sm:$0xff] }
 0x45f   : > { %13007 = vst [vmem:[#allocation125_spill] sm:$0xff] %v10490_v8  ;;  %v3001_v58 = vmul.f32 %v13009_v56, %v9984_v21  ;;  %3700 = vrot.lane.b32.xlu2 %v3684_v4, %s4789_s14  ;;  %v2957_v44 = vadd.f32 %v13010_v42, %v2885_v47  ;;  %v2975_v45 = vadd.f32 %v13011_v5, %v2903_v32  ;;  %v13014_v21 = vld [vmem:[#allocation48_spill] sm:$0xff] }
 0x460   : > { %13008 = vst [vmem:[#allocation54_spill] sm:$0xff] %v10492_v27  ;;  %v2993_v23 = vadd.f32 %v13012_v41, %v2921_v0  ;;  %v3011_v48 = vadd.f32 %v13013_v6, %v2939_v61  ;;  %v3076_v36 = vadd.f32 %v3068_v29, %v10335_v18  ;;  %v3094_v39 = vadd.f32 %v3086_v35, %v10405_v20  ;;  %v10577_v5 = vld [vmem:[%s11726_s3 + $0x42] ss:$0 sm:$0xff] }
 0x461   : > { %3714 = vrot.lane.b32.xlu0 %v3691_v62, %s4789_s14  ;;  %v3025_v17 = vpop.permute.xlu1 %3024  ;;  %v3027_v31 = vpop.permute.xlu2 %3026  ;;  %v10517_v34 = vadd.f32 %v13014_v21, %v10349_v49  ;;  %v2991_v47 = vadd.f32 %v2983_v15, %v10352_v24  ;;  %v3009_v32 = vadd.f32 %v3001_v58, %v10355_v33  ;;  %v3687_v62 = vld [vmem:[%s10324_s20 + $0x18] sm:$0xff]  ;;  %v3690_v21 = vld [vmem:[%s10324_s20 + $0x30] sm:$0xff] }
 0x462   : > { %v3036_v0 = vmul.f32 %v10370_v11, %v3025_v17  ;;  %v3054_v61 = vmul.f32 %v10379_v25, %v3025_v17  ;;  %v3072_v18 = vmul.f32 %v10384_v37, %v3025_v17  ;;  %v3090_v20 = vmul.f32 %v10389_v26, %v3025_v17  ;;  %v10525_v38 = vpop.permute.xlu0 %3022 }
 0x463   : > { %13015 = vst [vmem:[#allocation75_spill] sm:$0xff] %v10517_v34  ;;  %v3037_v16 = vmul.f32 %v10370_v11, %v3027_v31  ;;  %v3055_v49 = vmul.f32 %v10379_v25, %v3027_v31  ;;  %v3073_v9 = vmul.f32 %v10384_v37, %v3027_v31  ;;  %v3091_v24 = vmul.f32 %v10389_v26, %v3027_v31 }
 0x464   : > { %v10532_v33 = vadd.f32 %v3036_v0, %v10408_v57  ;;  %v10535_v52 = vadd.f32 %v3054_v61, %v10411_v30  ;;  %v10537_v19 = vadd.f32 %v3072_v18, %v2992_v55  ;;  %v10539_v4 = vadd.f32 %v3090_v20, %v3010_v63  ;;  %v10557_v55 = vld [vmem:[%s11726_s3 + $0x66] ss:$0 sm:$0xff]  ;;  %v10562_v63 = vld [vmem:[%s11726_s3 + $0x8a] ss:$0 sm:$0xff] }
 0x465   : > { %v10542_v29 = vadd.f32 %v3037_v16, %v2957_v44  ;;  %v10544_v35 = vadd.f32 %v3055_v49, %v2975_v45  ;;  %v10546_v15 = vadd.f32 %v3073_v9, %v2993_v23  ;;  %v10548_v56 = vadd.f32 %v3091_v24, %v3011_v48  ;;  %v10619_v24 = vld [vmem:[%s11726_s3 + $0x43] ss:$0 sm:$0xff] }
 0x466   : > { %v3071_v57 = vmul.f32 %v10384_v37, %v10525_v38  ;;  %v3089_v30 = vmul.f32 %v10389_v26, %v10525_v38  ;;  %v10572_v26 = vld [vmem:[%s11726_s3 + $0x1e] ss:$0 sm:$0xff] }
 0x467   : > { %13016 = vst [vmem:[#allocation9_spill] sm:$0xff] %v10542_v29  ;;  %3706 = vrot.lane.b32.xlu2 %v3687_v62, %s4789_s14 }
 0x468   : > { %13017 = vst [vmem:[#allocation64_spill] sm:$0xff] %v10544_v35  ;;  %v3079_v58 = vadd.f32 %v3071_v57, %v2991_v47  ;;  %v3097_v42 = vadd.f32 %v3089_v30, %v3009_v32  ;;  %v10637_v30 = vld [vmem:[%s11726_s3 + $0x8b] ss:$0 sm:$0xff] }
 0x469   : > { %v10565_v44 = vpop.permute.xlu1 %3102  ;;  %v10567_v37 = vpop.permute.xlu2 %3104 }
 0x46a   : > { %13018 = vst [vmem:[#allocation78_spill] sm:$0xff] %v10567_v37  ;;  %v3155_v45 = vmul.f32 %v10557_v55, %v10565_v44  ;;  %v3173_v41 = vmul.f32 %v10562_v63, %v10565_v44  ;;  %v3101_v23 = vpop.permute.xlu0 %3100  ;;  %v3156_v6 = vmul.f32 %v10557_v55, %v10567_v37  ;;  %v3174_v48 = vmul.f32 %v10562_v63, %v10567_v37 }
 0x46b   : > { %v3118_v0 = vmul.f32 %v10572_v26, %v3101_v23  ;;  %v3136_v61 = vmul.f32 %v10577_v5, %v3101_v23  ;;  %v3154_v18 = vmul.f32 %v10557_v55, %v3101_v23  ;;  %v3172_v20 = vmul.f32 %v10562_v63, %v3101_v23  ;;  %v13021_v23 = vld [vmem:[#allocation93_spill] sm:$0xff] }
 0x46c   : > { %v10588_v17 = vadd.f32 %v3155_v45, %v10438_v43  ;;  %v10591_v31 = vadd.f32 %v3173_v41, %v10440_v51  ;;  %v10594_v47 = vadd.f32 %v3156_v6, %v3076_v36  ;;  %v10596_v32 = vadd.f32 %v3174_v48, %v3094_v39  ;;  %v10610_v39 = vld [vmem:[%s11726_s3 + $0x1f] ss:$0 sm:$0xff] }
 0x46d   : > { %v3126_v43 = vadd.f32 %v3118_v0, %v10422_v54  ;;  %v3144_v51 = vadd.f32 %v3136_v61, %v10425_v53  ;;  %v3162_v16 = vadd.f32 %v3154_v18, %v10428_v22  ;;  %v3180_v36 = vadd.f32 %v3172_v20, %v10431_v13  ;;  %v10624_v54 = vld [vmem:[%s11726_s3 + $0x67] ss:$0 sm:$0xff]  ;;  %v10667_v20 = vld [vmem:[%s11726_s3 + $0x20] ss:$0 sm:$0xff] }
 0x46e   : > { %v3190_v6 = vmul.f32 %v10610_v39, %v13021_v23  ;;  %v3208_v0 = vmul.f32 %v10619_v24, %v13021_v23  ;;  %v3226_v61 = vmul.f32 %v10624_v54, %v13021_v23 }
 0x46f   : > { %3712 = vrot.lane.b32.xlu2 %v3690_v21, %s4789_s14 }
 0x470   : > { %v3216_v34 = vadd.f32 %v3208_v0, %v3144_v51 }
 0x471   : > { %v10612_v49 = vpop.permute.xlu1 %3108  ;;  %v10614_v9 = vpop.permute.xlu2 %3110 }
 0x472   : > { %13019 = vst [vmem:[#allocation34_spill] sm:$0xff] %v10612_v49  ;;  %v3158_v53 = vmul.f32 %v10557_v55, %v10612_v49  ;;  %v3176_v22 = vmul.f32 %v10562_v63, %v10612_v49  ;;  %v3107_v13 = vpop.permute.xlu0 %3106  ;;  %v3159_v62 = vmul.f32 %v10557_v55, %v10614_v9  ;;  %v3177_v57 = vmul.f32 %v10562_v63, %v10614_v9 }
 0x473   : > { %13020 = vst [vmem:[#allocation119_spill] sm:$0xff] %v10614_v9  ;;  %v3139_v18 = vmul.f32 %v10577_v5, %v3107_v13 }
 0x474   : > { %v10640_v45 = vadd.f32 %v3158_v53, %v10494_v40  ;;  %v10643_v41 = vadd.f32 %v3176_v22, %v10496_v50  ;;  %v10647_v48 = vadd.f32 %v3159_v62, %v3079_v58  ;;  %v10649_v21 = vadd.f32 %v3177_v57, %v3097_v42  ;;  %v10658_v40 = vld [vmem:[%s11726_s3 + $0x22] ss:$0 sm:$0xff]  ;;  %v10674_v22 = vld [vmem:[%s11726_s3 + $0x44] ss:$0 sm:$0xff]  ;;  %v10679_v62 = vld [vmem:[%s11726_s3 + $0x68] ss:$0 sm:$0xff] }
 0x475   : > { %13022 = vst [vmem:[#allocation63_spill] sm:$0xff] %v10658_v40  ;;  %v3121_v50 = vmul.f32 %v10572_v26, %v3107_v13  ;;  %v3157_v58 = vmul.f32 %v10557_v55, %v3107_v13  ;;  %v3175_v42 = vmul.f32 %v10562_v63, %v3107_v13  ;;  %v3244_v53 = vmul.f32 %v10637_v30, %v13021_v23  ;;  %v10684_v13 = vld [vmem:[%s11726_s3 + $0x8c] ss:$0 sm:$0xff]  ;;  %v13023_v57 = vld [vmem:[#allocation94_spill] sm:$0xff] }
 0x476   : > { %v10688_v35 = vmul.f32 %v10610_v39, %v13023_v57  ;;  %v10692_v23 = vmul.f32 %v10619_v24, %v13023_v57  ;;  %v10696_v29 = vmul.f32 %v10624_v54, %v13023_v57  ;;  %v3147_v8 = vadd.f32 %v3139_v18, %v10481_v10 }
 0x477   : > { %v3129_v27 = vadd.f32 %v3121_v50, %v10478_v3  ;;  %v3165_v9 = vadd.f32 %v3157_v58, %v10484_v60  ;;  %v3183_v49 = vadd.f32 %v3175_v42, %v10487_v46  ;;  %v10708_v37 = vmul.f32 %v10658_v40, %v13027_v28  ;;  %v13029_v42 = vld [vmem:[#allocation65_spill] sm:$0xff] }
 0x478   : > { %13024 = vst [vmem:[#allocation36_spill] sm:$0xff] %v10688_v35  ;;  %v3198_v35 = vadd.f32 %v3190_v6, %v3126_v43  ;;  %v3234_v60 = vadd.f32 %v3226_v61, %v3162_v16  ;;  %v3252_v46 = vadd.f32 %v3244_v53, %v3180_v36  ;;  %v3211_v16 = vmul.f32 %v10619_v24, %v13029_v42 }
 0x479   : > { %13025 = vst [vmem:[#allocation87_spill] sm:$0xff] %v10692_v23  ;;  %v10702_v59 = vpop.permute.xlu1 %3114  ;;  %v3261_v14 = vpop.permute.xlu2 %3260  ;;  %v3245_v23 = vmul.f32 %v10637_v30, %v13023_v57  ;;  %v3193_v57 = vmul.f32 %v10610_v39, %v13029_v42 }
 0x47a   : > { %13026 = vst [vmem:[#allocation114_spill] sm:$0xff] %v10702_v59  ;;  %v3161_v3 = vmul.f32 %v10557_v55, %v10702_v59  ;;  %v3179_v10 = vmul.f32 %v10562_v63, %v10702_v59  ;;  %v3113_v50 = vpop.permute.xlu0 %3112  ;;  %v3278_v18 = vmul.f32 %v10667_v20, %v3261_v14  ;;  %v3296_v43 = vmul.f32 %v10674_v22, %v3261_v14 }
 0x47b   : > { %13028 = vst [vmem:[#allocation115_spill] sm:$0xff] %v10708_v37  ;;  %v3314_v51 = vmul.f32 %v10679_v62, %v3261_v14  ;;  %v3332_v6 = vmul.f32 %v10684_v13, %v3261_v14  ;;  %v3124_v14 = vmul.f32 %v10572_v26, %v3113_v50 }
 0x47c   : > { %v10719_v0 = vadd.f32 %v3161_v3, %v10546_v15  ;;  %v10722_v58 = vadd.f32 %v3179_v10, %v10548_v56  ;;  %v10728_v36 = vadd.f32 %v3278_v18, %v3198_v35  ;;  %v10730_v61 = vadd.f32 %v3296_v43, %v3216_v34  ;;  %v13032_v10 = vld [vmem:[#allocation56_spill] sm:$0xff] }
 0x47d   : > { %v10732_v53 = vadd.f32 %v3314_v51, %v3234_v60  ;;  %v10734_v37 = vadd.f32 %v3332_v6, %v3252_v46  ;;  %v3142_v15 = vmul.f32 %v10577_v5, %v3113_v50  ;;  %v3160_v56 = vmul.f32 %v10557_v55, %v3113_v50 }
 0x47e   : > { %13030 = vst [vmem:[#allocation118_spill] sm:$0xff] %v10728_v36  ;;  %v3178_v3 = vmul.f32 %v10562_v63, %v3113_v50  ;;  %v3228_v59 = vmul.f32 %v10624_v54, %v13032_v10  ;;  %v3246_v35 = vmul.f32 %v10637_v30, %v13032_v10  ;;  %v3229_v34 = vmul.f32 %v10624_v54, %v13029_v42 }
 0x47f   : > { %13031 = vst [vmem:[#allocation120_spill] sm:$0xff] %v10730_v61  ;;  %v3247_v60 = vmul.f32 %v10637_v30, %v13029_v42  ;;  %v3132_v46 = vadd.f32 %v3124_v14, %v10532_v33  ;;  %v3150_v18 = vadd.f32 %v3142_v15, %v10535_v52  ;;  %v3168_v55 = vadd.f32 %v3160_v56, %v10537_v19 }
 0x480   : > { %v3186_v63 = vadd.f32 %v3178_v3, %v10539_v4  ;;  %v3236_v43 = vadd.f32 %v3228_v59, %v10594_v47  ;;  %v3254_v51 = vadd.f32 %v3246_v35, %v10596_v32  ;;  %v3201_v61 = vadd.f32 %v3193_v57, %v3129_v27  ;;  %v13033_v32 = vld [vmem:[#allocation129_spill] sm:$0xff]  ;;  %v10785_v35 = vld [vmem:[%s11726_s3 + $0x46] ss:$0 sm:$0xff] }
 0x481   : > { %v10752_v50 = vpop.permute.xlu1 %3264  ;;  %v3267_v6 = vpop.permute.xlu2 %3266  ;;  %v3219_v36 = vadd.f32 %v3211_v16, %v3147_v8  ;;  %v3237_v52 = vadd.f32 %v3229_v34, %v3165_v9  ;;  %v3255_v14 = vadd.f32 %v3247_v60, %v3183_v49  ;;  %v3232_v57 = vmul.f32 %v10624_v54, %v13033_v32  ;;  %13036 = vst [vmem:[#allocation21_spill] sm:$0xff] %v10785_v35  ;;  %v10790_v34 = vld [vmem:[%s11726_s3 + $0x6a] ss:$0 sm:$0xff] }
 0x482   : > { %v3316_v42 = vmul.f32 %v10679_v62, %v10752_v50  ;;  %v3334_v33 = vmul.f32 %v10684_v13, %v10752_v50  ;;  %v10760_v19 = vpop.permute.xlu0 %3262  ;;  %v3281_v4 = vmul.f32 %v10667_v20, %v3267_v6  ;;  %v3299_v15 = vmul.f32 %v10674_v22, %v3267_v6 }
 0x483   : > { %v3317_v59 = vmul.f32 %v10679_v62, %v3267_v6  ;;  %v3335_v47 = vmul.f32 %v10684_v13, %v3267_v6  ;;  %v3250_v49 = vmul.f32 %v10637_v30, %v13033_v32  ;;  %v3315_v60 = vmul.f32 %v10679_v62, %v10760_v19 }
 0x484   : > { %v10766_v27 = vadd.f32 %v3316_v42, %v3236_v43  ;;  %v10768_v8 = vadd.f32 %v3334_v33, %v3254_v51  ;;  %v10774_v9 = vadd.f32 %v3281_v4, %v3201_v61  ;;  %v10776_v16 = vadd.f32 %v3299_v15, %v3219_v36  ;;  %v13037_v51 = vld [vmem:[#allocation73_spill] sm:$0xff] }
 0x485   : > { %v10778_v56 = vadd.f32 %v3317_v59, %v3237_v52  ;;  %v10780_v3 = vadd.f32 %v3335_v47, %v3255_v14  ;;  %v3235_v61 = vadd.f32 %v10696_v29, %v10588_v17  ;;  %v3253_v36 = vadd.f32 %v3245_v23, %v10591_v31 }
 0x486   : > { %13034 = vst [vmem:[#allocation23_spill] sm:$0xff] %v10774_v9  ;;  %v3333_v43 = vmul.f32 %v10684_v13, %v10760_v19  ;;  %v3231_v6 = vmul.f32 %v10624_v54, %v13037_v51  ;;  %v3249_v42 = vmul.f32 %v10637_v30, %v13037_v51  ;;  %v3240_v33 = vadd.f32 %v3232_v57, %v3168_v55 }
 0x487   : > { %13035 = vst [vmem:[#allocation74_spill] sm:$0xff] %v10776_v16  ;;  %v3258_v52 = vadd.f32 %v3250_v49, %v3186_v63  ;;  %v3323_v14 = vadd.f32 %v3315_v60, %v3235_v61  ;;  %v3196_v29 = vmul.f32 %v10610_v39, %v13033_v32  ;;  %v3214_v17 = vmul.f32 %v10619_v24, %v13033_v32 }
 0x488   : > { %v3341_v4 = vadd.f32 %v3333_v43, %v3253_v36  ;;  %v3239_v23 = vadd.f32 %v3231_v6, %v10647_v48  ;;  %v3257_v15 = vadd.f32 %v3249_v42, %v10649_v21  ;;  %v10813_v47 = vmul.f32 %v10785_v35, %v13027_v28  ;;  %v10832_v43 = vld [vmem:[%s11726_s3 + $0x8e] ss:$0 sm:$0xff] }
 0x489   : > { %v10807_v31 = vpop.permute.xlu1 %3270  ;;  %v3273_v59 = vpop.permute.xlu2 %3272  ;;  %v10817_v55 = vmul.f32 %v10790_v34, %v13027_v28  ;;  %v3204_v57 = vadd.f32 %v3196_v29, %v3132_v46  ;;  %v3222_v49 = vadd.f32 %v3214_v17, %v3150_v18  ;;  %v13041_v46 = vld [vmem:[#allocation126_spill] sm:$0xff] }
 0x48a   : > { %13038 = vst [vmem:[#allocation90_spill] sm:$0xff] %v10807_v31  ;;  %v3319_v63 = vmul.f32 %v10679_v62, %v10807_v31  ;;  %v3337_v32 = vmul.f32 %v10684_v13, %v10807_v31  ;;  %v10823_v48 = vpop.permute.xlu0 %3268  ;;  %v3284_v21 = vmul.f32 %v10667_v20, %v3273_v59  ;;  %v3302_v61 = vmul.f32 %v10674_v22, %v3273_v59 }
 0x48b   : > { %13039 = vst [vmem:[#allocation15_spill] sm:$0xff] %v10813_v47  ;;  %v3320_v36 = vmul.f32 %v10679_v62, %v3273_v59  ;;  %v3338_v60 = vmul.f32 %v10684_v13, %v3273_v59  ;;  %v3230_v18 = vmul.f32 %v10624_v54, %v13041_v46  ;;  %v3248_v29 = vmul.f32 %v10637_v30, %v13041_v46 }
 0x48c   : > { %13040 = vst [vmem:[#allocation14_spill] sm:$0xff] %v10823_v48  ;;  %v10834_v6 = vadd.f32 %v3319_v63, %v3239_v23  ;;  %v10836_v42 = vadd.f32 %v3337_v32, %v3257_v15  ;;  %v10842_v17 = vadd.f32 %v3284_v21, %v3204_v57  ;;  %v10844_v16 = vadd.f32 %v3302_v61, %v3222_v49  ;;  %v10859_v32 = vld [vmem:[%s11726_s3 + $0x69] ss:$0 sm:$0xff] }
 0x48d   : > { %v10846_v59 = vadd.f32 %v3320_v36, %v3240_v33  ;;  %v10848_v9 = vadd.f32 %v3338_v60, %v3258_v52  ;;  %v3238_v47 = vadd.f32 %v3230_v18, %v10640_v45  ;;  %v3256_v23 = vadd.f32 %v3248_v29, %v10643_v41  ;;  %v10864_v33 = vld [vmem:[%s11726_s3 + $0x8d] ss:$0 sm:$0xff]  ;;  %v13044_v52 = vld [vmem:[#allocation132_spill] sm:$0xff] }
 0x48e   : > { %13042 = vst [vmem:[#allocation41_spill] sm:$0xff] %v10842_v17  ;;  %v3318_v15 = vmul.f32 %v10679_v62, %v10823_v48  ;;  %v3336_v63 = vmul.f32 %v10684_v13, %v10823_v48  ;;  %v10868_v45 = vmul.f32 %v10610_v39, %v13041_v46  ;;  %v10872_v41 = vmul.f32 %v10832_v43, %v13027_v28 }
 0x48f   : > { %13043 = vst [vmem:[#allocation106_spill] sm:$0xff] %v10844_v16  ;;  %v10876_v57 = vmul.f32 %v10790_v34, %v13044_v52  ;;  %v10880_v49 = vmul.f32 %v10832_v43, %v13044_v52  ;;  %v10884_v21 = vmul.f32 %v10610_v39, %v13032_v10  ;;  %v10888_v61 = vmul.f32 %v10619_v24, %v13032_v10  ;;  %v13048_v16 = vld [vmem:[#allocation58_spill] sm:$0xff] }
 0x490   : > { %v3326_v36 = vadd.f32 %v3318_v15, %v3238_v47  ;;  %v3344_v60 = vadd.f32 %v3336_v63, %v3256_v23  ;;  %v10892_v28 = vmul.f32 %v10619_v24, %v13041_v46  ;;  %v10900_v17 = vmul.f32 %v10610_v39, %v13048_v16 }
 0x491   : > { %13045 = vst [vmem:[#allocation121_spill] sm:$0xff] %v10876_v57  ;;  %v10894_v18 = vpop.permute.xlu1 %3364  ;;  %v10896_v29 = vpop.permute.xlu2 %3366  ;;  %v10904_v52 = vmul.f32 %v10619_v24, %v13048_v16  ;;  %v10908_v10 = vmul.f32 %v10658_v40, %v12987_v7  ;;  %v10912_v47 = vmul.f32 %v10610_v39, %v13037_v51  ;;  %v10916_v46 = vmul.f32 %v10619_v24, %v13037_v51 }
 0x492   : > { %13046 = vst [vmem:[#allocation101_spill] sm:$0xff] %v10880_v49  ;;  %v3418_v23 = vmul.f32 %v10859_v32, %v10894_v18  ;;  %v3436_v15 = vmul.f32 %v10864_v33, %v10894_v18  ;;  %v10922_v63 = vpop.permute.xlu0 %3274  ;;  %v3419_v49 = vmul.f32 %v10859_v32, %v10896_v29  ;;  %v3233_v39 = vmul.f32 %v10624_v54, %v13048_v16 }
 0x493   : > { %13047 = vst [vmem:[#allocation102_spill] sm:$0xff] %v10894_v18  ;;  %v3251_v24 = vmul.f32 %v10637_v30, %v13048_v16  ;;  %v10940_v18 = vmul.f32 %v10785_v35, %v12987_v7  ;;  %v10944_v48 = vmul.f32 %v10790_v34, %v12987_v7  ;;  %v10952_v30 = vmul.f32 %v10832_v43, %v12987_v7 }
 0x494   : > { %13049 = vst [vmem:[#allocation82_spill] sm:$0xff] %v10908_v10  ;;  %v3437_v10 = vmul.f32 %v10864_v33, %v10896_v29  ;;  %v10933_v51 = vadd.f32 %v3418_v23, %v10732_v53  ;;  %v10936_v57 = vadd.f32 %v3436_v15, %v10734_v37  ;;  %v10946_v31 = vadd.f32 %v3419_v49, %v3323_v14  ;;  %v13052_v53 = vld [vmem:[#allocation70_spill] sm:$0xff] }
 0x495   : > { %13050 = vst [vmem:[#allocation43_spill] sm:$0xff] %v10922_v63  ;;  %v10956_v37 = vmul.f32 %v10658_v40, %v13052_v53  ;;  %v3241_v16 = vadd.f32 %v3233_v39, %v10719_v0  ;;  %v3259_v23 = vadd.f32 %v3251_v24, %v10722_v58  ;;  %v3321_v15 = vmul.f32 %v10679_v62, %v10922_v63 }
 0x496   : > { %13051 = vst [vmem:[#allocation42_spill] sm:$0xff] %v10940_v18  ;;  %v10948_v54 = vadd.f32 %v3437_v10, %v3341_v4  ;;  %v3339_v14 = vmul.f32 %v10684_v13, %v10922_v63  ;;  %v10966_v4 = vmul.f32 %v10785_v35, %v13052_v53  ;;  %v10970_v7 = vmul.f32 %v10790_v34, %v13052_v53  ;;  %v13077_v63 = vld [vmem:[#allocation75_spill] sm:$0xff] }
 0x497   : > { %13053 = vst [vmem:[#allocation69_spill] sm:$0xff] %v10956_v37  ;;  %v10974_v49 = vmul.f32 %v10832_v43, %v13052_v53  ;;  %v10978_v0 = vmul.f32 %v10658_v40, %v12999_v2  ;;  %v3329_v62 = vadd.f32 %v3321_v15, %v3241_v16  ;;  %v10982_v13 = vmul.f32 %v10785_v35, %v12999_v2 }
 0x498   : > { %13054 = vst [vmem:[#allocation26_spill] sm:$0xff] %v10966_v4  ;;  %v3347_v58 = vadd.f32 %v3339_v14, %v3259_v23  ;;  %v10986_v10 = vmul.f32 %v10790_v34, %v12999_v2  ;;  %v10994_v53 = vmul.f32 %v10832_v43, %v12999_v2  ;;  %v13061_v4 = vld [vmem:[#allocation57_spill] sm:$0xff]  ;;  %v11006_v15 = vmul.f32 %v10658_v40, %v10257_v12 }
 0x499   : > { %13055 = vst [vmem:[#allocation76_spill] sm:$0xff] %v10974_v49  ;;  %v10988_v39 = vpop.permute.xlu1 %3370  ;;  %v10990_v24 = vpop.permute.xlu2 %3372  ;;  %v10998_v16 = vmul.f32 %v10790_v34, %v13061_v4  ;;  %v11002_v23 = vmul.f32 %v10832_v43, %v13061_v4  ;;  %v3032_v14 = vmul.f32 %v10370_v11, %v10471_v1  ;;  %v3050_v35 = vmul.f32 %v10379_v25, %v10471_v1 }
 0x49a   : > { %13056 = vst [vmem:[#allocation20_spill] sm:$0xff] %v10978_v0  ;;  %v3421_v2 = vmul.f32 %v10859_v32, %v10988_v39  ;;  %v11016_v18 = vpop.permute.xlu0 %3368  ;;  %v3035_v4 = vmul.f32 %v10370_v11, %v10525_v38  ;;  %v3053_v40 = vmul.f32 %v10379_v25, %v10525_v38  ;;  %v3440_v1 = vmul.f32 %v10864_v33, %v10990_v24  ;;  %v13067_v0 = vld [vmem:[#allocation78_spill] sm:$0xff] }
 0x49b   : > { %13057 = vst [vmem:[#allocation108_spill] sm:$0xff] %v10982_v13  ;;  %v3439_v13 = vmul.f32 %v10864_v33, %v10988_v39  ;;  %v3120_v25 = vmul.f32 %v10572_v26, %v13067_v0  ;;  %v3138_v38 = vmul.f32 %v10577_v5, %v13067_v0 }
 0x49c   : > { %13058 = vst [vmem:[#allocation84_spill] sm:$0xff] %v10986_v10  ;;  %v3420_v10 = vmul.f32 %v10859_v32, %v11016_v18 }
 0x49d   : > { %13059 = vst [vmem:[#allocation127_spill] sm:$0xff] %v10988_v39  ;;  %v3137_v39 = vmul.f32 %v10577_v5, %v10565_v44  ;;  %v11034_v11 = vadd.f32 %v3439_v13, %v10780_v3  ;;  %v11054_v3 = vmul.f32 %v10832_v43, %v10257_v12  ;;  %v13071_v13 = vld [vmem:[#allocation67_spill] sm:$0xff] }
 0x49e   : > { %13060 = vst [vmem:[#allocation25_spill] sm:$0xff] %v10994_v53  ;;  %v11042_v53 = vadd.f32 %v3440_v1, %v3344_v60  ;;  %v3040_v0 = vadd.f32 %v3032_v14, %v13071_v13  ;;  %v13073_v60 = vld [vmem:[#allocation97_spill] sm:$0xff]  ;;  %v3428_v49 = vadd.f32 %v3420_v10, %v10766_v27  ;;  %v13079_v13 = vld [vmem:[#allocation35_spill] sm:$0xff] }
 0x49f   : > { %13062 = vst [vmem:[#allocation117_spill] sm:$0xff] %v10998_v16  ;;  %v11031_v16 = vadd.f32 %v3421_v2, %v10778_v56  ;;  %v11050_v56 = vmul.f32 %v10790_v34, %v10257_v12  ;;  %v11060_v2 = vmul.f32 %v10790_v34, %v13073_v60  ;;  %v11064_v1 = vmul.f32 %v10832_v43, %v13073_v60  ;;  %v13082_v43 = vld [vmem:[#allocation34_spill] sm:$0xff] }
 0x4a0   : > { %13063 = vst [vmem:[#allocation100_spill] sm:$0xff] %v11002_v23  ;;  %v3119_v23 = vmul.f32 %v10572_v26, %v10565_v44  ;;  %v3438_v44 = vmul.f32 %v10864_v33, %v11016_v18  ;;  %v3122_v60 = vmul.f32 %v10572_v26, %v13082_v43 }
 0x4a1   : > { %13064 = vst [vmem:[#allocation47_spill] sm:$0xff] %v11006_v15  ;;  %v3422_v15 = vmul.f32 %v10859_v32, %v10990_v24  ;;  %v11072_v34 = vpop.permute.xlu1 %3376 }
 0x4a2   : > { %13065 = vst [vmem:[#allocation32_spill] sm:$0xff] %v11031_v16  ;;  %v3446_v12 = vadd.f32 %v3438_v44, %v10768_v8  ;;  %v3424_v27 = vmul.f32 %v10859_v32, %v11072_v34  ;;  %v3442_v8 = vmul.f32 %v10864_v33, %v11072_v34 }
 0x4a3   : > { %13066 = vst [vmem:[#allocation49_spill] sm:$0xff] %v11034_v11  ;;  %v11040_v37 = vadd.f32 %v3422_v15, %v3326_v36  ;;  %v13072_v36 = vld [vmem:[#allocation16_spill] sm:$0xff]  ;;  %v13076_v11 = vld [vmem:[#allocation19_spill] sm:$0xff] }
 0x4a4   : > { %13068 = vst [vmem:[#allocation96_spill] sm:$0xff] %v11042_v53  ;;  %v3058_v15 = vadd.f32 %v3050_v35, %v13072_v36  ;;  %v3043_v16 = vadd.f32 %v3035_v4, %v13076_v11  ;;  %v3145_v35 = vadd.f32 %v3137_v39, %v13079_v13  ;;  %v3128_v36 = vadd.f32 %v3120_v25, %v3040_v0  ;;  %v11092_v11 = vpop.permute.xlu0 %3374  ;;  %v13084_v25 = vld [vmem:[#allocation114_spill] sm:$0xff] }
 0x4a5   : > { %13069 = vst [vmem:[#allocation122_spill] sm:$0xff] %v11050_v56  ;;  %v3061_v56 = vadd.f32 %v3053_v40, %v13077_v63  ;;  %v3140_v40 = vmul.f32 %v10577_v5, %v13082_v43  ;;  %v13083_v63 = vld [vmem:[#allocation119_spill] sm:$0xff]  ;;  %v3143_v44 = vmul.f32 %v10577_v5, %v13084_v25  ;;  %v11102_v0 = vadd.f32 %v3442_v8, %v10848_v9  ;;  %v11119_v9 = vld [vmem:[%s11726_s3 + $0x6b] ss:$0 sm:$0xff] }
 0x4a6   : > { %13070 = vst [vmem:[#allocation30_spill] sm:$0xff] %v11054_v3  ;;  %v13078_v3 = vld [vmem:[#allocation107_spill] sm:$0xff]  ;;  %v3146_v53 = vadd.f32 %v3138_v38, %v3058_v15  ;;  %v3123_v4 = vmul.f32 %v10572_v26, %v13083_v63  ;;  %v3141_v10 = vmul.f32 %v10577_v5, %v13083_v63  ;;  %v3125_v38 = vmul.f32 %v10572_v26, %v13084_v25 }
 0x4a7   : > { %13074 = vst [vmem:[#allocation123_spill] sm:$0xff] %v11060_v2  ;;  %v3127_v14 = vadd.f32 %v3119_v23, %v13078_v3  ;;  %v11074_v2 = vpop.permute.xlu2 %3378  ;;  %v11099_v3 = vadd.f32 %v3424_v27, %v10846_v59  ;;  %v3200_v15 = vadd.f32 %v10884_v21, %v3128_v36  ;;  %v13086_v26 = vld [vmem:[#allocation87_spill] sm:$0xff]  ;;  %v3423_v5 = vmul.f32 %v10859_v32, %v11092_v11  ;;  %v11124_v21 = vld [vmem:[%s11726_s3 + $0x8f] ss:$0 sm:$0xff] }
 0x4a8   : > { %13075 = vst [vmem:[#allocation130_spill] sm:$0xff] %v11064_v1  ;;  %v3425_v39 = vmul.f32 %v10859_v32, %v11074_v2  ;;  %v3443_v23 = vmul.f32 %v10864_v33, %v11074_v2  ;;  %v3218_v13 = vadd.f32 %v10888_v61, %v3146_v53  ;;  %v3441_v59 = vmul.f32 %v10864_v33, %v11092_v11  ;;  %v13087_v61 = vld [vmem:[#allocation125_spill] sm:$0xff] }
 0x4a9   : > { %13080 = vst [vmem:[#allocation91_spill] sm:$0xff] %v11072_v34  ;;  %v13085_v34 = vld [vmem:[#allocation36_spill] sm:$0xff]  ;;  %v13089_v32 = vld [vmem:[#allocation9_spill] sm:$0xff]  ;;  %v11131_v27 = vadd.f32 %v3423_v5, %v10834_v6  ;;  %v3518_v25 = vadd.f32 %v10952_v30, %v3446_v12 }
 0x4aa   : > { %13081 = vst [vmem:[#allocation124_spill] sm:$0xff] %v11074_v2  ;;  %v11106_v43 = vadd.f32 %v3425_v39, %v3329_v62  ;;  %v11108_v63 = vadd.f32 %v3443_v23, %v3347_v58  ;;  %v3199_v1 = vadd.f32 %v13085_v34, %v3127_v14  ;;  %v3217_v2 = vadd.f32 %v13086_v26, %v3145_v35  ;;  %v13088_v58 = vld [vmem:[#allocation54_spill] sm:$0xff]  ;;  %v13090_v34 = vld [vmem:[#allocation64_spill] sm:$0xff] }
 0x4ab   : > { %v3130_v62 = vadd.f32 %v3122_v60, %v13087_v61  ;;  %v3148_v53 = vadd.f32 %v3140_v40, %v13088_v58  ;;  %v3131_v14 = vadd.f32 %v3123_v4, %v3043_v16  ;;  %v3149_v35 = vadd.f32 %v3141_v10, %v3061_v56  ;;  %v11144_v40 = vpop.permute.xlu1 %3526  ;;  %v11151_v6 = vld [vmem:[%s11726_s3 + $0x21] ss:$0 sm:$0xff] }
 0x4ac   : > { %v3133_v36 = vadd.f32 %v3125_v38, %v13089_v32  ;;  %v3151_v33 = vadd.f32 %v3143_v44, %v13090_v34  ;;  %v11134_v8 = vadd.f32 %v3441_v59, %v10836_v42  ;;  %v3280_v39 = vmul.f32 %v10667_v20, %v10752_v50  ;;  %v11186_v61 = vpop.permute.xlu0 %3524  ;;  %v13094_v32 = vld [vmem:[#allocation101_spill] sm:$0xff] }
 0x4ad   : > { %v3298_v60 = vmul.f32 %v10674_v22, %v10752_v50  ;;  %v3279_v16 = vmul.f32 %v10667_v20, %v10760_v19  ;;  %v3297_v56 = vmul.f32 %v10674_v22, %v10760_v19  ;;  %v3499_v42 = vadd.f32 %v10817_v55, %v10946_v31 }
 0x4ae   : > { %v3517_v50 = vadd.f32 %v10872_v41, %v10948_v54  ;;  %v3579_v10 = vmul.f32 %v11119_v9, %v11144_v40  ;;  %v3597_v19 = vmul.f32 %v11124_v21, %v11144_v40  ;;  %v3500_v23 = vadd.f32 %v10944_v48, %v3428_v49 }
 0x4af   : > { %v11146_v4 = vpop.permute.xlu2 %3528  ;;  %v3203_v31 = vadd.f32 %v10912_v47, %v3131_v14  ;;  %v3221_v55 = vadd.f32 %v10916_v46, %v3149_v35  ;;  %v3202_v26 = vadd.f32 %v10868_v45, %v3130_v62  ;;  %v3220_v48 = vadd.f32 %v10892_v28, %v3148_v53  ;;  %v11182_v47 = vld [vmem:[%s11726_s3 + $0x45] ss:$0 sm:$0xff]  ;;  %v13092_v53 = vld [vmem:[#allocation14_spill] sm:$0xff] }
 0x4b0   : > { %v3580_v38 = vmul.f32 %v11119_v9, %v11146_v4  ;;  %v3598_v44 = vmul.f32 %v11124_v21, %v11146_v4  ;;  %v11169_v41 = vadd.f32 %v3579_v10, %v3499_v42  ;;  %v11171_v54 = vadd.f32 %v3597_v19, %v3517_v50 }
 0x4b1   : > { %v3288_v30 = vadd.f32 %v3280_v39, %v3200_v15  ;;  %v3306_v5 = vadd.f32 %v3298_v60, %v3218_v13  ;;  %v3287_v59 = vadd.f32 %v3279_v16, %v3199_v1  ;;  %v3383_v46 = vmul.f32 %v11151_v6, %v10896_v29  ;;  %v13091_v15 = vld [vmem:[#allocation90_spill] sm:$0xff] }
 0x4b2   : > { %v11175_v49 = vadd.f32 %v3580_v38, %v3500_v23  ;;  %v11177_v12 = vadd.f32 %v3598_v44, %v3518_v25  ;;  %v3305_v45 = vadd.f32 %v3297_v56, %v3217_v2  ;;  %v11189_v28 = vadd.f32 %v10900_v17, %v3133_v36  ;;  %v11207_v17 = vld [vmem:[%s11726_s3 + $0x23] ss:$0 sm:$0xff] }
 0x4b3   : > { %v11192_v62 = vadd.f32 %v10904_v52, %v3151_v33  ;;  %v3384_v1 = vmul.f32 %v11151_v6, %v11016_v18  ;;  %v3283_v13 = vmul.f32 %v10667_v20, %v13091_v15  ;;  %v3301_v58 = vmul.f32 %v10674_v22, %v13091_v15  ;;  %v13093_v52 = vld [vmem:[#allocation121_spill] sm:$0xff]  ;;  %v11217_v39 = vpop.permute.xlu1 %3532  ;;  %v13097_v15 = vld [vmem:[#allocation76_spill] sm:$0xff] }
 0x4b4   : > { %v3282_v14 = vmul.f32 %v10667_v20, %v13092_v53  ;;  %v3300_v2 = vmul.f32 %v10674_v22, %v13092_v53  ;;  %v3498_v35 = vadd.f32 %v13093_v52, %v10933_v51  ;;  %v3516_v36 = vadd.f32 %v13094_v32, %v10936_v57 }
 0x4b5   : > { %v3578_v34 = vmul.f32 %v11119_v9, %v11186_v61  ;;  %v3596_v33 = vmul.f32 %v11124_v21, %v11186_v61  ;;  %v3391_v60 = vadd.f32 %v3383_v46, %v3287_v59  ;;  %v3401_v16 = vmul.f32 %v11182_v47, %v10896_v29  ;;  %v11242_v59 = vld [vmem:[%s11726_s3 + $0x47] ss:$0 sm:$0xff] }
 0x4b6   : > { %v3502_v56 = vadd.f32 %v10970_v7, %v11040_v37  ;;  %v3582_v51 = vmul.f32 %v11119_v9, %v11217_v39  ;;  %v3386_v57 = vmul.f32 %v11151_v6, %v10990_v24  ;;  %v3392_v42 = vadd.f32 %v3384_v1, %v3288_v30  ;;  %v13096_v1 = vld [vmem:[#allocation96_spill] sm:$0xff] }
 0x4b7   : > { %v11227_v50 = vadd.f32 %v3578_v34, %v3498_v35  ;;  %v11229_v10 = vadd.f32 %v3596_v33, %v3516_v36  ;;  %v3291_v19 = vadd.f32 %v3283_v13, %v3203_v31  ;;  %v3387_v23 = vmul.f32 %v11151_v6, %v11092_v11  ;;  %v13095_v31 = vld [vmem:[#allocation115_spill] sm:$0xff] }
 0x4b8   : > { %v3543_v29 = vmul.f32 %v11207_v17, %v11144_v40  ;;  %v11235_v25 = vadd.f32 %v3582_v51, %v3502_v56  ;;  %v3309_v37 = vadd.f32 %v3301_v58, %v3221_v55  ;;  %v3290_v7 = vadd.f32 %v3282_v14, %v3202_v26  ;;  %v3535_v55 = vpop.permute.xlu2 %3534  ;;  %v13098_v26 = vld [vmem:[#allocation43_spill] sm:$0xff]  ;;  %v13099_v14 = vld [vmem:[#allocation82_spill] sm:$0xff]  ;;  %v13101_v56 = vld [vmem:[#allocation25_spill] sm:$0xff] }
 0x4b9   : > { %v3308_v38 = vadd.f32 %v3300_v2, %v3220_v48  ;;  %v3544_v44 = vmul.f32 %v11207_v17, %v11146_v4  ;;  %v3409_v30 = vadd.f32 %v3401_v16, %v3305_v45  ;;  %v3463_v46 = vadd.f32 %v13095_v31, %v3391_v60  ;;  %v13100_v60 = vld [vmem:[#allocation84_spill] sm:$0xff] }
 0x4ba   : > { %v3520_v13 = vadd.f32 %v13097_v15, %v13096_v1  ;;  %v3600_v53 = vmul.f32 %v11124_v21, %v11217_v39  ;;  %v3285_v48 = vmul.f32 %v10667_v20, %v13098_v26  ;;  %v3394_v58 = vadd.f32 %v3386_v57, %v3290_v7  ;;  %v13104_v1 = vld [vmem:[#allocation20_spill] sm:$0xff] }
 0x4bb   : > { %v3404_v45 = vmul.f32 %v11182_v47, %v10990_v24  ;;  %v3464_v2 = vadd.f32 %v13099_v14, %v3392_v42  ;;  %v3402_v52 = vmul.f32 %v11182_v47, %v11016_v18  ;;  %v3395_v35 = vadd.f32 %v3387_v23, %v3291_v19  ;;  %v13102_v19 = vld [vmem:[#allocation15_spill] sm:$0xff] }
 0x4bc   : > { %v3551_v32 = vadd.f32 %v3543_v29, %v3463_v46  ;;  %v11256_v36 = vadd.f32 %v3600_v53, %v3520_v13  ;;  %v3546_v33 = vmul.f32 %v11207_v17, %v11217_v39  ;;  %v3503_v20 = vadd.f32 %v13100_v60, %v11131_v27  ;;  %v13103_v29 = vld [vmem:[#allocation69_spill] sm:$0xff]  ;;  %v11273_v27 = vpop.permute.xlu0 %3530  ;;  %v13105_v13 = vld [vmem:[#allocation124_spill] sm:$0xff] }
 0x4bd   : > { %v3552_v34 = vadd.f32 %v3544_v44, %v3464_v2  ;;  %v3583_v16 = vmul.f32 %v11119_v9, %v3535_v55  ;;  %v3561_v24 = vmul.f32 %v11242_v59, %v11144_v40  ;;  %v3521_v51 = vadd.f32 %v13101_v56, %v11134_v8  ;;  %v13106_v2 = vld [vmem:[#allocation32_spill] sm:$0xff] }
 0x4be   : > { %v3547_v18 = vmul.f32 %v11207_v17, %v3535_v55  ;;  %v3601_v57 = vmul.f32 %v11124_v21, %v3535_v55  ;;  %v3412_v42 = vadd.f32 %v3404_v45, %v3308_v38  ;;  %v3481_v23 = vadd.f32 %v13102_v19, %v3409_v30  ;;  %v13109_v60 = vld [vmem:[#allocation100_spill] sm:$0xff] }
 0x4bf   : > { %v3466_v7 = vadd.f32 %v13103_v29, %v3394_v58  ;;  %v11271_v44 = vadd.f32 %v3583_v16, %v3503_v20  ;;  %v3410_v31 = vadd.f32 %v3402_v52, %v3306_v5  ;;  %v3613_v46 = vmul.f32 0.5, %v3551_v32  ;;  %v13107_v52 = vld [vmem:[#allocation117_spill] sm:$0xff]  ;;  %v13111_v16 = vld [vmem:[#allocation26_spill] sm:$0xff] }
 0x4c0   : > { %v3467_v40 = vadd.f32 %v13104_v1, %v3395_v35  ;;  %v11276_v15 = vadd.f32 %v3601_v57, %v3521_v51  ;;  %v3303_v8 = vmul.f32 %v10674_v22, %v13098_v26  ;;  %v3389_v38 = vmul.f32 %v11151_v6, %v13105_v13  ;;  %v13108_v32 = vld [vmem:[#allocation49_spill] sm:$0xff] }
 0x4c1   : > { %v3614_v53 = vmul.f32 0.5, %v3552_v34  ;;  %v3554_v30 = vadd.f32 %v3546_v33, %v3466_v7  ;;  %v3405_v58 = vmul.f32 %v11182_v47, %v11092_v11  ;;  %v11284_v45 = vadd.f32 %v3561_v24, %v3481_v23  ;;  %v13110_v33 = vld [vmem:[#allocation42_spill] sm:$0xff]  ;;  %v3539_v24 = vpop.permute.xlu1 %3538 }
 0x4c2   : > { %v3562_v5 = vmul.f32 %v11242_v59, %v11146_v4  ;;  %v3555_v14 = vadd.f32 %v3547_v18, %v3467_v40  ;;  %v3501_v35 = vadd.f32 %v13107_v52, %v13106_v2  ;;  %v3519_v22 = vadd.f32 %v13109_v60, %v13108_v32 }
 0x4c3   : > { %v3581_v26 = vmul.f32 %v11119_v9, %v11273_v27  ;;  %v3599_v34 = vmul.f32 %v11124_v21, %v11273_v27  ;;  %v3293_v11 = vadd.f32 %v3285_v48, %v11189_v28  ;;  %4562 = vtanh.f32 %v3613_v46  ;;  %v13112_v48 = vld [vmem:[#allocation122_spill] sm:$0xff] }
 0x4c4   : > { %v3482_v20 = vadd.f32 %v13110_v33, %v3410_v31  ;;  %v3484_v4 = vadd.f32 %v13111_v16, %v3412_v42  ;;  %4564 = vtanh.f32 %v3614_v53  ;;  %v3616_v56 = vmul.f32 0.5, %v3554_v30  ;;  %v13113_v46 = vld [vmem:[#allocation30_spill] sm:$0xff]  ;;  %v11322_v30 = vpop.permute.xlu0 %3536  ;;  %v13120_v16 = vld [vmem:[#allocation21_spill] sm:$0xff] }
 0x4c5   : > { %v11299_v51 = vadd.f32 %v3581_v26, %v3501_v35  ;;  %v11301_v18 = vadd.f32 %v3599_v34, %v3519_v22  ;;  %v3397_v57 = vadd.f32 %v3389_v38, %v3293_v11  ;;  %v3413_v19 = vadd.f32 %v3405_v58, %v3309_v37  ;;  %v13117_v35 = vld [vmem:[#allocation130_spill] sm:$0xff] }
 0x4c6   : > { %v11303_v23 = vadd.f32 %v3562_v5, %v3482_v20  ;;  %v3617_v29 = vmul.f32 0.5, %v3555_v14  ;;  %4566 = vtanh.f32 %v11284_v45  ;;  %v3564_v28 = vmul.f32 %v11242_v59, %v11217_v39  ;;  %v13114_v39 = vld [vmem:[#allocation123_spill] sm:$0xff]  ;;  %v13118_v11 = vld [vmem:[#allocation102_spill] sm:$0xff] }
 0x4c7   : > { %v3505_v42 = vadd.f32 %v13112_v48, %v11106_v43  ;;  %v3585_v7 = vmul.f32 %v11119_v9, %v3539_v24  ;;  %v3565_v31 = vmul.f32 %v11242_v59, %v3535_v55  ;;  %v3523_v1 = vadd.f32 %v13113_v46, %v11108_v63  ;;  %v13115_v55 = vld [vmem:[#allocation108_spill] sm:$0xff]  ;;  %v13116_v63 = vld [vmem:[#allocation47_spill] sm:$0xff]  ;;  %v13119_v20 = vld [vmem:[#allocation18_spill] sm:$0xff] }
 0x4c8   : > { %v3549_v37 = vmul.f32 %v11207_v17, %v3539_v24  ;;  %v3603_v40 = vmul.f32 %v11124_v21, %v3539_v24  ;;  %v3407_v38 = vmul.f32 %v11182_v47, %v13105_v13  ;;  %4568 = vtanh.f32 %v3616_v56 }
 0x4c9   : > { %v11318_v53 = vadd.f32 %v3585_v7, %v3505_v42  ;;  %v3504_v43 = vadd.f32 %v13114_v39, %v11099_v3  ;;  %v4563_v58 = vpop.eup %4562  ;;  %v3485_v5 = vadd.f32 %v13115_v55, %v3413_v19  ;;  %4570 = vtanh.f32 %v3617_v29  ;;  %v13124_v39 = vld [vmem:[#allocation132_spill] sm:$0xff]  ;;  %v13126_v55 = vld [vmem:[#allocation57_spill] sm:$0xff] }
 0x4ca   : > { %v3469_v14 = vadd.f32 %v13116_v63, %v3397_v57  ;;  %v11326_v2 = vadd.f32 %v3603_v40, %v3523_v1  ;;  %v4565_v52 = vpop.eup %4564  ;;  %4572 = vtanh.f32 %v11303_v23  ;;  %v11329_v13 = vadd.f32 %v3564_v28, %v3484_v4  ;;  %v13123_v40 = vld [vmem:[#allocation118_spill] sm:$0xff]  ;;  %v13127_v63 = vld [vmem:[#allocation23_spill] sm:$0xff] }
 0x4cb   : > { %v3522_v32 = vadd.f32 %v13117_v35, %v11102_v0  ;;  %v3311_v3 = vadd.f32 %v3303_v8, %v11192_v62  ;;  %v11334_v60 = vadd.f32 %v3565_v31, %v3485_v5  ;;  %v3584_v26 = vmul.f32 %v11119_v9, %v11322_v30  ;;  %v13121_v0 = vld [vmem:[#allocation127_spill] sm:$0xff] }
 0x4cc   : > { %v3557_v22 = vadd.f32 %v3549_v37, %v3469_v14  ;;  %v4567_v34 = vpop.eup %4566  ;;  %v3382_v33 = vmul.f32 %v11151_v6, %v13118_v11  ;;  %v3479_v56 = vmul.f32 %v13120_v16, %v13119_v20  ;;  %v3602_v4 = vmul.f32 %v11124_v21, %v11322_v30  ;;  %v13122_v9 = vld [vmem:[#allocation91_spill] sm:$0xff] }
 0x4cd   : > { %v3629_v57 = vadd.f32 1.0, %v4563_v58  ;;  %v3385_v62 = vmul.f32 %v11151_v6, %v13121_v0  ;;  %v3415_v8 = vadd.f32 %v3407_v38, %v3311_v3  ;;  %v11346_v19 = vadd.f32 %v3584_v26, %v3504_v43  ;;  %v13125_v43 = vld [vmem:[#allocation63_spill] sm:$0xff]  ;;  %v13129_v3 = vld [vmem:[#allocation41_spill] sm:$0xff] }
 0x4ce   : > { %v3630_v29 = vadd.f32 1.0, %v4565_v52  ;;  %v4569_v28 = vpop.eup %4568  ;;  %v3388_v48 = vmul.f32 %v11151_v6, %v13122_v9  ;;  %4574 = vtanh.f32 %v11329_v13  ;;  %v11351_v42 = vadd.f32 %v3602_v4, %v3522_v32 }
 0x4cf   : > { %v11353_v7 = vmul.f32 0.5, %v3629_v57  ;;  %v4571_v31 = vpop.eup %4570  ;;  %4576 = vtanh.f32 %v11334_v60  ;;  %v3567_v21 = vmul.f32 %v11242_v59, %v3539_v24  ;;  %v3619_v46 = vmul.f32 0.5, %v3557_v22  ;;  %v13128_v24 = vld [vmem:[#allocation97_spill] sm:$0xff] }
 0x4d0   : > { %v11357_v1 = vmul.f32 0.5, %v3630_v29  ;;  %v4573_v37 = vpop.eup %4572  ;;  %v3390_v38 = vadd.f32 %v3382_v33, %v13123_v40  ;;  %v3454_v6 = vmul.f32 %v13125_v43, %v13124_v39  ;;  %v3457_v5 = vmul.f32 %v13125_v43, %v13126_v55 }
 0x4d1   : > { %v3733_v58 = vmul.f32 %v4567_v34, %v11353_v7  ;;  %v3393_v14 = vadd.f32 %v3385_v62, %v13127_v63  ;;  %v3487_v52 = vadd.f32 %v3479_v56, %v3415_v8  ;;  %v3460_v32 = vmul.f32 %v13125_v43, %v13128_v24  ;;  %v3701_v8 = vpop.permute.xlu2 %3700 }
 0x4d2   : > { %v3734_v35 = vmul.f32 %v4573_v37, %v11357_v1  ;;  %v3396_v22 = vadd.f32 %v3388_v48, %v13129_v3  ;;  %v3542_v26 = vmul.f32 %v11207_v17, %v11186_v61  ;;  %v3632_v33 = vadd.f32 1.0, %v4569_v28 }
 0x4d3   : > { %3750 = vrot.lane.b32.xlu2 %v3733_v58, %s4789_s14  ;;  %v3633_v34 = vadd.f32 1.0, %v4571_v31  ;;  %v3400_v20 = vmul.f32 %v11182_v47, %v13118_v11  ;;  %v3545_v56 = vmul.f32 %v11207_v17, %v11273_v27  ;;  %v11377_v4 = vadd.f32 %v3567_v21, %v3487_v52 }
 0x4d4   : > { %4578 = vtanh.f32 %v3619_v46  ;;  %3752 = vrot.lane.b32.xlu0 %v3734_v35, %s4789_s14  ;;  %v4575_v57 = vpop.eup %4574  ;;  %v3548_v62 = vmul.f32 %v11207_v17, %v11322_v30  ;;  %v3462_v29 = vadd.f32 %v3454_v6, %v3390_v38  ;;  %v11382_v48 = vmul.f32 0.5, %v3632_v33  ;;  %v13130_v6 = vld [vmem:[#allocation120_spill] sm:$0xff]  ;;  %v13131_v35 = vld [vmem:[#allocation74_spill] sm:$0xff] }
 0x4d5   : > { %v11384_v28 = vmul.f32 0.5, %v3633_v34  ;;  %v4577_v31 = vpop.eup %4576  ;;  %v3403_v11 = vmul.f32 %v11182_v47, %v13121_v0  ;;  %v3406_v21 = vmul.f32 %v11182_v47, %v13122_v9  ;;  %v3465_v46 = vadd.f32 %v3457_v5, %v3393_v14  ;;  %v13132_v47 = vld [vmem:[#allocation106_spill] sm:$0xff] }
 0x4d6   : > { %v3550_v37 = vadd.f32 %v3542_v26, %v3462_v29  ;;  %v3736_v40 = vmul.f32 %v4575_v57, %v11382_v48  ;;  %v3468_v17 = vadd.f32 %v3460_v32, %v3396_v22  ;;  %4580 = vtanh.f32 %v11377_v4 }
 0x4d7   : > { %v3737_v43 = vmul.f32 %v4577_v31, %v11384_v28  ;;  %v3553_v38 = vadd.f32 %v3545_v56, %v3465_v46  ;;  %v3408_v58 = vadd.f32 %v3400_v20, %v13130_v6  ;;  %v3411_v3 = vadd.f32 %v3403_v11, %v13131_v35 }
 0x4d8   : > { %v3556_v63 = vadd.f32 %v3548_v62, %v3468_v17  ;;  %v3472_v0 = vmul.f32 %v13120_v16, %v13124_v39  ;;  %v3414_v9 = vadd.f32 %v3406_v21, %v13132_v47  ;;  %v3560_v5 = vmul.f32 %v11242_v59, %v11186_v61 }
 0x4d9   : > { %v3612_v14 = vmul.f32 0.5, %v3550_v37  ;;  %v3475_v22 = vmul.f32 %v13120_v16, %v13126_v55  ;;  %v3563_v26 = vmul.f32 %v11242_v59, %v11273_v27  ;;  %v3478_v33 = vmul.f32 %v13120_v16, %v13128_v24  ;;  %v3707_v27 = vpop.permute.xlu2 %3706 }
 0x4da   : > { %v4579_v52 = vpop.eup %4578  ;;  %v3615_v34 = vmul.f32 0.5, %v3553_v38  ;;  %v3480_v39 = vadd.f32 %v3472_v0, %v3408_v58  ;;  %v3566_v61 = vmul.f32 %v11242_v59, %v11322_v30  ;;  %v3618_v20 = vmul.f32 0.5, %v3556_v63 }
 0x4db   : > { %3756 = vrot.lane.b32.xlu2 %v3736_v40, %s4789_s14  ;;  %v3635_v32 = vadd.f32 1.0, %v4579_v52  ;;  %v3483_v62 = vadd.f32 %v3475_v22, %v3411_v3  ;;  %v3486_v55 = vadd.f32 %v3478_v33, %v3414_v9  ;;  %4582 = vtanh.f32 %v3612_v14  ;;  %v3703_v14 = vpop.permute.xlu0 %3702 }
 0x4dc   : > { %3758 = vrot.lane.b32.xlu0 %v3737_v43, %s4789_s14  ;;  %v4581_v57 = vpop.eup %4580  ;;  %v11412_v29 = vadd.f32 %v3560_v5, %v3480_v39  ;;  %4584 = vtanh.f32 %v3615_v34  ;;  %v3653_v5 = vmul.f32 0.5, %v11284_v45 }
 0x4dd   : > { %v11410_v56 = vmul.f32 0.5, %v3635_v32  ;;  %v11415_v16 = vadd.f32 %v3563_v26, %v3483_v62  ;;  %v11417_v24 = vadd.f32 %v3566_v61, %v3486_v55  ;;  %4586 = vtanh.f32 %v3618_v20 }
 0x4de   : > { %4588 = vtanh.f32 %v11412_v29  ;;  %v3725_v32 = vmul.f32 %v3703_v14, %v11353_v7  ;;  %v3659_v61 = vmul.f32 0.5, %v11377_v4  ;;  %v3654_v4 = vmul.f32 0.5, %v11303_v23 }
 0x4df   : > { %v3739_v31 = vmul.f32 %v4581_v57, %v11410_v56  ;;  %4590 = vtanh.f32 %v11415_v16 }
 0x4e0   : > { %4592 = vtanh.f32 %v11417_v24 }
 0x4e1   : > { %v4583_v59 = vpop.eup %4582  ;;  %v3713_v38 = vpop.permute.xlu2 %3712  ;;  %4594 = vtanh.f32 %v3653_v5 }
 0x4e2   : > { %v4585_v30 = vpop.eup %4584  ;;  %v3628_v11 = vadd.f32 1.0, %v4583_v59 }
 0x4e3   : > { %3762 = vrot.lane.b32.xlu2 %v3739_v31, %s4789_s14  ;;  %v4587_v21 = vpop.eup %4586  ;;  %v3631_v46 = vadd.f32 1.0, %v4585_v30  ;;  %v3709_v34 = vpop.permute.xlu0 %3708 }
 0x4e4   : > { %v3636_v37 = vmul.f32 0.5, %v3628_v11  ;;  %v3634_v40 = vadd.f32 1.0, %v4587_v21  ;;  %v4589_v43 = vpop.eup %4588  ;;  %v3728_v20 = vmul.f32 %v3709_v34, %v11382_v48  ;;  %v3652_v34 = vmul.f32 0.5, %v11412_v29 }
 0x4e5   : > { %v3639_v17 = vmul.f32 0.5, %v3631_v46  ;;  %v4591_v6 = vpop.eup %4590  ;;  %v3877_v29 = vmul.f32 0.5, %v11169_v41  ;;  %v3880_v41 = vmul.f32 0.5, %v11235_v25  ;;  %v3883_v25 = vmul.f32 0.5, %v11318_v53 }
 0x4e6   : > { %v11423_v58 = vmul.f32 %v3701_v8, %v3636_v37  ;;  %v3732_v63 = vmul.f32 %v4589_v43, %v3636_v37  ;;  %v3642_v52 = vmul.f32 0.5, %v3634_v40  ;;  %v4593_v35 = vpop.eup %4592  ;;  %v3656_v8 = vmul.f32 0.5, %v11329_v13  ;;  %v3705_v40 = vpop.permute.xlu1 %3704 }
 0x4e7   : > { %v11425_v3 = vmul.f32 %v3707_v27, %v3639_v17  ;;  %v3735_v0 = vmul.f32 %v4591_v6, %v3639_v17  ;;  %v4595_v26 = vpop.eup %4594  ;;  %v3657_v17 = vmul.f32 0.5, %v11334_v60 }
 0x4e8   : > { %3748 = vrot.lane.b32.xlu1 %v3732_v63, %s4789_s14  ;;  %v11428_v47 = vmul.f32 %v3713_v38, %v3642_v52  ;;  %v3738_v9 = vmul.f32 %v4593_v35, %v3642_v52  ;;  %4596 = vtanh.f32 %v3656_v8  ;;  %v3669_v39 = vadd.f32 1.0, %v4595_v26 }
 0x4ea   : > { %v3677_v62 = vmul.f32 0.5, %v3669_v39 }
 0x4eb   : > { %v3715_v27 = vpop.permute.xlu0 %3714 }
 0x4ec   : > { %v3731_v59 = vmul.f32 %v3715_v27, %v11410_v56  ;;  %v3726_v56 = vmul.f32 %v3705_v40, %v11357_v1  ;;  %v3658_v27 = vmul.f32 0.5, %v11417_v24 }
 0x4ee   : > { %v4597_v45 = vpop.eup %4596 }
 0x4ef   : > { %v3672_v31 = vadd.f32 1.0, %v4597_v45 }
 0x4f0   : > { %3754 = vrot.lane.b32.xlu1 %v3735_v0, %s4789_s14  ;;  %v3711_v0 = vpop.permute.xlu1 %3710 }
 0x4f1   : > { %v3680_v11 = vmul.f32 0.5, %v3672_v31  ;;  %v3729_v5 = vmul.f32 %v3711_v0, %v11384_v28  ;;  %v3655_v28 = vmul.f32 0.5, %v11415_v16 }
 0x4f8   : > { %3760 = vrot.lane.b32.xlu1 %v3738_v9, %s4789_s14 }
 0x52d   : > { %v3751_v22 = vpop.permute.xlu2 %3750 }
 0x52e   : > { %v11435_v33 = vadd.f32 %v3751_v22, %v3725_v32 }
 0x530   : > { %4598 = vtanh.f32 %v11435_v33 }
 0x531   : > { %4600 = vtanh.f32 %v3659_v61 }
 0x535   : > { %v3757_v57 = vpop.permute.xlu2 %3756 }
 0x536   : > { %v4599_v55 = vpop.eup %4598  ;;  %v11440_v13 = vadd.f32 %v3757_v57, %v3728_v20  ;;  %v4328_v57 = vld [vmem:[%s10324_s20 + $0x40] sm:$0xff] }
 0x537   : > { %v3789_v7 = vmul.f32 %v4599_v55, %v3677_v62  ;;  %v4601_v30 = vpop.eup %4600 }
 0x538   : > { %4602 = vtanh.f32 %v11440_v13  ;;  %v3675_v43 = vadd.f32 1.0, %v4601_v30  ;;  %v4331_v30 = vld [vmem:[%s10324_s20 + $0x58] sm:$0xff] }
 0x539   : > { %3806 = vrot.lane.b32.xlu1 %v3789_v7, %s4789_s14 }
 0x53a   : > { %v3683_v38 = vmul.f32 0.5, %v3675_v43  ;;  %v4334_v43 = vld [vmem:[%s10324_s20 + $0x70] sm:$0xff] }
 0x53d   : > { %v3763_v48 = vpop.permute.xlu2 %3762 }
 0x53e   : > { %v4603_v21 = vpop.eup %4602  ;;  %v11446_v46 = vadd.f32 %v3763_v48, %v3731_v59 }
 0x53f   : > { %v3792_v37 = vmul.f32 %v4603_v21, %v3680_v11 }
 0x540   : > { %4604 = vtanh.f32 %v11446_v46 }
 0x541   : > { %4606 = vtanh.f32 %v3654_v4  ;;  %3812 = vrot.lane.b32.xlu1 %v3792_v37, %s4789_s14 }
 0x542   : > { %4608 = vtanh.f32 %v3657_v17 }
 0x546   : > { %v4605_v6 = vpop.eup %4604  ;;  %v3753_v23 = vpop.permute.xlu0 %3752 }
 0x547   : > { %v4607_v63 = vpop.eup %4606  ;;  %v3774_v52 = vadd.f32 %v3753_v23, %v3726_v56  ;;  %v3795_v35 = vmul.f32 %v4605_v6, %v3683_v38 }
 0x548   : > { %v3670_v9 = vadd.f32 1.0, %v4607_v63  ;;  %v4609_v14 = vpop.eup %4608 }
 0x549   : > { %4610 = vtanh.f32 %v3774_v52  ;;  %3818 = vrot.lane.b32.xlu1 %v3795_v35, %s4789_s14  ;;  %v3673_v26 = vadd.f32 1.0, %v4609_v14  ;;  %v3878_v14 = vmul.f32 0.5, %v11175_v49  ;;  %v3881_v49 = vmul.f32 0.5, %v11271_v44 }
 0x54a   : > { %v3678_v32 = vmul.f32 0.5, %v3670_v9  ;;  %v4329_v9 = vld [vmem:[%s10324_s20 + $0x48] sm:$0xff] }
 0x54b   : > { %v3681_v39 = vmul.f32 0.5, %v3673_v26 }
 0x54e   : > { %v3759_v8 = vpop.permute.xlu0 %3758 }
 0x54f   : > { %v4611_v60 = vpop.eup %4610  ;;  %v3777_v1 = vadd.f32 %v3759_v8, %v3729_v5 }
 0x550   : > { %v3790_v22 = vmul.f32 %v4611_v60, %v3678_v32 }
 0x551   : > { %4612 = vtanh.f32 %v3777_v1  ;;  %3848 = vrot.lane.b32.xlu1 %v3774_v52, %s4789_s14 }
 0x552   : > { %3808 = vrot.lane.b32.xlu2 %v3790_v22, %s4789_s14  ;;  %4614 = vtanh.f32 %v3652_v34  ;;  %v4332_v22 = vld [vmem:[%s10324_s20 + $0x60] sm:$0xff] }
 0x553   : > { %4616 = vtanh.f32 %v3655_v28  ;;  %v4335_v28 = vld [vmem:[%s10324_s20 + $0x78] sm:$0xff] }
 0x557   : > { %v4613_v61 = vpop.eup %4612 }
 0x558   : > { %v3793_v20 = vmul.f32 %v4613_v61, %v3681_v39  ;;  %v4615_v62 = vpop.eup %4614 }
 0x559   : > { %3854 = vrot.lane.b32.xlu1 %v3777_v1, %s4789_s14  ;;  %v3668_v7 = vadd.f32 1.0, %v4615_v62  ;;  %v4617_v31 = vpop.eup %4616 }
 0x55a   : > { %3814 = vrot.lane.b32.xlu2 %v3793_v20, %s4789_s14  ;;  %v3749_v45 = vpop.permute.xlu1 %3748  ;;  %v3671_v11 = vadd.f32 1.0, %v4617_v31 }
 0x55b   : > { %v3772_v55 = vadd.f32 %v3749_v45, %v11423_v58  ;;  %v3676_v59 = vmul.f32 0.5, %v3668_v7 }
 0x55c   : > { %v3679_v40 = vmul.f32 0.5, %v3671_v11 }
 0x55d   : > { %4618 = vtanh.f32 %v3772_v55 }
 0x55e   : > { %4620 = vtanh.f32 %v3877_v29  ;;  %v3876_v29 = vmul.f32 0.5, %v11227_v50  ;;  %v3882_v50 = vmul.f32 0.5, %v11346_v19 }
 0x55f   : > { %4622 = vtanh.f32 %v3658_v27  ;;  %v4330_v27 = vld [vmem:[%s10324_s20 + $0x50] sm:$0xff] }
 0x561   : > { %3965 = vrot.lane.b32.xlu1 %v4328_v57, %s4789_s14 }
 0x562   : > { %3844 = vrot.lane.b32.xlu2 %v3772_v55, %s4789_s14  ;;  %v3755_v16 = vpop.permute.xlu1 %3754 }
 0x563   : > { %v4619_v4 = vpop.eup %4618  ;;  %v3775_v58 = vadd.f32 %v3755_v16, %v11425_v3  ;;  %v3879_v16 = vmul.f32 0.5, %v11299_v51 }
 0x564   : > { %v3788_v48 = vmul.f32 %v4619_v4, %v3676_v59  ;;  %v4621_v24 = vpop.eup %4620 }
 0x565   : > { %4624 = vtanh.f32 %v3775_v58  ;;  %v4623_v21 = vpop.eup %4622  ;;  %v3893_v56 = vadd.f32 1.0, %v4621_v24 }
 0x566   : > { %3804 = vrot.lane.b32.xlu0 %v3788_v48, %s4789_s14  ;;  %4626 = vtanh.f32 %v3880_v41  ;;  %v3674_v6 = vadd.f32 1.0, %v4623_v21 }
 0x567   : > { %4628 = vtanh.f32 %v11171_v54  ;;  %v11479_v23 = vmul.f32 0.5, %v3893_v56 }
 0x569   : > { %3971 = vrot.lane.b32.xlu1 %v4331_v30, %s4789_s14 }
 0x56a   : > { %3850 = vrot.lane.b32.xlu2 %v3775_v58, %s4789_s14  ;;  %v3761_v37 = vpop.permute.xlu1 %3760 }
 0x56b   : > { %v4625_v17 = vpop.eup %4624  ;;  %v3778_v3 = vadd.f32 %v3761_v37, %v11428_v47  ;;  %v3682_v47 = vmul.f32 0.5, %v3674_v6 }
 0x56c   : > { %v3791_v38 = vmul.f32 %v4625_v17, %v3679_v40  ;;  %v4627_v63 = vpop.eup %4626 }
 0x56d   : > { %4630 = vtanh.f32 %v3778_v3  ;;  %v4629_v52 = vpop.eup %4628  ;;  %v3896_v5 = vadd.f32 1.0, %v4627_v63 }
 0x56e   : > { %3810 = vrot.lane.b32.xlu0 %v3791_v38, %s4789_s14  ;;  %4632 = vtanh.f32 %v3883_v25  ;;  %v3998_v0 = vmul.f32 %v4629_v52, %v11479_v23 }
 0x56f   : > { %4634 = vtanh.f32 %v11256_v36  ;;  %v11488_v8 = vmul.f32 0.5, %v3896_v5 }
 0x570   : > { %4636 = vtanh.f32 %v3878_v14  ;;  %v3917_v14 = vmul.f32 0.5, %v11171_v54 }
 0x571   : > { %3977 = vrot.lane.b32.xlu1 %v4334_v43, %s4789_s14  ;;  %4638 = vtanh.f32 %v11326_v2 }
 0x572   : > { %3856 = vrot.lane.b32.xlu2 %v3778_v3, %s4789_s14  ;;  %4640 = vtanh.f32 %v3881_v49 }
 0x573   : > { %v4631_v35 = vpop.eup %4630  ;;  %4642 = vtanh.f32 %v11177_v12 }
 0x574   : > { %v3794_v53 = vmul.f32 %v4631_v35, %v3682_v47  ;;  %v4633_v32 = vpop.eup %4632  ;;  %4644 = vtanh.f32 %v11276_v15 }
 0x575   : > { %v4635_v60 = vpop.eup %4634  ;;  %v3899_v26 = vadd.f32 1.0, %v4633_v32  ;;  %4646 = vtanh.f32 %v3876_v29 }
 0x576   : > { %3816 = vrot.lane.b32.xlu0 %v3794_v53, %s4789_s14  ;;  %v4001_v1 = vmul.f32 %v4635_v60, %v11488_v8  ;;  %v4637_v39 = vpop.eup %4636  ;;  %4648 = vtanh.f32 %v3879_v16 }
 0x577   : > { %v11498_v34 = vmul.f32 0.5, %v3899_v26  ;;  %v4639_v61 = vpop.eup %4638  ;;  %v3894_v45 = vadd.f32 1.0, %v4637_v39  ;;  %4650 = vtanh.f32 %v11229_v10 }
 0x578   : > { %4652 = vtanh.f32 %v3882_v50 }
 0x579   : > { %4015 = vrot.lane.b32.xlu1 %v3998_v0, %s4789_s14  ;;  %v4004_v20 = vmul.f32 %v4639_v61, %v11498_v34  ;;  %v11507_v44 = vmul.f32 0.5, %v3894_v45  ;;  %4654 = vtanh.f32 %v11301_v18  ;;  %v3923_v45 = vmul.f32 0.5, %v11326_v2 }
 0x57a   : > { %3967 = vrot.lane.b32.xlu2 %v4329_v9, %s4789_s14  ;;  %4656 = vtanh.f32 %v11351_v42 }
 0x57b   : > { %4658 = vtanh.f32 %v3917_v14 }
 0x57e   : > { %3846 = vrot.lane.b32.xlu0 %v11435_v33, %s4789_s14  ;;  %v4641_v33 = vpop.eup %4640 }
 0x57f   : > { %v4643_v57 = vpop.eup %4642  ;;  %v3897_v55 = vadd.f32 1.0, %v4641_v33 }
 0x580   : > { %v3999_v62 = vmul.f32 %v4643_v57, %v11507_v44  ;;  %v4645_v7 = vpop.eup %4644 }
 0x581   : > { %4021 = vrot.lane.b32.xlu1 %v4001_v1, %s4789_s14  ;;  %v4647_v59 = vpop.eup %4646 }
 0x582   : > { %3973 = vrot.lane.b32.xlu2 %v4332_v22, %s4789_s14  ;;  %v3892_v30 = vadd.f32 1.0, %v4647_v59  ;;  %v4649_v58 = vpop.eup %4648  ;;  %v3920_v22 = vmul.f32 0.5, %v11256_v36 }
 0x583   : > { %v4651_v48 = vpop.eup %4650  ;;  %v3895_v41 = vadd.f32 1.0, %v4649_v58 }
 0x584   : > { %v11529_v4 = vmul.f32 0.5, %v3892_v30  ;;  %v4653_v21 = vpop.eup %4652  ;;  %4660 = vtanh.f32 %v3920_v22 }
 0x585   : > { %v11535_v24 = vmul.f32 0.5, %v3895_v41  ;;  %v4655_v37 = vpop.eup %4654  ;;  %v3898_v43 = vadd.f32 1.0, %v4653_v21  ;;  %v3921_v21 = vmul.f32 0.5, %v11276_v15 }
 0x586   : > { %3852 = vrot.lane.b32.xlu0 %v11440_v13, %s4789_s14  ;;  %v11515_v13 = vmul.f32 0.5, %v3897_v55  ;;  %v3997_v51 = vmul.f32 %v4651_v48, %v11529_v4  ;;  %v4657_v38 = vpop.eup %4656 }
 0x587   : > { %v4000_v40 = vmul.f32 %v4655_v37, %v11535_v24  ;;  %v11546_v3 = vmul.f32 0.5, %v3898_v43  ;;  %v4659_v39 = vpop.eup %4658 }
 0x588   : > { %v4002_v31 = vmul.f32 %v4645_v7, %v11515_v13 }
 0x589   : > { %4027 = vrot.lane.b32.xlu1 %v4004_v20, %s4789_s14  ;;  %v4003_v25 = vmul.f32 %v4657_v38, %v11546_v3 }
 0x58a   : > { %3979 = vrot.lane.b32.xlu2 %v4335_v28, %s4789_s14  ;;  %v3933_v28 = vadd.f32 1.0, %v4659_v39  ;;  %v4661_v36 = vpop.eup %4660  ;;  %v3922_v39 = vmul.f32 0.5, %v11351_v42 }
 0x58b   : > { %v3936_v2 = vadd.f32 1.0, %v4661_v36 }
 0x58d   : > { %v3944_v59 = vmul.f32 0.5, %v3936_v2 }
 0x58e   : > { %3858 = vrot.lane.b32.xlu0 %v11446_v46, %s4789_s14  ;;  %v4333_v46 = vld [vmem:[%s10324_s20 + $0x68] sm:$0xff]  ;;  %s11537_s20 = scalar_lea.vmem [#allocation2], %s4304_s17  ;;  %s4713_s17 = scalar_lea.hbm %s11728_s5, 256 }
 0x58f   : > { %s4161_s13 = sshll.u32 %s11537_s20, 4  ;;  %s4162_s13 = int_to_ptr.vmem [resolvable:$true] %s4161_s13 }
 0x592   : > { %4017 = vrot.lane.b32.xlu2 %v3999_v62, %s4789_s14 }
 0x596   : > { %3969 = vrot.lane.b32.xlu0 %v4330_v27, %s4789_s14 }
 0x59a   : > { %4023 = vrot.lane.b32.xlu2 %v4002_v31, %s4789_s14 }
 0x59e   : > { %3975 = vrot.lane.b32.xlu0 %v4333_v46, %s4789_s14 }
 0x5a6   : > { %4013 = vrot.lane.b32.xlu0 %v3997_v51, %s4789_s14 }
 0x5ab   : > { %v3807_v11 = vpop.permute.xlu1 %3806 }
 0x5ac   : > { %3829 = vst.msk [vmem:[%s11537_s20 + $0x8] sm:$0xff] %vm349_vm0, %v3807_v11  ;;  %v3809_v19 = vpop.permute.xlu2 %3808 }
 0x5ad   : > { %3830 = vst.msk [vmem:[%s11537_s20 + $0x10] sm:$0xff] %vm349_vm0, %v3809_v19 }
 0x5ae   : > { %4019 = vrot.lane.b32.xlu0 %v4000_v40, %s4789_s14 }
 0x5b3   : > { %v3813_v17 = vpop.permute.xlu1 %3812 }
 0x5b4   : > { %3832 = vst.msk [vmem:[%s11537_s20 + $0x20] sm:$0xff] %vm349_vm0, %v3813_v17  ;;  %v3815_v56 = vpop.permute.xlu2 %3814 }
 0x5b5   : > { %3833 = vst.msk [vmem:[%s11537_s20 + $0x28] sm:$0xff] %vm349_vm0, %v3815_v56 }
 0x5b6   : > { %4025 = vrot.lane.b32.xlu0 %v4003_v25, %s4789_s14 }
 0x5bb   : > { %v3819_v6 = vpop.permute.xlu1 %3818 }
 0x5bc   : > { %3835 = vst.msk [vmem:[%s11537_s20 + $0x38] sm:$0xff] %vm349_vm0, %v3819_v6  ;;  %v3845_v63 = vpop.permute.xlu2 %3844 }
 0x5bd   : > { %3868 = vst.msk [vmem:[%s11556_s11] sm:$0xff] %vm349_vm0, %v3845_v63 }
 0x5c3   : > { %v3849_v52 = vpop.permute.xlu1 %3848 }
 0x5c4   : > { %3870 = vst.msk [vmem:[%s11556_s11 + $0x10] sm:$0xff] %vm349_vm0, %v3849_v52  ;;  %v3851_v47 = vpop.permute.xlu2 %3850 }
 0x5c5   : > { %3871 = vst.msk [vmem:[%s11556_s11 + $0x18] sm:$0xff] %vm349_vm0, %v3851_v47 }
 0x5cb   : > { %v3855_v35 = vpop.permute.xlu1 %3854 }
 0x5cc   : > { %3873 = vst.msk [vmem:[%s11556_s11 + $0x28] sm:$0xff] %vm349_vm0, %v3855_v35  ;;  %v3857_v0 = vpop.permute.xlu2 %3856 }
 0x5cd   : > { %3874 = vst.msk [vmem:[%s11556_s11 + $0x30] sm:$0xff] %vm349_vm0, %v3857_v0 }
 0x5d3   : > { %v11568_v9 = vpop.permute.xlu1 %3965 }
 0x5d4   : > { %v3968_v32 = vpop.permute.xlu2 %3967 }
 0x5d5   : > { %v3990_v26 = vmul.f32 %v3968_v32, %v11479_v23  ;;  %v3941_v23 = vmul.f32 0.5, %v3933_v28 }
 0x5d8   : > { %v3805_v53 = vpop.permute.xlu0 %3804 }
 0x5d9   : > { %3828 = vst.msk [vmem:[%s11537_s20] sm:$0xff] %vm349_vm0, %v3805_v53 }
 0x5db   : > { %v11570_v5 = vpop.permute.xlu1 %3971 }
 0x5dc   : > { %v3974_v54 = vpop.permute.xlu2 %3973 }
 0x5dd   : > { %v3993_v33 = vmul.f32 %v3974_v54, %v11488_v8 }
 0x5e0   : > { %v3811_v1 = vpop.permute.xlu0 %3810 }
 0x5e1   : > { %3831 = vst.msk [vmem:[%s11537_s20 + $0x18] sm:$0xff] %vm349_vm0, %v3811_v1 }
 0x5e3   : > { %v11575_v60 = vpop.permute.xlu1 %3977 }
 0x5e4   : > { %v3980_v27 = vpop.permute.xlu2 %3979  ;;  %v3995_v42 = vmul.f32 %v11575_v60, %v11546_v3 }
 0x5e5   : > { %v3996_v8 = vmul.f32 %v3980_v27, %v11498_v34  ;;  %v3918_v34 = vmul.f32 0.5, %v11177_v12  ;;  %v3916_v12 = vmul.f32 0.5, %v11229_v10  ;;  %v3989_v10 = vmul.f32 %v11568_v9, %v11529_v4 }
 0x5e8   : > { %v3817_v61 = vpop.permute.xlu0 %3816 }
 0x5e9   : > { %3834 = vst.msk [vmem:[%s11537_s20 + $0x30] sm:$0xff] %vm349_vm0, %v3817_v61 }
 0x5eb   : > { %v4016_v49 = vpop.permute.xlu1 %4015 }
 0x5ec   : > { %v11581_v20 = vadd.f32 %v4016_v49, %v3990_v26  ;;  %v4018_v37 = vpop.permute.xlu2 %4017 }
 0x5ee   : > { %4662 = vtanh.f32 %v11581_v20 }
 0x5ef   : > { %4664 = vtanh.f32 %v3923_v45 }
 0x5f0   : > { %v3847_v55 = vpop.permute.xlu0 %3846 }
 0x5f1   : > { %3869 = vst.msk [vmem:[%s11556_s11 + $0x8] sm:$0xff] %vm349_vm0, %v3847_v55 }
 0x5f3   : > { %v4022_v57 = vpop.permute.xlu1 %4021 }
 0x5f4   : > { %v4663_v62 = vpop.eup %4662  ;;  %v11588_v29 = vadd.f32 %v4022_v57, %v3993_v33  ;;  %v4024_v52 = vpop.permute.xlu2 %4023 }
 0x5f5   : > { %v4054_v7 = vmul.f32 %v4663_v62, %v3941_v23  ;;  %v4665_v31 = vpop.eup %4664 }
 0x5f6   : > { %4666 = vtanh.f32 %v11588_v29  ;;  %v3939_v48 = vadd.f32 1.0, %v4665_v31 }
 0x5f7   : > { %4071 = vrot.lane.b32.xlu0 %v4054_v7, %s4789_s14 }
 0x5f8   : > { %v3853_v30 = vpop.permute.xlu0 %3852  ;;  %v3947_v51 = vmul.f32 0.5, %v3939_v48 }
 0x5f9   : > { %3872 = vst.msk [vmem:[%s11556_s11 + $0x20] sm:$0xff] %vm349_vm0, %v3853_v30 }
 0x5fb   : > { %v4028_v16 = vpop.permute.xlu1 %4027 }
 0x5fc   : > { %v4667_v46 = vpop.eup %4666  ;;  %v11595_v50 = vadd.f32 %v4028_v16, %v3996_v8 }
 0x5fd   : > { %v4057_v58 = vmul.f32 %v4667_v46, %v3944_v59 }
 0x5fe   : > { %4668 = vtanh.f32 %v11595_v50 }
 0x5ff   : > { %4077 = vrot.lane.b32.xlu0 %v4057_v58, %s4789_s14  ;;  %4670 = vtanh.f32 %v3918_v34 }
 0x600   : > { %v3859_v11 = vpop.permute.xlu0 %3858  ;;  %4672 = vtanh.f32 %v3921_v21 }
 0x601   : > { %3875 = vst.msk [vmem:[%s11556_s11 + $0x38] sm:$0xff] %vm349_vm0, %v3859_v11 }
 0x604   : > { %v4669_v41 = vpop.eup %4668 }
 0x605   : > { %v4060_v19 = vmul.f32 %v4669_v41, %v3947_v51  ;;  %v4671_v17 = vpop.eup %4670 }
 0x606   : > { %v3934_v38 = vadd.f32 1.0, %v4671_v17  ;;  %v4673_v63 = vpop.eup %4672 }
 0x607   : > { %4083 = vrot.lane.b32.xlu0 %v4060_v19, %s4789_s14  ;;  %v3937_v53 = vadd.f32 1.0, %v4673_v63 }
 0x608   : > { %v3970_v40 = vpop.permute.xlu0 %3969  ;;  %v3942_v47 = vmul.f32 0.5, %v3934_v38 }
 0x609   : > { %v3991_v43 = vmul.f32 %v3970_v40, %v11507_v44  ;;  %v3919_v44 = vmul.f32 0.5, %v11301_v18  ;;  %v3945_v1 = vmul.f32 0.5, %v3937_v53  ;;  %v3992_v18 = vmul.f32 %v11570_v5, %v11535_v24 }
 0x60b   : > { %v4039_v56 = vadd.f32 %v4018_v37, %v3991_v43 }
 0x60d   : > { %4674 = vtanh.f32 %v4039_v56 }
 0x60e   : > { %4676 = vtanh.f32 %v3916_v12 }
 0x60f   : > { %4114 = vrot.lane.b32.xlu0 %v4039_v56, %s4789_s14 }
 0x610   : > { %v3976_v25 = vpop.permute.xlu0 %3975 }
 0x611   : > { %v3994_v6 = vmul.f32 %v3976_v25, %v11515_v13 }
 0x613   : > { %v4675_v15 = vpop.eup %4674  ;;  %v4042_v35 = vadd.f32 %v4024_v52, %v3994_v6 }
 0x614   : > { %v4055_v0 = vmul.f32 %v4675_v15, %v3942_v47  ;;  %v4677_v13 = vpop.eup %4676 }
 0x615   : > { %4678 = vtanh.f32 %v4042_v35  ;;  %v3932_v49 = vadd.f32 1.0, %v4677_v13 }
 0x616   : > { %4073 = vrot.lane.b32.xlu1 %v4055_v0, %s4789_s14  ;;  %4680 = vtanh.f32 %v3919_v44 }
 0x617   : > { %4120 = vrot.lane.b32.xlu0 %v4042_v35, %s4789_s14  ;;  %v3940_v28 = vmul.f32 0.5, %v3932_v49 }
 0x618   : > { %v4014_v14 = vpop.permute.xlu0 %4013 }
 0x619   : > { %v4037_v32 = vadd.f32 %v4014_v14, %v3989_v10 }
 0x61b   : > { %v4679_v22 = vpop.eup %4678  ;;  %4682 = vtanh.f32 %v4037_v32 }
 0x61c   : > { %v4058_v26 = vmul.f32 %v4679_v22, %v3945_v1  ;;  %v4681_v61 = vpop.eup %4680  ;;  %4684 = vtanh.f32 %v3922_v39 }
 0x61d   : > { %v3935_v33 = vadd.f32 1.0, %v4681_v61 }
 0x61e   : > { %4079 = vrot.lane.b32.xlu1 %v4058_v26, %s4789_s14 }
 0x61f   : > { %v3943_v23 = vmul.f32 0.5, %v3935_v33 }
 0x620   : > { %v4020_v54 = vpop.permute.xlu0 %4019 }
 0x621   : > { %v4683_v4 = vpop.eup %4682  ;;  %v4040_v9 = vadd.f32 %v4020_v54, %v3992_v18 }
 0x622   : > { %v4053_v45 = vmul.f32 %v4683_v4, %v3940_v28  ;;  %v4685_v36 = vpop.eup %4684 }
 0x623   : > { %4686 = vtanh.f32 %v4040_v9  ;;  %v3938_v55 = vadd.f32 1.0, %v4685_v36 }
 0x624   : > { %4069 = vrot.lane.b32.xlu2 %v4053_v45, %s4789_s14 }
 0x625   : > { %v3946_v7 = vmul.f32 0.5, %v3938_v55 }
 0x626   : > { %4110 = vrot.lane.b32.xlu1 %v4037_v32, %s4789_s14 }
 0x628   : > { %v4026_v57 = vpop.permute.xlu0 %4025 }
 0x629   : > { %v4687_v24 = vpop.eup %4686  ;;  %v4043_v5 = vadd.f32 %v4026_v57, %v3995_v42 }
 0x62a   : > { %v4056_v62 = vmul.f32 %v4687_v24, %v3943_v23 }
 0x62b   : > { %4688 = vtanh.f32 %v4043_v5 }
 0x62c   : > { %4075 = vrot.lane.b32.xlu2 %v4056_v62, %s4789_s14 }
 0x62e   : > { %4116 = vrot.lane.b32.xlu1 %v4040_v9, %s4789_s14 }
 0x631   : > { %v4689_v27 = vpop.eup %4688 }
 0x632   : > { %v4059_v3 = vmul.f32 %v4689_v27, %v3946_v7 }
 0x634   : > { %4081 = vrot.lane.b32.xlu2 %v4059_v3, %s4789_s14 }
 0x636   : > { %4122 = vrot.lane.b32.xlu1 %v4043_v5, %s4789_s14 }
 0x63c   : > { %4112 = vrot.lane.b32.xlu2 %v11581_v20, %s4789_s14 }
 0x644   : > { %4118 = vrot.lane.b32.xlu2 %v11588_v29, %s4789_s14 }
 0x64c   : > { %4124 = vrot.lane.b32.xlu2 %v11595_v50, %s4789_s14  ;;  %s4363_s14 = sshll.u32 %s4850_s25, 7 }
 0x64d   : > { %s4160_s18 = scalar_lea.hbm %s11728_s5, %s4363_s14 }
 0x64e   : > { %s4163_s15 = sshll.u32 %s4160_s18, 4  ;;  %s4164_s15 = int_to_ptr.hbm [resolvable:$true] %s4163_s15 }
 0x64f   : > { %s4707_s10 = sshra.s32 %s4164_s15, 4  ;;  %s4708_s10 = int_to_ptr.hbm [resolvable:$true] %s4707_s10 }
 0x650   : > { %s4709_s26 = scalar_lea.hbm %s4708_s10, 128  ;;  %p4714_p0 = scmp.lt.s32.totalorder %s4708_s10, %s11728_s5 }
 0x651   : > { %p4710_p11 = scmp.ne.s32.totalorder %s4708_s10, %s4709_s26  ;;  %p4715_p1 = scmp.lt.s32.totalorder %s4713_s17, %s4709_s26 }
 0x653   : > { %p4711_p12 = pnand %p4710_p11, %p4867_p5  ;;  %p4716_p2 = por %p4715_p1, %p4714_p0 }
 0x655   : > { %p4712_p13 = pneg %p4711_p12 }
 0x657   : > { %p4717_p3 = pnand %p4716_p2, %p4712_p13 }
 0x669   : > { %v4072_v60 = vpop.permute.xlu0 %4071 }
 0x66a   : > { %4337 = vst.msk [vmem:[%s11537_s20 + $0x48] sm:$0xff] %vm349_vm0, %v4072_v60 }
 0x671   : > { %v4078_v2 = vpop.permute.xlu0 %4077 }
 0x672   : > { %4340 = vst.msk [vmem:[%s11537_s20 + $0x60] sm:$0xff] %vm349_vm0, %v4078_v2 }
 0x679   : > { %v4084_v8 = vpop.permute.xlu0 %4083 }
 0x67a   : > { %4343 = vst.msk [vmem:[%s11537_s20 + $0x78] sm:$0xff] %vm349_vm0, %v4084_v8 }
 0x67e   : > { %v4070_v20 = vpop.permute.xlu2 %4069 }
 0x67f   : > { %4336 = vst.msk [vmem:[%s11537_s20 + $0x40] sm:$0xff] %vm349_vm0, %v4070_v20 }
 0x681   : > { %v4115_v29 = vpop.permute.xlu0 %4114 }
 0x682   : > { %4346 = vst.msk [vmem:[%s11556_s11 + $0x50] sm:$0xff] %vm349_vm0, %v4115_v29 }
 0x686   : > { %v4076_v31 = vpop.permute.xlu2 %4075 }
 0x687   : > { %4339 = vst.msk [vmem:[%s11537_s20 + $0x58] sm:$0xff] %vm349_vm0, %v4076_v31 }
 0x688   : > { %v4074_v59 = vpop.permute.xlu1 %4073 }
 0x689   : > { %v4121_v16 = vpop.permute.xlu0 %4120  ;;  %4338 = vst.msk [vmem:[%s11537_s20 + $0x50] sm:$0xff] %vm349_vm0, %v4074_v59 }
 0x68a   : > { %4349 = vst.msk [vmem:[%s11556_s11 + $0x68] sm:$0xff] %vm349_vm0, %v4121_v16 }
 0x68e   : > { %v4082_v46 = vpop.permute.xlu2 %4081 }
 0x68f   : > { %4342 = vst.msk [vmem:[%s11537_s20 + $0x70] sm:$0xff] %vm349_vm0, %v4082_v46 }
 0x690   : > { %v4080_v30 = vpop.permute.xlu1 %4079 }
 0x691   : > { %4341 = vst.msk [vmem:[%s11537_s20 + $0x68] sm:$0xff] %vm349_vm0, %v4080_v30 }
 0x692   : > { %4720 = shalt.err (!%p4717_p3)
}
 0x693   : > { %s4792_s20 = smov 128   ;;  %s4793_s18 = smov 8  }
 0x694   : > { %4365 = dma.vmem_to_hbm [thread:$0]  (%p4867_p5), %s4162_s13, 2048, %s4164_s15, %s4144_s19, %s4792_s20, %s4792_s20, %s4793_s18  }
 0x695   : > { %s4177_s13 = scalar_lea.hbm %s11729_s6, %s4363_s14  ;;  %s4178_s15 = sshll.u32 %s11556_s11, 4  ;;  %s4179_s15 = int_to_ptr.vmem [resolvable:$true] %s4178_s15 }
 0x696   : > { %v4113_v50 = vpop.permute.xlu2 %4112  ;;  %s4180_s19 = sshll.u32 %s4177_s13, 4  ;;  %s4149_s28 = scalar_lea.sflag [#allocation5], %s11527_s9  ;;  %s4181_s19 = int_to_ptr.hbm [resolvable:$true] %s4180_s19 }
 0x697   : > { %4345 = vst.msk [vmem:[%s11556_s11 + $0x48] sm:$0xff] %vm349_vm0, %v4113_v50  ;;  %s4735_s29 = sshra.s32 %s4181_s19, 4  ;;  %s4741_s12 = scalar_lea.hbm %s11729_s6, 256  ;;  %s4736_s29 = int_to_ptr.hbm [resolvable:$true] %s4735_s29 }
 0x698   : > { %v4111_v58 = vpop.permute.xlu1 %4110  ;;  %s4737_s17 = scalar_lea.hbm %s4736_s29, 128  ;;  %p4742_p9 = scmp.lt.s32.totalorder %s4736_s29, %s11729_s6 }
 0x699   : > { %4344 = vst.msk [vmem:[%s11556_s11 + $0x40] sm:$0xff] %vm349_vm0, %v4111_v58  ;;  %p4738_p4 = scmp.ne.s32.totalorder %s4736_s29, %s4737_s17  ;;  %p4743_p10 = scmp.lt.s32.totalorder %s4741_s12, %s4737_s17 }
 0x69b   : > { %p4739_p7 = pnand %p4738_p4, %p4867_p5  ;;  %p4744_p11 = por %p4743_p10, %p4742_p9 }
 0x69d   : > { %p4740_p8 = pneg %p4739_p7 }
 0x69e   : > { %v4119_v48 = vpop.permute.xlu2 %4118 }
 0x69f   : > { %4348 = vst.msk [vmem:[%s11556_s11 + $0x60] sm:$0xff] %vm349_vm0, %v4119_v48  ;;  %p4745_p12 = pnand %p4744_p11, %p4740_p8 }
 0x6a0   : > { %v4117_v51 = vpop.permute.xlu1 %4116 }
 0x6a1   : > { %4347 = vst.msk [vmem:[%s11556_s11 + $0x58] sm:$0xff] %vm349_vm0, %v4117_v51 }
 0x6a6   : > { %v4125_v41 = vpop.permute.xlu2 %4124 }
 0x6a7   : > { %4351 = vst.msk [vmem:[%s11556_s11 + $0x78] sm:$0xff] %vm349_vm0, %v4125_v41 }
 0x6a8   : > { %v4123_v11 = vpop.permute.xlu1 %4122 }
 0x6a9   : > { %4350 = vst.msk [vmem:[%s11556_s11 + $0x70] sm:$0xff] %vm349_vm0, %v4123_v11 }
 0x6aa   : > { %4748 = shalt.err (!%p4745_p12)
}
 0x6ab   : > { %4366 = dma.vmem_to_hbm [thread:$0]  (%p4867_p5), %s4179_s15, 2048, %s4181_s19, %s4149_s28, %s4792_s20, %s4792_s20, %s4793_s18  }
 0x6ac PF: > { %p4376_p13 = scmp.ge.s32.totalorder %s4787_s24, 2  ;;  %s4195_s9 = sand.u32 1, %s4775_s21  }
 0x6ad   : > { %s4196_s11 = scalar_lea.sflag [#allocation3], %s4195_s9 }
 0x6ae   : > { %p4370_p0 = pnand %p4376_p13, %p4871_p6 }
 0x6b0   : > { %p4371_p1 = pneg %p4370_p0 }
 0x6b2   : > { %4766 = dma.done.wait (%p4371_p1), %s4196_s11, 2048  }
 0x6b3   : > { %4768 = vsyncadd (%p4371_p1), %s4196_s11, 4294965248  ;;  %s4206_s26 = scalar_lea.sflag [#allocation5], %s4195_s9 }
 0x6b4   : > { %4770 = dma.done.wait (%p4371_p1), %s4206_s26, 2048  }
 0x6b5   : > { %4772 = vsyncadd (%p4371_p1), %s4206_s26, 4294965248  ;;  %p20_p5 = scmp.ge.s32.totalorder %s4854_s27, 4   ;;  %s13133_s21 = smov %s4779_s22 }
 0x6b6   : > { %s13134_s22 = smov %s4783_s23  ;;  %s13135_s23 = smov %s4865_s30 }
 0x6b7   : > { %s13136_s24 = smov %s4854_s27  ;;  %22 = sbr.rel (!%p20_p5) target bundleno = 5 (0x5), region = 103 }
 0x6bc   :  { %4212 = vsyncpa [#allocation3], 1 }
 0x6bd   :  { %4214 = vsyncpa [#allocation3 + $0x1], 1 }
 0x6be   :  { %4215 = vsyncpa [#allocation5], 1 }
 0x6bf   :  { %4217 = vsyncpa [#allocation5 + $0x1], 1 }

</bundles_post_ra>
